<compile_context>
chip_gen: v7x
topology: tpu7x:2x2x1
jax: 0.10.0
libtpu: 0.0.40
codegen_flags: <defaults>
</compile_context>

<pallas_src>
import functools

import jax
import jax.numpy as jnp
from jax import lax
from jax.experimental import pallas as pl
from jax.experimental.pallas import tpu as pltpu

EPS = 1e-5  # PyTorch InstanceNorm2d default eps


def _round_up(x, m):
    return ((x + m - 1) // m) * m


def _device_vmem_cap():
    try:
        cap = getattr(pltpu.get_tpu_info(), "vmem_capacity_bytes", None)
        if cap:
            return int(cap)
    except Exception:
        pass
    return 64 * 1024 * 1024


_VMEM_CAP = _device_vmem_cap()


def _pad_block_bytes(rows, cols, dtype):
    """VMEM footprint of a (rows, cols) block incl. (sublane, 128) padding."""
    item = jnp.dtype(dtype).itemsize
    return _round_up(rows, 32 // item) * _round_up(cols, 128) * item


def _vmem_limit(estimate):
    return int(min(max(estimate, 32 * 1024 * 1024), _VMEM_CAP))


# ---------------------------------------------------------------------------
# In-kernel helpers
# ---------------------------------------------------------------------------
def _valid_col_mask(m, wp, wo):
    # 1.0 on real output columns, 0.0 on the (Wp - Wo) wrap-around columns.
    col = lax.broadcasted_iota(jnp.int32, (m, 1), 0) % wp
    return (col < wo).astype(jnp.float32)


def _group_pool(s, groups, cw):
    if groups == 1:
        return s
    tot = s[:, 0:cw]
    for g in range(1, groups):
        tot = tot + s[:, g * cw:(g + 1) * cw]
    return jnp.concatenate([tot] * groups, axis=1)


def _instance_norm(y, mask, groups, cw, inv_cnt):
    # InstanceNorm2d(affine=False): stats over masked spatial positions and,
    # for the sub-pixel deconv, over the `groups` phase blocks of width cw.
    s = _group_pool(jnp.sum(y * mask, axis=0, keepdims=True), groups, cw)
    mean = s * inv_cnt
    d = y - mean
    v = _group_pool(jnp.sum(d * d * mask, axis=0, keepdims=True), groups, cw)
    return d * lax.rsqrt(v * inv_cnt + EPS)


def _accumulate_taps(x_ref, w_ref, tap_offsets, m):
    # Fused im2col GEMM: each tap is a contiguous row window of the flattened
    # padded activation; bf16 MXU inputs, f32 accumulation as a traced value.
    y = jnp.dot(x_ref[pl.ds(tap_offsets[0], m), :], w_ref[0],
                preferred_element_type=jnp.float32)
    for t in range(1, len(tap_offsets)):
        y = y + jnp.dot(x_ref[pl.ds(tap_offsets[t], m), :], w_ref[t],
                        preferred_element_type=jnp.float32)
    return y


# ---------------------------------------------------------------------------
# Kernels
# ---------------------------------------------------------------------------
def _fused_conv_kernel(x_ref, w_ref, o_ref, *, tap_offsets, m, wp, wo, mode,
                       groups, cw, inv_cnt):
    # x_ref : (L, K)     bf16  padded + (optionally row-grouped) activation
    # w_ref : (T, K, N)  bf16  tap-major weights (N lane-padded)
    # o_ref : (M, N)
    y = _accumulate_taps(x_ref, w_ref, tap_offsets, m)

    if mode in ("in", "in_relu"):
        mask = _valid_col_mask(m, wp, wo)
        y = _instance_norm(y, mask, groups, cw, inv_cnt)

    if mode == "in_relu":
        y = jnp.maximum(y, 0.0)
    elif mode == "tanh":
        y = jnp.tanh(y)
    elif mode == "sigmoid":
        y = jax.nn.sigmoid(y)
    elif mode == "heads":
        # Fused attention/img heads: column 0 = sigmoid (att), rest = tanh (img).
        col = lax.broadcasted_iota(jnp.int32, y.shape, 1)
        y = jnp.where(col < 1, jax.nn.sigmoid(y), jnp.tanh(y))

    o_ref[...] = y.astype(o_ref.dtype)


def _res_block_kernel(x_ref, w1_ref, w2_ref, o_ref, mid_ref, *, taps1, taps2,
                      m, wp, wo, c, store_off, inv_cnt):
    # One full residual block:  out = x + IN(conv2(relu(IN(conv1(x)))))
    # x_ref  : (L, K1)      bf16  padded (+row-grouped) block input
    # w1_ref : (T1, K1, N)  bf16
    # w2_ref : (9, N, N)    bf16  (contraction dim zero-padded from c to N)
    # o_ref  : (M, N)
    # mid_ref: (Lmid, N)    bf16  VMEM-only intermediate in conv2's padded layout
    n = o_ref.shape[-1]
    mask = _valid_col_mask(m, wp, wo)

    # conv1 + InstanceNorm + ReLU
    y = _accumulate_taps(x_ref, w1_ref, taps1, m)
    y = jnp.maximum(_instance_norm(y, mask, 1, n, inv_cnt), 0.0)

    # Stash the intermediate in conv2's zero-padded flattened layout (it never
    # touches HBM).  Wrap-around columns are zeroed so the shifted store lands
    # exactly on conv2's zero padding; store_off is 16-row aligned.
    mid_ref[...] = jnp.zeros_like(mid_ref)
    mid_ref[pl.ds(store_off, m), :] = (y * mask).astype(mid_ref.dtype)

    # conv2 + InstanceNorm
    y2 = _accumulate_taps(mid_ref, w2_ref, taps2, m)
    y2 = _instance_norm(y2, mask, 1, n, inv_cnt)

    # Residual add: the skip is the conv1 input window (channels 0:c of the
    # row-grouped activation), so no extra HBM read is needed.
    skip = x_ref[pl.ds(wp + 1, m), :].astype(jnp.float32)[:, :c]
    if n > c:
        skip = jnp.concatenate([skip, jnp.zeros((m, n - c), jnp.float32)],
                               axis=1)
    o_ref[...] = (y2 + skip).astype(o_ref.dtype)


# ---------------------------------------------------------------------------
# One-time weight preparation (hoisted out of the forward pass, bf16 layout)
# ---------------------------------------------------------------------------
def _prep_conv(w_oihw, mode):
    """k x k stride-1 Conv2d (pad k//2, bias=False) [+ IN / activation]."""
    cout, cin, k, _ = (int(d) for d in w_oihw.shape)
    cw = _round_up(cout, 128)                       # lane-dense store width
    wk = jnp.transpose(w_oihw, (2, 3, 1, 0))        # (kh, kw, cin, cout)
    row_group = cin < 128 and k > 1
    if row_group:                                   # k taps of K = k*cin
        wk = wk.reshape(k, k * cin, cout)
    else:                                           # k*k taps of K = cin
        wk = wk.reshape(k * k, cin, cout)
    wpad = jnp.zeros(wk.shape[:2] + (cw,), jnp.float32).at[:, :, :cout].set(wk)
    return dict(w=wpad.astype(jnp.bfloat16), k=k, pad=k // 2, mode=mode,
                groups=1, cout=cout, cw=cw, row_group=row_group)


def _prep_down(w_oihw, mode="in_relu"):
    """Conv2d(k=4, s=2, p=1) phase-folded into a stride-1 2x2 conv on the
    2x2-phase-decomposed input (channel order (p, q, cin))."""
    cout, cin = int(w_oihw.shape[0]), int(w_oihw.shape[1])
    cw = _round_up(cout, 128)
    cin_ph = 4 * cin
    w6 = w_oihw.reshape(cout, cin, 2, 2, 2, 2)      # (co, ci, a, p, b, q); i=2a+p, j=2b+q
    w2 = jnp.transpose(w6, (2, 4, 3, 5, 1, 0))      # (a, b, p, q, ci, co)
    row_group = cin_ph < 128
    if row_group:                                   # 2 taps of K = 2*4*cin
        wk = w2.reshape(2, 2 * cin_ph, cout)
    else:                                           # 4 taps of K = 4*cin
        wk = w2.reshape(4, cin_ph, cout)
    wpad = jnp.zeros(wk.shape[:2] + (cw,), jnp.float32).at[:, :, :cout].set(wk)
    return dict(w=wpad.astype(jnp.bfloat16), k=2, pad=0, mode=mode,
                groups=1, cout=cout, cw=cw, row_group=row_group,
                phase_input=True)


def _prep_up(wt_iokk, mode="in_relu"):
    """ConvTranspose2d(k=4, s=2, p=1) lowered sub-pixel style: one stride-1 3x3
    conv producing 4*Cout phase channels (col = (r*2+s)*cw + co), pixel-shuffled
    on the host."""
    cin, cout = int(wt_iokk.shape[0]), int(wt_iokk.shape[1])
    cw = _round_up(cout, 32)                        # 4*cw is a multiple of 128
    w3 = jnp.zeros((3, 3, cin, 2, 2, cw), jnp.float32)
    imap = {(0, 0): 3, (0, 1): 1, (1, 1): 2, (1, 2): 0}   # (phase, tap) -> ConvT index
    for (r, u), i in imap.items():
        for (s, v), j in imap.items():
            w3 = w3.at[u, v, :, r, s, :cout].set(wt_iokk[:, :, i, j])
    row_group = cin < 128
    if row_group:                                   # 3 taps of K = 3*cin
        w = w3.reshape(3, 3 * cin, 4 * cw)
    else:                                           # 9 taps of K = cin
        w = w3.reshape(9, cin, 4 * cw)
    return dict(w=w.astype(jnp.bfloat16), k=3, pad=1, mode=mode, groups=4,
                cout=cout, cw=cw, row_group=row_group, pixel_shuffle=True)


def _prep_res(w1_oihw, w2_oihw):
    """One residual block (conv-IN-ReLU-conv-IN + skip) -> one pallas_call."""
    c = int(w1_oihw.shape[1])                       # dim_in == dim_out
    l1 = _prep_conv(w1_oihw, "in_relu")
    cw = l1["cw"]
    # conv2 reads the lane-padded intermediate scratch -> pad its K to cw.
    wk2 = jnp.transpose(w2_oihw, (2, 3, 1, 0)).reshape(9, c, c)
    w2p = jnp.zeros((9, cw, cw), jnp.float32).at[:, :c, :c].set(wk2)
    return dict(w1=l1["w"], w2=w2p.astype(jnp.bfloat16), c=c, cw=cw,
                row_group=l1["row_group"])


def _prep_heads(att_w, img_w):
    """Fused attention (sigmoid) + image (tanh) heads sharing one GEMM."""
    return _prep_conv(jnp.concatenate([att_w, img_w], axis=0), "heads")


# ---------------------------------------------------------------------------
# Host glue
# ---------------------------------------------------------------------------
def _to_phases(x):
    """pad=1 then 2x2 phase decomposition; channel order (p, q, cin)."""
    xp = jnp.pad(x, ((0, 0), (1, 1), (1, 1), (0, 0)))
    return jnp.concatenate(
        [xp[:, p::2, q::2, :] for p in (0, 1) for q in (0, 1)], axis=-1)


def _flatten_padded(h, k, pad, row_group):
    """Pad + flatten the NHWC activation for the fused-im2col kernel."""
    B, H, W, C = h.shape
    Hp, Wp = H + 2 * pad, W + 2 * pad
    Ho, Wo = Hp - k + 1, Wp - k + 1
    M, L = Ho * Wp, (Hp + 1) * Wp
    xpad = jnp.pad(h.astype(jnp.bfloat16),
                   ((0, 0), (pad, pad + 2), (pad, pad), (0, 0)))
    xext = xpad.reshape(B, (Hp + 2) * Wp, C)
    if row_group:
        # Per-row im2col: the k column taps fold into channels -> K = k*C.
        x_in = jnp.concatenate([xext[:, j:j + L, :] for j in range(k)], axis=-1)
        taps = tuple(i * Wp for i in range(k))
    else:
        x_in = xext[:, :L, :]
        taps = tuple(i * Wp + j for i in range(k) for j in range(k))
    return x_in, dict(B=B, Wp=Wp, Ho=Ho, Wo=Wo, M=M, L=L, taps=taps)


def conv_layer(h, layer, out_dtype=jnp.bfloat16):
    if layer.get("phase_input", False):
        h = _to_phases(h)

    k, pad = layer["k"], layer["pad"]
    mode, groups = layer["mode"], layer["groups"]
    cw, cout = layer["cw"], layer["cout"]
    w = layer["w"]                                  # (T, K, N) bf16
    T, K, N = (int(d) for d in w.shape)

    x_in, g = _flatten_padded(h, k, pad, layer["row_group"])
    assert x_in.shape[-1] == K, (x_in.shape, K)
    B, M, L, Wp, Wo, Ho = g["B"], g["M"], g["L"], g["Wp"], g["Wo"], g["Ho"]

    inv_cnt = 1.0 / float(Ho * Wo * groups)
    kernel = functools.partial(
        _fused_conv_kernel, tap_offsets=g["taps"], m=M, wp=Wp, wo=Wo,
        mode=mode, groups=groups, cw=cw, inv_cnt=inv_cnt)

    vmem_est = (2 * _pad_block_bytes(L, K, jnp.bfloat16)
                + 2 * T * _pad_block_bytes(K, N, jnp.bfloat16)
                + 2 * _pad_block_bytes(M, N, out_dtype)
                + 4 * _pad_block_bytes(M, N, jnp.float32)
                + (2 << 20))
    io_bytes = (x_in.size * 2 + w.size * 2
                + B * M * N * jnp.dtype(out_dtype).itemsize)

    out = pl.pallas_call(
        kernel,
        out_shape=jax.ShapeDtypeStruct((B, M, N), out_dtype),
        grid=(B,),
        in_specs=[pl.BlockSpec((None, L, K), lambda b: (b, 0, 0)),
                  pl.BlockSpec((T, K, N), lambda b: (0, 0, 0))],
        out_specs=pl.BlockSpec((None, M, N), lambda b: (b, 0, 0)),
        compiler_params=pltpu.CompilerParams(
            dimension_semantics=("parallel",),
            vmem_limit_bytes=_vmem_limit(vmem_est)),
        cost_estimate=pl.CostEstimate(
            flops=2 * B * M * T * K * N,
            transcendentals=(2 * B * M * N
                             if mode in ("heads", "tanh", "sigmoid") else 0),
            bytes_accessed=int(io_bytes)),
    )(x_in, w)

    # Strip wrap-around columns and lane padding; pixel-shuffle deconv phases.
    out = out.reshape(B, Ho, Wp, groups, cw)[:, :, :Wo, :, :cout]
    if layer.get("pixel_shuffle", False):
        out = out.reshape(B, Ho, Wo, 2, 2, cout)
        out = jnp.transpose(out, (0, 1, 3, 2, 4, 5)).reshape(
            B, 2 * Ho, 2 * Wo, cout)
    else:
        out = out.reshape(B, Ho, Wo, cout)
    return out


def res_block(h, lay, out_dtype=jnp.bfloat16):
    c, cw = lay["c"], lay["cw"]
    w1, w2 = lay["w1"], lay["w2"]
    T1, K1, N = (int(d) for d in w1.shape)

    x_in, g = _flatten_padded(h, 3, 1, lay["row_group"])
    assert x_in.shape[-1] == K1, (x_in.shape, K1)
    B, M, L, Wp, Wo, Ho = g["B"], g["M"], g["L"], g["Wp"], g["Wo"], g["Ho"]

    # Align conv2's shifted intermediate store to a 16-row boundary.
    delta = (-(Wp + 1)) % 16
    store_off = Wp + 1 + delta
    Lmid = L + delta
    taps2 = tuple(delta + i * Wp + j for i in range(3) for j in range(3))
    inv_cnt = 1.0 / float(Ho * Wo)

    kernel = functools.partial(
        _res_block_kernel, taps1=g["taps"], taps2=taps2, m=M, wp=Wp, wo=Wo,
        c=c, store_off=store_off, inv_cnt=inv_cnt)

    vmem_est = (2 * _pad_block_bytes(L, K1, jnp.bfloat16)
                + 2 * T1 * _pad_block_bytes(K1, N, jnp.bfloat16)
                + 2 * 9 * _pad_block_bytes(N, N, jnp.bfloat16)
                + 2 * _pad_block_bytes(M, N, out_dtype)
                + _pad_block_bytes(Lmid, N, jnp.bfloat16)
                + 6 * _pad_block_bytes(M, N, jnp.float32)
                + (2 << 20))
    io_bytes = x_in.size * 2 + w1.size * 2 + w2.size * 2 + B * M * N * 2

    out = pl.pallas_call(
        kernel,
        out_shape=jax.ShapeDtypeStruct((B, M, N), out_dtype),
        grid=(B,),
        in_specs=[pl.BlockSpec((None, L, K1), lambda b: (b, 0, 0)),
                  pl.BlockSpec((T1, K1, N), lambda b: (0, 0, 0)),
                  pl.BlockSpec((9, N, N), lambda b: (0, 0, 0))],
        out_specs=pl.BlockSpec((None, M, N), lambda b: (b, 0, 0)),
        scratch_shapes=[pltpu.VMEM((Lmid, N), jnp.bfloat16)],
        compiler_params=pltpu.CompilerParams(
            dimension_semantics=("parallel",),
            vmem_limit_bytes=_vmem_limit(vmem_est)),
        cost_estimate=pl.CostEstimate(
            flops=2 * B * M * N * (T1 * K1 + 9 * N),
            transcendentals=0,
            bytes_accessed=int(io_bytes)),
    )(x_in, w1, w2)

    return out.reshape(B, Ho, Wp, N)[:, :, :Wo, :c].reshape(B, Ho, Wo, c)


# ---------------------------------------------------------------------------
# Generator parameters + forward pass
# ---------------------------------------------------------------------------
def init_torch_params(key, conv_dim=16, c_dim=5, repeat_num=2):
    # weights_init_fn: Conv* weights ~ N(0, 0.02); all convs are bias=False.
    keys = iter(jax.random.split(key, 7 + 2 * repeat_num))
    nrm = lambda kk, shape: 0.02 * jax.random.normal(kk, shape, jnp.float32)

    p = {}
    p["stem"] = nrm(next(keys), (conv_dim, 3 + c_dim, 7, 7))
    curr = conv_dim
    p["down"] = []
    for _ in range(2):
        p["down"].append(nrm(next(keys), (curr * 2, curr, 4, 4)))
        curr *= 2
    p["res"] = []
    for _ in range(repeat_num):
        p["res"].append((nrm(next(keys), (curr, curr, 3, 3)),
                         nrm(next(keys), (curr, curr, 3, 3))))
    p["up"] = []
    for _ in range(2):
        # ConvTranspose2d weight layout: (Cin, Cout, kH, kW)
        p["up"].append(nrm(next(keys), (curr, curr // 2, 4, 4)))
        curr //= 2
    p["img"] = nrm(next(keys), (3, curr, 7, 7))
    p["att"] = nrm(next(keys), (1, curr, 7, 7))
    return p


def prepare_generator(p):
    """One-time conversion of PyTorch-layout weights into kernel layout."""
    return dict(
        stem=_prep_conv(p["stem"], "in_relu"),
        down=[_prep_down(w) for w in p["down"]],
        res=[_prep_res(w1, w2) for (w1, w2) in p["res"]],
        up=[_prep_up(w) for w in p["up"]],
        heads=_prep_heads(p["att"], p["img"]),
    )


def generator_forward(layers, x_nchw, c):
    x = jnp.transpose(x_nchw, (0, 2, 3, 1)).astype(jnp.float32)     # NCHW -> NHWC
    B, H, W, _ = x.shape
    c_map = jnp.broadcast_to(c[:, None, None, :].astype(jnp.float32),
                             (B, H, W, c.shape[1]))
    h = jnp.concatenate([x, c_map], axis=-1).astype(jnp.bfloat16)   # [img, c]

    h = conv_layer(h, layers["stem"])
    for lyr in layers["down"]:
        h = conv_layer(h, lyr)
    for lyr in layers["res"]:
        h = res_block(h, lyr)                                       # x + main(x)
    for lyr in layers["up"]:
        h = conv_layer(h, lyr)

    heads = conv_layer(h, layers["heads"], out_dtype=jnp.float32)   # (B,H,W,4)
    att = heads[..., 0:1]                                           # sigmoid head
    img = heads[..., 1:4]                                           # tanh head
    # back to NCHW; return order matches PyTorch: (attention_reg, img_reg)
    return jnp.transpose(att, (0, 3, 1, 2)), jnp.transpose(img, (0, 3, 1, 2))


if __name__ == "__main__":
    key = jax.random.PRNGKey(0)
    kp, kx, kc = jax.random.split(key, 3)

    conv_dim, c_dim, repeat_num = 16, 5, 2      # small config (module default: 64/5/6)
    B, H, W = 2, 16, 16

    torch_params = init_torch_params(kp, conv_dim=conv_dim, c_dim=c_dim,
                                     repeat_num=repeat_num)
    layers = prepare_generator(torch_params)    # weight prep hoisted out of forward

    x = jax.random.normal(kx, (B, 3, H, W), jnp.float32)
    c = jax.random.normal(kc, (B, c_dim), jnp.float32)

    fwd = jax.jit(functools.partial(generator_forward, layers))
    att, img = fwd(x, c)
    jax.block_until_ready((att, img))

    assert att.shape == (B, 1, H, W) and img.shape == (B, 3, H, W)
    assert bool(jnp.all(jnp.isfinite(att))) and bool(jnp.all(jnp.isfinite(img)))
    assert bool(jnp.all((att >= 0.0) & (att <= 1.0)))    # sigmoid head range
    assert bool(jnp.all((img >= -1.0) & (img <= 1.0)))   # tanh head range
    print("KERNEL_OK")
</pallas_src>

<mosaic_0001>
module attributes {stable_mosaic.version = 11 : i64} {
  func.func @_fused_conv_kernel(%arg0: i32, %arg1: memref<1x506x56xbf16, #tpu.memory_space<vmem>>, %arg2: memref<7x56x128xbf16, #tpu.memory_space<vmem>>, %arg3: memref<1x352x128xbf16, #tpu.memory_space<vmem>>) attributes {dimension_semantics = [#tpu.dimension_semantics<parallel>], iteration_bounds = array<i64: 2>, scalar_prefetch = 0 : i64, scratch_operands = 0 : i64, tpu.core_type = #tpu.core_type<tc>, window_params = [{transform_indices = @transform_0, window_bounds = array<i64: 1, 506, 56>}, {pipeline_mode = #tpu.pipeline_mode<synchronous>, transform_indices = @transform_1, window_bounds = array<i64: 7, 56, 128>}, {transform_indices = @transform_2, window_bounds = array<i64: 1, 352, 128>}]} {
    %c0 = arith.constant 0 : index
    %c0_0 = arith.constant 0 : index
    %c0_1 = arith.constant 0 : index
    %0 = vector.load %arg1[%c0, %c0_0, %c0_1] : memref<1x506x56xbf16, #tpu.memory_space<vmem>>, vector<1x352x56xbf16>
    %1 = vector.shape_cast %0 : vector<1x352x56xbf16> to vector<352x56xbf16>
    %c0_2 = arith.constant 0 : index
    %c0_3 = arith.constant 0 : index
    %c0_4 = arith.constant 0 : index
    %2 = vector.load %arg2[%c0_2, %c0_3, %c0_4] : memref<7x56x128xbf16, #tpu.memory_space<vmem>>, vector<1x56x128xbf16>
    %3 = vector.shape_cast %2 : vector<1x56x128xbf16> to vector<56x128xbf16>
    %cst = arith.constant dense<0.000000e+00> : vector<352x128xf32>
    %4 = tpu.matmul %1, %3, %cst {dimension_numbers = #tpu.dot_dimension_numbers<[1], [0], [0], [1], [0, 0, 1, 1], [], []>} : vector<352x56xbf16>, vector<56x128xbf16>, vector<352x128xf32> -> vector<352x128xf32>
    %c0_5 = arith.constant 0 : index
    %c22 = arith.constant 22 : index
    %c0_6 = arith.constant 0 : index
    %5 = vector.load %arg1[%c0_5, %c22, %c0_6] : memref<1x506x56xbf16, #tpu.memory_space<vmem>>, vector<1x352x56xbf16>
    %6 = vector.shape_cast %5 : vector<1x352x56xbf16> to vector<352x56xbf16>
    %c1 = arith.constant 1 : index
    %c0_7 = arith.constant 0 : index
    %c0_8 = arith.constant 0 : index
    %7 = vector.load %arg2[%c1, %c0_7, %c0_8] : memref<7x56x128xbf16, #tpu.memory_space<vmem>>, vector<1x56x128xbf16>
    %8 = vector.shape_cast %7 : vector<1x56x128xbf16> to vector<56x128xbf16>
    %cst_9 = arith.constant dense<0.000000e+00> : vector<352x128xf32>
    %9 = tpu.matmul %6, %8, %cst_9 {dimension_numbers = #tpu.dot_dimension_numbers<[1], [0], [0], [1], [0, 0, 1, 1], [], []>} : vector<352x56xbf16>, vector<56x128xbf16>, vector<352x128xf32> -> vector<352x128xf32>
    %10 = arith.addf %4, %9 : vector<352x128xf32>
    %c0_10 = arith.constant 0 : index
    %c44 = arith.constant 44 : index
    %c0_11 = arith.constant 0 : index
    %11 = vector.load %arg1[%c0_10, %c44, %c0_11] : memref<1x506x56xbf16, #tpu.memory_space<vmem>>, vector<1x352x56xbf16>
    %12 = vector.shape_cast %11 : vector<1x352x56xbf16> to vector<352x56xbf16>
    %c2 = arith.constant 2 : index
    %c0_12 = arith.constant 0 : index
    %c0_13 = arith.constant 0 : index
    %13 = vector.load %arg2[%c2, %c0_12, %c0_13] : memref<7x56x128xbf16, #tpu.memory_space<vmem>>, vector<1x56x128xbf16>
    %14 = vector.shape_cast %13 : vector<1x56x128xbf16> to vector<56x128xbf16>
    %cst_14 = arith.constant dense<0.000000e+00> : vector<352x128xf32>
    %15 = tpu.matmul %12, %14, %cst_14 {dimension_numbers = #tpu.dot_dimension_numbers<[1], [0], [0], [1], [0, 0, 1, 1], [], []>} : vector<352x56xbf16>, vector<56x128xbf16>, vector<352x128xf32> -> vector<352x128xf32>
    %16 = arith.addf %10, %15 : vector<352x128xf32>
    %c0_15 = arith.constant 0 : index
    %c66 = arith.constant 66 : index
    %c0_16 = arith.constant 0 : index
    %17 = vector.load %arg1[%c0_15, %c66, %c0_16] : memref<1x506x56xbf16, #tpu.memory_space<vmem>>, vector<1x352x56xbf16>
    %18 = vector.shape_cast %17 : vector<1x352x56xbf16> to vector<352x56xbf16>
    %c3 = arith.constant 3 : index
    %c0_17 = arith.constant 0 : index
    %c0_18 = arith.constant 0 : index
    %19 = vector.load %arg2[%c3, %c0_17, %c0_18] : memref<7x56x128xbf16, #tpu.memory_space<vmem>>, vector<1x56x128xbf16>
    %20 = vector.shape_cast %19 : vector<1x56x128xbf16> to vector<56x128xbf16>
    %cst_19 = arith.constant dense<0.000000e+00> : vector<352x128xf32>
    %21 = tpu.matmul %18, %20, %cst_19 {dimension_numbers = #tpu.dot_dimension_numbers<[1], [0], [0], [1], [0, 0, 1, 1], [], []>} : vector<352x56xbf16>, vector<56x128xbf16>, vector<352x128xf32> -> vector<352x128xf32>
    %22 = arith.addf %16, %21 : vector<352x128xf32>
    %c0_20 = arith.constant 0 : index
    %c88 = arith.constant 88 : index
    %c0_21 = arith.constant 0 : index
    %23 = vector.load %arg1[%c0_20, %c88, %c0_21] : memref<1x506x56xbf16, #tpu.memory_space<vmem>>, vector<1x352x56xbf16>
    %24 = vector.shape_cast %23 : vector<1x352x56xbf16> to vector<352x56xbf16>
    %c4 = arith.constant 4 : index
    %c0_22 = arith.constant 0 : index
    %c0_23 = arith.constant 0 : index
    %25 = vector.load %arg2[%c4, %c0_22, %c0_23] : memref<7x56x128xbf16, #tpu.memory_space<vmem>>, vector<1x56x128xbf16>
    %26 = vector.shape_cast %25 : vector<1x56x128xbf16> to vector<56x128xbf16>
    %cst_24 = arith.constant dense<0.000000e+00> : vector<352x128xf32>
    %27 = tpu.matmul %24, %26, %cst_24 {dimension_numbers = #tpu.dot_dimension_numbers<[1], [0], [0], [1], [0, 0, 1, 1], [], []>} : vector<352x56xbf16>, vector<56x128xbf16>, vector<352x128xf32> -> vector<352x128xf32>
    %28 = arith.addf %22, %27 : vector<352x128xf32>
    %c0_25 = arith.constant 0 : index
    %c110 = arith.constant 110 : index
    %c0_26 = arith.constant 0 : index
    %29 = vector.load %arg1[%c0_25, %c110, %c0_26] : memref<1x506x56xbf16, #tpu.memory_space<vmem>>, vector<1x352x56xbf16>
    %30 = vector.shape_cast %29 : vector<1x352x56xbf16> to vector<352x56xbf16>
    %c5 = arith.constant 5 : index
    %c0_27 = arith.constant 0 : index
    %c0_28 = arith.constant 0 : index
    %31 = vector.load %arg2[%c5, %c0_27, %c0_28] : memref<7x56x128xbf16, #tpu.memory_space<vmem>>, vector<1x56x128xbf16>
    %32 = vector.shape_cast %31 : vector<1x56x128xbf16> to vector<56x128xbf16>
    %cst_29 = arith.constant dense<0.000000e+00> : vector<352x128xf32>
    %33 = tpu.matmul %30, %32, %cst_29 {dimension_numbers = #tpu.dot_dimension_numbers<[1], [0], [0], [1], [0, 0, 1, 1], [], []>} : vector<352x56xbf16>, vector<56x128xbf16>, vector<352x128xf32> -> vector<352x128xf32>
    %34 = arith.addf %28, %33 : vector<352x128xf32>
    %c0_30 = arith.constant 0 : index
    %c132 = arith.constant 132 : index
    %c0_31 = arith.constant 0 : index
    %35 = vector.load %arg1[%c0_30, %c132, %c0_31] : memref<1x506x56xbf16, #tpu.memory_space<vmem>>, vector<1x352x56xbf16>
    %36 = vector.shape_cast %35 : vector<1x352x56xbf16> to vector<352x56xbf16>
    %c6 = arith.constant 6 : index
    %c0_32 = arith.constant 0 : index
    %c0_33 = arith.constant 0 : index
    %37 = vector.load %arg2[%c6, %c0_32, %c0_33] : memref<7x56x128xbf16, #tpu.memory_space<vmem>>, vector<1x56x128xbf16>
    %38 = vector.shape_cast %37 : vector<1x56x128xbf16> to vector<56x128xbf16>
    %cst_34 = arith.constant dense<0.000000e+00> : vector<352x128xf32>
    %39 = tpu.matmul %36, %38, %cst_34 {dimension_numbers = #tpu.dot_dimension_numbers<[1], [0], [0], [1], [0, 0, 1, 1], [], []>} : vector<352x56xbf16>, vector<56x128xbf16>, vector<352x128xf32> -> vector<352x128xf32>
    %40 = arith.addf %34, %39 : vector<352x128xf32>
    %41 = tpu.iota {dimensions = array<i32: 0>} : vector<352x1xi32>
    %c22_i32 = arith.constant 22 : i32
    %c0_i32 = arith.constant 0 : i32
    %42 = arith.cmpi eq, %c22_i32, %c0_i32 : i32
    %c1_i32 = arith.constant 1 : i32
    %43 = arith.select %42, %c1_i32, %c22_i32 : i32
    %44 = vector.broadcast %43 : i32 to vector<352x1xi32>
    %45 = arith.remsi %41, %44 : vector<352x1xi32>
    %c0_i32_35 = arith.constant 0 : i32
    %46 = vector.broadcast %c0_i32_35 : i32 to vector<352x1xi32>
    %47 = arith.cmpi ne, %45, %46 : vector<352x1xi32>
    %c0_i32_36 = arith.constant 0 : i32
    %48 = vector.broadcast %c0_i32_36 : i32 to vector<352x1xi32>
    %49 = arith.cmpi slt, %45, %48 : vector<352x1xi32>
    %c0_i32_37 = arith.constant 0 : i32
    %50 = arith.cmpi slt, %43, %c0_i32_37 : i32
    %51 = vector.broadcast %50 : i1 to vector<352x1xi1>
    %52 = vector.broadcast %51 : vector<352x1xi1> to vector<352x1xi1>
    %53 = arith.xori %49, %52 : vector<352x1xi1>
    %54 = arith.andi %53, %47 : vector<352x1xi1>
    %55 = vector.broadcast %43 : i32 to vector<352x1xi32>
    %56 = arith.addi %45, %55 : vector<352x1xi32>
    %57 = arith.select %54, %56, %45 : vector<352x1xi1>, vector<352x1xi32>
    %c16_i32 = arith.constant 16 : i32
    %58 = vector.broadcast %c16_i32 : i32 to vector<352x1xi32>
    %59 = arith.cmpi slt, %57, %58 : vector<352x1xi32>
    %60 = arith.extui %59 : vector<352x1xi1> to vector<352x1xi32>
    %61 = arith.sitofp %60 : vector<352x1xi32> to vector<352x1xf32>
    %62 = vector.broadcast %61 : vector<352x1xf32> to vector<352x128xf32>
    %63 = arith.mulf %40, %62 : vector<352x128xf32>
    %cst_38 = arith.constant dense<0.000000e+00> : vector<128xf32>
    %64 = vector.multi_reduction <add>, %63, %cst_38 [0] : vector<352x128xf32> to vector<128xf32>
    %65 = vector.shape_cast %64 : vector<128xf32> to vector<1x128xf32>
    %cst_39 = arith.constant 3.906250e-03 : f32
    %66 = vector.broadcast %cst_39 : f32 to vector<1x128xf32>
    %67 = arith.mulf %65, %66 : vector<1x128xf32>
    %68 = vector.broadcast %67 : vector<1x128xf32> to vector<352x128xf32>
    %69 = arith.subf %40, %68 : vector<352x128xf32>
    %70 = arith.mulf %69, %69 : vector<352x128xf32>
    %71 = vector.broadcast %61 : vector<352x1xf32> to vector<352x128xf32>
    %72 = arith.mulf %70, %71 : vector<352x128xf32>
    %cst_40 = arith.constant dense<0.000000e+00> : vector<128xf32>
    %73 = vector.multi_reduction <add>, %72, %cst_40 [0] : vector<352x128xf32> to vector<128xf32>
    %74 = vector.shape_cast %73 : vector<128xf32> to vector<1x128xf32>
    %cst_41 = arith.constant 3.906250e-03 : f32
    %75 = vector.broadcast %cst_41 : f32 to vector<1x128xf32>
    %76 = arith.mulf %74, %75 : vector<1x128xf32>
    %cst_42 = arith.constant 9.99999974E-6 : f32
    %77 = vector.broadcast %cst_42 : f32 to vector<1x128xf32>
    %78 = arith.addf %76, %77 : vector<1x128xf32>
    %79 = math.rsqrt %78 : vector<1x128xf32>
    %80 = vector.broadcast %79 : vector<1x128xf32> to vector<352x128xf32>
    %81 = arith.mulf %69, %80 : vector<352x128xf32>
    %cst_43 = arith.constant 0.000000e+00 : f32
    %82 = vector.broadcast %cst_43 : f32 to vector<352x128xf32>
    %83 = arith.maximumf %81, %82 : vector<352x128xf32>
    %84 = arith.truncf %83 : vector<352x128xf32> to vector<352x128xbf16>
    %c0_44 = arith.constant 0 : index
    %c0_45 = arith.constant 0 : index
    %c0_46 = arith.constant 0 : index
    %85 = vector.load %arg3[%c0_44, %c0_45, %c0_46] : memref<1x352x128xbf16, #tpu.memory_space<vmem>>, vector<1x352x128xbf16>
    %86 = vector.shape_cast %85 : vector<1x352x128xbf16> to vector<352x128xbf16>
    %87 = vector.shape_cast %84 : vector<352x128xbf16> to vector<1x352x128xbf16>
    tpu.vector_store %arg3[%c0_44, %c0_45, %c0_46], %87 {strides = array<i32>} : memref<1x352x128xbf16, #tpu.memory_space<vmem>>, vector<1x352x128xbf16>,
    return
  }
  func.func @transform_0(%arg0: i32) -> (i32, i32, i32) {
    %c0_i32 = arith.constant 0 : i32
    %c0_i32_0 = arith.constant 0 : i32
    %c0_i32_1 = arith.constant 0 : i32
    return %arg0, %c0_i32, %c0_i32_0 : i32, i32, i32
  }
  func.func @transform_1(%arg0: i32) -> (i32, i32, i32) {
    %c0_i32 = arith.constant 0 : i32
    %c0_i32_0 = arith.constant 0 : i32
    %c0_i32_1 = arith.constant 0 : i32
    %c0_i32_2 = arith.constant 0 : i32
    return %c0_i32, %c0_i32_0, %c0_i32_1 : i32, i32, i32
  }
  func.func @transform_2(%arg0: i32) -> (i32, i32, i32) {
    %c0_i32 = arith.constant 0 : i32
    %c0_i32_0 = arith.constant 0 : i32
    %c0_i32_1 = arith.constant 0 : i32
    return %arg0, %c0_i32, %c0_i32_0 : i32, i32, i32
  }
}

module attributes {stable_mosaic.version = 11 : i64} {
  func.func @_fused_conv_kernel(%arg0: i32, %arg1: memref<1x90x128xbf16, #tpu.memory_space<vmem>>, %arg2: memref<2x128x128xbf16, #tpu.memory_space<vmem>>, %arg3: memref<1x72x128xbf16, #tpu.memory_space<vmem>>) attributes {dimension_semantics = [#tpu.dimension_semantics<parallel>], iteration_bounds = array<i64: 2>, scalar_prefetch = 0 : i64, scratch_operands = 0 : i64, tpu.core_type = #tpu.core_type<tc>, window_params = [{transform_indices = @transform_0, window_bounds = array<i64: 1, 90, 128>}, {pipeline_mode = #tpu.pipeline_mode<synchronous>, transform_indices = @transform_1, window_bounds = array<i64: 2, 128, 128>}, {transform_indices = @transform_2, window_bounds = array<i64: 1, 72, 128>}]} {
    %c0 = arith.constant 0 : index
    %c0_0 = arith.constant 0 : index
    %c0_1 = arith.constant 0 : index
    %0 = vector.load %arg1[%c0, %c0_0, %c0_1] : memref<1x90x128xbf16, #tpu.memory_space<vmem>>, vector<1x72x128xbf16>
    %1 = vector.shape_cast %0 : vector<1x72x128xbf16> to vector<72x128xbf16>
    %c0_2 = arith.constant 0 : index
    %c0_3 = arith.constant 0 : index
    %c0_4 = arith.constant 0 : index
    %2 = vector.load %arg2[%c0_2, %c0_3, %c0_4] : memref<2x128x128xbf16, #tpu.memory_space<vmem>>, vector<1x128x128xbf16>
    %3 = vector.shape_cast %2 : vector<1x128x128xbf16> to vector<128x128xbf16>
    %cst = arith.constant dense<0.000000e+00> : vector<72x128xf32>
    %4 = tpu.matmul %1, %3, %cst {dimension_numbers = #tpu.dot_dimension_numbers<[1], [0], [0], [1], [0, 0, 1, 1], [], []>} : vector<72x128xbf16>, vector<128x128xbf16>, vector<72x128xf32> -> vector<72x128xf32>
    %c0_5 = arith.constant 0 : index
    %c9 = arith.constant 9 : index
    %c0_6 = arith.constant 0 : index
    %5 = vector.load %arg1[%c0_5, %c9, %c0_6] : memref<1x90x128xbf16, #tpu.memory_space<vmem>>, vector<1x72x128xbf16>
    %6 = vector.shape_cast %5 : vector<1x72x128xbf16> to vector<72x128xbf16>
    %c1 = arith.constant 1 : index
    %c0_7 = arith.constant 0 : index
    %c0_8 = arith.constant 0 : index
    %7 = vector.load %arg2[%c1, %c0_7, %c0_8] : memref<2x128x128xbf16, #tpu.memory_space<vmem>>, vector<1x128x128xbf16>
    %8 = vector.shape_cast %7 : vector<1x128x128xbf16> to vector<128x128xbf16>
    %cst_9 = arith.constant dense<0.000000e+00> : vector<72x128xf32>
    %9 = tpu.matmul %6, %8, %cst_9 {dimension_numbers = #tpu.dot_dimension_numbers<[1], [0], [0], [1], [0, 0, 1, 1], [], []>} : vector<72x128xbf16>, vector<128x128xbf16>, vector<72x128xf32> -> vector<72x128xf32>
    %10 = arith.addf %4, %9 : vector<72x128xf32>
    %11 = tpu.iota {dimensions = array<i32: 0>} : vector<72x1xi32>
    %c9_i32 = arith.constant 9 : i32
    %c0_i32 = arith.constant 0 : i32
    %12 = arith.cmpi eq, %c9_i32, %c0_i32 : i32
    %c1_i32 = arith.constant 1 : i32
    %13 = arith.select %12, %c1_i32, %c9_i32 : i32
    %14 = vector.broadcast %13 : i32 to vector<72x1xi32>
    %15 = arith.remsi %11, %14 : vector<72x1xi32>
    %c0_i32_10 = arith.constant 0 : i32
    %16 = vector.broadcast %c0_i32_10 : i32 to vector<72x1xi32>
    %17 = arith.cmpi ne, %15, %16 : vector<72x1xi32>
    %c0_i32_11 = arith.constant 0 : i32
    %18 = vector.broadcast %c0_i32_11 : i32 to vector<72x1xi32>
    %19 = arith.cmpi slt, %15, %18 : vector<72x1xi32>
    %c0_i32_12 = arith.constant 0 : i32
    %20 = arith.cmpi slt, %13, %c0_i32_12 : i32
    %21 = vector.broadcast %20 : i1 to vector<72x1xi1>
    %22 = vector.broadcast %21 : vector<72x1xi1> to vector<72x1xi1>
    %23 = arith.xori %19, %22 : vector<72x1xi1>
    %24 = arith.andi %23, %17 : vector<72x1xi1>
    %25 = vector.broadcast %13 : i32 to vector<72x1xi32>
    %26 = arith.addi %15, %25 : vector<72x1xi32>
    %27 = arith.select %24, %26, %15 : vector<72x1xi1>, vector<72x1xi32>
    %c8_i32 = arith.constant 8 : i32
    %28 = vector.broadcast %c8_i32 : i32 to vector<72x1xi32>
    %29 = arith.cmpi slt, %27, %28 : vector<72x1xi32>
    %30 = arith.extui %29 : vector<72x1xi1> to vector<72x1xi32>
    %31 = arith.sitofp %30 : vector<72x1xi32> to vector<72x1xf32>
    %32 = vector.broadcast %31 : vector<72x1xf32> to vector<72x128xf32>
    %33 = arith.mulf %10, %32 : vector<72x128xf32>
    %cst_13 = arith.constant dense<0.000000e+00> : vector<128xf32>
    %34 = vector.multi_reduction <add>, %33, %cst_13 [0] : vector<72x128xf32> to vector<128xf32>
    %35 = vector.shape_cast %34 : vector<128xf32> to vector<1x128xf32>
    %cst_14 = arith.constant 1.562500e-02 : f32
    %36 = vector.broadcast %cst_14 : f32 to vector<1x128xf32>
    %37 = arith.mulf %35, %36 : vector<1x128xf32>
    %38 = vector.broadcast %37 : vector<1x128xf32> to vector<72x128xf32>
    %39 = arith.subf %10, %38 : vector<72x128xf32>
    %40 = arith.mulf %39, %39 : vector<72x128xf32>
    %41 = vector.broadcast %31 : vector<72x1xf32> to vector<72x128xf32>
    %42 = arith.mulf %40, %41 : vector<72x128xf32>
    %cst_15 = arith.constant dense<0.000000e+00> : vector<128xf32>
    %43 = vector.multi_reduction <add>, %42, %cst_15 [0] : vector<72x128xf32> to vector<128xf32>
    %44 = vector.shape_cast %43 : vector<128xf32> to vector<1x128xf32>
    %cst_16 = arith.constant 1.562500e-02 : f32
    %45 = vector.broadcast %cst_16 : f32 to vector<1x128xf32>
    %46 = arith.mulf %44, %45 : vector<1x128xf32>
    %cst_17 = arith.constant 9.99999974E-6 : f32
    %47 = vector.broadcast %cst_17 : f32 to vector<1x128xf32>
    %48 = arith.addf %46, %47 : vector<1x128xf32>
    %49 = math.rsqrt %48 : vector<1x128xf32>
    %50 = vector.broadcast %49 : vector<1x128xf32> to vector<72x128xf32>
    %51 = arith.mulf %39, %50 : vector<72x128xf32>
    %cst_18 = arith.constant 0.000000e+00 : f32
    %52 = vector.broadcast %cst_18 : f32 to vector<72x128xf32>
    %53 = arith.maximumf %51, %52 : vector<72x128xf32>
    %54 = arith.truncf %53 : vector<72x128xf32> to vector<72x128xbf16>
    %c0_19 = arith.constant 0 : index
    %c0_20 = arith.constant 0 : index
    %c0_21 = arith.constant 0 : index
    %55 = vector.load %arg3[%c0_19, %c0_20, %c0_21] : memref<1x72x128xbf16, #tpu.memory_space<vmem>>, vector<1x72x128xbf16>
    %56 = vector.shape_cast %55 : vector<1x72x128xbf16> to vector<72x128xbf16>
    %57 = vector.shape_cast %54 : vector<72x128xbf16> to vector<1x72x128xbf16>
    tpu.vector_store %arg3[%c0_19, %c0_20, %c0_21], %57 {strides = array<i32>} : memref<1x72x128xbf16, #tpu.memory_space<vmem>>, vector<1x72x128xbf16>,
    return
  }
  func.func @transform_0(%arg0: i32) -> (i32, i32, i32) {
    %c0_i32 = arith.constant 0 : i32
    %c0_i32_0 = arith.constant 0 : i32
    %c0_i32_1 = arith.constant 0 : i32
    return %arg0, %c0_i32, %c0_i32_0 : i32, i32, i32
  }
  func.func @transform_1(%arg0: i32) -> (i32, i32, i32) {
    %c0_i32 = arith.constant 0 : i32
    %c0_i32_0 = arith.constant 0 : i32
    %c0_i32_1 = arith.constant 0 : i32
    %c0_i32_2 = arith.constant 0 : i32
    return %c0_i32, %c0_i32_0, %c0_i32_1 : i32, i32, i32
  }
  func.func @transform_2(%arg0: i32) -> (i32, i32, i32) {
    %c0_i32 = arith.constant 0 : i32
    %c0_i32_0 = arith.constant 0 : i32
    %c0_i32_1 = arith.constant 0 : i32
    return %arg0, %c0_i32, %c0_i32_0 : i32, i32, i32
  }
}

module attributes {stable_mosaic.version = 11 : i64} {
  func.func @_fused_conv_kernel(%arg0: i32, %arg1: memref<1x30x128xbf16, #tpu.memory_space<vmem>>, %arg2: memref<4x128x128xbf16, #tpu.memory_space<vmem>>, %arg3: memref<1x20x128xbf16, #tpu.memory_space<vmem>>) attributes {dimension_semantics = [#tpu.dimension_semantics<parallel>], iteration_bounds = array<i64: 2>, scalar_prefetch = 0 : i64, scratch_operands = 0 : i64, tpu.core_type = #tpu.core_type<tc>, window_params = [{transform_indices = @transform_0, window_bounds = array<i64: 1, 30, 128>}, {pipeline_mode = #tpu.pipeline_mode<synchronous>, transform_indices = @transform_1, window_bounds = array<i64: 4, 128, 128>}, {transform_indices = @transform_2, window_bounds = array<i64: 1, 20, 128>}]} {
    %c0 = arith.constant 0 : index
    %c0_0 = arith.constant 0 : index
    %c0_1 = arith.constant 0 : index
    %0 = vector.load %arg1[%c0, %c0_0, %c0_1] : memref<1x30x128xbf16, #tpu.memory_space<vmem>>, vector<1x20x128xbf16>
    %1 = vector.shape_cast %0 : vector<1x20x128xbf16> to vector<20x128xbf16>
    %c0_2 = arith.constant 0 : index
    %c0_3 = arith.constant 0 : index
    %c0_4 = arith.constant 0 : index
    %2 = vector.load %arg2[%c0_2, %c0_3, %c0_4] : memref<4x128x128xbf16, #tpu.memory_space<vmem>>, vector<1x128x128xbf16>
    %3 = vector.shape_cast %2 : vector<1x128x128xbf16> to vector<128x128xbf16>
    %cst = arith.constant dense<0.000000e+00> : vector<20x128xf32>
    %4 = tpu.matmul %1, %3, %cst {dimension_numbers = #tpu.dot_dimension_numbers<[1], [0], [0], [1], [0, 0, 1, 1], [], []>} : vector<20x128xbf16>, vector<128x128xbf16>, vector<20x128xf32> -> vector<20x128xf32>
    %c0_5 = arith.constant 0 : index
    %c1 = arith.constant 1 : index
    %c0_6 = arith.constant 0 : index
    %5 = vector.load %arg1[%c0_5, %c1, %c0_6] : memref<1x30x128xbf16, #tpu.memory_space<vmem>>, vector<1x20x128xbf16>
    %6 = vector.shape_cast %5 : vector<1x20x128xbf16> to vector<20x128xbf16>
    %c1_7 = arith.constant 1 : index
    %c0_8 = arith.constant 0 : index
    %c0_9 = arith.constant 0 : index
    %7 = vector.load %arg2[%c1_7, %c0_8, %c0_9] : memref<4x128x128xbf16, #tpu.memory_space<vmem>>, vector<1x128x128xbf16>
    %8 = vector.shape_cast %7 : vector<1x128x128xbf16> to vector<128x128xbf16>
    %cst_10 = arith.constant dense<0.000000e+00> : vector<20x128xf32>
    %9 = tpu.matmul %6, %8, %cst_10 {dimension_numbers = #tpu.dot_dimension_numbers<[1], [0], [0], [1], [0, 0, 1, 1], [], []>} : vector<20x128xbf16>, vector<128x128xbf16>, vector<20x128xf32> -> vector<20x128xf32>
    %10 = arith.addf %4, %9 : vector<20x128xf32>
    %c0_11 = arith.constant 0 : index
    %c5 = arith.constant 5 : index
    %c0_12 = arith.constant 0 : index
    %11 = vector.load %arg1[%c0_11, %c5, %c0_12] : memref<1x30x128xbf16, #tpu.memory_space<vmem>>, vector<1x20x128xbf16>
    %12 = vector.shape_cast %11 : vector<1x20x128xbf16> to vector<20x128xbf16>
    %c2 = arith.constant 2 : index
    %c0_13 = arith.constant 0 : index
    %c0_14 = arith.constant 0 : index
    %13 = vector.load %arg2[%c2, %c0_13, %c0_14] : memref<4x128x128xbf16, #tpu.memory_space<vmem>>, vector<1x128x128xbf16>
    %14 = vector.shape_cast %13 : vector<1x128x128xbf16> to vector<128x128xbf16>
    %cst_15 = arith.constant dense<0.000000e+00> : vector<20x128xf32>
    %15 = tpu.matmul %12, %14, %cst_15 {dimension_numbers = #tpu.dot_dimension_numbers<[1], [0], [0], [1], [0, 0, 1, 1], [], []>} : vector<20x128xbf16>, vector<128x128xbf16>, vector<20x128xf32> -> vector<20x128xf32>
    %16 = arith.addf %10, %15 : vector<20x128xf32>
    %c0_16 = arith.constant 0 : index
    %c6 = arith.constant 6 : index
    %c0_17 = arith.constant 0 : index
    %17 = vector.load %arg1[%c0_16, %c6, %c0_17] : memref<1x30x128xbf16, #tpu.memory_space<vmem>>, vector<1x20x128xbf16>
    %18 = vector.shape_cast %17 : vector<1x20x128xbf16> to vector<20x128xbf16>
    %c3 = arith.constant 3 : index
    %c0_18 = arith.constant 0 : index
    %c0_19 = arith.constant 0 : index
    %19 = vector.load %arg2[%c3, %c0_18, %c0_19] : memref<4x128x128xbf16, #tpu.memory_space<vmem>>, vector<1x128x128xbf16>
    %20 = vector.shape_cast %19 : vector<1x128x128xbf16> to vector<128x128xbf16>
    %cst_20 = arith.constant dense<0.000000e+00> : vector<20x128xf32>
    %21 = tpu.matmul %18, %20, %cst_20 {dimension_numbers = #tpu.dot_dimension_numbers<[1], [0], [0], [1], [0, 0, 1, 1], [], []>} : vector<20x128xbf16>, vector<128x128xbf16>, vector<20x128xf32> -> vector<20x128xf32>
    %22 = arith.addf %16, %21 : vector<20x128xf32>
    %23 = tpu.iota {dimensions = array<i32: 0>} : vector<20x1xi32>
    %c5_i32 = arith.constant 5 : i32
    %c0_i32 = arith.constant 0 : i32
    %24 = arith.cmpi eq, %c5_i32, %c0_i32 : i32
    %c1_i32 = arith.constant 1 : i32
    %25 = arith.select %24, %c1_i32, %c5_i32 : i32
    %26 = vector.broadcast %25 : i32 to vector<20x1xi32>
    %27 = arith.remsi %23, %26 : vector<20x1xi32>
    %c0_i32_21 = arith.constant 0 : i32
    %28 = vector.broadcast %c0_i32_21 : i32 to vector<20x1xi32>
    %29 = arith.cmpi ne, %27, %28 : vector<20x1xi32>
    %c0_i32_22 = arith.constant 0 : i32
    %30 = vector.broadcast %c0_i32_22 : i32 to vector<20x1xi32>
    %31 = arith.cmpi slt, %27, %30 : vector<20x1xi32>
    %c0_i32_23 = arith.constant 0 : i32
    %32 = arith.cmpi slt, %25, %c0_i32_23 : i32
    %33 = vector.broadcast %32 : i1 to vector<20x1xi1>
    %34 = vector.broadcast %33 : vector<20x1xi1> to vector<20x1xi1>
    %35 = arith.xori %31, %34 : vector<20x1xi1>
    %36 = arith.andi %35, %29 : vector<20x1xi1>
    %37 = vector.broadcast %25 : i32 to vector<20x1xi32>
    %38 = arith.addi %27, %37 : vector<20x1xi32>
    %39 = arith.select %36, %38, %27 : vector<20x1xi1>, vector<20x1xi32>
    %c4_i32 = arith.constant 4 : i32
    %40 = vector.broadcast %c4_i32 : i32 to vector<20x1xi32>
    %41 = arith.cmpi slt, %39, %40 : vector<20x1xi32>
    %42 = arith.extui %41 : vector<20x1xi1> to vector<20x1xi32>
    %43 = arith.sitofp %42 : vector<20x1xi32> to vector<20x1xf32>
    %44 = vector.broadcast %43 : vector<20x1xf32> to vector<20x128xf32>
    %45 = arith.mulf %22, %44 : vector<20x128xf32>
    %cst_24 = arith.constant dense<0.000000e+00> : vector<128xf32>
    %46 = vector.multi_reduction <add>, %45, %cst_24 [0] : vector<20x128xf32> to vector<128xf32>
    %47 = vector.shape_cast %46 : vector<128xf32> to vector<1x128xf32>
    %cst_25 = arith.constant 6.250000e-02 : f32
    %48 = vector.broadcast %cst_25 : f32 to vector<1x128xf32>
    %49 = arith.mulf %47, %48 : vector<1x128xf32>
    %50 = vector.broadcast %49 : vector<1x128xf32> to vector<20x128xf32>
    %51 = arith.subf %22, %50 : vector<20x128xf32>
    %52 = arith.mulf %51, %51 : vector<20x128xf32>
    %53 = vector.broadcast %43 : vector<20x1xf32> to vector<20x128xf32>
    %54 = arith.mulf %52, %53 : vector<20x128xf32>
    %cst_26 = arith.constant dense<0.000000e+00> : vector<128xf32>
    %55 = vector.multi_reduction <add>, %54, %cst_26 [0] : vector<20x128xf32> to vector<128xf32>
    %56 = vector.shape_cast %55 : vector<128xf32> to vector<1x128xf32>
    %cst_27 = arith.constant 6.250000e-02 : f32
    %57 = vector.broadcast %cst_27 : f32 to vector<1x128xf32>
    %58 = arith.mulf %56, %57 : vector<1x128xf32>
    %cst_28 = arith.constant 9.99999974E-6 : f32
    %59 = vector.broadcast %cst_28 : f32 to vector<1x128xf32>
    %60 = arith.addf %58, %59 : vector<1x128xf32>
    %61 = math.rsqrt %60 : vector<1x128xf32>
    %62 = vector.broadcast %61 : vector<1x128xf32> to vector<20x128xf32>
    %63 = arith.mulf %51, %62 : vector<20x128xf32>
    %cst_29 = arith.constant 0.000000e+00 : f32
    %64 = vector.broadcast %cst_29 : f32 to vector<20x128xf32>
    %65 = arith.maximumf %63, %64 : vector<20x128xf32>
    %66 = arith.truncf %65 : vector<20x128xf32> to vector<20x128xbf16>
    %c0_30 = arith.constant 0 : index
    %c0_31 = arith.constant 0 : index
    %c0_32 = arith.constant 0 : index
    %67 = vector.load %arg3[%c0_30, %c0_31, %c0_32] : memref<1x20x128xbf16, #tpu.memory_space<vmem>>, vector<1x20x128xbf16>
    %68 = vector.shape_cast %67 : vector<1x20x128xbf16> to vector<20x128xbf16>
    %69 = vector.shape_cast %66 : vector<20x128xbf16> to vector<1x20x128xbf16>
    tpu.vector_store %arg3[%c0_30, %c0_31, %c0_32], %69 {strides = array<i32>} : memref<1x20x128xbf16, #tpu.memory_space<vmem>>, vector<1x20x128xbf16>,
    return
  }
  func.func @transform_0(%arg0: i32) -> (i32, i32, i32) {
    %c0_i32 = arith.constant 0 : i32
    %c0_i32_0 = arith.constant 0 : i32
    %c0_i32_1 = arith.constant 0 : i32
    return %arg0, %c0_i32, %c0_i32_0 : i32, i32, i32
  }
  func.func @transform_1(%arg0: i32) -> (i32, i32, i32) {
    %c0_i32 = arith.constant 0 : i32
    %c0_i32_0 = arith.constant 0 : i32
    %c0_i32_1 = arith.constant 0 : i32
    %c0_i32_2 = arith.constant 0 : i32
    return %c0_i32, %c0_i32_0, %c0_i32_1 : i32, i32, i32
  }
  func.func @transform_2(%arg0: i32) -> (i32, i32, i32) {
    %c0_i32 = arith.constant 0 : i32
    %c0_i32_0 = arith.constant 0 : i32
    %c0_i32_1 = arith.constant 0 : i32
    return %arg0, %c0_i32, %c0_i32_0 : i32, i32, i32
  }
}

module attributes {stable_mosaic.version = 11 : i64} {
  func.func @_res_block_kernel(%arg0: i32, %arg1: memref<1x42x192xbf16, #tpu.memory_space<vmem>>, %arg2: memref<3x192x128xbf16, #tpu.memory_space<vmem>>, %arg3: memref<9x128x128xbf16, #tpu.memory_space<vmem>>, %arg4: memref<1x24x128xbf16, #tpu.memory_space<vmem>>, %arg5: memref<51x128xbf16, #tpu.memory_space<vmem>>) attributes {dimension_semantics = [#tpu.dimension_semantics<parallel>], iteration_bounds = array<i64: 2>, scalar_prefetch = 0 : i64, scratch_operands = 1 : i64, tpu.core_type = #tpu.core_type<tc>, window_params = [{transform_indices = @transform_0, window_bounds = array<i64: 1, 42, 192>}, {pipeline_mode = #tpu.pipeline_mode<synchronous>, transform_indices = @transform_1, window_bounds = array<i64: 3, 192, 128>}, {pipeline_mode = #tpu.pipeline_mode<synchronous>, transform_indices = @transform_2, window_bounds = array<i64: 9, 128, 128>}, {transform_indices = @transform_3, window_bounds = array<i64: 1, 24, 128>}]} {
    %0 = tpu.iota {dimensions = array<i32: 0>} : vector<24x1xi32>
    %c6_i32 = arith.constant 6 : i32
    %c0_i32 = arith.constant 0 : i32
    %1 = arith.cmpi eq, %c6_i32, %c0_i32 : i32
    %c1_i32 = arith.constant 1 : i32
    %2 = arith.select %1, %c1_i32, %c6_i32 : i32
    %3 = vector.broadcast %2 : i32 to vector<24x1xi32>
    %4 = arith.remsi %0, %3 : vector<24x1xi32>
    %c0_i32_0 = arith.constant 0 : i32
    %5 = vector.broadcast %c0_i32_0 : i32 to vector<24x1xi32>
    %6 = arith.cmpi ne, %4, %5 : vector<24x1xi32>
    %c0_i32_1 = arith.constant 0 : i32
    %7 = vector.broadcast %c0_i32_1 : i32 to vector<24x1xi32>
    %8 = arith.cmpi slt, %4, %7 : vector<24x1xi32>
    %c0_i32_2 = arith.constant 0 : i32
    %9 = arith.cmpi slt, %2, %c0_i32_2 : i32
    %10 = vector.broadcast %9 : i1 to vector<24x1xi1>
    %11 = vector.broadcast %10 : vector<24x1xi1> to vector<24x1xi1>
    %12 = arith.xori %8, %11 : vector<24x1xi1>
    %13 = arith.andi %12, %6 : vector<24x1xi1>
    %14 = vector.broadcast %2 : i32 to vector<24x1xi32>
    %15 = arith.addi %4, %14 : vector<24x1xi32>
    %16 = arith.select %13, %15, %4 : vector<24x1xi1>, vector<24x1xi32>
    %c4_i32 = arith.constant 4 : i32
    %17 = vector.broadcast %c4_i32 : i32 to vector<24x1xi32>
    %18 = arith.cmpi slt, %16, %17 : vector<24x1xi32>
    %19 = arith.extui %18 : vector<24x1xi1> to vector<24x1xi32>
    %20 = arith.sitofp %19 : vector<24x1xi32> to vector<24x1xf32>
    %c0 = arith.constant 0 : index
    %c0_3 = arith.constant 0 : index
    %c0_4 = arith.constant 0 : index
    %21 = vector.load %arg1[%c0, %c0_3, %c0_4] : memref<1x42x192xbf16, #tpu.memory_space<vmem>>, vector<1x24x192xbf16>
    %22 = vector.shape_cast %21 : vector<1x24x192xbf16> to vector<24x192xbf16>
    %c0_5 = arith.constant 0 : index
    %c0_6 = arith.constant 0 : index
    %c0_7 = arith.constant 0 : index
    %23 = vector.load %arg2[%c0_5, %c0_6, %c0_7] : memref<3x192x128xbf16, #tpu.memory_space<vmem>>, vector<1x192x128xbf16>
    %24 = vector.shape_cast %23 : vector<1x192x128xbf16> to vector<192x128xbf16>
    %cst = arith.constant dense<0.000000e+00> : vector<24x128xf32>
    %25 = tpu.matmul %22, %24, %cst {dimension_numbers = #tpu.dot_dimension_numbers<[1], [0], [0], [1], [0, 0, 1, 1], [], []>} : vector<24x192xbf16>, vector<192x128xbf16>, vector<24x128xf32> -> vector<24x128xf32>
    %c0_8 = arith.constant 0 : index
    %c6 = arith.constant 6 : index
    %c0_9 = arith.constant 0 : index
    %26 = vector.load %arg1[%c0_8, %c6, %c0_9] : memref<1x42x192xbf16, #tpu.memory_space<vmem>>, vector<1x24x192xbf16>
    %27 = vector.shape_cast %26 : vector<1x24x192xbf16> to vector<24x192xbf16>
    %c1 = arith.constant 1 : index
    %c0_10 = arith.constant 0 : index
    %c0_11 = arith.constant 0 : index
    %28 = vector.load %arg2[%c1, %c0_10, %c0_11] : memref<3x192x128xbf16, #tpu.memory_space<vmem>>, vector<1x192x128xbf16>
    %29 = vector.shape_cast %28 : vector<1x192x128xbf16> to vector<192x128xbf16>
    %cst_12 = arith.constant dense<0.000000e+00> : vector<24x128xf32>
    %30 = tpu.matmul %27, %29, %cst_12 {dimension_numbers = #tpu.dot_dimension_numbers<[1], [0], [0], [1], [0, 0, 1, 1], [], []>} : vector<24x192xbf16>, vector<192x128xbf16>, vector<24x128xf32> -> vector<24x128xf32>
    %31 = arith.addf %25, %30 : vector<24x128xf32>
    %c0_13 = arith.constant 0 : index
    %c12 = arith.constant 12 : index
    %c0_14 = arith.constant 0 : index
    %32 = vector.load %arg1[%c0_13, %c12, %c0_14] : memref<1x42x192xbf16, #tpu.memory_space<vmem>>, vector<1x24x192xbf16>
    %33 = vector.shape_cast %32 : vector<1x24x192xbf16> to vector<24x192xbf16>
    %c2 = arith.constant 2 : index
    %c0_15 = arith.constant 0 : index
    %c0_16 = arith.constant 0 : index
    %34 = vector.load %arg2[%c2, %c0_15, %c0_16] : memref<3x192x128xbf16, #tpu.memory_space<vmem>>, vector<1x192x128xbf16>
    %35 = vector.shape_cast %34 : vector<1x192x128xbf16> to vector<192x128xbf16>
    %cst_17 = arith.constant dense<0.000000e+00> : vector<24x128xf32>
    %36 = tpu.matmul %33, %35, %cst_17 {dimension_numbers = #tpu.dot_dimension_numbers<[1], [0], [0], [1], [0, 0, 1, 1], [], []>} : vector<24x192xbf16>, vector<192x128xbf16>, vector<24x128xf32> -> vector<24x128xf32>
    %37 = arith.addf %31, %36 : vector<24x128xf32>
    %38 = vector.broadcast %20 : vector<24x1xf32> to vector<24x128xf32>
    %39 = arith.mulf %37, %38 : vector<24x128xf32>
    %cst_18 = arith.constant dense<0.000000e+00> : vector<128xf32>
    %40 = vector.multi_reduction <add>, %39, %cst_18 [0] : vector<24x128xf32> to vector<128xf32>
    %41 = vector.shape_cast %40 : vector<128xf32> to vector<1x128xf32>
    %cst_19 = arith.constant 6.250000e-02 : f32
    %42 = vector.broadcast %cst_19 : f32 to vector<1x128xf32>
    %43 = arith.mulf %41, %42 : vector<1x128xf32>
    %44 = vector.broadcast %43 : vector<1x128xf32> to vector<24x128xf32>
    %45 = arith.subf %37, %44 : vector<24x128xf32>
    %46 = arith.mulf %45, %45 : vector<24x128xf32>
    %47 = vector.broadcast %20 : vector<24x1xf32> to vector<24x128xf32>
    %48 = arith.mulf %46, %47 : vector<24x128xf32>
    %cst_20 = arith.constant dense<0.000000e+00> : vector<128xf32>
    %49 = vector.multi_reduction <add>, %48, %cst_20 [0] : vector<24x128xf32> to vector<128xf32>
    %50 = vector.shape_cast %49 : vector<128xf32> to vector<1x128xf32>
    %cst_21 = arith.constant 6.250000e-02 : f32
    %51 = vector.broadcast %cst_21 : f32 to vector<1x128xf32>
    %52 = arith.mulf %50, %51 : vector<1x128xf32>
    %cst_22 = arith.constant 9.99999974E-6 : f32
    %53 = vector.broadcast %cst_22 : f32 to vector<1x128xf32>
    %54 = arith.addf %52, %53 : vector<1x128xf32>
    %55 = math.rsqrt %54 : vector<1x128xf32>
    %56 = vector.broadcast %55 : vector<1x128xf32> to vector<24x128xf32>
    %57 = arith.mulf %45, %56 : vector<24x128xf32>
    %cst_23 = arith.constant 0.000000e+00 : f32
    %58 = vector.broadcast %cst_23 : f32 to vector<24x128xf32>
    %59 = arith.maximumf %57, %58 : vector<24x128xf32>
    %cst_24 = arith.constant 0.000000e+00 : bf16
    %60 = vector.broadcast %cst_24 : bf16 to vector<51x128xbf16>
    %c0_25 = arith.constant 0 : index
    %c0_26 = arith.constant 0 : index
    %61 = vector.load %arg5[%c0_25, %c0_26] : memref<51x128xbf16, #tpu.memory_space<vmem>>, vector<51x128xbf16>
    tpu.vector_store %arg5[%c0_25, %c0_26], %60 {strides = array<i32>} : memref<51x128xbf16, #tpu.memory_space<vmem>>, vector<51x128xbf16>,
    %62 = vector.broadcast %20 : vector<24x1xf32> to vector<24x128xf32>
    %63 = arith.mulf %59, %62 : vector<24x128xf32>
    %64 = arith.truncf %63 : vector<24x128xf32> to vector<24x128xbf16>
    %c16 = arith.constant 16 : index
    %c0_27 = arith.constant 0 : index
    %65 = vector.load %arg5[%c16, %c0_27] : memref<51x128xbf16, #tpu.memory_space<vmem>>, vector<24x128xbf16>
    tpu.vector_store %arg5[%c16, %c0_27], %64 {strides = array<i32>} : memref<51x128xbf16, #tpu.memory_space<vmem>>, vector<24x128xbf16>,
    %c9 = arith.constant 9 : index
    %c0_28 = arith.constant 0 : index
    %66 = vector.load %arg5[%c9, %c0_28] : memref<51x128xbf16, #tpu.memory_space<vmem>>, vector<24x128xbf16>
    %c0_29 = arith.constant 0 : index
    %c0_30 = arith.constant 0 : index
    %c0_31 = arith.constant 0 : index
    %67 = vector.load %arg3[%c0_29, %c0_30, %c0_31] : memref<9x128x128xbf16, #tpu.memory_space<vmem>>, vector<1x128x128xbf16>
    %68 = vector.shape_cast %67 : vector<1x128x128xbf16> to vector<128x128xbf16>
    %cst_32 = arith.constant dense<0.000000e+00> : vector<24x128xf32>
    %69 = tpu.matmul %66, %68, %cst_32 {dimension_numbers = #tpu.dot_dimension_numbers<[1], [0], [0], [1], [0, 0, 1, 1], [], []>} : vector<24x128xbf16>, vector<128x128xbf16>, vector<24x128xf32> -> vector<24x128xf32>
    %c10 = arith.constant 10 : index
    %c0_33 = arith.constant 0 : index
    %70 = vector.load %arg5[%c10, %c0_33] : memref<51x128xbf16, #tpu.memory_space<vmem>>, vector<24x128xbf16>
    %c1_34 = arith.constant 1 : index
    %c0_35 = arith.constant 0 : index
    %c0_36 = arith.constant 0 : index
    %71 = vector.load %arg3[%c1_34, %c0_35, %c0_36] : memref<9x128x128xbf16, #tpu.memory_space<vmem>>, vector<1x128x128xbf16>
    %72 = vector.shape_cast %71 : vector<1x128x128xbf16> to vector<128x128xbf16>
    %cst_37 = arith.constant dense<0.000000e+00> : vector<24x128xf32>
    %73 = tpu.matmul %70, %72, %cst_37 {dimension_numbers = #tpu.dot_dimension_numbers<[1], [0], [0], [1], [0, 0, 1, 1], [], []>} : vector<24x128xbf16>, vector<128x128xbf16>, vector<24x128xf32> -> vector<24x128xf32>
    %74 = arith.addf %69, %73 : vector<24x128xf32>
    %c11 = arith.constant 11 : index
    %c0_38 = arith.constant 0 : index
    %75 = vector.load %arg5[%c11, %c0_38] : memref<51x128xbf16, #tpu.memory_space<vmem>>, vector<24x128xbf16>
    %c2_39 = arith.constant 2 : index
    %c0_40 = arith.constant 0 : index
    %c0_41 = arith.constant 0 : index
    %76 = vector.load %arg3[%c2_39, %c0_40, %c0_41] : memref<9x128x128xbf16, #tpu.memory_space<vmem>>, vector<1x128x128xbf16>
    %77 = vector.shape_cast %76 : vector<1x128x128xbf16> to vector<128x128xbf16>
    %cst_42 = arith.constant dense<0.000000e+00> : vector<24x128xf32>
    %78 = tpu.matmul %75, %77, %cst_42 {dimension_numbers = #tpu.dot_dimension_numbers<[1], [0], [0], [1], [0, 0, 1, 1], [], []>} : vector<24x128xbf16>, vector<128x128xbf16>, vector<24x128xf32> -> vector<24x128xf32>
    %79 = arith.addf %74, %78 : vector<24x128xf32>
    %c15 = arith.constant 15 : index
    %c0_43 = arith.constant 0 : index
    %80 = vector.load %arg5[%c15, %c0_43] : memref<51x128xbf16, #tpu.memory_space<vmem>>, vector<24x128xbf16>
    %c3 = arith.constant 3 : index
    %c0_44 = arith.constant 0 : index
    %c0_45 = arith.constant 0 : index
    %81 = vector.load %arg3[%c3, %c0_44, %c0_45] : memref<9x128x128xbf16, #tpu.memory_space<vmem>>, vector<1x128x128xbf16>
    %82 = vector.shape_cast %81 : vector<1x128x128xbf16> to vector<128x128xbf16>
    %cst_46 = arith.constant dense<0.000000e+00> : vector<24x128xf32>
    %83 = tpu.matmul %80, %82, %cst_46 {dimension_numbers = #tpu.dot_dimension_numbers<[1], [0], [0], [1], [0, 0, 1, 1], [], []>} : vector<24x128xbf16>, vector<128x128xbf16>, vector<24x128xf32> -> vector<24x128xf32>
    %84 = arith.addf %79, %83 : vector<24x128xf32>
    %c16_47 = arith.constant 16 : index
    %c0_48 = arith.constant 0 : index
    %85 = vector.load %arg5[%c16_47, %c0_48] : memref<51x128xbf16, #tpu.memory_space<vmem>>, vector<24x128xbf16>
    %c4 = arith.constant 4 : index
    %c0_49 = arith.constant 0 : index
    %c0_50 = arith.constant 0 : index
    %86 = vector.load %arg3[%c4, %c0_49, %c0_50] : memref<9x128x128xbf16, #tpu.memory_space<vmem>>, vector<1x128x128xbf16>
    %87 = vector.shape_cast %86 : vector<1x128x128xbf16> to vector<128x128xbf16>
    %cst_51 = arith.constant dense<0.000000e+00> : vector<24x128xf32>
    %88 = tpu.matmul %85, %87, %cst_51 {dimension_numbers = #tpu.dot_dimension_numbers<[1], [0], [0], [1], [0, 0, 1, 1], [], []>} : vector<24x128xbf16>, vector<128x128xbf16>, vector<24x128xf32> -> vector<24x128xf32>
    %89 = arith.addf %84, %88 : vector<24x128xf32>
    %c17 = arith.constant 17 : index
    %c0_52 = arith.constant 0 : index
    %90 = vector.load %arg5[%c17, %c0_52] : memref<51x128xbf16, #tpu.memory_space<vmem>>, vector<24x128xbf16>
    %c5 = arith.constant 5 : index
    %c0_53 = arith.constant 0 : index
    %c0_54 = arith.constant 0 : index
    %91 = vector.load %arg3[%c5, %c0_53, %c0_54] : memref<9x128x128xbf16, #tpu.memory_space<vmem>>, vector<1x128x128xbf16>
    %92 = vector.shape_cast %91 : vector<1x128x128xbf16> to vector<128x128xbf16>
    %cst_55 = arith.constant dense<0.000000e+00> : vector<24x128xf32>
    %93 = tpu.matmul %90, %92, %cst_55 {dimension_numbers = #tpu.dot_dimension_numbers<[1], [0], [0], [1], [0, 0, 1, 1], [], []>} : vector<24x128xbf16>, vector<128x128xbf16>, vector<24x128xf32> -> vector<24x128xf32>
    %94 = arith.addf %89, %93 : vector<24x128xf32>
    %c21 = arith.constant 21 : index
    %c0_56 = arith.constant 0 : index
    %95 = vector.load %arg5[%c21, %c0_56] : memref<51x128xbf16, #tpu.memory_space<vmem>>, vector<24x128xbf16>
    %c6_57 = arith.constant 6 : index
    %c0_58 = arith.constant 0 : index
    %c0_59 = arith.constant 0 : index
    %96 = vector.load %arg3[%c6_57, %c0_58, %c0_59] : memref<9x128x128xbf16, #tpu.memory_space<vmem>>, vector<1x128x128xbf16>
    %97 = vector.shape_cast %96 : vector<1x128x128xbf16> to vector<128x128xbf16>
    %cst_60 = arith.constant dense<0.000000e+00> : vector<24x128xf32>
    %98 = tpu.matmul %95, %97, %cst_60 {dimension_numbers = #tpu.dot_dimension_numbers<[1], [0], [0], [1], [0, 0, 1, 1], [], []>} : vector<24x128xbf16>, vector<128x128xbf16>, vector<24x128xf32> -> vector<24x128xf32>
    %99 = arith.addf %94, %98 : vector<24x128xf32>
    %c22 = arith.constant 22 : index
    %c0_61 = arith.constant 0 : index
    %100 = vector.load %arg5[%c22, %c0_61] : memref<51x128xbf16, #tpu.memory_space<vmem>>, vector<24x128xbf16>
    %c7 = arith.constant 7 : index
    %c0_62 = arith.constant 0 : index
    %c0_63 = arith.constant 0 : index
    %101 = vector.load %arg3[%c7, %c0_62, %c0_63] : memref<9x128x128xbf16, #tpu.memory_space<vmem>>, vector<1x128x128xbf16>
    %102 = vector.shape_cast %101 : vector<1x128x128xbf16> to vector<128x128xbf16>
    %cst_64 = arith.constant dense<0.000000e+00> : vector<24x128xf32>
    %103 = tpu.matmul %100, %102, %cst_64 {dimension_numbers = #tpu.dot_dimension_numbers<[1], [0], [0], [1], [0, 0, 1, 1], [], []>} : vector<24x128xbf16>, vector<128x128xbf16>, vector<24x128xf32> -> vector<24x128xf32>
    %104 = arith.addf %99, %103 : vector<24x128xf32>
    %c23 = arith.constant 23 : index
    %c0_65 = arith.constant 0 : index
    %105 = vector.load %arg5[%c23, %c0_65] : memref<51x128xbf16, #tpu.memory_space<vmem>>, vector<24x128xbf16>
    %c8 = arith.constant 8 : index
    %c0_66 = arith.constant 0 : index
    %c0_67 = arith.constant 0 : index
    %106 = vector.load %arg3[%c8, %c0_66, %c0_67] : memref<9x128x128xbf16, #tpu.memory_space<vmem>>, vector<1x128x128xbf16>
    %107 = vector.shape_cast %106 : vector<1x128x128xbf16> to vector<128x128xbf16>
    %cst_68 = arith.constant dense<0.000000e+00> : vector<24x128xf32>
    %108 = tpu.matmul %105, %107, %cst_68 {dimension_numbers = #tpu.dot_dimension_numbers<[1], [0], [0], [1], [0, 0, 1, 1], [], []>} : vector<24x128xbf16>, vector<128x128xbf16>, vector<24x128xf32> -> vector<24x128xf32>
    %109 = arith.addf %104, %108 : vector<24x128xf32>
    %110 = vector.broadcast %20 : vector<24x1xf32> to vector<24x128xf32>
    %111 = arith.mulf %109, %110 : vector<24x128xf32>
    %cst_69 = arith.constant dense<0.000000e+00> : vector<128xf32>
    %112 = vector.multi_reduction <add>, %111, %cst_69 [0] : vector<24x128xf32> to vector<128xf32>
    %113 = vector.shape_cast %112 : vector<128xf32> to vector<1x128xf32>
    %cst_70 = arith.constant 6.250000e-02 : f32
    %114 = vector.broadcast %cst_70 : f32 to vector<1x128xf32>
    %115 = arith.mulf %113, %114 : vector<1x128xf32>
    %116 = vector.broadcast %115 : vector<1x128xf32> to vector<24x128xf32>
    %117 = arith.subf %109, %116 : vector<24x128xf32>
    %118 = arith.mulf %117, %117 : vector<24x128xf32>
    %119 = vector.broadcast %20 : vector<24x1xf32> to vector<24x128xf32>
    %120 = arith.mulf %118, %119 : vector<24x128xf32>
    %cst_71 = arith.constant dense<0.000000e+00> : vector<128xf32>
    %121 = vector.multi_reduction <add>, %120, %cst_71 [0] : vector<24x128xf32> to vector<128xf32>
    %122 = vector.shape_cast %121 : vector<128xf32> to vector<1x128xf32>
    %cst_72 = arith.constant 6.250000e-02 : f32
    %123 = vector.broadcast %cst_72 : f32 to vector<1x128xf32>
    %124 = arith.mulf %122, %123 : vector<1x128xf32>
    %cst_73 = arith.constant 9.99999974E-6 : f32
    %125 = vector.broadcast %cst_73 : f32 to vector<1x128xf32>
    %126 = arith.addf %124, %125 : vector<1x128xf32>
    %127 = math.rsqrt %126 : vector<1x128xf32>
    %128 = vector.broadcast %127 : vector<1x128xf32> to vector<24x128xf32>
    %129 = arith.mulf %117, %128 : vector<24x128xf32>
    %c0_74 = arith.constant 0 : index
    %c7_75 = arith.constant 7 : index
    %c0_76 = arith.constant 0 : index
    %130 = vector.load %arg1[%c0_74, %c7_75, %c0_76] : memref<1x42x192xbf16, #tpu.memory_space<vmem>>, vector<1x24x192xbf16>
    %131 = vector.shape_cast %130 : vector<1x24x192xbf16> to vector<24x192xbf16>
    %132 = arith.extf %131 : vector<24x192xbf16> to vector<24x192xf32>
    %133 = vector.extract_strided_slice %132 {offsets = [0, 0], sizes = [24, 64], strides = [1, 1]} : vector<24x192xf32> to vector<24x64xf32>
    %cst_77 = arith.constant 0.000000e+00 : f32
    %134 = vector.broadcast %cst_77 : f32 to vector<24x64xf32>
    %135 = tpu.concatenate %133, %134 in 1 : vector<24x64xf32>, vector<24x64xf32> -> vector<24x128xf32>
    %136 = arith.addf %129, %135 : vector<24x128xf32>
    %137 = arith.truncf %136 : vector<24x128xf32> to vector<24x128xbf16>
    %c0_78 = arith.constant 0 : index
    %c0_79 = arith.constant 0 : index
    %c0_80 = arith.constant 0 : index
    %138 = vector.load %arg4[%c0_78, %c0_79, %c0_80] : memref<1x24x128xbf16, #tpu.memory_space<vmem>>, vector<1x24x128xbf16>
    %139 = vector.shape_cast %138 : vector<1x24x128xbf16> to vector<24x128xbf16>
    %140 = vector.shape_cast %137 : vector<24x128xbf16> to vector<1x24x128xbf16>
    tpu.vector_store %arg4[%c0_78, %c0_79, %c0_80], %140 {strides = array<i32>} : memref<1x24x128xbf16, #tpu.memory_space<vmem>>, vector<1x24x128xbf16>,
    return
  }
  func.func @transform_0(%arg0: i32) -> (i32, i32, i32) {
    %c0_i32 = arith.constant 0 : i32
    %c0_i32_0 = arith.constant 0 : i32
    %c0_i32_1 = arith.constant 0 : i32
    return %arg0, %c0_i32, %c0_i32_0 : i32, i32, i32
  }
  func.func @transform_1(%arg0: i32) -> (i32, i32, i32) {
    %c0_i32 = arith.constant 0 : i32
    %c0_i32_0 = arith.constant 0 : i32
    %c0_i32_1 = arith.constant 0 : i32
    %c0_i32_2 = arith.constant 0 : i32
    return %c0_i32, %c0_i32_0, %c0_i32_1 : i32, i32, i32
  }
  func.func @transform_2(%arg0: i32) -> (i32, i32, i32) {
    %c0_i32 = arith.constant 0 : i32
    %c0_i32_0 = arith.constant 0 : i32
    %c0_i32_1 = arith.constant 0 : i32
    %c0_i32_2 = arith.constant 0 : i32
    return %c0_i32, %c0_i32_0, %c0_i32_1 : i32, i32, i32
  }
  func.func @transform_3(%arg0: i32) -> (i32, i32, i32) {
    %c0_i32 = arith.constant 0 : i32
    %c0_i32_0 = arith.constant 0 : i32
    %c0_i32_1 = arith.constant 0 : i32
    return %arg0, %c0_i32, %c0_i32_0 : i32, i32, i32
  }
}

module attributes {stable_mosaic.version = 11 : i64} {
  func.func @_fused_conv_kernel(%arg0: i32, %arg1: memref<1x42x192xbf16, #tpu.memory_space<vmem>>, %arg2: memref<3x192x128xbf16, #tpu.memory_space<vmem>>, %arg3: memref<1x24x128xbf16, #tpu.memory_space<vmem>>) attributes {dimension_semantics = [#tpu.dimension_semantics<parallel>], iteration_bounds = array<i64: 2>, scalar_prefetch = 0 : i64, scratch_operands = 0 : i64, tpu.core_type = #tpu.core_type<tc>, window_params = [{transform_indices = @transform_0, window_bounds = array<i64: 1, 42, 192>}, {pipeline_mode = #tpu.pipeline_mode<synchronous>, transform_indices = @transform_1, window_bounds = array<i64: 3, 192, 128>}, {transform_indices = @transform_2, window_bounds = array<i64: 1, 24, 128>}]} {
    %c0 = arith.constant 0 : index
    %c0_0 = arith.constant 0 : index
    %c0_1 = arith.constant 0 : index
    %0 = vector.load %arg1[%c0, %c0_0, %c0_1] : memref<1x42x192xbf16, #tpu.memory_space<vmem>>, vector<1x24x192xbf16>
    %1 = vector.shape_cast %0 : vector<1x24x192xbf16> to vector<24x192xbf16>
    %c0_2 = arith.constant 0 : index
    %c0_3 = arith.constant 0 : index
    %c0_4 = arith.constant 0 : index
    %2 = vector.load %arg2[%c0_2, %c0_3, %c0_4] : memref<3x192x128xbf16, #tpu.memory_space<vmem>>, vector<1x192x128xbf16>
    %3 = vector.shape_cast %2 : vector<1x192x128xbf16> to vector<192x128xbf16>
    %cst = arith.constant dense<0.000000e+00> : vector<24x128xf32>
    %4 = tpu.matmul %1, %3, %cst {dimension_numbers = #tpu.dot_dimension_numbers<[1], [0], [0], [1], [0, 0, 1, 1], [], []>} : vector<24x192xbf16>, vector<192x128xbf16>, vector<24x128xf32> -> vector<24x128xf32>
    %c0_5 = arith.constant 0 : index
    %c6 = arith.constant 6 : index
    %c0_6 = arith.constant 0 : index
    %5 = vector.load %arg1[%c0_5, %c6, %c0_6] : memref<1x42x192xbf16, #tpu.memory_space<vmem>>, vector<1x24x192xbf16>
    %6 = vector.shape_cast %5 : vector<1x24x192xbf16> to vector<24x192xbf16>
    %c1 = arith.constant 1 : index
    %c0_7 = arith.constant 0 : index
    %c0_8 = arith.constant 0 : index
    %7 = vector.load %arg2[%c1, %c0_7, %c0_8] : memref<3x192x128xbf16, #tpu.memory_space<vmem>>, vector<1x192x128xbf16>
    %8 = vector.shape_cast %7 : vector<1x192x128xbf16> to vector<192x128xbf16>
    %cst_9 = arith.constant dense<0.000000e+00> : vector<24x128xf32>
    %9 = tpu.matmul %6, %8, %cst_9 {dimension_numbers = #tpu.dot_dimension_numbers<[1], [0], [0], [1], [0, 0, 1, 1], [], []>} : vector<24x192xbf16>, vector<192x128xbf16>, vector<24x128xf32> -> vector<24x128xf32>
    %10 = arith.addf %4, %9 : vector<24x128xf32>
    %c0_10 = arith.constant 0 : index
    %c12 = arith.constant 12 : index
    %c0_11 = arith.constant 0 : index
    %11 = vector.load %arg1[%c0_10, %c12, %c0_11] : memref<1x42x192xbf16, #tpu.memory_space<vmem>>, vector<1x24x192xbf16>
    %12 = vector.shape_cast %11 : vector<1x24x192xbf16> to vector<24x192xbf16>
    %c2 = arith.constant 2 : index
    %c0_12 = arith.constant 0 : index
    %c0_13 = arith.constant 0 : index
    %13 = vector.load %arg2[%c2, %c0_12, %c0_13] : memref<3x192x128xbf16, #tpu.memory_space<vmem>>, vector<1x192x128xbf16>
    %14 = vector.shape_cast %13 : vector<1x192x128xbf16> to vector<192x128xbf16>
    %cst_14 = arith.constant dense<0.000000e+00> : vector<24x128xf32>
    %15 = tpu.matmul %12, %14, %cst_14 {dimension_numbers = #tpu.dot_dimension_numbers<[1], [0], [0], [1], [0, 0, 1, 1], [], []>} : vector<24x192xbf16>, vector<192x128xbf16>, vector<24x128xf32> -> vector<24x128xf32>
    %16 = arith.addf %10, %15 : vector<24x128xf32>
    %17 = tpu.iota {dimensions = array<i32: 0>} : vector<24x1xi32>
    %c6_i32 = arith.constant 6 : i32
    %c0_i32 = arith.constant 0 : i32
    %18 = arith.cmpi eq, %c6_i32, %c0_i32 : i32
    %c1_i32 = arith.constant 1 : i32
    %19 = arith.select %18, %c1_i32, %c6_i32 : i32
    %20 = vector.broadcast %19 : i32 to vector<24x1xi32>
    %21 = arith.remsi %17, %20 : vector<24x1xi32>
    %c0_i32_15 = arith.constant 0 : i32
    %22 = vector.broadcast %c0_i32_15 : i32 to vector<24x1xi32>
    %23 = arith.cmpi ne, %21, %22 : vector<24x1xi32>
    %c0_i32_16 = arith.constant 0 : i32
    %24 = vector.broadcast %c0_i32_16 : i32 to vector<24x1xi32>
    %25 = arith.cmpi slt, %21, %24 : vector<24x1xi32>
    %c0_i32_17 = arith.constant 0 : i32
    %26 = arith.cmpi slt, %19, %c0_i32_17 : i32
    %27 = vector.broadcast %26 : i1 to vector<24x1xi1>
    %28 = vector.broadcast %27 : vector<24x1xi1> to vector<24x1xi1>
    %29 = arith.xori %25, %28 : vector<24x1xi1>
    %30 = arith.andi %29, %23 : vector<24x1xi1>
    %31 = vector.broadcast %19 : i32 to vector<24x1xi32>
    %32 = arith.addi %21, %31 : vector<24x1xi32>
    %33 = arith.select %30, %32, %21 : vector<24x1xi1>, vector<24x1xi32>
    %c4_i32 = arith.constant 4 : i32
    %34 = vector.broadcast %c4_i32 : i32 to vector<24x1xi32>
    %35 = arith.cmpi slt, %33, %34 : vector<24x1xi32>
    %36 = arith.extui %35 : vector<24x1xi1> to vector<24x1xi32>
    %37 = arith.sitofp %36 : vector<24x1xi32> to vector<24x1xf32>
    %38 = vector.broadcast %37 : vector<24x1xf32> to vector<24x128xf32>
    %39 = arith.mulf %16, %38 : vector<24x128xf32>
    %cst_18 = arith.constant dense<0.000000e+00> : vector<128xf32>
    %40 = vector.multi_reduction <add>, %39, %cst_18 [0] : vector<24x128xf32> to vector<128xf32>
    %41 = vector.shape_cast %40 : vector<128xf32> to vector<1x128xf32>
    %42 = vector.extract_strided_slice %41 {offsets = [0, 0], sizes = [1, 32], strides = [1, 1]} : vector<1x128xf32> to vector<1x32xf32>
    %43 = vector.extract_strided_slice %41 {offsets = [0, 32], sizes = [1, 32], strides = [1, 1]} : vector<1x128xf32> to vector<1x32xf32>
    %44 = arith.addf %42, %43 : vector<1x32xf32>
    %45 = vector.extract_strided_slice %41 {offsets = [0, 64], sizes = [1, 32], strides = [1, 1]} : vector<1x128xf32> to vector<1x32xf32>
    %46 = arith.addf %44, %45 : vector<1x32xf32>
    %47 = vector.extract_strided_slice %41 {offsets = [0, 96], sizes = [1, 32], strides = [1, 1]} : vector<1x128xf32> to vector<1x32xf32>
    %48 = arith.addf %46, %47 : vector<1x32xf32>
    %49 = tpu.concatenate %48, %48, %48, %48 in 1 : vector<1x32xf32>, vector<1x32xf32>, vector<1x32xf32>, vector<1x32xf32> -> vector<1x128xf32>
    %cst_19 = arith.constant 1.562500e-02 : f32
    %50 = vector.broadcast %cst_19 : f32 to vector<1x128xf32>
    %51 = arith.mulf %49, %50 : vector<1x128xf32>
    %52 = vector.broadcast %51 : vector<1x128xf32> to vector<24x128xf32>
    %53 = arith.subf %16, %52 : vector<24x128xf32>
    %54 = arith.mulf %53, %53 : vector<24x128xf32>
    %55 = vector.broadcast %37 : vector<24x1xf32> to vector<24x128xf32>
    %56 = arith.mulf %54, %55 : vector<24x128xf32>
    %cst_20 = arith.constant dense<0.000000e+00> : vector<128xf32>
    %57 = vector.multi_reduction <add>, %56, %cst_20 [0] : vector<24x128xf32> to vector<128xf32>
    %58 = vector.shape_cast %57 : vector<128xf32> to vector<1x128xf32>
    %59 = vector.extract_strided_slice %58 {offsets = [0, 0], sizes = [1, 32], strides = [1, 1]} : vector<1x128xf32> to vector<1x32xf32>
    %60 = vector.extract_strided_slice %58 {offsets = [0, 32], sizes = [1, 32], strides = [1, 1]} : vector<1x128xf32> to vector<1x32xf32>
    %61 = arith.addf %59, %60 : vector<1x32xf32>
    %62 = vector.extract_strided_slice %58 {offsets = [0, 64], sizes = [1, 32], strides = [1, 1]} : vector<1x128xf32> to vector<1x32xf32>
    %63 = arith.addf %61, %62 : vector<1x32xf32>
    %64 = vector.extract_strided_slice %58 {offsets = [0, 96], sizes = [1, 32], strides = [1, 1]} : vector<1x128xf32> to vector<1x32xf32>
    %65 = arith.addf %63, %64 : vector<1x32xf32>
    %66 = tpu.concatenate %65, %65, %65, %65 in 1 : vector<1x32xf32>, vector<1x32xf32>, vector<1x32xf32>, vector<1x32xf32> -> vector<1x128xf32>
    %cst_21 = arith.constant 1.562500e-02 : f32
    %67 = vector.broadcast %cst_21 : f32 to vector<1x128xf32>
    %68 = arith.mulf %66, %67 : vector<1x128xf32>
    %cst_22 = arith.constant 9.99999974E-6 : f32
    %69 = vector.broadcast %cst_22 : f32 to vector<1x128xf32>
    %70 = arith.addf %68, %69 : vector<1x128xf32>
    %71 = math.rsqrt %70 : vector<1x128xf32>
    %72 = vector.broadcast %71 : vector<1x128xf32> to vector<24x128xf32>
    %73 = arith.mulf %53, %72 : vector<24x128xf32>
    %cst_23 = arith.constant 0.000000e+00 : f32
    %74 = vector.broadcast %cst_23 : f32 to vector<24x128xf32>
    %75 = arith.maximumf %73, %74 : vector<24x128xf32>
    %76 = arith.truncf %75 : vector<24x128xf32> to vector<24x128xbf16>
    %c0_24 = arith.constant 0 : index
    %c0_25 = arith.constant 0 : index
    %c0_26 = arith.constant 0 : index
    %77 = vector.load %arg3[%c0_24, %c0_25, %c0_26] : memref<1x24x128xbf16, #tpu.memory_space<vmem>>, vector<1x24x128xbf16>
    %78 = vector.shape_cast %77 : vector<1x24x128xbf16> to vector<24x128xbf16>
    %79 = vector.shape_cast %76 : vector<24x128xbf16> to vector<1x24x128xbf16>
    tpu.vector_store %arg3[%c0_24, %c0_25, %c0_26], %79 {strides = array<i32>} : memref<1x24x128xbf16, #tpu.memory_space<vmem>>, vector<1x24x128xbf16>,
    return
  }
  func.func @transform_0(%arg0: i32) -> (i32, i32, i32) {
    %c0_i32 = arith.constant 0 : i32
    %c0_i32_0 = arith.constant 0 : i32
    %c0_i32_1 = arith.constant 0 : i32
    return %arg0, %c0_i32, %c0_i32_0 : i32, i32, i32
  }
  func.func @transform_1(%arg0: i32) -> (i32, i32, i32) {
    %c0_i32 = arith.constant 0 : i32
    %c0_i32_0 = arith.constant 0 : i32
    %c0_i32_1 = arith.constant 0 : i32
    %c0_i32_2 = arith.constant 0 : i32
    return %c0_i32, %c0_i32_0, %c0_i32_1 : i32, i32, i32
  }
  func.func @transform_2(%arg0: i32) -> (i32, i32, i32) {
    %c0_i32 = arith.constant 0 : i32
    %c0_i32_0 = arith.constant 0 : i32
    %c0_i32_1 = arith.constant 0 : i32
    return %arg0, %c0_i32, %c0_i32_0 : i32, i32, i32
  }
}

module attributes {stable_mosaic.version = 11 : i64} {
  func.func @_fused_conv_kernel(%arg0: i32, %arg1: memref<1x110x96xbf16, #tpu.memory_space<vmem>>, %arg2: memref<3x96x128xbf16, #tpu.memory_space<vmem>>, %arg3: memref<1x80x128xbf16, #tpu.memory_space<vmem>>) attributes {dimension_semantics = [#tpu.dimension_semantics<parallel>], iteration_bounds = array<i64: 2>, scalar_prefetch = 0 : i64, scratch_operands = 0 : i64, tpu.core_type = #tpu.core_type<tc>, window_params = [{transform_indices = @transform_0, window_bounds = array<i64: 1, 110, 96>}, {pipeline_mode = #tpu.pipeline_mode<synchronous>, transform_indices = @transform_1, window_bounds = array<i64: 3, 96, 128>}, {transform_indices = @transform_2, window_bounds = array<i64: 1, 80, 128>}]} {
    %c0 = arith.constant 0 : index
    %c0_0 = arith.constant 0 : index
    %c0_1 = arith.constant 0 : index
    %0 = vector.load %arg1[%c0, %c0_0, %c0_1] : memref<1x110x96xbf16, #tpu.memory_space<vmem>>, vector<1x80x96xbf16>
    %1 = vector.shape_cast %0 : vector<1x80x96xbf16> to vector<80x96xbf16>
    %c0_2 = arith.constant 0 : index
    %c0_3 = arith.constant 0 : index
    %c0_4 = arith.constant 0 : index
    %2 = vector.load %arg2[%c0_2, %c0_3, %c0_4] : memref<3x96x128xbf16, #tpu.memory_space<vmem>>, vector<1x96x128xbf16>
    %3 = vector.shape_cast %2 : vector<1x96x128xbf16> to vector<96x128xbf16>
    %cst = arith.constant dense<0.000000e+00> : vector<80x128xf32>
    %4 = tpu.matmul %1, %3, %cst {dimension_numbers = #tpu.dot_dimension_numbers<[1], [0], [0], [1], [0, 0, 1, 1], [], []>} : vector<80x96xbf16>, vector<96x128xbf16>, vector<80x128xf32> -> vector<80x128xf32>
    %c0_5 = arith.constant 0 : index
    %c10 = arith.constant 10 : index
    %c0_6 = arith.constant 0 : index
    %5 = vector.load %arg1[%c0_5, %c10, %c0_6] : memref<1x110x96xbf16, #tpu.memory_space<vmem>>, vector<1x80x96xbf16>
    %6 = vector.shape_cast %5 : vector<1x80x96xbf16> to vector<80x96xbf16>
    %c1 = arith.constant 1 : index
    %c0_7 = arith.constant 0 : index
    %c0_8 = arith.constant 0 : index
    %7 = vector.load %arg2[%c1, %c0_7, %c0_8] : memref<3x96x128xbf16, #tpu.memory_space<vmem>>, vector<1x96x128xbf16>
    %8 = vector.shape_cast %7 : vector<1x96x128xbf16> to vector<96x128xbf16>
    %cst_9 = arith.constant dense<0.000000e+00> : vector<80x128xf32>
    %9 = tpu.matmul %6, %8, %cst_9 {dimension_numbers = #tpu.dot_dimension_numbers<[1], [0], [0], [1], [0, 0, 1, 1], [], []>} : vector<80x96xbf16>, vector<96x128xbf16>, vector<80x128xf32> -> vector<80x128xf32>
    %10 = arith.addf %4, %9 : vector<80x128xf32>
    %c0_10 = arith.constant 0 : index
    %c20 = arith.constant 20 : index
    %c0_11 = arith.constant 0 : index
    %11 = vector.load %arg1[%c0_10, %c20, %c0_11] : memref<1x110x96xbf16, #tpu.memory_space<vmem>>, vector<1x80x96xbf16>
    %12 = vector.shape_cast %11 : vector<1x80x96xbf16> to vector<80x96xbf16>
    %c2 = arith.constant 2 : index
    %c0_12 = arith.constant 0 : index
    %c0_13 = arith.constant 0 : index
    %13 = vector.load %arg2[%c2, %c0_12, %c0_13] : memref<3x96x128xbf16, #tpu.memory_space<vmem>>, vector<1x96x128xbf16>
    %14 = vector.shape_cast %13 : vector<1x96x128xbf16> to vector<96x128xbf16>
    %cst_14 = arith.constant dense<0.000000e+00> : vector<80x128xf32>
    %15 = tpu.matmul %12, %14, %cst_14 {dimension_numbers = #tpu.dot_dimension_numbers<[1], [0], [0], [1], [0, 0, 1, 1], [], []>} : vector<80x96xbf16>, vector<96x128xbf16>, vector<80x128xf32> -> vector<80x128xf32>
    %16 = arith.addf %10, %15 : vector<80x128xf32>
    %17 = tpu.iota {dimensions = array<i32: 0>} : vector<80x1xi32>
    %c10_i32 = arith.constant 10 : i32
    %c0_i32 = arith.constant 0 : i32
    %18 = arith.cmpi eq, %c10_i32, %c0_i32 : i32
    %c1_i32 = arith.constant 1 : i32
    %19 = arith.select %18, %c1_i32, %c10_i32 : i32
    %20 = vector.broadcast %19 : i32 to vector<80x1xi32>
    %21 = arith.remsi %17, %20 : vector<80x1xi32>
    %c0_i32_15 = arith.constant 0 : i32
    %22 = vector.broadcast %c0_i32_15 : i32 to vector<80x1xi32>
    %23 = arith.cmpi ne, %21, %22 : vector<80x1xi32>
    %c0_i32_16 = arith.constant 0 : i32
    %24 = vector.broadcast %c0_i32_16 : i32 to vector<80x1xi32>
    %25 = arith.cmpi slt, %21, %24 : vector<80x1xi32>
    %c0_i32_17 = arith.constant 0 : i32
    %26 = arith.cmpi slt, %19, %c0_i32_17 : i32
    %27 = vector.broadcast %26 : i1 to vector<80x1xi1>
    %28 = vector.broadcast %27 : vector<80x1xi1> to vector<80x1xi1>
    %29 = arith.xori %25, %28 : vector<80x1xi1>
    %30 = arith.andi %29, %23 : vector<80x1xi1>
    %31 = vector.broadcast %19 : i32 to vector<80x1xi32>
    %32 = arith.addi %21, %31 : vector<80x1xi32>
    %33 = arith.select %30, %32, %21 : vector<80x1xi1>, vector<80x1xi32>
    %c8_i32 = arith.constant 8 : i32
    %34 = vector.broadcast %c8_i32 : i32 to vector<80x1xi32>
    %35 = arith.cmpi slt, %33, %34 : vector<80x1xi32>
    %36 = arith.extui %35 : vector<80x1xi1> to vector<80x1xi32>
    %37 = arith.sitofp %36 : vector<80x1xi32> to vector<80x1xf32>
    %38 = vector.broadcast %37 : vector<80x1xf32> to vector<80x128xf32>
    %39 = arith.mulf %16, %38 : vector<80x128xf32>
    %cst_18 = arith.constant dense<0.000000e+00> : vector<128xf32>
    %40 = vector.multi_reduction <add>, %39, %cst_18 [0] : vector<80x128xf32> to vector<128xf32>
    %41 = vector.shape_cast %40 : vector<128xf32> to vector<1x128xf32>
    %42 = vector.extract_strided_slice %41 {offsets = [0, 0], sizes = [1, 32], strides = [1, 1]} : vector<1x128xf32> to vector<1x32xf32>
    %43 = vector.extract_strided_slice %41 {offsets = [0, 32], sizes = [1, 32], strides = [1, 1]} : vector<1x128xf32> to vector<1x32xf32>
    %44 = arith.addf %42, %43 : vector<1x32xf32>
    %45 = vector.extract_strided_slice %41 {offsets = [0, 64], sizes = [1, 32], strides = [1, 1]} : vector<1x128xf32> to vector<1x32xf32>
    %46 = arith.addf %44, %45 : vector<1x32xf32>
    %47 = vector.extract_strided_slice %41 {offsets = [0, 96], sizes = [1, 32], strides = [1, 1]} : vector<1x128xf32> to vector<1x32xf32>
    %48 = arith.addf %46, %47 : vector<1x32xf32>
    %49 = tpu.concatenate %48, %48, %48, %48 in 1 : vector<1x32xf32>, vector<1x32xf32>, vector<1x32xf32>, vector<1x32xf32> -> vector<1x128xf32>
    %cst_19 = arith.constant 3.906250e-03 : f32
    %50 = vector.broadcast %cst_19 : f32 to vector<1x128xf32>
    %51 = arith.mulf %49, %50 : vector<1x128xf32>
    %52 = vector.broadcast %51 : vector<1x128xf32> to vector<80x128xf32>
    %53 = arith.subf %16, %52 : vector<80x128xf32>
    %54 = arith.mulf %53, %53 : vector<80x128xf32>
    %55 = vector.broadcast %37 : vector<80x1xf32> to vector<80x128xf32>
    %56 = arith.mulf %54, %55 : vector<80x128xf32>
    %cst_20 = arith.constant dense<0.000000e+00> : vector<128xf32>
    %57 = vector.multi_reduction <add>, %56, %cst_20 [0] : vector<80x128xf32> to vector<128xf32>
    %58 = vector.shape_cast %57 : vector<128xf32> to vector<1x128xf32>
    %59 = vector.extract_strided_slice %58 {offsets = [0, 0], sizes = [1, 32], strides = [1, 1]} : vector<1x128xf32> to vector<1x32xf32>
    %60 = vector.extract_strided_slice %58 {offsets = [0, 32], sizes = [1, 32], strides = [1, 1]} : vector<1x128xf32> to vector<1x32xf32>
    %61 = arith.addf %59, %60 : vector<1x32xf32>
    %62 = vector.extract_strided_slice %58 {offsets = [0, 64], sizes = [1, 32], strides = [1, 1]} : vector<1x128xf32> to vector<1x32xf32>
    %63 = arith.addf %61, %62 : vector<1x32xf32>
    %64 = vector.extract_strided_slice %58 {offsets = [0, 96], sizes = [1, 32], strides = [1, 1]} : vector<1x128xf32> to vector<1x32xf32>
    %65 = arith.addf %63, %64 : vector<1x32xf32>
    %66 = tpu.concatenate %65, %65, %65, %65 in 1 : vector<1x32xf32>, vector<1x32xf32>, vector<1x32xf32>, vector<1x32xf32> -> vector<1x128xf32>
    %cst_21 = arith.constant 3.906250e-03 : f32
    %67 = vector.broadcast %cst_21 : f32 to vector<1x128xf32>
    %68 = arith.mulf %66, %67 : vector<1x128xf32>
    %cst_22 = arith.constant 9.99999974E-6 : f32
    %69 = vector.broadcast %cst_22 : f32 to vector<1x128xf32>
    %70 = arith.addf %68, %69 : vector<1x128xf32>
    %71 = math.rsqrt %70 : vector<1x128xf32>
    %72 = vector.broadcast %71 : vector<1x128xf32> to vector<80x128xf32>
    %73 = arith.mulf %53, %72 : vector<80x128xf32>
    %cst_23 = arith.constant 0.000000e+00 : f32
    %74 = vector.broadcast %cst_23 : f32 to vector<80x128xf32>
    %75 = arith.maximumf %73, %74 : vector<80x128xf32>
    %76 = arith.truncf %75 : vector<80x128xf32> to vector<80x128xbf16>
    %c0_24 = arith.constant 0 : index
    %c0_25 = arith.constant 0 : index
    %c0_26 = arith.constant 0 : index
    %77 = vector.load %arg3[%c0_24, %c0_25, %c0_26] : memref<1x80x128xbf16, #tpu.memory_space<vmem>>, vector<1x80x128xbf16>
    %78 = vector.shape_cast %77 : vector<1x80x128xbf16> to vector<80x128xbf16>
    %79 = vector.shape_cast %76 : vector<80x128xbf16> to vector<1x80x128xbf16>
    tpu.vector_store %arg3[%c0_24, %c0_25, %c0_26], %79 {strides = array<i32>} : memref<1x80x128xbf16, #tpu.memory_space<vmem>>, vector<1x80x128xbf16>,
    return
  }
  func.func @transform_0(%arg0: i32) -> (i32, i32, i32) {
    %c0_i32 = arith.constant 0 : i32
    %c0_i32_0 = arith.constant 0 : i32
    %c0_i32_1 = arith.constant 0 : i32
    return %arg0, %c0_i32, %c0_i32_0 : i32, i32, i32
  }
  func.func @transform_1(%arg0: i32) -> (i32, i32, i32) {
    %c0_i32 = arith.constant 0 : i32
    %c0_i32_0 = arith.constant 0 : i32
    %c0_i32_1 = arith.constant 0 : i32
    %c0_i32_2 = arith.constant 0 : i32
    return %c0_i32, %c0_i32_0, %c0_i32_1 : i32, i32, i32
  }
  func.func @transform_2(%arg0: i32) -> (i32, i32, i32) {
    %c0_i32 = arith.constant 0 : i32
    %c0_i32_0 = arith.constant 0 : i32
    %c0_i32_1 = arith.constant 0 : i32
    return %arg0, %c0_i32, %c0_i32_0 : i32, i32, i32
  }
}

module attributes {stable_mosaic.version = 11 : i64} {
  func.func @_fused_conv_kernel(%arg0: i32, %arg1: memref<1x506x112xbf16, #tpu.memory_space<vmem>>, %arg2: memref<7x112x128xbf16, #tpu.memory_space<vmem>>, %arg3: memref<1x352x128xf32, #tpu.memory_space<vmem>>) attributes {dimension_semantics = [#tpu.dimension_semantics<parallel>], iteration_bounds = array<i64: 2>, scalar_prefetch = 0 : i64, scratch_operands = 0 : i64, tpu.core_type = #tpu.core_type<tc>, window_params = [{transform_indices = @transform_0, window_bounds = array<i64: 1, 506, 112>}, {pipeline_mode = #tpu.pipeline_mode<synchronous>, transform_indices = @transform_1, window_bounds = array<i64: 7, 112, 128>}, {transform_indices = @transform_2, window_bounds = array<i64: 1, 352, 128>}]} {
    %c0 = arith.constant 0 : index
    %c0_0 = arith.constant 0 : index
    %c0_1 = arith.constant 0 : index
    %0 = vector.load %arg1[%c0, %c0_0, %c0_1] : memref<1x506x112xbf16, #tpu.memory_space<vmem>>, vector<1x352x112xbf16>
    %1 = vector.shape_cast %0 : vector<1x352x112xbf16> to vector<352x112xbf16>
    %c0_2 = arith.constant 0 : index
    %c0_3 = arith.constant 0 : index
    %c0_4 = arith.constant 0 : index
    %2 = vector.load %arg2[%c0_2, %c0_3, %c0_4] : memref<7x112x128xbf16, #tpu.memory_space<vmem>>, vector<1x112x128xbf16>
    %3 = vector.shape_cast %2 : vector<1x112x128xbf16> to vector<112x128xbf16>
    %cst = arith.constant dense<0.000000e+00> : vector<352x128xf32>
    %4 = tpu.matmul %1, %3, %cst {dimension_numbers = #tpu.dot_dimension_numbers<[1], [0], [0], [1], [0, 0, 1, 1], [], []>} : vector<352x112xbf16>, vector<112x128xbf16>, vector<352x128xf32> -> vector<352x128xf32>
    %c0_5 = arith.constant 0 : index
    %c22 = arith.constant 22 : index
    %c0_6 = arith.constant 0 : index
    %5 = vector.load %arg1[%c0_5, %c22, %c0_6] : memref<1x506x112xbf16, #tpu.memory_space<vmem>>, vector<1x352x112xbf16>
    %6 = vector.shape_cast %5 : vector<1x352x112xbf16> to vector<352x112xbf16>
    %c1 = arith.constant 1 : index
    %c0_7 = arith.constant 0 : index
    %c0_8 = arith.constant 0 : index
    %7 = vector.load %arg2[%c1, %c0_7, %c0_8] : memref<7x112x128xbf16, #tpu.memory_space<vmem>>, vector<1x112x128xbf16>
    %8 = vector.shape_cast %7 : vector<1x112x128xbf16> to vector<112x128xbf16>
    %cst_9 = arith.constant dense<0.000000e+00> : vector<352x128xf32>
    %9 = tpu.matmul %6, %8, %cst_9 {dimension_numbers = #tpu.dot_dimension_numbers<[1], [0], [0], [1], [0, 0, 1, 1], [], []>} : vector<352x112xbf16>, vector<112x128xbf16>, vector<352x128xf32> -> vector<352x128xf32>
    %10 = arith.addf %4, %9 : vector<352x128xf32>
    %c0_10 = arith.constant 0 : index
    %c44 = arith.constant 44 : index
    %c0_11 = arith.constant 0 : index
    %11 = vector.load %arg1[%c0_10, %c44, %c0_11] : memref<1x506x112xbf16, #tpu.memory_space<vmem>>, vector<1x352x112xbf16>
    %12 = vector.shape_cast %11 : vector<1x352x112xbf16> to vector<352x112xbf16>
    %c2 = arith.constant 2 : index
    %c0_12 = arith.constant 0 : index
    %c0_13 = arith.constant 0 : index
    %13 = vector.load %arg2[%c2, %c0_12, %c0_13] : memref<7x112x128xbf16, #tpu.memory_space<vmem>>, vector<1x112x128xbf16>
    %14 = vector.shape_cast %13 : vector<1x112x128xbf16> to vector<112x128xbf16>
    %cst_14 = arith.constant dense<0.000000e+00> : vector<352x128xf32>
    %15 = tpu.matmul %12, %14, %cst_14 {dimension_numbers = #tpu.dot_dimension_numbers<[1], [0], [0], [1], [0, 0, 1, 1], [], []>} : vector<352x112xbf16>, vector<112x128xbf16>, vector<352x128xf32> -> vector<352x128xf32>
    %16 = arith.addf %10, %15 : vector<352x128xf32>
    %c0_15 = arith.constant 0 : index
    %c66 = arith.constant 66 : index
    %c0_16 = arith.constant 0 : index
    %17 = vector.load %arg1[%c0_15, %c66, %c0_16] : memref<1x506x112xbf16, #tpu.memory_space<vmem>>, vector<1x352x112xbf16>
    %18 = vector.shape_cast %17 : vector<1x352x112xbf16> to vector<352x112xbf16>
    %c3 = arith.constant 3 : index
    %c0_17 = arith.constant 0 : index
    %c0_18 = arith.constant 0 : index
    %19 = vector.load %arg2[%c3, %c0_17, %c0_18] : memref<7x112x128xbf16, #tpu.memory_space<vmem>>, vector<1x112x128xbf16>
    %20 = vector.shape_cast %19 : vector<1x112x128xbf16> to vector<112x128xbf16>
    %cst_19 = arith.constant dense<0.000000e+00> : vector<352x128xf32>
    %21 = tpu.matmul %18, %20, %cst_19 {dimension_numbers = #tpu.dot_dimension_numbers<[1], [0], [0], [1], [0, 0, 1, 1], [], []>} : vector<352x112xbf16>, vector<112x128xbf16>, vector<352x128xf32> -> vector<352x128xf32>
    %22 = arith.addf %16, %21 : vector<352x128xf32>
    %c0_20 = arith.constant 0 : index
    %c88 = arith.constant 88 : index
    %c0_21 = arith.constant 0 : index
    %23 = vector.load %arg1[%c0_20, %c88, %c0_21] : memref<1x506x112xbf16, #tpu.memory_space<vmem>>, vector<1x352x112xbf16>
    %24 = vector.shape_cast %23 : vector<1x352x112xbf16> to vector<352x112xbf16>
    %c4 = arith.constant 4 : index
    %c0_22 = arith.constant 0 : index
    %c0_23 = arith.constant 0 : index
    %25 = vector.load %arg2[%c4, %c0_22, %c0_23] : memref<7x112x128xbf16, #tpu.memory_space<vmem>>, vector<1x112x128xbf16>
    %26 = vector.shape_cast %25 : vector<1x112x128xbf16> to vector<112x128xbf16>
    %cst_24 = arith.constant dense<0.000000e+00> : vector<352x128xf32>
    %27 = tpu.matmul %24, %26, %cst_24 {dimension_numbers = #tpu.dot_dimension_numbers<[1], [0], [0], [1], [0, 0, 1, 1], [], []>} : vector<352x112xbf16>, vector<112x128xbf16>, vector<352x128xf32> -> vector<352x128xf32>
    %28 = arith.addf %22, %27 : vector<352x128xf32>
    %c0_25 = arith.constant 0 : index
    %c110 = arith.constant 110 : index
    %c0_26 = arith.constant 0 : index
    %29 = vector.load %arg1[%c0_25, %c110, %c0_26] : memref<1x506x112xbf16, #tpu.memory_space<vmem>>, vector<1x352x112xbf16>
    %30 = vector.shape_cast %29 : vector<1x352x112xbf16> to vector<352x112xbf16>
    %c5 = arith.constant 5 : index
    %c0_27 = arith.constant 0 : index
    %c0_28 = arith.constant 0 : index
    %31 = vector.load %arg2[%c5, %c0_27, %c0_28] : memref<7x112x128xbf16, #tpu.memory_space<vmem>>, vector<1x112x128xbf16>
    %32 = vector.shape_cast %31 : vector<1x112x128xbf16> to vector<112x128xbf16>
    %cst_29 = arith.constant dense<0.000000e+00> : vector<352x128xf32>
    %33 = tpu.matmul %30, %32, %cst_29 {dimension_numbers = #tpu.dot_dimension_numbers<[1], [0], [0], [1], [0, 0, 1, 1], [], []>} : vector<352x112xbf16>, vector<112x128xbf16>, vector<352x128xf32> -> vector<352x128xf32>
    %34 = arith.addf %28, %33 : vector<352x128xf32>
    %c0_30 = arith.constant 0 : index
    %c132 = arith.constant 132 : index
    %c0_31 = arith.constant 0 : index
    %35 = vector.load %arg1[%c0_30, %c132, %c0_31] : memref<1x506x112xbf16, #tpu.memory_space<vmem>>, vector<1x352x112xbf16>
    %36 = vector.shape_cast %35 : vector<1x352x112xbf16> to vector<352x112xbf16>
    %c6 = arith.constant 6 : index
    %c0_32 = arith.constant 0 : index
    %c0_33 = arith.constant 0 : index
    %37 = vector.load %arg2[%c6, %c0_32, %c0_33] : memref<7x112x128xbf16, #tpu.memory_space<vmem>>, vector<1x112x128xbf16>
    %38 = vector.shape_cast %37 : vector<1x112x128xbf16> to vector<112x128xbf16>
    %cst_34 = arith.constant dense<0.000000e+00> : vector<352x128xf32>
    %39 = tpu.matmul %36, %38, %cst_34 {dimension_numbers = #tpu.dot_dimension_numbers<[1], [0], [0], [1], [0, 0, 1, 1], [], []>} : vector<352x112xbf16>, vector<112x128xbf16>, vector<352x128xf32> -> vector<352x128xf32>
    %40 = arith.addf %34, %39 : vector<352x128xf32>
    %41 = tpu.iota {dimensions = array<i32: 1>} : vector<352x128xi32>
    %c1_i32 = arith.constant 1 : i32
    %42 = vector.broadcast %c1_i32 : i32 to vector<352x128xi32>
    %43 = arith.cmpi slt, %41, %42 : vector<352x128xi32>
    %44 = arith.negf %40 : vector<352x128xf32>
    %45 = math.exp %44 : vector<352x128xf32>
    %cst_35 = arith.constant 1.000000e+00 : f32
    %46 = vector.broadcast %cst_35 : f32 to vector<352x128xf32>
    %47 = arith.addf %46, %45 : vector<352x128xf32>
    %48 = arith.divf %46, %47 : vector<352x128xf32>
    %49 = math.tanh %40 : vector<352x128xf32>
    %50 = arith.select %43, %48, %49 : vector<352x128xi1>, vector<352x128xf32>
    %c0_36 = arith.constant 0 : index
    %c0_37 = arith.constant 0 : index
    %c0_38 = arith.constant 0 : index
    %51 = vector.load %arg3[%c0_36, %c0_37, %c0_38] : memref<1x352x128xf32, #tpu.memory_space<vmem>>, vector<1x352x128xf32>
    %52 = vector.shape_cast %51 : vector<1x352x128xf32> to vector<352x128xf32>
    %53 = vector.shape_cast %50 : vector<352x128xf32> to vector<1x352x128xf32>
    tpu.vector_store %arg3[%c0_36, %c0_37, %c0_38], %53 {strides = array<i32>} : memref<1x352x128xf32, #tpu.memory_space<vmem>>, vector<1x352x128xf32>,
    return
  }
  func.func @transform_0(%arg0: i32) -> (i32, i32, i32) {
    %c0_i32 = arith.constant 0 : i32
    %c0_i32_0 = arith.constant 0 : i32
    %c0_i32_1 = arith.constant 0 : i32
    return %arg0, %c0_i32, %c0_i32_0 : i32, i32, i32
  }
  func.func @transform_1(%arg0: i32) -> (i32, i32, i32) {
    %c0_i32 = arith.constant 0 : i32
    %c0_i32_0 = arith.constant 0 : i32
    %c0_i32_1 = arith.constant 0 : i32
    %c0_i32_2 = arith.constant 0 : i32
    return %c0_i32, %c0_i32_0, %c0_i32_1 : i32, i32, i32
  }
  func.func @transform_2(%arg0: i32) -> (i32, i32, i32) {
    %c0_i32 = arith.constant 0 : i32
    %c0_i32_0 = arith.constant 0 : i32
    %c0_i32_1 = arith.constant 0 : i32
    return %arg0, %c0_i32, %c0_i32_0 : i32, i32, i32
  }
}

</mosaic_0001>

<bundles_post_ra>
// kernel: generator_forward.9
= control target key start
LH: loop header
LB: loop body
LE: loop exit
PB: predicated region body
PF: predicated region fallthrough
CT: control target
= control target key end

     0   :  { %s1170_s9 = smov 0   ;;  %s1460_s0 = inlined_call_operand.vmem [shape: bf16[2,90,128], index: 0, kind: input, shape index: {}]   ;;  %s1461_s1 = inlined_call_operand.vmem [shape: bf16[2,128,128], index: 1, kind: input, shape index: {}]   ;;  %s1462_s2 = inlined_call_operand.vmem [shape: bf16[2,72,128], index: 2, kind: output, shape index: {}]  }
   0x1 LB: > { %s879_s10 = sadd.s32 4294967295, %s1151_s9   ;;  %p883_p0 = scmp.ge.s32.totalorder %s1151_s9, 1  ;;  %s1151_s9 = sphi %s1170_s9, %s12_s9  }
   0x2   : > { %p112_p1 = scmp.lt.s32.totalorder %s1151_s9, 3 }
   0x4   : > { %p113_p2 = pnand %p883_p0, %p112_p1 }
   0x5   : > { %v1117_v0 = vld [vmem:[%s1461_s1 + $0x40] sm:$0xff] (!%p113_p2)   ;;  %v1153_v1 = vmov (!%p113_p2), 0.0   ;;  %v1119_v3 = vld [vmem:[%s1461_s1 + $0x48] sm:$0xff] (!%p113_p2)   ;;  %vm1154_vm0 = vmmov (!%p113_p2), 0   ;;  %p134_p3 = scmp.lt.s32.totalorder (!%p113_p2), %s879_s10, 1  ;;  %v1121_v5 = vld [vmem:[%s1461_s1 + $0x50] sm:$0xff] (!%p113_p2)   ;;  %v511_v60 = vlaneseq (!%p113_p2) }
   0x6   : > { %116 = sbr.rel (%p113_p2) target bundleno = 361 (0x169), region = 28  ;;  %1006 = vmatprep.subr.bf16.mxu1 (!%p113_p2), %v1153_v1  ;;  %1042 = vmatprep.subr.bf16.mxu0 (!%p113_p2), %v1153_v1  ;;  %v1118_v2 = vld [vmem:[%s1461_s1] sm:$0xff] (!%p113_p2)   ;;  %v1120_v4 = vld [vmem:[%s1461_s1 + $0x8] sm:$0xff] (!%p113_p2)   ;;  %v1122_v6 = vld [vmem:[%s1461_s1 + $0x10] sm:$0xff] (!%p113_p2)   ;;  %vm214_vm1 = vsmask.f32 (!%p113_p2), 7424 }
   0x7   : > { %1007 = vmatpush3.bf16.msra.mxu1 (!%p113_p2), %v1117_v0  ;;  %1022 = vmatprep.mubr.msk.bf16.mxu1 (!%p113_p2), %vm1154_vm0, %v1153_v1  ;;  %v1123_v7 = vld [vmem:[%s1461_s1 + $0x58] sm:$0xff] (!%p113_p2)   ;;  %v1125_v9 = vld [vmem:[%s1461_s1 + $0x60] sm:$0xff] (!%p113_p2)   ;;  %v1127_v16 = vld [vmem:[%s1461_s1 + $0x68] sm:$0xff] (!%p113_p2)   ;;  %v512_v61 = vshrl.u32 (!%p113_p2), %v511_v60, 7 }
   0x8   : > { %1043 = vmatpush3.bf16.msra.mxu0 (!%p113_p2), %v1118_v2  ;;  %1008 = vmatprep.subr.bf16.mxu1 (!%p113_p2), %v1153_v1  ;;  %v1124_v8 = vld [vmem:[%s1461_s1 + $0x18] sm:$0xff] (!%p113_p2)   ;;  %v1126_v10 = vld [vmem:[%s1461_s1 + $0x20] sm:$0xff] (!%p113_p2)   ;;  %v1128_v18 = vld [vmem:[%s1461_s1 + $0x28] sm:$0xff] (!%p113_p2)  }
   0x9   : > { %1044 = vmatprep.subr.bf16.mxu0 (!%p113_p2), %v1153_v1  ;;  %1058 = vmatprep.mubr.msk.bf16.mxu0 (!%p113_p2), %vm1154_vm0, %v1153_v1  ;;  %v1129_v20 = vld [vmem:[%s1461_s1 + $0x70] sm:$0xff] (!%p113_p2)   ;;  %v1131_v27 = vld [vmem:[%s1461_s1 + $0x78] sm:$0xff] (!%p113_p2)   ;;  %v513_v62 = vadd.s32 (!%p113_p2), 8, %v512_v61  ;;  %v1288_v63 = vmul.u32.u64.low (!%p113_p2), 3817748708, %v512_v61  ;;  %v1289_v0 = vmul.u32.u64.high 3817748708, %v512_v61, %v1288_v63 }
   0xa   : > { %v1130_v24 = vld [vmem:[%s1461_s1 + $0x30] sm:$0xff] (!%p113_p2)   ;;  %v1132_v31 = vld [vmem:[%s1461_s1 + $0x38] sm:$0xff] (!%p113_p2)  }
   0xb   : > { %1009 = vmatpush3.bf16.msra.mxu1 (!%p113_p2), %v1119_v3  ;;  %v1291_v2 = vmul.u32.u64.low (!%p113_p2), 3817748708, %v513_v62  ;;  %v1292_v3 = vmul.u32.u64.high 3817748708, %v513_v62, %v1291_v2 }
   0xc   : > { %1045 = vmatpush3.bf16.msra.mxu0 (!%p113_p2), %v1120_v4  ;;  %1010 = vmatprep.subr.bf16.mxu1 (!%p113_p2), %v1153_v1  ;;  %v514_v4 = vadd.s32 (!%p113_p2), 16, %v512_v61 }
   0xd   : > { %s1484_s10 = smov (!%p134_p3, %s879_s10), 1  ;;  %1046 = vmatprep.subr.bf16.mxu0 %v1153_v1 }
   0xe   : > { %s1087_s23 = smul.u32 48, %s1484_s10 }
   0xf   : > { %1011 = vmatpush3.bf16.msra.mxu1 %v1121_v5  ;;  %v515_v5 = vadd.s32 24, %v512_v61  ;;  %s1088_s21 = smul.u32 36, %s1484_s10 }
  0x10   : > { %1047 = vmatpush3.bf16.msra.mxu0 %v1122_v6  ;;  %1012 = vmatprep.subr.bf16.mxu1 %v1153_v1  ;;  %s1220_s30 = scalar_lea.vmem %s1460_s0, %s1087_s23  ;;  %v527_v6 = vshrl.u32 %v1289_v0, 3 }
  0x11   : > { %1048 = vmatprep.subr.bf16.mxu0 %v1153_v1  ;;  %v146_v11 = vld [vmem:[%s1220_s30 + $0x4] sm:$0xf]  ;;  %v147_v12 = vld [vmem:[%s1220_s30 + $0x8] sm:$0xf]  ;;  %v148_v13 = vld [vmem:[%s1220_s30 + $0xc] sm:$0xf]  ;;  %s143_s24 = scalar_lea.vmem %s1462_s2, %s1088_s21 }
  0x12   : > { %v1234_v14 = vld [vmem:[%s1220_s30 + $0x10] sm:$0xf]  ;;  %v902_v15 = vcombine.low %v146_v11, %v147_v12  ;;  %v150_v25 = vld [vmem:[%s1220_s30 + $0x14] sm:$0xf]  ;;  %v151_v26 = vld [vmem:[%s1220_s30 + $0x18] sm:$0xf]  ;;  %v916_v43 = vcombine.low %v147_v12, %v148_v13 }
  0x13   : > { %1013 = vmatpush3.bf16.msra.mxu1 %v1123_v7  ;;  %v903_v17 = vcombine.low %v148_v13, %v1234_v14  ;;  %v904_v30 = vcombine.low %v150_v25, %v151_v26  ;;  %v145_v32 = vld [vmem:[%s1220_s30] sm:$0xf]  ;;  %v152_v37 = vld [vmem:[%s1220_s30 + $0x1c] sm:$0xf]  ;;  %v1140_v48 = vld [vmem:[%s1220_s30 + $0x24] sm:$0x1f]   ;;  %v917_v50 = vcombine.low %v1234_v14, %v150_v25 }
  0x14   : > { %1049 = vmatpush3.bf16.msra.mxu0 %v1124_v8  ;;  %1014 = vmatprep.subr.bf16.mxu1 %v1153_v1  ;;  %v218_v19 = vshll.u32 %v902_v15, 16  ;;  %v216_v21 = vshrl.u32 %v902_v15, 16  ;;  %v915_v34 = vcombine.low %v145_v32, %v146_v11  ;;  %v153_v38 = vld [vmem:[%s1220_s30 + $0x20] sm:$0xf]  ;;  %v247_v52 = vshll.u32 %v1140_v48, 16 }
  0x15   : > { %1050 = vmatprep.subr.bf16.mxu0 %v1153_v1  ;;  %v223_v23 = vshll.u32 %v903_v17, 16  ;;  %v227_v35 = vshrl.u32 %v903_v17, 16  ;;  %v231_v36 = vshll.u32 %v904_v30, 16  ;;  %v905_v41 = vcombine.low %v152_v37, %v153_v38 }
  0x16   : > { %v220_v22 = vrot.slane %v218_v19, 1  ;;  %v235_v44 = vshrl.u32 %v904_v30, 16  ;;  %v249_v54 = vrot.slane %v247_v52, 1  ;;  %v918_v56 = vcombine.low %v151_v26, %v152_v37 }
  0x17   : > { %1015 = vmatpush3.bf16.msra.mxu1 %v1125_v9  ;;  %v225_v29 = vrot.slane %v223_v23, 1  ;;  %v233_v40 = vrot.slane %v231_v36, 1  ;;  %v239_v45 = vshll.u32 %v905_v41, 16  ;;  %v243_v51 = vshrl.u32 %v905_v41, 16 }
  0x18   : > { %1051 = vmatpush3.bf16.msra.mxu0 %v1126_v10  ;;  %1016 = vmatprep.subr.bf16.mxu1 %v1153_v1  ;;  %v221_v28 = vor.u32 %v220_v22, %v216_v21  ;;  %v251_v57 = vshrl.u32 %v1140_v48, 16  ;;  %v919_v59 = vcombine.low %v153_v38, %v153_v38  ;;  %v538_v9 = vshrl.u32 %v1292_v3, 3 }
  0x19   : > { %1052 = vmatprep.subr.bf16.mxu0 %v1153_v1  ;;  %v229_v39 = vor.u32 %v227_v35, %v225_v29  ;;  %v237_v46 = vor.u32 %v235_v44, %v233_v40  ;;  %v241_v47 = vrot.slane %v239_v45, 1  ;;  %v528_v12 = vmul.u32 9, %v527_v6 }
  0x1a   : > { %v226_v33 = vsel %vm214_vm1, %v221_v28, %v225_v29  ;;  %v253_v58 = vor.u32 %v251_v57, %v249_v54  ;;  %v1295_v7 = vmul.u32.u64.low 3817748708, %v514_v4  ;;  %v1296_v8 = vmul.u32.u64.high 3817748708, %v514_v4, %v1295_v7 }
  0x1b   : > { %1017 = vmatpush3.bf16.msra.mxu1 %v1127_v16  ;;  %v234_v42 = vsel %vm214_vm1, %v229_v39, %v233_v40  ;;  %v242_v49 = vsel %vm214_vm1, %v237_v46, %v241_v47  ;;  %v245_v53 = vor.u32 %v243_v51, %v241_v47  ;;  %v516_v13 = vadd.s32 32, %v512_v61 }
  0x1c   : > { %1053 = vmatpush3.bf16.msra.mxu0 %v1128_v18  ;;  %1018 = vmatprep.subr.bf16.mxu1 %v1153_v1  ;;  %v1299_v10 = vmul.u32.u64.low 3817748708, %v515_v5  ;;  %v1300_v11 = vmul.u32.u64.high 3817748708, %v515_v5, %v1299_v10  ;;  %v539_v14 = vmul.u32 9, %v538_v9  ;;  %v517_v15 = vadd.s32 40, %v512_v61 }
  0x1d   : > { %1054 = vmatprep.subr.bf16.mxu0 %v1153_v1  ;;  %v250_v55 = vsel %vm214_vm1, %v245_v53, %v249_v54  ;;  %v529_v16 = vsub.s32 %v512_v61, %v528_v12  ;;  %v549_v17 = vshrl.u32 %v1296_v8, 3  ;;  %v1310_v25 = vadd.s32 48, %v512_v61 }
  0x1e   : > { %v1303_v18 = vmul.u32.u64.low 3817748708, %v516_v13  ;;  %v1304_v19 = vmul.u32.u64.high 3817748708, %v516_v13, %v1303_v18  ;;  %v560_v21 = vshrl.u32 %v1300_v11, 3  ;;  %v1316_v29 = vadd.s32 56, %v512_v61 }
  0x1f   : > { %1019 = vmatpush3.bf16.msra.mxu1 %v1129_v20  ;;  %v540_v20 = vsub.s32 %v513_v62, %v539_v14  ;;  %v1307_v22 = vmul.u32.u64.low 3817748708, %v517_v15  ;;  %v1308_v23 = vmul.u32.u64.high 3817748708, %v517_v15, %v1307_v22  ;;  %vm620_vm2 = vcmp.ne.s32.totalorder %v529_v16, 0 }
  0x20   : > { %1055 = vmatpush3.bf16.msra.mxu0 %v1130_v24  ;;  %1020 = vmatprep.subr.bf16.mxu1 %v1153_v1  ;;  %vm629_vm3 = vcmp.lt.s32.totalorder %v529_v16, 0  ;;  %v550_v24 = vmul.u32 9, %v549_v17  ;;  %v647_v26 = vadd.s32 9, %v529_v16  ;;  %v561_v28 = vmul.u32 9, %v560_v21 }
  0x21   : > { %1056 = vmatprep.subr.bf16.mxu0 %v1153_v1  ;;  %vm621_vm4 = vcmp.ne.s32.totalorder %v540_v20, 0  ;;  %vm630_vm5 = vcmp.lt.s32.totalorder %v540_v20, 0  ;;  %vm1312_vm6 = vmand %vm629_vm3, %vm620_vm2  ;;  %v648_v30 = vadd.s32 9, %v540_v20  ;;  %v582_v38 = vshrl.u32 %v1308_v23, 3 }
  0x22   : > { %vm1318_vm7 = vmand %vm630_vm5, %vm621_vm4  ;;  %v551_v32 = vsub.s32 %v514_v4, %v550_v24  ;;  %v656_v36 = vsel %vm1312_vm6, %v647_v26, %v529_v16  ;;  %v562_v37 = vsub.s32 %v515_v5, %v561_v28 }
  0x23   : > { %1021 = vmatpush3.bf16.msra.mxu1 %v1131_v27  ;;  %v1331_v39 = vmul.u32.u64.low 3817748708, %v1316_v29  ;;  %v1332_v40 = vmul.u32.u64.high 3817748708, %v1316_v29, %v1331_v39  ;;  %v657_v41 = vsel %vm1318_vm7, %v648_v30, %v540_v20  ;;  %vm1338_vm10 = vcmp.lt.s32.totalorder %v656_v36, 8 }
  0x24   : > { %1057 = vmatpush3.bf16.msra.mxu0 %v1132_v31  ;;  %vm622_vm8 = vcmp.ne.s32.totalorder %v551_v32, 0  ;;  %vm631_vm9 = vcmp.lt.s32.totalorder %v551_v32, 0  ;;  %v649_v45 = vadd.s32 9, %v551_v32  ;;  %vm623_vm11 = vcmp.ne.s32.totalorder %v562_v37, 0 }
  0x25   : > { %vm632_vm12 = vcmp.lt.s32.totalorder %v562_v37, 0  ;;  %v583_v46 = vmul.u32 9, %v582_v38  ;;  %vm666_vm13 = vcmp.lt.s32.totalorder %v657_v41, 8  ;;  %vm1342_vm14 = vmand %vm631_vm9, %vm622_vm8  ;;  %v1356_v57 = vsel %vm1338_vm10, 1.0, %v1153_v1 }
  0x26   : > { %1023 = vmatmul.mubr.bf16.vlgmr.msra.gmra.mrb[0].mxu1 %v226_v33  ;;  %v571_v33 = vshrl.u32 %v1304_v19, 3  ;;  %vm1360_vm15 = vmand %vm632_vm12, %vm623_vm11  ;;  %v1365_v62 = vsel %vm666_vm13, 1.0, %v1153_v1  ;;  %v658_v0 = vsel %vm1342_vm14, %v649_v45, %v551_v32  ;;  %v604_v3 = vshrl.u32 %v1332_v40, 3 }
  0x27   : > { %1059 = vmatmul.mubr.bf16.vlgmr.msra.gmra.mrb[0].mxu0 %v915_v34  ;;  %1026 = vmatprep.mubr.msk.bf16.mxu1 %vm1154_vm0, %v1153_v1  ;;  %v1324_v34 = vmul.u32.u64.low 3817748708, %v1310_v25  ;;  %v1325_v35 = vmul.u32.u64.high 3817748708, %v1310_v25, %v1324_v34  ;;  %v584_v2 = vsub.s32 %v517_v15, %v583_v46  ;;  %vm667_vm2 = vcmp.lt.s32.totalorder %v658_v0, 8 }
  0x28   : > { %1062 = vmatprep.mubr.msk.bf16.mxu0 %vm1154_vm0, %v1153_v1  ;;  %v605_v11 = vmul.u32 9, %v604_v3  ;;  %v1383_v16 = vsel %vm667_vm2, 1.0, %v1153_v1 }
  0x29   : > { %v593_v53 = vshrl.u32 %v1325_v35, 3  ;;  %vm625_vm3 = vcmp.ne.s32.totalorder %v584_v2, 0  ;;  %vm634_vm4 = vcmp.lt.s32.totalorder %v584_v2, 0  ;;  %v652_v18 = vadd.s32 9, %v584_v2 }
  0x2a   : > { %vm1391_vm7 = vmand %vm634_vm4, %vm625_vm3  ;;  %v606_v30 = vsub.s32 %v1316_v29, %v605_v11 }
  0x2b   : > { %v594_v7 = vmul.u32 9, %v593_v53  ;;  %v661_v34 = vsel %vm1391_vm7, %v652_v18, %v584_v2 }
  0x2c   : > { %vm627_vm11 = vcmp.ne.s32.totalorder %v606_v30, 0  ;;  %vm636_vm12 = vcmp.lt.s32.totalorder %v606_v30, 0  ;;  %vm670_vm13 = vcmp.lt.s32.totalorder %v661_v34, 8  ;;  %v654_v45 = vadd.s32 9, %v606_v30 }
  0x2d   : > { %v595_v19 = vsub.s32 %v1310_v25, %v594_v7 }
  0x2e   : > { %1027 = vmatmul.mubr.bf16.gmra.mrb[4].mxu1 %v234_v42  ;;  %v572_v42 = vmul.u32 9, %v571_v33 }
  0x2f   : > { %1063 = vmatmul.mubr.bf16.gmra.mrb[4].mxu0 %v916_v43  ;;  %1030 = vmatprep.mubr.msk.bf16.mxu1 %vm1154_vm0, %v1153_v1  ;;  %v1336_v43 = vadd.s32 64, %v512_v61  ;;  %vm626_vm8 = vcmp.ne.s32.totalorder %v595_v19, 0  ;;  %vm635_vm9 = vcmp.lt.s32.totalorder %v595_v19, 0  ;;  %v653_v38 = vadd.s32 9, %v595_v19 }
  0x30   : > { %1066 = vmatprep.mubr.msk.bf16.mxu0 %vm1154_vm0, %v1153_v1  ;;  %v573_v52 = vsub.s32 %v516_v13, %v572_v42  ;;  %vm1409_vm14 = vmand %vm635_vm9, %vm626_vm8 }
  0x32   : > { %vm633_vm1 = vcmp.lt.s32.totalorder %v573_v52, 0  ;;  %v651_v10 = vadd.s32 9, %v573_v52 }
  0x36   : > { %1031 = vmatmul.mubr.bf16.gmra.mrb[8].mxu1 %v242_v49  ;;  %v650_v49 = vadd.s32 9, %v562_v37 }
  0x37   : > { %1067 = vmatmul.mubr.bf16.gmra.mrb[8].mxu0 %v917_v50  ;;  %1034 = vmatprep.mubr.msk.bf16.mxu1 %vm1154_vm0, %v1153_v1 }
  0x38   : > { %1070 = vmatprep.mubr.msk.bf16.mxu0 %vm1154_vm0, %v1153_v1  ;;  %v659_v6 = vsel %vm1360_vm15, %v650_v49, %v562_v37  ;;  %vm1417_vm15 = vmand %vm636_vm12, %vm627_vm11 }
  0x39   : > { %vm668_vm5 = vcmp.lt.s32.totalorder %v659_v6, 8 }
  0x3a   : > { %v1396_v27 = vsel %vm668_vm5, 1.0, %v1153_v1 }
  0x3e   : > { %1035 = vmatmul.mubr.bf16.gmra.mrb[12].mxu1 %v250_v55  ;;  %v1348_v54 = vmul.u32.u64.low 3817748708, %v1336_v43  ;;  %v1349_v55 = vmul.u32.u64.high 3817748708, %v1336_v43, %v1348_v54 }
  0x3f   : > { %1071 = vmatmul.mubr.bf16.gmra.mrb[12].mxu0 %v918_v56  ;;  %1038 = vmatprep.mubr.msk.bf16.mxu1 %vm1154_vm0, %v1153_v1  ;;  %v662_v54 = vsel %vm1409_vm14, %v653_v38, %v595_v19 }
  0x40   : > { %1074 = vmatprep.mubr.msk.bf16.mxu0 %vm1154_vm0, %v1153_v1  ;;  %vm624_vm0 = vcmp.ne.s32.totalorder %v573_v52, 0  ;;  %v615_v20 = vshrl.u32 %v1349_v55, 3  ;;  %vm671_vm2 = vcmp.lt.s32.totalorder %v662_v54, 8 }
  0x41   : > { %vm1378_vm6 = vmand %vm633_vm1, %vm624_vm0  ;;  %v1435_v6 = vsel %vm671_vm2, 1.0, %v1153_v1 }
  0x42   : > { %v660_v25 = vsel %vm1378_vm6, %v651_v10, %v573_v52  ;;  %v616_v35 = vmul.u32 9, %v615_v20  ;;  %v1422_v52 = vsel %vm670_vm13, 1.0, %v1153_v1 }
  0x43   : > { %vm669_vm10 = vcmp.lt.s32.totalorder %v660_v25, 8 }
  0x44   : > { %v1414_v42 = vsel %vm669_vm10, 1.0, %v1153_v1  ;;  %v617_v46 = vsub.s32 %v1336_v43, %v616_v35  ;;  %v663_v43 = vsel %vm1417_vm15, %v654_v45, %v606_v30 }
  0x45   : > { %vm672_vm3 = vcmp.lt.s32.totalorder %v663_v43, 8 }
  0x46   : > { %1039 = vmatmul.mubr.bf16.gmra.mrb[16].mxu1 %v253_v58  ;;  %vm628_vm0 = vcmp.ne.s32.totalorder %v617_v46, 0  ;;  %vm637_vm1 = vcmp.lt.s32.totalorder %v617_v46, 0 }
  0x47   : > { %1075 = vmatmul.mubr.bf16.gmra.mrb[16].mxu0 %v919_v59  ;;  %vm1430_vm4 = vmand %vm637_vm1, %vm628_vm0 }
  0xf9   : > { %v341_v47 = vpop.f32.mrb[0].mxu1 }
  0xfa   : > { %v473_v50 = vpop.f32.mrb[0].mxu0  ;;  %v1024_v51 = vpop.f32.mrb[1].mxu1 }
  0xfb   : > { %v1351_v56 = vadd.f32 %v473_v50, %v341_v47  ;;  %v1060_v58 = vpop.f32.mrb[1].mxu0  ;;  %v344_v59 = vpop.f32.mrb[2].mxu1 }
  0xfc   : > { %v476_v61 = vpop.f32.mrb[2].mxu0  ;;  %v1025_v63 = vpop.f32.mrb[3].mxu1 }
  0xfd   : > { %v1370_v4 = vadd.f32 %v476_v61, %v344_v59  ;;  %v1061_v5 = vpop.f32.mrb[3].mxu0  ;;  %v692_v8 = vmul.f32 %v1356_v57, %v1351_v56  ;;  %v655_v63 = vadd.s32 9, %v617_v46 }
  0xff   : > { %v693_v9 = vmul.f32 %v1365_v62, %v1370_v4  ;;  %v664_v14 = vsel %vm1430_vm4, %v655_v63, %v617_v46 }
 0x100   : > { %vm673_vm5 = vcmp.lt.s32.totalorder %v664_v14, 8 }
 0x101   : > { %v701_v12 = vadd.f32 %v693_v9, %v692_v8  ;;  %v349_v13 = vpop.f32.mrb[4].mxu1 }
 0x102   : > { %v481_v15 = vpop.f32.mrb[4].mxu0  ;;  %v1028_v17 = vpop.f32.mrb[5].mxu1 }
 0x103   : > { %v1387_v21 = vadd.f32 %v481_v15, %v349_v13  ;;  %v1064_v22 = vpop.f32.mrb[5].mxu0  ;;  %v352_v23 = vpop.f32.mrb[6].mxu1 }
 0x104   : > { %v484_v26 = vpop.f32.mrb[6].mxu0  ;;  %v1029_v28 = vpop.f32.mrb[7].mxu1 }
 0x105   : > { %v694_v31 = vmul.f32 %v1383_v16, %v1387_v21  ;;  %v1403_v32 = vadd.f32 %v484_v26, %v352_v23  ;;  %v1065_v33 = vpop.f32.mrb[7].mxu0  ;;  %v936_v26 = vsel %vm673_vm5, 1.0, %v1153_v1 }
 0x107   : > { %v702_v36 = vadd.f32 %v701_v12, %v694_v31  ;;  %v695_v37 = vmul.f32 %v1396_v27, %v1403_v32  ;;  %v935_v12 = vsel %vm672_vm3, 1.0, %v1153_v1 }
 0x109   : > { %v703_v29 = vadd.f32 %v702_v36, %v695_v37  ;;  %v357_v39 = vpop.f32.mrb[8].mxu1 }
 0x10a   : > { %v489_v41 = vpop.f32.mrb[8].mxu0  ;;  %v1032_v44 = vpop.f32.mrb[9].mxu1 }
 0x10b   : > { %v490_v47 = vadd.f32 %v489_v41, %v357_v39  ;;  %v1068_v48 = vpop.f32.mrb[9].mxu0  ;;  %v360_v49 = vpop.f32.mrb[10].mxu1 }
 0x10c   : > { %v492_v51 = vpop.f32.mrb[10].mxu0  ;;  %v1033_v53 = vpop.f32.mrb[11].mxu1 }
 0x10d   : > { %v696_v55 = vmul.f32 %v1414_v42, %v490_v47  ;;  %v493_v58 = vadd.f32 %v492_v51, %v360_v49  ;;  %v1069_v59 = vpop.f32.mrb[11].mxu0 }
 0x10f   : > { %v704_v60 = vadd.f32 %v703_v29, %v696_v55  ;;  %v697_v61 = vmul.f32 %v1422_v52, %v493_v58 }
 0x111   : > { %v705_v0 = vadd.f32 %v704_v60, %v697_v61  ;;  %v365_v2 = vpop.f32.mrb[12].mxu1 }
 0x112   : > { %v497_v5 = vpop.f32.mrb[12].mxu0  ;;  %v1036_v7 = vpop.f32.mrb[13].mxu1 }
 0x113   : > { %v498_v8 = vadd.f32 %v497_v5, %v365_v2  ;;  %v1072_v9 = vpop.f32.mrb[13].mxu0  ;;  %v368_v10 = vpop.f32.mrb[14].mxu1 }
 0x114   : > { %v500_v11 = vpop.f32.mrb[14].mxu0  ;;  %v1037_v13 = vpop.f32.mrb[15].mxu1 }
 0x115   : > { %v698_v15 = vmul.f32 %v1435_v6, %v498_v8  ;;  %v501_v17 = vadd.f32 %v500_v11, %v368_v10  ;;  %v1073_v18 = vpop.f32.mrb[15].mxu0 }
 0x117   : > { %v706_v19 = vadd.f32 %v705_v0, %v698_v15  ;;  %v699_v20 = vmul.f32 %v935_v12, %v501_v17 }
 0x119   : > { %v707_v22 = vadd.f32 %v706_v19, %v699_v20  ;;  %v373_v23 = vpop.f32.mrb[16].mxu1 }
 0x11a   : > { %v505_v24 = vpop.f32.mrb[16].mxu0  ;;  %v1040_v28 = vpop.f32.mrb[17].mxu1 }
 0x11b   : > { %v506_v25 = vadd.f32 %v505_v24, %v373_v23  ;;  %v1076_v30 = vpop.f32.mrb[17].mxu0  ;;  %v376_v31 = vpop.f32.mrb[18].mxu1 }
 0x11c   : > { %v508_v33 = vpop.f32.mrb[18].mxu0  ;;  %v1041_v34 = vpop.f32.mrb[19].mxu1 }
 0x11d   : > { %v700_v35 = vmul.f32 %v936_v26, %v506_v25  ;;  %v1077_v36 = vpop.f32.mrb[19].mxu0 }
 0x11f   : > { %v708_v37 = vadd.f32 %v707_v22, %v700_v35 }
 0x121   : > { %v709_v38 = vrot.slane %v708_v37, 4 }
 0x123   : > { %v710_v29 = vadd.f32 %v709_v38, %v708_v37 }
 0x125   : > { %v711_v39 = vrot.slane %v710_v29, 2 }
 0x127   : > { %v712_v40 = vadd.f32 %v711_v39, %v710_v29 }
 0x129   : > { %v713_v41 = vrot.slane %v712_v40, 1 }
 0x12b   : > { %v714_v44 = vadd.f32 %v713_v41, %v712_v40 }
 0x12d   : > { %v715_v45 = vmul.f32 0.015625, %v714_v44 }
 0x12f   : > { %v716_v46 = vsub.f32 %v1351_v56, %v715_v45  ;;  %v717_v1 = vsub.f32 %v1370_v4, %v715_v45  ;;  %v718_v48 = vsub.f32 %v1387_v21, %v715_v45  ;;  %v719_v49 = vsub.f32 %v1403_v32, %v715_v45 }
 0x130   : > { %v720_v50 = vsub.f32 %v490_v47, %v715_v45  ;;  %v721_v51 = vsub.f32 %v493_v58, %v715_v45  ;;  %v722_v53 = vsub.f32 %v498_v8, %v715_v45  ;;  %v723_v54 = vsub.f32 %v501_v17, %v715_v45 }
 0x131   : > { %v724_v55 = vsub.f32 %v506_v25, %v715_v45  ;;  %v725_v59 = vmul.f32 %v716_v46, %v716_v46  ;;  %v726_v43 = vmul.f32 %v717_v1, %v717_v1  ;;  %v727_v60 = vmul.f32 %v718_v48, %v718_v48 }
 0x132   : > { %v728_v61 = vmul.f32 %v719_v49, %v719_v49  ;;  %v729_v56 = vmul.f32 %v720_v50, %v720_v50  ;;  %v730_v21 = vmul.f32 %v721_v51, %v721_v51  ;;  %v731_v58 = vmul.f32 %v722_v53, %v722_v53 }
 0x133   : > { %v734_v63 = vmul.f32 %v1356_v57, %v725_v59  ;;  %v735_v0 = vmul.f32 %v1365_v62, %v726_v43  ;;  %v736_v4 = vmul.f32 %v1383_v16, %v727_v60  ;;  %v732_v7 = vmul.f32 %v723_v54, %v723_v54 }
 0x134   : > { %v737_v32 = vmul.f32 %v1396_v27, %v728_v61  ;;  %v738_v3 = vmul.f32 %v1414_v42, %v729_v56  ;;  %v739_v8 = vmul.f32 %v1422_v52, %v730_v21  ;;  %v733_v10 = vmul.f32 %v724_v55, %v724_v55 }
 0x135   : > { %v743_v2 = vadd.f32 %v735_v0, %v734_v63  ;;  %v740_v57 = vmul.f32 %v1435_v6, %v731_v58  ;;  %v741_v11 = vmul.f32 %v935_v12, %v732_v7 }
 0x136   : > { %v742_v13 = vmul.f32 %v936_v26, %v733_v10 }
 0x137   : > { %v744_v47 = vadd.f32 %v743_v2, %v736_v4 }
 0x139   : > { %v745_v5 = vadd.f32 %v744_v47, %v737_v32 }
 0x13b   : > { %v746_v9 = vadd.f32 %v745_v5, %v738_v3 }
 0x13d   : > { %v747_v62 = vadd.f32 %v746_v9, %v739_v8 }
 0x13f   : > { %v748_v16 = vadd.f32 %v747_v62, %v740_v57 }
 0x141   : > { %v749_v14 = vadd.f32 %v748_v16, %v741_v11 }
 0x143   : > { %v750_v15 = vadd.f32 %v749_v14, %v742_v13 }
 0x145   : > { %v751_v27 = vrot.slane %v750_v15, 4 }
 0x147   : > { %v752_v17 = vadd.f32 %v751_v27, %v750_v15 }
 0x149   : > { %v753_v18 = vrot.slane %v752_v17, 2 }
 0x14b   : > { %v754_v19 = vadd.f32 %v753_v18, %v752_v17 }
 0x14d   : > { %v755_v42 = vrot.slane %v754_v19, 1 }
 0x14f   : > { %v756_v20 = vadd.f32 %v755_v42, %v754_v19 }
 0x151   : > { %v757_v22 = vmul.f32 0.015625, %v756_v20 }
 0x153   : > { %v758_v23 = vadd.f32 1e-05, %v757_v22 }
 0x155   : > { %1143 = vrsqrt.f32 %v758_v23 }
 0x15f   : > { %v1144_v52 = vpop.eup %1143 }
 0x160   : > { %v760_v24 = vmul.f32 %v1144_v52, %v716_v46  ;;  %v761_v6 = vmul.f32 %v1144_v52, %v717_v1  ;;  %v762_v28 = vmul.f32 %v1144_v52, %v718_v48  ;;  %v763_v25 = vmul.f32 %v1144_v52, %v719_v49 }
 0x161   : > { %v764_v12 = vmul.f32 %v1144_v52, %v720_v50  ;;  %v765_v30 = vmul.f32 %v1144_v52, %v721_v51  ;;  %v766_v26 = vmul.f32 %v1144_v52, %v722_v53  ;;  %v767_v31 = vmul.f32 %v1144_v52, %v723_v54 }
 0x162   : > { %v768_v33 = vmul.f32 %v1144_v52, %v724_v55  ;;  %v769_v34 = vmax.f32 %v760_v24, 0.0  ;;  %v770_v35 = vmax.f32 %v761_v6, 0.0  ;;  %v771_v36 = vmax.f32 %v762_v28, 0.0 }
 0x163   : > { %v772_v37 = vmax.f32 %v763_v25, 0.0  ;;  %v773_v38 = vmax.f32 %v764_v12, 0.0  ;;  %v774_v29 = vmax.f32 %v765_v30, 0.0  ;;  %v775_v39 = vmax.f32 %v766_v26, 0.0 }
 0x164   : > { %v776_v40 = vmax.f32 %v767_v31, 0.0  ;;  %v777_v41 = vmax.f32 %v768_v33, 0.0  ;;  %v960_v44 = vpack.c.bf16 %v770_v35, %v769_v34 }
 0x165   : > { %v965_v45 = vpack.c.bf16 %v772_v37, %v771_v36  ;;  %v970_v46 = vpack.c.bf16 %v774_v29, %v773_v38 }
 0x166   : > { %v956_v1 = vpack.c.bf16 %v777_v41, %v777_v41  ;;  %961 = vst [vmem:[%s143_s24] sm:$0xff] %v960_v44   ;;  %v975_v48 = vpack.c.bf16 %v776_v40, %v775_v39 }
 0x167   : > { %977 = vst [vmem:[%s143_s24 + $0x8] sm:$0xff] %v965_v45   ;;  %978 = vst [vmem:[%s143_s24 + $0x10] sm:$0xff] %v970_v46  }
 0x168   : > { %979 = vst [vmem:[%s143_s24 + $0x18] sm:$0xff] %v975_v48   ;;  %823 = vst [vmem:[%s143_s24 + $0x20] sm:$0xf] %v956_v1 }
 0x169 PF: > { %s12_s9 = sadd.s32 1, %s1151_s9  }
 0x16a   : > { %p9_p4 = scmp.ge.s32.totalorder %s12_s9, 4  }
 0x16c   :  { %11 = sbr.rel (!%p9_p4) target bundleno = 1 (0x1), region = 59 }

// kernel: generator_forward.8
= control target key start
LH: loop header
LB: loop body
LE: loop exit
PB: predicated region body
PF: predicated region fallthrough
CT: control target
= control target key end

     0   :  { %s6978_s9 = smov 0   ;;  %s9606_s0 = inlined_call_operand.vmem [shape: bf16[2,506,56], index: 0, kind: input, shape index: {}]   ;;  %s9607_s1 = inlined_call_operand.vmem [shape: bf16[7,56,128], index: 1, kind: input, shape index: {}]   ;;  %s9608_s2 = inlined_call_operand.vmem [shape: bf16[2,352,128], index: 2, kind: output, shape index: {}]  }
   0x1 LB: > { %s5220_s10 = sadd.s32 4294967295, %s6960_s9   ;;  %p5224_p0 = scmp.ge.s32.totalorder %s6960_s9, 1  ;;  %s6960_s9 = sphi %s6978_s9, %s12_s9  }
   0x2   : > { %p112_p1 = scmp.lt.s32.totalorder %s6960_s9, 3 }
   0x4   : > { %p113_p2 = pnand %p5224_p0, %p112_p1 }
   0x6   : > { %116 = sbr.rel (%p113_p2) target bundleno = 734 (0x2de), region = 28 }
   0xd   : > { %v6781_v0 = vld [vmem:[%s9607_s1 + $0x1c] sm:$0xff]   ;;  %v6992_v1 = vld [vmem:[%s9607_s1 + $0x54] sm:$0xff]   ;;  %p134_p3 = scmp.lt.s32.totalorder %s5220_s10, 1  ;;  %v6783_v2 = vld [vmem:[%s9607_s1 + $0x24] sm:$0xff]   ;;  %vm455_vm0 = vcmask 1043456   ;;  %vm321_vm1 = vcmask 1044480  }
   0xe   : > { %6039 = vmatprep.subr.bf16.mxu1 %v6781_v0  ;;  %6195 = vmatprep.subr.bf16.mxu0 %v6992_v1  ;;  %v6784_v3 = vld [vmem:[%s9607_s1 + $0x5c] sm:$0xff]   ;;  %v6785_v4 = vld [vmem:[%s9607_s1 + $0x2c] sm:$0xff]   ;;  %v6786_v5 = vld [vmem:[%s9607_s1 + $0x64] sm:$0xff]   ;;  %vm388_vm2 = vcmask 457728   ;;  %vm1696_vm3 = vcmask 1046528   ;;  %vm1141_vm4 = vcmask 1045504  }
   0xf   : > { %6040 = vmatpush3.bf16.msra.mxu1 %v6781_v0  ;;  %s9936_s10 = smov (!%p134_p3, %s5220_s10), 1  ;;  %6196 = vmatpush3.bf16.msra.mxu0 %v6992_v1  ;;  %v6787_v6 = vld [vmem:[%s9607_s1 + $0x34] ss:$0 sps:$4 sm:$0xff]   ;;  %v6788_v7 = vld [vmem:[%s9607_s1 + $0x6c] ss:$0 sps:$4 sm:$0xff]   ;;  %v6800_v34 = vld [vmem:[%s9607_s1] sm:$0xff]  }
  0x10   : > { %6041 = vmatprep.subr.bf16.mxu1 %v6783_v2  ;;  %6197 = vmatprep.subr.bf16.mxu0 %v6784_v3  ;;  %s5681_s23 = sshll.u32 %s9936_s10, 8  ;;  %v457_v9 = vsel %vm455_vm0, %v6787_v6, 0  ;;  %v7030_v11 = vsel %vm455_vm0, %v6788_v7, 0  ;;  %v6796_v25 = vld [vmem:[%s9607_s1 + $0x70] sm:$0xff]   ;;  %v6802_v39 = vld [vmem:[%s9607_s1 + $0x78] sm:$0xff]   ;;  %v6811_v58 = vld [vmem:[%s9607_s1 + $0x80] sm:$0xff]  }
  0x11   : > { %s7017_s28 = scalar_lea.vmem %s9606_s0, %s5681_s23  ;;  %v6812_v59 = vld [vmem:[%s9607_s1 + $0x8] sm:$0xff]  }
  0x12   : > { %v7023_v8 = vld [vmem:[%s7017_s28 + $0xc] sm:$0xf]  ;;  %v7027_v10 = vld [vmem:[%s7017_s28 + $0x10] sm:$0xff]   ;;  %v196_v12 = vld [vmem:[%s7017_s28 + $0x8] sm:$0x8] }
  0x13   : > { %6042 = vmatpush3.bf16.msra.mxu1 %v6783_v2  ;;  %6198 = vmatpush3.bf16.msra.mxu0 %v6784_v3  ;;  %v6793_v13 = vld [vmem:[%s7017_s28 + $0x28] sm:$0xff]   ;;  %v5235_v14 = vcombine.low %v196_v12, %v7023_v8  ;;  %v323_v15 = vrot.slane %v7027_v10, 3  ;;  %v6792_v16 = vld [vmem:[%s7017_s28 + $0x20] sm:$0xfe]   ;;  %v7038_v18 = vld [vmem:[%s7017_s28 + $0x18] sm:$0xff]  }
  0x14   : > { %6043 = vmatprep.subr.bf16.mxu1 %v6785_v4  ;;  %6199 = vmatprep.subr.bf16.mxu0 %v6786_v5  ;;  %v1698_v17 = vrot.slane %v6793_v13, 1  ;;  %v6795_v20 = vld [vmem:[%s7017_s28 + $0x30] sm:$0xff]   ;;  %v1697_v21 = vrot.slane %v6792_v16, 1  ;;  %v325_v22 = vrot.slane %v7038_v18, 3  ;;  %v7052_v28 = vld [vmem:[%s7017_s28 + $0x20] sm:$0xff]   ;;  %v6798_v30 = vld [vmem:[%s7017_s28 + $0x38] sm:$0xff]  }
  0x15   : > { %v322_v19 = vrot.slane %v5235_v14, 3  ;;  %v1700_v24 = vrot.slane %v6795_v20, 1  ;;  %v327_v31 = vrot.slane %v7052_v28, 3  ;;  %v7060_v32 = vld [vmem:[%s7017_s28 + $0x28] sm:$0xff]   ;;  %v1702_v33 = vrot.slane %v6798_v30, 1  ;;  %v6801_v37 = vld [vmem:[%s7017_s28 + $0x40] sm:$0xff]  }
  0x16   : > { %v1699_v26 = vsel %vm1696_vm3, %v1697_v21, %v1698_v17  ;;  %v326_v27 = vsel %vm321_vm1, %v323_v15, %v325_v22  ;;  %v329_v36 = vrot.slane %v7060_v32, 3  ;;  %v1704_v40 = vrot.slane %v6801_v37, 1  ;;  %v7077_v41 = vld [vmem:[%s7017_s28 + $0x30] sm:$0xff]   ;;  %v6804_v42 = vld [vmem:[%s7017_s28 + $0x48] sm:$0xff]   ;;  %v7083_v45 = vld [vmem:[%s7017_s28 + $0x38] sm:$0xff]  }
  0x17   : > { %6044 = vmatpush3.bf16.msra.mxu1 %v6785_v4  ;;  %6200 = vmatpush3.bf16.msra.mxu0 %v6786_v5  ;;  %v324_v23 = vsel %vm321_vm1, %v322_v19, %v323_v15  ;;  %v1701_v29 = vsel %vm1696_vm3, %v1698_v17, %v1700_v24  ;;  %v328_v35 = vsel %vm321_vm1, %v325_v22, %v327_v31  ;;  %v331_v44 = vrot.slane %v7077_v41, 3  ;;  %v6806_v48 = vld [vmem:[%s7017_s28 + $0x50] sm:$0xff]   ;;  %v7089_v50 = vld [vmem:[%s7017_s28 + $0x40] sm:$0xff]   ;;  %v6808_v52 = vld [vmem:[%s7017_s28 + $0x58] sm:$0xff]  }
  0x18   : > { %6675 = vmatprep.subr.msk.bf16.mxu1 %vm455_vm0, %v6787_v6  ;;  %6678 = vmatprep.subr.msk.bf16.mxu0 %vm455_vm0, %v6788_v7  ;;  %v1703_v38 = vsel %vm1696_vm3, %v1700_v24, %v1702_v33  ;;  %v330_v43 = vsel %vm321_vm1, %v327_v31, %v329_v36  ;;  %v1705_v46 = vsel %vm1696_vm3, %v1702_v33, %v1704_v40  ;;  %v1706_v47 = vrot.slane %v6804_v42, 1  ;;  %v7100_v57 = vld [vmem:[%s7017_s28 + $0x48] sm:$0xff]   ;;  %v6810_v61 = vld [vmem:[%s7017_s28 + $0x60] sm:$0xff]   ;;  %v7113_v0 = vld [vmem:[%s7017_s28 + $0x50] sm:$0xff]  }
  0x19   : > { %6047 = vmatprep.mubr.msk.bf16.mxu1 %vm388_vm2, %v324_v23  ;;  %6203 = vmatprep.mubr.msk.bf16.mxu0 %vm388_vm2, %v1699_v26  ;;  %v332_v49 = vsel %vm321_vm1, %v329_v36, %v331_v44  ;;  %v333_v53 = vrot.slane %v7083_v45, 3  ;;  %v1708_v54 = vrot.slane %v6806_v48, 1  ;;  %v335_v55 = vrot.slane %v7089_v50, 3  ;;  %v6814_v3 = vld [vmem:[%s7017_s28 + $0x68] sm:$0xff]   ;;  %v7129_v13 = vld [vmem:[%s7017_s28 + $0x58] sm:$0xff]   ;;  %v6816_v15 = vld [vmem:[%s7017_s28 + $0x70] sm:$0xff]  }
  0x1a   : > { %v1707_v51 = vsel %vm1696_vm3, %v1704_v40, %v1706_v47  ;;  %v1710_v56 = vrot.slane %v6808_v52, 1  ;;  %v337_v4 = vrot.slane %v7100_v57, 3  ;;  %v6817_v5 = vld [vmem:[%s9607_s1 + $0x88] ss:$0 sps:$4 sm:$0xff]   ;;  %v1712_v6 = vrot.slane %v6810_v61, 1  ;;  %v7136_v19 = vld [vmem:[%s7017_s28 + $0x60] sm:$0xff]  }
  0x1b   : > { %6046 = vmatpush3.bf16.msra.mxu1 %v457_v9  ;;  %6202 = vmatpush3.bf16.msra.mxu0 %v7030_v11  ;;  %v334_v60 = vsel %vm321_vm1, %v331_v44, %v333_v53  ;;  %v1709_v62 = vsel %vm1696_vm3, %v1706_v47, %v1708_v54  ;;  %v336_v63 = vsel %vm321_vm1, %v333_v53, %v335_v55  ;;  %v339_v7 = vrot.slane %v7113_v0, 3  ;;  %v6819_v21 = vld [vmem:[%s7017_s28 + $0x78] sm:$0xff]   ;;  %v7157_v31 = vld [vmem:[%s7017_s28 + $0x80] sm:$0xff]   ;;  %v6823_v47 = vld [vmem:[%s7017_s28 + $0x2c] sm:$0xff]  }
  0x1c   : > { %6247 = vmatprep.subr.bf16.mxu0 %v6796_v25  ;;  %6091 = vmatprep.subr.bf16.mxu1 %v6800_v34  ;;  %v1711_v2 = vsel %vm1696_vm3, %v1708_v54, %v1710_v56  ;;  %v1714_v9 = vrot.slane %v6814_v3, 1  ;;  %v2335_v12 = vsel %vm455_vm0, %v6817_v5, 0  ;;  %v338_v14 = vsel %vm321_vm1, %v335_v55, %v337_v4  ;;  %v7173_v40 = vld [vmem:[%s7017_s28 + $0x78] sm:$0xff]   ;;  %v7198_v55 = vld [vmem:[%s7017_s28 + $0x88] sm:$0xff]  }
  0x1d   : > { %v1713_v16 = vsel %vm1696_vm3, %v1710_v56, %v1712_v6  ;;  %v340_v17 = vsel %vm321_vm1, %v337_v4, %v339_v7  ;;  %v341_v22 = vrot.slane %v7129_v13, 3  ;;  %v1716_v23 = vrot.slane %v6816_v15, 1  ;;  %v6825_v52 = vld [vmem:[%s7017_s28 + $0x34] sm:$0xff]   ;;  %v6829_v54 = vld [vmem:[%s7017_s28 + $0x3c] sm:$0xff]   ;;  %v6833_v4 = vld [vmem:[%s7017_s28 + $0x4c] sm:$0xff]  }
  0x1e   : > { %6048 = vmatmul.mubr.msk.bf16.vlgmr.msra.gmra.mrb[0].mxu1 %vm388_vm2, %v326_v27  ;;  %6204 = vmatmul.mubr.msk.bf16.vlgmr.msra.gmra.mrb[0].mxu0 %vm388_vm2, %v1701_v29  ;;  %v1715_v20 = vsel %vm1696_vm3, %v1712_v6, %v1714_v9  ;;  %v343_v24 = vrot.slane %v7136_v19, 3  ;;  %v1718_v26 = vrot.slane %v6819_v21, 1  ;;  %v6827_v27 = vld [vmem:[%s9607_s1 + $0x10] sm:$0xff]   ;;  %v7153_v29 = vld [vmem:[%s7017_s28 + $0x68] sm:$0xff]   ;;  %v349_v48 = vrot.slane %v7173_v40, 3  ;;  %v6851_v3 = vld [vmem:[%s9607_s1 + $0x38] sm:$0xff]  }
  0x1f   : > { %6248 = vmatpush3.bf16.msra.mxu0 %v6796_v25  ;;  %6051 = vmatprep.mubr.msk.bf16.mxu1 %vm388_vm2, %v328_v35  ;;  %v6826_v25 = vld [vmem:[%s9607_s1 + $0x8c] sm:$0xff]   ;;  %v342_v30 = vsel %vm321_vm1, %v339_v7, %v341_v22  ;;  %v1717_v33 = vsel %vm1696_vm3, %v1714_v9, %v1716_v23  ;;  %v345_v37 = vrot.slane %v7153_v29, 3  ;;  %v353_v61 = vrot.slane %v7198_v55, 3  ;;  %v7224_v6 = vld [vmem:[%s7017_s28 + $0x98] sm:$0xff]   ;;  %v7228_v9 = vld [vmem:[%s7017_s28 + $0xa0] sm:$0xff]  }
  0x20   : > { %6207 = vmatprep.mubr.msk.bf16.mxu0 %vm388_vm2, %v1703_v38  ;;  %6092 = vmatpush3.bf16.msra.mxu1 %v6800_v34  ;;  %v344_v34 = vsel %vm321_vm1, %v341_v22, %v343_v24  ;;  %v7162_v35 = vld [vmem:[%s7017_s28 + $0x70] sm:$0xff]   ;;  %v1719_v36 = vsel %vm1696_vm3, %v1716_v23, %v1718_v26  ;;  %v1720_v38 = vrot.slane %v7157_v31, 1  ;;  %v359_v15 = vrot.slane %v7228_v9, 3  ;;  %v7244_v21 = vld [vmem:[%s7017_s28 + $0xa8] sm:$0xff]  }
  0x21   : > { %6249 = vmatprep.subr.bf16.mxu0 %v6802_v39  ;;  %6093 = vmatprep.subr.bf16.mxu1 %v6812_v59  ;;  %v346_v42 = vsel %vm321_vm1, %v343_v24, %v345_v37  ;;  %v7201_v56 = vld [vmem:[%s7017_s28 + $0x90] sm:$0xff]  }
  0x22   : > { %v1721_v44 = vsel %vm1696_vm3, %v1718_v26, %v1720_v38  ;;  %v6842_v23 = vld [vmem:[%s7017_s28 + $0xb0] sm:$0xff]  }
  0x23   : > { %6250 = vmatpush3.bf16.msra.mxu0 %v6802_v39  ;;  %v347_v39 = vrot.slane %v7162_v35, 3  ;;  %v363_v26 = vrot.slane %v6842_v23, 3 }
  0x24   : > { %6251 = vmatprep.subr.bf16.mxu0 %v6811_v58  ;;  %6094 = vmatpush3.bf16.msra.mxu1 %v6812_v59 }
  0x25   : > { %6095 = vmatprep.subr.bf16.mxu1 %v6827_v27 }
  0x26   : > { %6052 = vmatmul.mubr.msk.bf16.gmra.mrb[4].mxu1 %vm388_vm2, %v330_v43  ;;  %6208 = vmatmul.mubr.msk.bf16.gmra.mrb[4].mxu0 %vm388_vm2, %v1705_v46  ;;  %v7177_v43 = vld [vmem:[%s7017_s28 + $0x80] sm:$0xff]   ;;  %v348_v46 = vsel %vm321_vm1, %v345_v37, %v347_v39  ;;  %v6843_v37 = vld [vmem:[%s7017_s28 + $0x6c] sm:$0xff]  }
  0x27   : > { %6055 = vmatprep.mubr.msk.bf16.mxu1 %vm388_vm2, %v332_v49  ;;  %6211 = vmatprep.mubr.msk.bf16.mxu0 %vm388_vm2, %v1707_v51  ;;  %v351_v49 = vrot.slane %v7177_v43, 3  ;;  %v6841_v51 = vld [vmem:[%s9607_s1 + $0x18] ss:$0 sps:$4 sm:$0xff]  }
  0x28   : > { %6252 = vmatpush3.bf16.msra.mxu0 %v6811_v58  ;;  %6096 = vmatpush3.bf16.msra.mxu1 %v6827_v27  ;;  %v764_v53 = vsel %vm455_vm0, %v6841_v51, 0  ;;  %v350_v58 = vsel %vm321_vm1, %v347_v39, %v349_v48  ;;  %v7257_v27 = vld [vmem:[%s9607_s1 + $0xa8] sm:$0xff]  }
  0x29   : > { %6680 = vmatprep.subr.msk.bf16.mxu0 %vm455_vm0, %v6817_v5  ;;  %6676 = vmatprep.subr.msk.bf16.mxu1 %vm455_vm0, %v6841_v51  ;;  %v352_v59 = vsel %vm321_vm1, %v349_v48, %v351_v49  ;;  %v354_v5 = vsel %vm321_vm1, %v351_v49, %v353_v61  ;;  %v147_v48 = vld [vmem:[%s7017_s28 + $0x8] sm:$0xf] }
  0x2a   : > { %v5285_v49 = vcombine.low %v147_v48, %v7023_v8  ;;  %v6848_v51 = vld [vmem:[%s7017_s28 + $0x84] sm:$0xff]  }
  0x2b   : > { %v6867_v8 = vld [vmem:[%s9607_s1 + $0x48] sm:$0xff]  }
  0x2c   : > { %6254 = vmatpush3.bf16.msra.mxu0 %v2335_v12  ;;  %6098 = vmatpush3.bf16.msra.mxu1 %v764_v53  ;;  %v6857_v12 = vld [vmem:[%s9607_s1 + $0xa4] ss:$0 sps:$4 sm:$0xff]  }
  0x2d   : > { %6299 = vmatprep.subr.bf16.mxu0 %v6826_v25  ;;  %6143 = vmatprep.subr.bf16.mxu1 %v6851_v3  ;;  %v6858_v53 = vld [vmem:[%s9607_s1 + $0x40] sm:$0xff]  }
  0x2e   : > { %6056 = vmatmul.mubr.msk.bf16.gmra.mrb[8].mxu1 %vm388_vm2, %v334_v60  ;;  %6212 = vmatmul.mubr.msk.bf16.gmra.mrb[8].mxu0 %vm388_vm2, %v1709_v62  ;;  %v6836_v60 = vld [vmem:[%s9607_s1 + $0x94] sm:$0xff]   ;;  %v355_v62 = vrot.slane %v7201_v56, 3  ;;  %v6881_v48 = vld [vmem:[%s7017_s28 + $0x24] sm:$0xff]  }
  0x2f   : > { %6059 = vmatprep.mubr.msk.bf16.mxu1 %vm388_vm2, %v336_v63  ;;  %6215 = vmatprep.mubr.msk.bf16.mxu0 %vm388_vm2, %v1711_v2  ;;  %v6849_v63 = vld [vmem:[%s9607_s1 + $0x9c] sm:$0xff]   ;;  %v6831_v2 = vld [vmem:[%s7017_s28 + $0x44] sm:$0xff]  }
  0x30   : > { %v356_v7 = vsel %vm321_vm1, %v353_v61, %v355_v62  ;;  %v6855_v61 = vld [vmem:[%s7017_s28 + $0xac] sm:$0xff]  }
  0x36   : > { %6060 = vmatmul.mubr.msk.bf16.gmra.mrb[12].mxu1 %vm388_vm2, %v338_v14  ;;  %6216 = vmatmul.mubr.msk.bf16.gmra.mrb[12].mxu0 %vm388_vm2, %v1713_v16  ;;  %v357_v14 = vrot.slane %v7224_v6, 3  ;;  %v6835_v16 = vld [vmem:[%s7017_s28 + $0x54] sm:$0xff]  }
  0x37   : > { %6063 = vmatprep.mubr.msk.bf16.mxu1 %vm388_vm2, %v340_v17  ;;  %6219 = vmatprep.mubr.msk.bf16.mxu0 %vm388_vm2, %v1715_v20  ;;  %v2889_v17 = vsel %vm455_vm0, %v6857_v12, 0  ;;  %v6838_v20 = vld [vmem:[%s7017_s28 + $0x5c] sm:$0xff]  }
  0x38   : > { %v358_v22 = vsel %vm321_vm1, %v355_v62, %v357_v14  ;;  %v360_v24 = vsel %vm321_vm1, %v357_v14, %v359_v15  ;;  %v6864_v62 = vld [vmem:[%s7017_s28 + $0x3c] sm:$0xff]   ;;  %v6872_v14 = vld [vmem:[%s9607_s1 + $0xb0] sm:$0xff]  }
  0x3e   : > { %6064 = vmatmul.mubr.msk.bf16.gmra.mrb[16].mxu1 %vm388_vm2, %v342_v30  ;;  %6220 = vmatmul.mubr.msk.bf16.gmra.mrb[16].mxu0 %vm388_vm2, %v1717_v33  ;;  %v6844_v30 = vld [vmem:[%s7017_s28 + $0xb8] ss:$0 sps:$4 sm:$0x77]  }
  0x3f   : > { %6067 = vmatprep.mubr.msk.bf16.mxu1 %vm388_vm2, %v344_v34  ;;  %6223 = vmatprep.mubr.msk.bf16.mxu0 %vm388_vm2, %v1719_v36  ;;  %v6840_v34 = vld [vmem:[%s7017_s28 + $0x64] sm:$0xff]   ;;  %v365_v39 = vrot.slane %v6844_v30, 3 }
  0x46   : > { %6068 = vmatmul.mubr.msk.bf16.gmra.mrb[20].mxu1 %vm388_vm2, %v346_v42  ;;  %6224 = vmatmul.mubr.msk.bf16.gmra.mrb[20].mxu0 %vm388_vm2, %v1721_v44  ;;  %v6845_v42 = vld [vmem:[%s7017_s28 + $0x74] sm:$0xff]   ;;  %v366_v44 = vsel %vm321_vm1, %v363_v26, %v365_v39  ;;  %v6879_v39 = vld [vmem:[%s7017_s28 + $0x1c] sm:$0xff]  }
  0x47   : > { %6071 = vmatprep.mubr.msk.bf16.mxu1 %vm388_vm2, %v348_v46  ;;  %6255 = vmatprep.mubr.msk.bf16.mxu0 %vm388_vm2, %v6823_v47  ;;  %v6846_v46 = vld [vmem:[%s7017_s28] sm:$0xff]  }
  0x48   : > { %v6847_v47 = vld [vmem:[%s7017_s28 + $0x7c] sm:$0xff]  }
  0x4e   : > { %6072 = vmatmul.mubr.msk.bf16.gmra.mrb[24].mxu1 %vm388_vm2, %v350_v58  ;;  %6256 = vmatmul.mubr.msk.bf16.vlgmr.msra.gmra.mrb[0].mxu0 %vm388_vm2, %v6825_v52  ;;  %v6850_v52 = vld [vmem:[%s7017_s28 + $0x8c] sm:$0xff]   ;;  %v6853_v58 = vld [vmem:[%s7017_s28 + $0x9c] sm:$0xff]  }
  0x4f   : > { %6075 = vmatprep.mubr.msk.bf16.mxu1 %vm388_vm2, %v352_v59  ;;  %6300 = vmatpush3.bf16.msra.mxu0 %v6826_v25  ;;  %v361_v25 = vrot.slane %v7244_v21, 3  ;;  %v6875_v59 = vld [vmem:[%s9607_s1 + $0x50] ss:$0 sps:$4 sm:$0xff]  }
  0x50   : > { %6259 = vmatprep.mubr.msk.bf16.mxu0 %vm388_vm2, %v6829_v54  ;;  %6301 = vmatprep.subr.bf16.mxu0 %v6836_v60  ;;  %v6852_v54 = vld [vmem:[%s7017_s28 + $0x94] sm:$0xff]  }
  0x51   : > { %v362_v33 = vsel %vm321_vm1, %v359_v15, %v361_v25  ;;  %v364_v36 = vsel %vm321_vm1, %v361_v25, %v363_v26 }
  0x53   : > { %6302 = vmatpush3.bf16.msra.mxu0 %v6836_v60  ;;  %v6854_v60 = vld [vmem:[%s7017_s28 + $0xa4] sm:$0xff]  }
  0x54   : > { %6303 = vmatprep.subr.bf16.mxu0 %v6849_v63 }
  0x56   : > { %6076 = vmatmul.mubr.msk.bf16.gmra.mrb[28].mxu1 %vm388_vm2, %v354_v5  ;;  %6260 = vmatmul.mubr.msk.bf16.gmra.mrb[4].mxu0 %vm388_vm2, %v6831_v2  ;;  %v6865_v2 = vld [vmem:[%s7017_s28 + $0x44] sm:$0xff]   ;;  %v6869_v5 = vld [vmem:[%s7017_s28 + $0x54] sm:$0xff]  }
  0x57   : > { %6079 = vmatprep.mubr.msk.bf16.mxu1 %vm388_vm2, %v356_v7  ;;  %6263 = vmatprep.mubr.msk.bf16.mxu0 %vm388_vm2, %v6833_v4  ;;  %v6868_v4 = vld [vmem:[%s7017_s28 + $0x4c] sm:$0xff]   ;;  %v6870_v7 = vld [vmem:[%s7017_s28 + $0x5c] sm:$0xff]  }
  0x58   : > { %6304 = vmatpush3.bf16.msra.mxu0 %v6849_v63  ;;  %v6862_v63 = vld [vmem:[%s7017_s28 + $0xd4] sm:$0xff]   ;;  %v2765_v15 = vrot.slane %v6870_v7, 3  ;;  %v6892_v7 = vld [vmem:[%s7017_s28 + $0x4c] sm:$0xff]  }
  0x59   : > { %6681 = vmatprep.subr.msk.bf16.mxu0 %vm455_vm0, %v6857_v12 }
  0x5c   : > { %6306 = vmatpush3.bf16.msra.mxu0 %v2889_v17  ;;  %v6871_v17 = vld [vmem:[%s7017_s28 + $0x64] sm:$0xff]  }
  0x5d   : > { %6351 = vmatprep.subr.bf16.mxu0 %v7257_v27  ;;  %v2767_v23 = vrot.slane %v6871_v17, 3 }
  0x5e   : > { %6080 = vmatmul.mubr.msk.bf16.gmra.mrb[32].mxu1 %vm388_vm2, %v358_v22  ;;  %6264 = vmatmul.mubr.msk.bf16.gmra.mrb[8].mxu0 %vm388_vm2, %v6835_v16  ;;  %v6883_v16 = vld [vmem:[%s9607_s1 + $0xb8] sm:$0xff]  }
  0x5f   : > { %6083 = vmatprep.mubr.msk.bf16.mxu1 %vm388_vm2, %v360_v24  ;;  %6267 = vmatprep.mubr.msk.bf16.mxu0 %vm388_vm2, %v6838_v20  ;;  %v6873_v20 = vld [vmem:[%s7017_s28 + $0x6c] sm:$0xff]   ;;  %v2768_v26 = vsel %vm321_vm1, %v2765_v15, %v2767_v23 }
  0x60   : > { %v2769_v24 = vrot.slane %v6873_v20, 3  ;;  %v6953_v20 = vld [vmem:[%s9607_s1 + $0x6c] ss:$0 sps:$4 sm:$0xff]  }
  0x66   : > { %6084 = vmatmul.mubr.msk.bf16.gmra.mrb[36].mxu1 %vm388_vm2, %v362_v33  ;;  %6268 = vmatmul.mubr.msk.bf16.gmra.mrb[12].mxu0 %vm388_vm2, %v6840_v34 }
  0x67   : > { %6087 = vmatprep.mubr.msk.bf16.mxu1 %vm388_vm2, %v364_v36  ;;  %6271 = vmatprep.mubr.msk.bf16.mxu0 %vm388_vm2, %v6843_v37  ;;  %v6877_v36 = vld [vmem:[%s7017_s28 + $0x84] sm:$0xff]   ;;  %v6878_v37 = vld [vmem:[%s7017_s28 + $0x14] sm:$0xfc]  }
  0x6e   : > { %6088 = vmatmul.mubr.msk.bf16.gmra.mrb[40].mxu1 %vm388_vm2, %v366_v44  ;;  %6272 = vmatmul.mubr.msk.bf16.gmra.mrb[16].mxu0 %vm388_vm2, %v6845_v42  ;;  %v1142_v44 = vrot.slane %v6878_v37, 2 }
  0x6f   : > { %6099 = vmatprep.mubr.msk.bf16.mxu1 %vm388_vm2, %v6846_v46  ;;  %6275 = vmatprep.mubr.msk.bf16.mxu0 %vm388_vm2, %v6847_v47  ;;  %v1143_v46 = vrot.slane %v6879_v39, 2  ;;  %v6900_v39 = vld [vmem:[%s7017_s28 + $0xd4] sm:$0xff]  }
  0x76   : > { %6100 = vmatmul.mubr.msk.bf16.vlgmr.msra.gmra.mrb[0].mxu1 %vm388_vm2, %v5285_v49  ;;  %6276 = vmatmul.mubr.msk.bf16.gmra.mrb[20].mxu0 %vm388_vm2, %v6848_v51  ;;  %v1144_v51 = vsel %vm1141_vm4, %v1142_v44, %v1143_v46 }
  0x77   : > { %6103 = vmatprep.mubr.msk.bf16.mxu1 %vm388_vm2, %v7027_v10  ;;  %6279 = vmatprep.mubr.msk.bf16.mxu0 %vm388_vm2, %v6850_v52  ;;  %v1275_v10 = vsel %vm455_vm0, %v6875_v59, 0  ;;  %v6882_v52 = vld [vmem:[%s7017_s28 + $0x94] sm:$0xff]  }
  0x78   : > { %6144 = vmatpush3.bf16.msra.mxu1 %v6851_v3 }
  0x79   : > { %6145 = vmatprep.subr.bf16.mxu1 %v6858_v53 }
  0x7c   : > { %6146 = vmatpush3.bf16.msra.mxu1 %v6858_v53 }
  0x7d   : > { %6147 = vmatprep.subr.bf16.mxu1 %v6867_v8 }
  0x7e   : > { %6104 = vmatmul.mubr.msk.bf16.gmra.mrb[4].mxu1 %vm388_vm2, %v7038_v18  ;;  %6280 = vmatmul.mubr.msk.bf16.gmra.mrb[24].mxu0 %vm388_vm2, %v6852_v54  ;;  %v6856_v18 = vld [vmem:[%s7017_s28 + $0xb4] sm:$0xff]   ;;  %v2779_v54 = vrot.slane %v6882_v52, 3 }
  0x7f   : > { %6107 = vmatprep.mubr.msk.bf16.mxu1 %vm388_vm2, %v7052_v28  ;;  %6283 = vmatprep.mubr.msk.bf16.mxu0 %vm388_vm2, %v6853_v58  ;;  %v6859_v28 = vld [vmem:[%s7017_s28 + $0xbc] sm:$0xff]  }
  0x80   : > { %6148 = vmatpush3.bf16.msra.mxu1 %v6867_v8  ;;  %v1145_v8 = vrot.slane %v6881_v48, 2 }
  0x81   : > { %6677 = vmatprep.subr.msk.bf16.mxu1 %vm455_vm0, %v6875_v59 }
  0x84   : > { %6150 = vmatpush3.bf16.msra.mxu1 %v1275_v10  ;;  %v1146_v10 = vsel %vm1141_vm4, %v1143_v46, %v1145_v8  ;;  %v2795_v46 = vrot.slane %v6900_v39, 3  ;;  %v6921_v39 = vld [vmem:[%s7017_s28 + $0x80] sm:$0xff]  }
  0x85   : > { %6403 = vmatprep.subr.bf16.mxu1 %v6992_v1  ;;  %v6860_v1 = vld [vmem:[%s7017_s28 + $0xc4] sm:$0xff]  }
  0x86   : > { %6108 = vmatmul.mubr.msk.bf16.gmra.mrb[8].mxu1 %vm388_vm2, %v7060_v32  ;;  %6284 = vmatmul.mubr.msk.bf16.gmra.mrb[28].mxu0 %vm388_vm2, %v6854_v60  ;;  %v6861_v32 = vld [vmem:[%s7017_s28 + $0xcc] sm:$0xff]   ;;  %v6886_v60 = vld [vmem:[%s7017_s28 + $0x34] sm:$0xff]  }
  0x87   : > { %6111 = vmatprep.mubr.msk.bf16.mxu1 %vm388_vm2, %v7077_v41  ;;  %6287 = vmatprep.mubr.msk.bf16.mxu0 %vm388_vm2, %v6855_v61  ;;  %v6863_v41 = vld [vmem:[%s7017_s28 + $0x34] sm:$0xf8]  }
  0x8e   : > { %6112 = vmatmul.mubr.msk.bf16.gmra.mrb[12].mxu1 %vm388_vm2, %v7083_v45  ;;  %6288 = vmatmul.mubr.msk.bf16.gmra.mrb[32].mxu0 %vm388_vm2, %v6856_v18  ;;  %v2756_v45 = vrot.slane %v6863_v41, 3  ;;  %v1149_v41 = vrot.slane %v6886_v60, 2 }
  0x8f   : > { %6115 = vmatprep.mubr.msk.bf16.mxu1 %vm388_vm2, %v7089_v50  ;;  %6291 = vmatprep.mubr.msk.bf16.mxu0 %vm388_vm2, %v6859_v28  ;;  %v2757_v50 = vrot.slane %v6864_v62, 3  ;;  %v6887_v28 = vld [vmem:[%s7017_s28 + $0xa4] sm:$0xff]  }
  0x90   : > { %v2783_v62 = vrot.slane %v6887_v28, 3 }
  0x91   : > { %v2758_v3 = vsel %vm321_vm1, %v2756_v45, %v2757_v50  ;;  %v6950_v45 = vld [vmem:[%s9607_s1 + $0x54] sm:$0xff]  }
  0x96   : > { %6116 = vmatmul.mubr.msk.bf16.gmra.mrb[16].mxu1 %vm388_vm2, %v7100_v57  ;;  %6292 = vmatmul.mubr.msk.bf16.gmra.mrb[36].mxu0 %vm388_vm2, %v6860_v1  ;;  %v2759_v57 = vrot.slane %v6865_v2, 3  ;;  %v6888_v1 = vld [vmem:[%s7017_s28 + $0x3c] sm:$0xff]  }
  0x97   : > { %6119 = vmatprep.mubr.msk.bf16.mxu1 %vm388_vm2, %v7113_v0  ;;  %6295 = vmatprep.mubr.msk.bf16.mxu0 %vm388_vm2, %v6861_v32  ;;  %v2761_v0 = vrot.slane %v6868_v4, 3  ;;  %v6889_v32 = vld [vmem:[%s7017_s28 + $0xac] sm:$0xff]   ;;  %v6951_v2 = vld [vmem:[%s9607_s1 + $0x5c] sm:$0xff]   ;;  %v6890_v4 = vld [vmem:[%s7017_s28 + $0x44] sm:$0xff]  }
  0x98   : > { %v2760_v12 = vsel %vm321_vm1, %v2757_v50, %v2759_v57  ;;  %v1151_v50 = vrot.slane %v6888_v1, 2  ;;  %v6908_v1 = vld [vmem:[%s7017_s28 + $0x84] sm:$0xff]  }
  0x9e   : > { %6120 = vmatmul.mubr.msk.bf16.gmra.mrb[20].mxu1 %vm388_vm2, %v7129_v13  ;;  %6296 = vmatmul.mubr.msk.bf16.gmra.mrb[40].mxu0 %vm388_vm2, %v6862_v63  ;;  %v2762_v13 = vsel %vm321_vm1, %v2759_v57, %v2761_v0  ;;  %v2785_v63 = vrot.slane %v6889_v32, 3 }
  0x9f   : > { %6123 = vmatprep.mubr.msk.bf16.mxu1 %vm388_vm2, %v7136_v19  ;;  %6307 = vmatprep.mubr.msk.bf16.mxu0 %vm388_vm2, %v2758_v3  ;;  %v2763_v19 = vrot.slane %v6869_v5, 3  ;;  %v6891_v5 = vld [vmem:[%s7017_s28 + $0xb4] sm:$0xff]  }
  0xa1   : > { %v2766_v22 = vsel %vm321_vm1, %v2763_v19, %v2765_v15  ;;  %v2787_v15 = vrot.slane %v6891_v5, 3 }
  0xa6   : > { %6124 = vmatmul.mubr.msk.bf16.gmra.mrb[24].mxu1 %vm388_vm2, %v7153_v29  ;;  %6308 = vmatmul.mubr.msk.bf16.vlgmr.msra.gmra.mrb[0].mxu0 %vm388_vm2, %v2760_v12  ;;  %v2764_v29 = vsel %vm321_vm1, %v2761_v0, %v2763_v19  ;;  %v1152_v0 = vsel %vm1141_vm4, %v1149_v41, %v1151_v50  ;;  %v2786_v12 = vsel %vm321_vm1, %v2783_v62, %v2785_v63  ;;  %v1153_v19 = vrot.slane %v6890_v4, 2 }
  0xa7   : > { %6127 = vmatprep.mubr.msk.bf16.mxu1 %vm388_vm2, %v7162_v35  ;;  %6352 = vmatpush3.bf16.msra.mxu0 %v7257_v27  ;;  %v6896_v35 = vld [vmem:[%s9607_s1 + $0xc0] ss:$0 sps:$4 sm:$0xff]   ;;  %v2770_v27 = vsel %vm321_vm1, %v2767_v23, %v2769_v24 }
  0xa8   : > { %6311 = vmatprep.mubr.msk.bf16.mxu0 %vm388_vm2, %v2762_v13  ;;  %6353 = vmatprep.subr.bf16.mxu0 %v6872_v14  ;;  %v3443_v25 = vsel %vm455_vm0, %v6896_v35, 0  ;;  %v6952_v13 = vld [vmem:[%s9607_s1 + $0x64] sm:$0xff]  }
  0xab   : > { %6354 = vmatpush3.bf16.msra.mxu0 %v6872_v14  ;;  %v6893_v14 = vld [vmem:[%s7017_s28 + $0xbc] sm:$0xff]  }
  0xac   : > { %6355 = vmatprep.subr.bf16.mxu0 %v6883_v16  ;;  %v2789_v17 = vrot.slane %v6893_v14, 3  ;;  %v6914_v14 = vld [vmem:[%s7017_s28 + $0x9c] sm:$0xff]  }
  0xae   : > { %6128 = vmatmul.mubr.msk.bf16.gmra.mrb[28].mxu1 %vm388_vm2, %v7173_v40  ;;  %6312 = vmatmul.mubr.msk.bf16.gmra.mrb[4].mxu0 %vm388_vm2, %v2764_v29  ;;  %v6874_v40 = vld [vmem:[%s7017_s28 + $0x74] sm:$0xff]   ;;  %v1154_v29 = vsel %vm1141_vm4, %v1151_v50, %v1153_v19 }
  0xaf   : > { %6131 = vmatprep.mubr.msk.bf16.mxu1 %vm388_vm2, %v7177_v43  ;;  %6315 = vmatprep.mubr.msk.bf16.mxu0 %vm388_vm2, %v2766_v22  ;;  %v6876_v43 = vld [vmem:[%s7017_s28 + $0x7c] sm:$0xff]   ;;  %v2771_v30 = vrot.slane %v6874_v40, 3  ;;  %v2788_v22 = vsel %vm321_vm1, %v2785_v63, %v2787_v15  ;;  %v6898_v40 = vld [vmem:[%s7017_s28 + $0xcc] sm:$0xff]   ;;  %v1169_v63 = vrot.slane %v6908_v1, 2 }
  0xb0   : > { %6356 = vmatpush3.bf16.msra.mxu0 %v6883_v16  ;;  %v2773_v33 = vrot.slane %v6876_v43, 3  ;;  %v1155_v16 = vrot.slane %v6892_v7, 2  ;;  %v6911_v50 = vld [vmem:[%s7017_s28 + $0x58] sm:$0xff]  }
  0xb1   : > { %6682 = vmatprep.subr.msk.bf16.mxu0 %vm455_vm0, %v6896_v35  ;;  %v2772_v34 = vsel %vm321_vm1, %v2769_v24, %v2771_v30  ;;  %v6894_v35 = vld [vmem:[%s7017_s28 + $0x54] sm:$0xff]   ;;  %v6895_v24 = vld [vmem:[%s7017_s28 + $0xc4] sm:$0xff]   ;;  %v3315_v4 = vrot.slane %v6911_v50, 2 }
  0xb2   : > { %v2774_v42 = vsel %vm321_vm1, %v2771_v30, %v2773_v33  ;;  %v1156_v23 = vsel %vm1141_vm4, %v1153_v19, %v1155_v16  ;;  %v2791_v43 = vrot.slane %v6895_v24, 3  ;;  %v6915_v19 = vld [vmem:[%s7017_s28 + $0x68] sm:$0xff]   ;;  %v6917_v24 = vld [vmem:[%s7017_s28 + $0x70] sm:$0xff]  }
  0xb4   : > { %6358 = vmatpush3.bf16.msra.mxu0 %v3443_v25  ;;  %v6897_v25 = vld [vmem:[%s7017_s28 + $0x5c] sm:$0xff]  }
  0xb5   : > { %v1159_v30 = vrot.slane %v6897_v25, 2  ;;  %v6918_v25 = vld [vmem:[%s7017_s28 + $0xac] sm:$0xff]  }
  0xb6   : > { %6132 = vmatmul.mubr.msk.bf16.gmra.mrb[32].mxu1 %vm388_vm2, %v7198_v55  ;;  %6316 = vmatmul.mubr.msk.bf16.gmra.mrb[8].mxu0 %vm388_vm2, %v2768_v26  ;;  %v6880_v55 = vld [vmem:[%s7017_s28 + $0x8c] sm:$0xff]   ;;  %v2790_v26 = vsel %vm321_vm1, %v2787_v15, %v2789_v17 }
  0xb7   : > { %6135 = vmatprep.mubr.msk.bf16.mxu1 %vm388_vm2, %v7201_v56  ;;  %6319 = vmatprep.mubr.msk.bf16.mxu0 %vm388_vm2, %v2770_v27  ;;  %v2775_v56 = vrot.slane %v6877_v36, 3  ;;  %v2777_v47 = vrot.slane %v6880_v55, 3  ;;  %v1157_v27 = vrot.slane %v6894_v35, 2  ;;  %v2792_v36 = vsel %vm321_vm1, %v2789_v17, %v2791_v43  ;;  %v6916_v35 = vld [vmem:[%s7017_s28 + $0xa4] sm:$0xff]  }
  0xb8   : > { %v1175_v17 = vrot.slane %v6914_v14, 2 }
  0xb9   : > { %v2776_v49 = vsel %vm321_vm1, %v2773_v33, %v2775_v56  ;;  %v2778_v53 = vsel %vm321_vm1, %v2775_v56, %v2777_v47  ;;  %v2780_v61 = vsel %vm321_vm1, %v2777_v47, %v2779_v54  ;;  %v2793_v33 = vrot.slane %v6898_v40, 3  ;;  %v6902_v56 = vld [vmem:[%s7017_s28 + $0xdc] sm:$0xff]  }
  0xba   : > { %v1160_v37 = vsel %vm1141_vm4, %v1157_v27, %v1159_v30  ;;  %v2797_v48 = vrot.slane %v6902_v56, 3  ;;  %v6919_v40 = vld [vmem:[%s7017_s28 + $0x78] sm:$0xff]   ;;  %v6923_v56 = vld [vmem:[%s7017_s28 + $0x88] sm:$0xff]  }
  0xbb   : > { %v2794_v55 = vsel %vm321_vm1, %v2791_v43, %v2793_v33  ;;  %v2796_v52 = vsel %vm321_vm1, %v2793_v33, %v2795_v46  ;;  %v3321_v43 = vrot.slane %v6917_v24, 2  ;;  %v3323_v33 = vrot.slane %v6919_v40, 2 }
  0xbe   : > { %6136 = vmatmul.mubr.msk.bf16.gmra.mrb[36].mxu1 %vm388_vm2, %v7224_v6  ;;  %6320 = vmatmul.mubr.msk.bf16.gmra.mrb[12].mxu0 %vm388_vm2, %v2772_v34  ;;  %v6884_v6 = vld [vmem:[%s7017_s28 + $0x2c] sm:$0xff]   ;;  %v1158_v34 = vsel %vm1141_vm4, %v1155_v16, %v1157_v27  ;;  %v1177_v27 = vrot.slane %v6916_v35, 2  ;;  %v6938_v35 = vld [vmem:[%s7017_s28 + $0xb8] sm:$0xff]  }
  0xbf   : > { %6139 = vmatprep.mubr.msk.bf16.mxu1 %vm388_vm2, %v7228_v9  ;;  %6323 = vmatprep.mubr.msk.bf16.mxu0 %vm388_vm2, %v2774_v42  ;;  %v6885_v9 = vld [vmem:[%s7017_s28 + $0x9c] sm:$0xff]   ;;  %v1147_v58 = vrot.slane %v6884_v6, 2  ;;  %v6901_v42 = vld [vmem:[%s7017_s28 + $0x6c] sm:$0xff]  }
  0xc0   : > { %v2781_v59 = vrot.slane %v6885_v9, 3  ;;  %v1163_v47 = vrot.slane %v6901_v42, 2  ;;  %v6905_v9 = vld [vmem:[%s7017_s28 + $0x7c] sm:$0xff]  }
  0xc1   : > { %v1148_v18 = vsel %vm1141_vm4, %v1145_v8, %v1147_v58  ;;  %v1150_v3 = vsel %vm1141_vm4, %v1147_v58, %v1149_v41  ;;  %v2798_v8 = vsel %vm321_vm1, %v2795_v46, %v2797_v48  ;;  %v6907_v58 = vld [vmem:[%s7017_s28 + $0x48] sm:$0xff]   ;;  %v1167_v60 = vrot.slane %v6905_v9, 2  ;;  %v6909_v41 = vld [vmem:[%s7017_s28 + $0x50] sm:$0xff]   ;;  %v6922_v42 = vld [vmem:[%s7017_s28 + $0xbc] sm:$0xff]  }
  0xc2   : > { %v2784_v57 = vsel %vm321_vm1, %v2781_v59, %v2783_v62  ;;  %v6910_v62 = vld [vmem:[%s7017_s28 + $0x8c] sm:$0xff]   ;;  %v3325_v46 = vrot.slane %v6921_v39, 2 }
  0xc3   : > { %v6926_v9 = vld [vmem:[%s7017_s28 + $0x88] sm:$0xff]  }
  0xc6   : > { %6140 = vmatmul.mubr.msk.bf16.gmra.mrb[40].mxu1 %vm388_vm2, %v7244_v21  ;;  %6324 = vmatmul.mubr.msk.bf16.gmra.mrb[16].mxu0 %vm388_vm2, %v2776_v49  ;;  %v2782_v21 = vsel %vm321_vm1, %v2779_v54, %v2781_v59  ;;  %v6906_v54 = vld [vmem:[%s7017_s28 + $0x40] sm:$0xfc]  }
  0xc7   : > { %6151 = vmatprep.mubr.msk.bf16.mxu1 %vm388_vm2, %v1144_v51  ;;  %6327 = vmatprep.mubr.msk.bf16.mxu0 %vm388_vm2, %v2778_v53  ;;  %v6903_v51 = vld [vmem:[%s7017_s28 + $0x74] sm:$0xff]   ;;  %v6904_v53 = vld [vmem:[%s7017_s28 + $0xe4] ss:$0 sps:$4 sm:$0x77]  }
  0xc8   : > { %v1165_v59 = vrot.slane %v6903_v51, 2  ;;  %v6924_v51 = vld [vmem:[%s7017_s28 + $0xc4] ss:$0 sps:$4 sm:$0x33]  }
  0xca   : > { %v1166_v28 = vsel %vm1141_vm4, %v1163_v47, %v1165_v59  ;;  %v1168_v32 = vsel %vm1141_vm4, %v1165_v59, %v1167_v60 }
  0xce   : > { %6152 = vmatmul.mubr.msk.bf16.vlgmr.msra.gmra.mrb[0].mxu1 %vm388_vm2, %v1146_v10  ;;  %6328 = vmatmul.mubr.msk.bf16.gmra.mrb[20].mxu0 %vm388_vm2, %v2780_v61  ;;  %v2799_v10 = vrot.slane %v6904_v53, 3  ;;  %v3310_v61 = vrot.slane %v6906_v54, 2  ;;  %v6925_v53 = vld [vmem:[%s7017_s28 + $0x90] sm:$0xff]   ;;  %v6927_v54 = vld [vmem:[%s7017_s28 + $0x98] sm:$0xff]  }
  0xcf   : > { %6155 = vmatprep.mubr.msk.bf16.mxu1 %vm388_vm2, %v1148_v18  ;;  %6331 = vmatprep.mubr.msk.bf16.mxu0 %vm388_vm2, %v2782_v21  ;;  %v3311_v18 = vrot.slane %v6907_v58, 2  ;;  %v1185_v58 = vrot.slane %v6924_v51, 2  ;;  %v3329_v59 = vrot.slane %v6925_v53, 2 }
  0xd0   : > { %6407 = vmatpush3.bf16.msra.mxu1 %v6950_v45  ;;  %v2800_v21 = vsel %vm321_vm1, %v2797_v48, %v2799_v10  ;;  %v3327_v48 = vrot.slane %v6923_v56, 2  ;;  %v1722_v10 = vrot.slane %v6926_v9, 1 }
  0xd1   : > { %6404 = vmatprep.subr.bf16.mxu1 %v6951_v2  ;;  %v3312_v45 = vsel %vm1141_vm4, %v3310_v61, %v3311_v18 }
  0xd2   : > { %v1723_v1 = vsel %vm1696_vm3, %v1720_v38, %v1722_v10 }
  0xd4   : > { %6408 = vmatpush3.bf16.msra.mxu1 %v6951_v2  ;;  %v3313_v2 = vrot.slane %v6909_v41, 2 }
  0xd5   : > { %6405 = vmatprep.subr.bf16.mxu1 %v6952_v13 }
  0xd6   : > { %6156 = vmatmul.mubr.msk.bf16.gmra.mrb[4].mxu1 %vm388_vm2, %v1150_v3  ;;  %6332 = vmatmul.mubr.msk.bf16.gmra.mrb[24].mxu0 %vm388_vm2, %v2784_v57  ;;  %v1171_v3 = vrot.slane %v6910_v62, 2  ;;  %v1170_v57 = vsel %vm1141_vm4, %v1167_v60, %v1169_v63  ;;  %v3314_v5 = vsel %vm1141_vm4, %v3311_v18, %v3313_v2  ;;  %v3331_v60 = vrot.slane %v6927_v54, 2  ;;  %v6928_v18 = vld [vmem:[%s7017_s28 + $0x90] sm:$0xff]   ;;  %v6931_v62 = vld [vmem:[%s7017_s28 + $0xa8] sm:$0xff]  }
  0xd7   : > { %6159 = vmatprep.mubr.msk.bf16.mxu1 %vm388_vm2, %v1152_v0  ;;  %6335 = vmatprep.mubr.msk.bf16.mxu0 %vm388_vm2, %v2786_v12  ;;  %v6912_v0 = vld [vmem:[%s7017_s28 + $0x94] sm:$0xff]   ;;  %v6913_v12 = vld [vmem:[%s7017_s28 + $0x60] sm:$0xff]   ;;  %v3335_v38 = vrot.slane %v6931_v62, 2 }
  0xd8   : > { %6409 = vmatpush3.bf16.msra.mxu1 %v6952_v13  ;;  %v1172_v7 = vsel %vm1141_vm4, %v1169_v63, %v1171_v3  ;;  %v3316_v13 = vsel %vm1141_vm4, %v3313_v2, %v3315_v4  ;;  %v1173_v15 = vrot.slane %v6912_v0, 2  ;;  %v3317_v16 = vrot.slane %v6913_v12, 2  ;;  %v6932_v2 = vld [vmem:[%s7017_s28 + $0xa0] sm:$0xff]   ;;  %v6934_v0 = vld [vmem:[%s7017_s28 + $0xa8] sm:$0xff]  }
  0xd9   : > { %6679 = vmatprep.subr.msk.bf16.mxu1 %vm455_vm0, %v6953_v20  ;;  %v3319_v20 = vrot.slane %v6915_v19, 2  ;;  %v3332_v41 = vsel %vm1141_vm4, %v3329_v59, %v3331_v60  ;;  %v1728_v12 = vrot.slane %v6932_v2, 1 }
  0xdc   : > { %6410 = vmatpush3.bf16.msra.mxu1 %v7030_v11  ;;  %v6899_v11 = vld [vmem:[%s7017_s28 + $0x64] sm:$0xff]  }
  0xdd   : > { %v1161_v44 = vrot.slane %v6899_v11, 2  ;;  %v6920_v11 = vld [vmem:[%s7017_s28 + $0xb4] sm:$0xff]  }
  0xde   : > { %6160 = vmatmul.mubr.msk.bf16.gmra.mrb[8].mxu1 %vm388_vm2, %v1154_v29  ;;  %6336 = vmatmul.mubr.msk.bf16.gmra.mrb[28].mxu0 %vm388_vm2, %v2788_v22  ;;  %v1174_v29 = vsel %vm1141_vm4, %v1171_v3, %v1173_v15  ;;  %v3318_v22 = vsel %vm1141_vm4, %v3315_v4, %v3317_v16 }
  0xdf   : > { %6163 = vmatprep.mubr.msk.bf16.mxu1 %vm388_vm2, %v1156_v23  ;;  %6339 = vmatprep.mubr.msk.bf16.mxu0 %vm388_vm2, %v2790_v26  ;;  %v1162_v49 = vsel %vm1141_vm4, %v1159_v30, %v1161_v44  ;;  %v1164_v6 = vsel %vm1141_vm4, %v1161_v44, %v1163_v47  ;;  %v1176_v23 = vsel %vm1141_vm4, %v1173_v15, %v1175_v17  ;;  %v1179_v30 = vrot.slane %v6918_v25, 2 }
  0xe0   : > { %v3320_v26 = vsel %vm1141_vm4, %v3317_v16, %v3319_v20  ;;  %v1181_v44 = vrot.slane %v6920_v11, 2  ;;  %v1183_v47 = vrot.slane %v6922_v42, 2  ;;  %v6936_v16 = vld [vmem:[%s7017_s28 + $0xb0] sm:$0xff]   ;;  %v6942_v11 = vld [vmem:[%s7017_s28 + $0xc8] sm:$0xff]  }
  0xe1   : > { %v1732_v24 = vrot.slane %v6936_v16, 1 }
  0xe2   : > { %v1186_v61 = vsel %vm1141_vm4, %v1183_v47, %v1185_v58  ;;  %v6947_v58 = vld [vmem:[%s7017_s28 + $0xf0] ss:$0 sps:$4 sm:$0x33]  }
  0xe6   : > { %6164 = vmatmul.mubr.msk.bf16.gmra.mrb[12].mxu1 %vm388_vm2, %v1158_v34  ;;  %6340 = vmatmul.mubr.msk.bf16.gmra.mrb[32].mxu0 %vm388_vm2, %v2792_v36  ;;  %v1178_v34 = vsel %vm1141_vm4, %v1175_v17, %v1177_v27  ;;  %v3322_v36 = vsel %vm1141_vm4, %v3319_v20, %v3321_v43 }
  0xe7   : > { %6167 = vmatprep.mubr.msk.bf16.mxu1 %vm388_vm2, %v1160_v37  ;;  %6343 = vmatprep.mubr.msk.bf16.mxu0 %vm388_vm2, %v2794_v55  ;;  %v1180_v37 = vsel %vm1141_vm4, %v1177_v27, %v1179_v30  ;;  %v3324_v55 = vsel %vm1141_vm4, %v3321_v43, %v3323_v33  ;;  %v6940_v43 = vld [vmem:[%s7017_s28 + $0xc0] sm:$0xff]  }
  0xe8   : > { %v1736_v39 = vrot.slane %v6940_v43, 1 }
  0xee   : > { %6168 = vmatmul.mubr.msk.bf16.gmra.mrb[16].mxu1 %vm388_vm2, %v1162_v49  ;;  %6344 = vmatmul.mubr.msk.bf16.gmra.mrb[36].mxu0 %vm388_vm2, %v2796_v52  ;;  %v1182_v49 = vsel %vm1141_vm4, %v1179_v30, %v1181_v44  ;;  %v3326_v52 = vsel %vm1141_vm4, %v3323_v33, %v3325_v46 }
  0xef   : > { %6171 = vmatprep.mubr.msk.bf16.mxu1 %vm388_vm2, %v1164_v6  ;;  %6347 = vmatprep.mubr.msk.bf16.mxu0 %vm388_vm2, %v2798_v8  ;;  %v1184_v6 = vsel %vm1141_vm4, %v1181_v44, %v1183_v47  ;;  %v3328_v8 = vsel %vm1141_vm4, %v3325_v46, %v3327_v48  ;;  %v6944_v46 = vld [vmem:[%s7017_s28 + $0xd0] ss:$0 sps:$4 sm:$0x11]  }
  0xf6   : > { %6172 = vmatmul.mubr.msk.bf16.gmra.mrb[20].mxu1 %vm388_vm2, %v1166_v28  ;;  %6348 = vmatmul.mubr.msk.bf16.gmra.mrb[40].mxu0 %vm388_vm2, %v2800_v21  ;;  %v3330_v28 = vsel %vm1141_vm4, %v3327_v48, %v3329_v59  ;;  %v6929_v21 = vld [vmem:[%s7017_s28 + $0xa0] sm:$0xff]  }
  0xf7   : > { %6175 = vmatprep.mubr.msk.bf16.mxu1 %vm388_vm2, %v1168_v32  ;;  %6359 = vmatprep.mubr.msk.bf16.mxu0 %vm388_vm2, %v3312_v45  ;;  %v6930_v32 = vld [vmem:[%s7017_s28 + $0x98] sm:$0xff]   ;;  %v1724_v45 = vrot.slane %v6928_v18, 1  ;;  %v3333_v31 = vrot.slane %v6929_v21, 2 }
  0xf8   : > { %v1726_v50 = vrot.slane %v6930_v32, 1 }
  0xf9   : > { %v1725_v63 = vsel %vm1696_vm3, %v1722_v10, %v1724_v45  ;;  %v3334_v3 = vsel %vm1141_vm4, %v3331_v60, %v3333_v31  ;;  %v3353_v10 = vrot.slane %v6947_v58, 2 }
  0xfa   : > { %v1727_v4 = vsel %vm1696_vm3, %v1724_v45, %v1726_v50  ;;  %v1729_v15 = vsel %vm1696_vm3, %v1726_v50, %v1728_v12 }
  0xfe   : > { %6176 = vmatmul.mubr.msk.bf16.gmra.mrb[24].mxu1 %vm388_vm2, %v1170_v57  ;;  %6360 = vmatmul.mubr.msk.bf16.vlgmr.msra.gmra.mrb[0].mxu0 %vm388_vm2, %v3314_v5  ;;  %v6933_v57 = vld [vmem:[%s7017_s28 + $0xb0] sm:$0xff]   ;;  %v3336_v5 = vsel %vm1141_vm4, %v3333_v31, %v3335_v38 }
  0xff   : > { %6179 = vmatprep.mubr.msk.bf16.mxu1 %vm388_vm2, %v1172_v7  ;;  %6363 = vmatprep.mubr.msk.bf16.mxu0 %vm388_vm2, %v3316_v13  ;;  %v6935_v7 = vld [vmem:[%s7017_s28 + $0xb8] sm:$0xff]   ;;  %v3337_v14 = vrot.slane %v6933_v57, 2  ;;  %v1730_v13 = vrot.slane %v6934_v0, 1 }
 0x100   : > { %v3339_v19 = vrot.slane %v6935_v7, 2 }
 0x101   : > { %v3338_v17 = vsel %vm1141_vm4, %v3335_v38, %v3337_v14  ;;  %v1731_v20 = vsel %vm1696_vm3, %v1728_v12, %v1730_v13  ;;  %v1733_v27 = vsel %vm1696_vm3, %v1730_v13, %v1732_v24 }
 0x106   : > { %6180 = vmatmul.mubr.msk.bf16.gmra.mrb[28].mxu1 %vm388_vm2, %v1174_v29  ;;  %6364 = vmatmul.mubr.msk.bf16.gmra.mrb[4].mxu0 %vm388_vm2, %v3318_v22  ;;  %v6937_v29 = vld [vmem:[%s7017_s28 + $0xc0] sm:$0xff]   ;;  %v3340_v22 = vsel %vm1141_vm4, %v3337_v14, %v3339_v19 }
 0x107   : > { %6183 = vmatprep.mubr.msk.bf16.mxu1 %vm388_vm2, %v1176_v23  ;;  %6367 = vmatprep.mubr.msk.bf16.mxu0 %vm388_vm2, %v3320_v26  ;;  %v6939_v23 = vld [vmem:[%s7017_s28 + $0xc8] sm:$0xff]   ;;  %v3341_v25 = vrot.slane %v6937_v29, 2  ;;  %v1734_v26 = vrot.slane %v6938_v35, 1 }
 0x108   : > { %v3343_v40 = vrot.slane %v6939_v23, 2 }
 0x109   : > { %v3342_v30 = vsel %vm1141_vm4, %v3339_v19, %v3341_v25  ;;  %v1735_v33 = vsel %vm1696_vm3, %v1732_v24, %v1734_v26  ;;  %v1737_v44 = vsel %vm1696_vm3, %v1734_v26, %v1736_v39 }
 0x10e   : > { %6184 = vmatmul.mubr.msk.bf16.gmra.mrb[32].mxu1 %vm388_vm2, %v1178_v34  ;;  %6368 = vmatmul.mubr.msk.bf16.gmra.mrb[8].mxu0 %vm388_vm2, %v3322_v36  ;;  %v6941_v34 = vld [vmem:[%s7017_s28 + $0xd0] sm:$0xff]   ;;  %v3344_v36 = vsel %vm1141_vm4, %v3341_v25, %v3343_v40 }
 0x10f   : > { %6187 = vmatprep.mubr.msk.bf16.mxu1 %vm388_vm2, %v1180_v37  ;;  %6371 = vmatprep.mubr.msk.bf16.mxu0 %vm388_vm2, %v3324_v55  ;;  %v6943_v37 = vld [vmem:[%s7017_s28 + $0xd8] sm:$0xff]   ;;  %v3345_v42 = vrot.slane %v6941_v34, 2  ;;  %v1738_v55 = vrot.slane %v6942_v11, 1 }
 0x110   : > { %v3347_v56 = vrot.slane %v6943_v37, 2 }
 0x111   : > { %v3346_v47 = vsel %vm1141_vm4, %v3343_v40, %v3345_v42  ;;  %v1739_v48 = vsel %vm1696_vm3, %v1736_v39, %v1738_v55 }
 0x112   : > { %v3348_v51 = vsel %vm1141_vm4, %v3345_v42, %v3347_v56 }
 0x116   : > { %6188 = vmatmul.mubr.msk.bf16.gmra.mrb[36].mxu1 %vm388_vm2, %v1182_v49  ;;  %6372 = vmatmul.mubr.msk.bf16.gmra.mrb[12].mxu0 %vm388_vm2, %v3326_v52  ;;  %v6945_v49 = vld [vmem:[%s7017_s28 + $0xe0] sm:$0xff]   ;;  %v6946_v52 = vld [vmem:[%s7017_s28 + $0xe8] sm:$0xff]   ;;  %s6683_s28 = smul.u32 176, %s9936_s10 }
 0x117   : > { %6191 = vmatprep.mubr.msk.bf16.mxu1 %vm388_vm2, %v1184_v6  ;;  %6375 = vmatprep.mubr.msk.bf16.mxu0 %vm388_vm2, %v3328_v8  ;;  %v1740_v6 = vrot.slane %v6944_v46, 1  ;;  %v3349_v53 = vrot.slane %v6945_v49, 2  ;;  %v3351_v9 = vrot.slane %v6946_v52, 2 }
 0x118   : > { %s9575_s30 = scalar_lea.vmem %s9608_s2, %s6683_s28 }
 0x119   : > { %v1741_v8 = vsel %vm1696_vm3, %v1738_v55, %v1740_v6  ;;  %v3350_v54 = vsel %vm1141_vm4, %v3347_v56, %v3349_v53  ;;  %v3352_v59 = vsel %vm1141_vm4, %v3349_v53, %v3351_v9  ;;  %v3354_v60 = vsel %vm1141_vm4, %v3351_v9, %v3353_v10 }
 0x11e   : > { %6192 = vmatmul.mubr.msk.bf16.gmra.mrb[40].mxu1 %vm388_vm2, %v1186_v61  ;;  %6376 = vmatmul.mubr.msk.bf16.gmra.mrb[16].mxu0 %vm388_vm2, %v3330_v28  ;;  %v3698_v61 = vlaneseq }
 0x11f   : > { %6227 = vmatprep.mubr.msk.bf16.mxu1 %vm388_vm2, %v1723_v1  ;;  %6379 = vmatprep.mubr.msk.bf16.mxu0 %vm388_vm2, %v3332_v41 }
 0x120   : > { %v7613_v18 = vshrl.u32 %v3698_v61, 7 }
 0x122   : > { %v3701_v28 = vadd.s32 16, %v7613_v18  ;;  %v3702_v32 = vadd.s32 24, %v7613_v18  ;;  %v3700_v41 = vadd.s32 8, %v7613_v18  ;;  %v3705_v2 = vadd.s32 48, %v7613_v18 }
 0x123   : > { %v7622_v62 = vmul.u32.u64.low 3123612579, %v7613_v18  ;;  %v7623_v45 = vmul.u32.u64.high 3123612579, %v7613_v18, %v7622_v62  ;;  %v3706_v14 = vadd.s32 56, %v7613_v18  ;;  %v7648_v23 = vadd.s32 40, %v7613_v18 }
 0x124   : > { %v7616_v1 = vmul.u32.u64.low 3123612579, %v3701_v28  ;;  %v7617_v21 = vmul.u32.u64.high 3123612579, %v3701_v28, %v7616_v1  ;;  %v7625_v31 = vmul.u32.u64.low 3123612579, %v3702_v32  ;;  %v7626_v50 = vmul.u32.u64.high 3123612579, %v3702_v32, %v7625_v31 }
 0x125   : > { %v7634_v57 = vmul.u32.u64.low 3123612579, %v3705_v2  ;;  %v7635_v0 = vmul.u32.u64.high 3123612579, %v3705_v2, %v7634_v57  ;;  %v7644_v29 = vmul.u32.u64.low 3123612579, %v3706_v14  ;;  %v7645_v35 = vmul.u32.u64.high 3123612579, %v3706_v14, %v7644_v29 }
 0x126   : > { %6228 = vmatmul.mubr.msk.bf16.vlgmr.msra.gmra.mrb[24].mxu1 %vm388_vm2, %v1725_v63  ;;  %6380 = vmatmul.mubr.msk.bf16.gmra.mrb[20].mxu0 %vm388_vm2, %v3334_v3  ;;  %v7628_v38 = vmul.u32.u64.low 3123612579, %v3700_v41  ;;  %v7629_v63 = vmul.u32.u64.high 3123612579, %v3700_v41, %v7628_v38  ;;  %v3771_v3 = vshrl.u32 %v7617_v21, 4  ;;  %v3782_v12 = vshrl.u32 %v7626_v50, 4 }
 0x127   : > { %6231 = vmatprep.mubr.msk.bf16.mxu1 %vm388_vm2, %v1727_v4  ;;  %6383 = vmatprep.mubr.msk.bf16.mxu0 %vm388_vm2, %v3336_v5  ;;  %v3749_v4 = vshrl.u32 %v7623_v45, 4  ;;  %v3703_v5 = vadd.s32 32, %v7613_v18  ;;  %v7652_v25 = vadd.s32 80, %v7613_v18  ;;  %v3815_v26 = vshrl.u32 %v7635_v0, 4 }
 0x128   : > { %v3772_v7 = vmul.u32 22, %v3771_v3  ;;  %v3760_v13 = vshrl.u32 %v7629_v63, 4  ;;  %v7672_v55 = vadd.s32 88, %v7613_v18  ;;  %v3826_v56 = vshrl.u32 %v7645_v35, 4 }
 0x129   : > { %v3750_v19 = vmul.u32 22, %v3749_v4  ;;  %v3816_v39 = vmul.u32 22, %v3815_v26  ;;  %v7701_v10 = vadd.s32 72, %v7613_v18  ;;  %v7705_v61 = vadd.s32 112, %v7613_v18 }
 0x12a   : > { %v7837_v6 = vadd.s32 144, %v7613_v18 }
 0x12b   : > { %v3751_v24 = vsub.s32 %v7613_v18, %v3750_v19  ;;  %v7690_v53 = vsub.s32 %v3705_v2, %v3816_v39  ;;  %v7723_v31 = vmul.u32.u64.low 3123612579, %v7701_v10  ;;  %v7724_v50 = vmul.u32.u64.high 3123612579, %v7701_v10, %v7723_v31 }
 0x12c   : > { %v7728_v2 = vmul.u32.u64.low 3123612579, %v7705_v61  ;;  %v7729_v3 = vmul.u32.u64.high 3123612579, %v7705_v61, %v7728_v2 }
 0x12d   : > { %vm4227_vm7 = vcmp.ne.s32.totalorder %v3751_v24, 0  ;;  %vm4271_vm9 = vcmp.lt.s32.totalorder %v3751_v24, 0  ;;  %v4359_v49 = vadd.s32 22, %v3751_v24  ;;  %vm4277_vm3 = vcmp.lt.s32.totalorder %v7690_v53, 0 }
 0x12e   : > { %6232 = vmatmul.mubr.msk.bf16.gmra.mrb[28].mxu1 %vm388_vm2, %v1729_v15  ;;  %6384 = vmatmul.mubr.msk.bf16.gmra.mrb[24].mxu0 %vm388_vm2, %v3338_v17  ;;  %v7641_v15 = vmul.u32.u64.low 3123612579, %v3703_v5  ;;  %v7642_v16 = vmul.u32.u64.high 3123612579, %v3703_v5, %v7641_v15  ;;  %v3773_v17 = vsub.s32 %v3701_v28, %v3772_v7  ;;  %vm7682_vm14 = vmand %vm4271_vm9, %vm4227_vm7  ;;  %v4365_v0 = vadd.s32 22, %v7690_v53 }
 0x12f   : > { %6235 = vmatprep.mubr.msk.bf16.mxu1 %vm388_vm2, %v1731_v20  ;;  %6387 = vmatprep.mubr.msk.bf16.mxu0 %vm388_vm2, %v3340_v22  ;;  %v3783_v20 = vmul.u32 22, %v3782_v12  ;;  %v3761_v22 = vmul.u32 22, %v3760_v13  ;;  %v4403_v1 = vsel %vm7682_vm14, %v4359_v49, %v3751_v24  ;;  %v9609_v13 = vmov 0.0  }
 0x130   : > { %vm4229_vm5 = vcmp.ne.s32.totalorder %v3773_v17, 0  ;;  %vm4273_vm6 = vcmp.lt.s32.totalorder %v3773_v17, 0  ;;  %v4361_v34 = vadd.s32 22, %v3773_v17  ;;  %v3793_v42 = vshrl.u32 %v7642_v16, 4 }
 0x131   : > { %v3784_v40 = vsub.s32 %v3702_v32, %v3783_v20  ;;  %vm7666_vm8 = vmand %vm4273_vm6, %vm4229_vm5  ;;  %vm4447_vm4 = vcmp.lt.s32.totalorder %v4403_v1, 16  ;;  %v3903_v37 = vshrl.u32 %v7729_v3, 4 }
 0x132   : > { %v3794_v9 = vmul.u32 22, %v3793_v42  ;;  %v7758_v15 = vsel %vm4447_vm4, 1.0, %v9609_v13 }
 0x133   : > { %vm4230_vm10 = vcmp.ne.s32.totalorder %v3784_v40, 0  ;;  %vm4274_vm11 = vcmp.lt.s32.totalorder %v3784_v40, 0  ;;  %9682 = vst [vmem:[#allocation3_spill] sm:$0xff] %v7758_v15 }
 0x134   : > { %vm7686_vm15 = vmand %vm4274_vm11, %vm4230_vm10  ;;  %v7719_v62 = vsub.s32 %v3703_v5, %v3794_v9  ;;  %v7844_v9 = vadd.s32 128, %v7613_v18 }
 0x136   : > { %6236 = vmatmul.mubr.msk.bf16.gmra.mrb[32].mxu1 %vm388_vm2, %v1733_v27  ;;  %6388 = vmatmul.mubr.msk.bf16.gmra.mrb[28].mxu0 %vm388_vm2, %v3342_v30  ;;  %v3762_v27 = vsub.s32 %v3700_v41, %v3761_v22  ;;  %v7656_v43 = vmul.u32.u64.low 3123612579, %v7648_v23  ;;  %v7657_v30 = vmul.u32.u64.high 3123612579, %v7648_v23, %v7656_v43  ;;  %vm4231_vm6 = vcmp.ne.s32.totalorder %v7719_v62, 0 }
 0x137   : > { %6239 = vmatprep.mubr.msk.bf16.mxu1 %vm388_vm2, %v1735_v33  ;;  %6391 = vmatprep.mubr.msk.bf16.mxu0 %vm388_vm2, %v3344_v36  ;;  %v7660_v33 = vadd.s32 64, %v7613_v18  ;;  %v7663_v11 = vmul.u32.u64.low 3123612579, %v7652_v25  ;;  %v7664_v36 = vmul.u32.u64.high 3123612579, %v7652_v25, %v7663_v11  ;;  %vm4275_vm7 = vcmp.lt.s32.totalorder %v7719_v62, 0 }
 0x138   : > { %vm4228_vm12 = vcmp.ne.s32.totalorder %v3762_v27, 0  ;;  %vm4272_vm13 = vcmp.lt.s32.totalorder %v3762_v27, 0  ;;  %v4360_v52 = vadd.s32 22, %v3762_v27  ;;  %v4363_v35 = vadd.s32 22, %v7719_v62 }
 0x139   : > { %vm7696_vm0 = vmand %vm4272_vm13, %vm4228_vm12  ;;  %v3859_v21 = vshrl.u32 %v7664_v36, 4  ;;  %v7795_v43 = vadd.s32 120, %v7613_v18  ;;  %v7803_v11 = vadd.s32 104, %v7613_v18 }
 0x13a   : > { %v4404_v41 = vsel %vm7696_vm0, %v4360_v52, %v3762_v27  ;;  %vm7772_vm12 = vmand %vm4275_vm7, %vm4231_vm6  ;;  %v7900_v2 = vmul.u32.u64.low 3123612579, %v7844_v9  ;;  %v7901_v3 = vmul.u32.u64.high 3123612579, %v7844_v9, %v7900_v2 }
 0x13b   : > { %v3860_v57 = vmul.u32 22, %v3859_v21  ;;  %v4407_v39 = vsel %vm7772_vm12, %v4363_v35, %v7719_v62  ;;  %v8029_v2 = vadd.s32 184, %v7613_v18 }
 0x13c   : > { %vm7852_vm6 = vcmp.lt.s32.totalorder %v4407_v39, 16 }
 0x13e   : > { %6240 = vmatmul.mubr.msk.bf16.gmra.mrb[36].mxu1 %vm388_vm2, %v1737_v44  ;;  %6392 = vmatmul.mubr.msk.bf16.gmra.mrb[32].mxu0 %vm388_vm2, %v3346_v47  ;;  %v7676_v44 = vmul.u32.u64.low 3123612579, %v7660_v33  ;;  %v7677_v46 = vmul.u32.u64.high 3123612579, %v7660_v33, %v7676_v44  ;;  %v4405_v47 = vsel %vm7666_vm8, %v4361_v34, %v3773_v17  ;;  %vm7739_vm8 = vcmp.lt.s32.totalorder %v4404_v41, 16 }
 0x13f   : > { %6243 = vmatprep.mubr.msk.bf16.mxu1 %vm388_vm2, %v1739_v48  ;;  %6395 = vmatprep.mubr.msk.bf16.mxu0 %vm388_vm2, %v3348_v51  ;;  %v4362_v51 = vadd.s32 22, %v3784_v40  ;;  %vm7707_vm1 = vcmp.lt.s32.totalorder %v4405_v47, 16  ;;  %v7783_v24 = vsel %vm7739_vm8, 1.0, %v9609_v13 }
 0x140   : > { %v3837_v63 = vshrl.u32 %v7677_v46, 4  ;;  %v7755_v19 = vsel %vm7707_vm1, 1.0, %v9609_v13  ;;  %9685 = vst [vmem:[#allocation4_spill] sm:$0xff] %v7783_v24 }
 0x141   : > { %v4406_v32 = vsel %vm7686_vm15, %v4362_v51, %v3784_v40  ;;  %9681 = vst [vmem:[#allocation2_spill] sm:$0xff] %v7755_v19  ;;  %v7833_v51 = vmul.u32.u64.low 3123612579, %v7803_v11  ;;  %v7834_v52 = vmul.u32.u64.high 3123612579, %v7803_v11, %v7833_v51 }
 0x142   : > { %vm7731_vm5 = vcmp.lt.s32.totalorder %v4406_v32, 16  ;;  %v3838_v17 = vmul.u32 22, %v3837_v63  ;;  %v3925_v51 = vshrl.u32 %v7901_v3, 4 }
 0x143   : > { %v7766_v20 = vsel %vm7731_vm5, 1.0, %v9609_v13  ;;  %v3892_v35 = vshrl.u32 %v7834_v52, 4 }
 0x144   : > { %v7808_v36 = vsub.s32 %v7660_v33, %v3838_v17  ;;  %v7823_v33 = vmul.u32.u64.low 3123612579, %v7795_v43  ;;  %v7824_v46 = vmul.u32.u64.high 3123612579, %v7795_v43, %v7823_v33 }
 0x145   : > { %v3893_v48 = vmul.u32 22, %v3892_v35 }
 0x146   : > { %6244 = vmatmul.mubr.msk.bf16.gmra.mrb[40].mxu1 %vm388_vm2, %v1741_v8  ;;  %6396 = vmatmul.mubr.msk.bf16.gmra.mrb[36].mxu0 %vm388_vm2, %v3350_v54  ;;  %v7693_v8 = vmul.u32.u64.low 3123612579, %v7672_v55  ;;  %v7694_v54 = vmul.u32.u64.high 3123612579, %v7672_v55, %v7693_v8  ;;  %vm4279_vm4 = vcmp.lt.s32.totalorder %v7808_v36, 0  ;;  %v4367_v32 = vadd.s32 22, %v7808_v36 }
 0x147   : > { %6399 = vmatprep.mubr.msk.bf16.mxu0 %vm388_vm2, %v3352_v59  ;;  %v3827_v59 = vmul.u32 22, %v3826_v56 }
 0x148   : > { %v3870_v5 = vshrl.u32 %v7694_v54, 4 }
 0x149   : > { %v3828_v45 = vsub.s32 %v3706_v14, %v3827_v59  ;;  %v7750_v14 = vadd.s32 96, %v7613_v18 }
 0x14a   : > { %v3871_v27 = vmul.u32 22, %v3870_v5  ;;  %v8043_v5 = vadd.s32 168, %v7613_v18 }
 0x14b   : > { %vm4234_vm10 = vcmp.ne.s32.totalorder %v3828_v45, 0  ;;  %vm4278_vm11 = vcmp.lt.s32.totalorder %v3828_v45, 0  ;;  %v4366_v22 = vadd.s32 22, %v3828_v45 }
 0x14c   : > { %vm7790_vm13 = vmand %vm4278_vm11, %vm4234_vm10  ;;  %v7820_v44 = vsub.s32 %v7672_v55, %v3871_v27 }
 0x14d   : > { %v4410_v42 = vsel %vm7790_vm13, %v4366_v22, %v3828_v45 }
 0x14e   : > { %6400 = vmatmul.mubr.msk.bf16.gmra.mrb[40].mxu0 %vm388_vm2, %v3354_v60  ;;  %v3804_v60 = vshrl.u32 %v7657_v30, 4  ;;  %vm4233_vm2 = vcmp.ne.s32.totalorder %v7690_v53, 0  ;;  %v7799_v30 = vmul.u32.u64.low 3123612579, %v7750_v14  ;;  %v7800_v34 = vmul.u32.u64.high 3123612579, %v7750_v14, %v7799_v30 }
 0x14f   : > { %vm7745_vm9 = vmand %vm4277_vm3, %vm4233_vm2  ;;  %vm4235_vm3 = vcmp.ne.s32.totalorder %v7808_v36, 0  ;;  %vm7856_vm7 = vcmp.lt.s32.totalorder %v4410_v42, 16  ;;  %vm4282_vm10 = vcmp.lt.s32.totalorder %v7820_v44, 0 }
 0x150   : > { %v3805_v38 = vmul.u32 22, %v3804_v60  ;;  %v4409_v26 = vsel %vm7745_vm9, %v4365_v0, %v7690_v53  ;;  %v3904_v53 = vmul.u32 22, %v3903_v37  ;;  %vm4238_vm9 = vcmp.ne.s32.totalorder %v7820_v44, 0  ;;  %vm7881_vm11 = vmand %vm4279_vm4, %vm4235_vm3 }
 0x151   : > { %vm7848_vm5 = vcmp.lt.s32.totalorder %v4409_v26, 16  ;;  %v3881_v45 = vshrl.u32 %v7800_v34, 4  ;;  %v7913_v0 = vadd.s32 152, %v7613_v18  ;;  %v4411_v7 = vsel %vm7881_vm11, %v4367_v32, %v7808_v36  ;;  %vm7931_vm13 = vmand %vm4282_vm10, %vm4238_vm9 }
 0x152   : > { %v7761_v16 = vsub.s32 %v7648_v23, %v3805_v38  ;;  %v7778_v23 = vsub.s32 %v7652_v25, %v3860_v57  ;;  %v3848_v25 = vshrl.u32 %v7724_v50, 4  ;;  %v7896_v38 = vsel %vm7848_vm5, 1.0, %v9609_v13 }
 0x153   : > { %v7890_v31 = vmul.u32.u64.low 3123612579, %v7837_v6  ;;  %v7891_v50 = vmul.u32.u64.high 3123612579, %v7837_v6, %v7890_v31  ;;  %v3905_v63 = vsub.s32 %v7705_v61, %v3904_v53  ;;  %v4370_v57 = vadd.s32 22, %v7820_v44 }
 0x154   : > { %vm4232_vm14 = vcmp.ne.s32.totalorder %v7761_v16, 0  ;;  %vm4276_vm15 = vcmp.lt.s32.totalorder %v7761_v16, 0  ;;  %v4364_v56 = vadd.s32 22, %v7761_v16  ;;  %vm4237_vm0 = vcmp.ne.s32.totalorder %v7778_v23, 0 }
 0x155   : > { %vm4281_vm1 = vcmp.lt.s32.totalorder %v7778_v23, 0  ;;  %vm7828_vm2 = vmand %vm4276_vm15, %vm4232_vm14  ;;  %v3849_v49 = vmul.u32 22, %v3848_v25  ;;  %v4369_v60 = vadd.s32 22, %v7778_v23  ;;  %v7918_v61 = vsel %vm7856_vm7, 1.0, %v9609_v13 }
 0x156   : > { %v4408_v1 = vsel %vm7828_vm2, %v4364_v56, %v7761_v16  ;;  %vm7870_vm8 = vmand %vm4281_vm1, %vm4237_vm0  ;;  %9700 = vst [vmem:[#allocation5_spill] sm:$0xff] %v7918_v61  ;;  %v3914_v16 = vshrl.u32 %v7824_v46, 4  ;;  %v3882_v29 = vmul.u32 22, %v3881_v45  ;;  %vm4241_vm1 = vcmp.ne.s32.totalorder %v3905_v63, 0 }
 0x157   : > { %v7886_v62 = vsub.s32 %v7701_v10, %v3849_v49  ;;  %v7906_v10 = vsel %vm7852_vm6, 1.0, %v9609_v13  ;;  %v4413_v4 = vsel %vm7870_vm8, %v4369_v60, %v7778_v23  ;;  %vm7920_vm12 = vcmp.lt.s32.totalorder %v4408_v1, 16 }
 0x158   : > { %vm7943_vm0 = vcmp.lt.s32.totalorder %v4413_v4, 16  ;;  %vm4285_vm2 = vcmp.lt.s32.totalorder %v3905_v63, 0  ;;  %v7948_v26 = vadd.s32 136, %v7613_v18  ;;  %v4414_v27 = vsel %vm7931_vm13, %v4370_v57, %v7820_v44 }
 0x159   : > { %vm4236_vm14 = vcmp.ne.s32.totalorder %v7886_v62, 0  ;;  %vm4280_vm15 = vcmp.lt.s32.totalorder %v7886_v62, 0  ;;  %v7956_v25 = vmul.u32.u64.low 3123612579, %v7913_v0  ;;  %v7957_v30 = vmul.u32.u64.high 3123612579, %v7913_v0, %v7956_v25  ;;  %vm7979_vm5 = vmand %vm4285_vm2, %vm4241_vm1 }
 0x15a   : > { %v7960_v34 = vadd.s32 176, %v7613_v18  ;;  %vm4455_vm3 = vcmp.lt.s32.totalorder %v4411_v7, 16  ;;  %vm7968_vm4 = vmand %vm4280_vm15, %vm4236_vm14  ;;  %v4368_v39 = vadd.s32 22, %v7886_v62  ;;  %v4373_v42 = vadd.s32 22, %v3905_v63 }
 0x15b   : > { %v3915_v56 = vmul.u32 22, %v3914_v16  ;;  %v7976_v44 = vsel %vm7920_vm12, 1.0, %v9609_v13  ;;  %v7984_v46 = vsub.s32 %v7750_v14, %v3882_v29  ;;  %v3947_v49 = vshrl.u32 %v7891_v50, 4 }
 0x15c   : > { %vm4458_vm6 = vcmp.lt.s32.totalorder %v4414_v27, 16  ;;  %v7989_v52 = vmul.u32.u64.low 3123612579, %v7948_v26  ;;  %v7990_v53 = vmul.u32.u64.high 3123612579, %v7948_v26, %v7989_v52  ;;  %v7995_v54 = vsel %vm7943_vm0, 1.0, %v9609_v13 }
 0x15d   : > { %9711 = vst [vmem:[#allocation6_spill] sm:$0xff] %v7995_v54  ;;  %v7998_v58 = vsel %vm4455_vm3, 1.0, %v9609_v13  ;;  %v8001_v14 = vmul.u32.u64.low 3123612579, %v7960_v34  ;;  %v8002_v59 = vmul.u32.u64.high 3123612579, %v7960_v34, %v8001_v14  ;;  %v4412_v60 = vsel %vm7968_vm4, %v4368_v39, %v7886_v62 }
 0x15e   : > { %9712 = vst [vmem:[#allocation7_spill] sm:$0xff] %v7998_v58  ;;  %v4417_v1 = vsel %vm7979_vm5, %v4373_v42, %v3905_v63  ;;  %v8010_v21 = vsub.s32 %v7795_v43, %v3915_v56  ;;  %v8013_v32 = vadd.s32 160, %v7613_v18  ;;  %v8018_v45 = vsel %vm4458_vm6, 1.0, %v9609_v13 }
 0x15f   : > { %9713 = vst [vmem:[#allocation8_spill] sm:$0xff] %v8018_v45  ;;  %vm4239_vm7 = vcmp.ne.s32.totalorder %v7984_v46, 0  ;;  %v8022_v31 = vsub.s32 %v7803_v11, %v3893_v48  ;;  %v3948_v62 = vmul.u32 22, %v3947_v49  ;;  %vm4283_vm8 = vcmp.lt.s32.totalorder %v7984_v46, 0 }
 0x160   : > { %v4371_v43 = vadd.s32 22, %v7984_v46  ;;  %v3926_v63 = vmul.u32 22, %v3925_v51  ;;  %vm8033_vm9 = vcmp.lt.s32.totalorder %v4412_v60, 16  ;;  %vm8037_vm10 = vcmp.lt.s32.totalorder %v4417_v1, 16  ;;  %vm8057_vm13 = vmand %vm4283_vm8, %vm4239_vm7 }
 0x161   : > { %v3958_v57 = vshrl.u32 %v7957_v30, 4  ;;  %vm4242_vm11 = vcmp.ne.s32.totalorder %v8010_v21, 0  ;;  %vm4286_vm12 = vcmp.lt.s32.totalorder %v8010_v21, 0  ;;  %vm4240_vm14 = vcmp.ne.s32.totalorder %v8022_v31, 0 }
 0x162   : > { %v8050_v12 = vmul.u32.u64.low 3123612579, %v8013_v32  ;;  %v8051_v16 = vmul.u32.u64.high 3123612579, %v8013_v32, %v8050_v12  ;;  %vm4284_vm15 = vcmp.lt.s32.totalorder %v8022_v31, 0  ;;  %v8064_v35 = vsub.s32 %v7837_v6, %v3948_v62  ;;  %vm8104_vm0 = vmand %vm4286_vm12, %vm4242_vm11 }
 0x163   : > { %v8067_v23 = vadd.s32 208, %v7613_v18  ;;  %v8070_v27 = vsub.s32 %v7844_v9, %v3926_v63  ;;  %v3936_v25 = vshrl.u32 %v7990_v53, 4  ;;  %v3959_v39 = vmul.u32 22, %v3958_v57  ;;  %vm8120_vm1 = vmand %vm4284_vm15, %vm4240_vm14 }
 0x164   : > { %v8074_v30 = vmul.u32.u64.low 3123612579, %v8029_v2  ;;  %v8075_v37 = vmul.u32.u64.high 3123612579, %v8029_v2, %v8074_v30  ;;  %v3991_v42 = vshrl.u32 %v8002_v59, 4  ;;  %v8085_v6 = vsel %vm8033_vm9, 1.0, %v9609_v13 }
 0x165   : > { %v8079_v56 = vmul.u32.u64.low 3123612579, %v8043_v5  ;;  %v8080_v33 = vmul.u32.u64.high 3123612579, %v8043_v5, %v8079_v56  ;;  %9720 = vst [vmem:[#allocation9_spill] sm:$0xff] %v8085_v6  ;;  %v8090_v9 = vsel %vm8037_vm10, 1.0, %v9609_v13  ;;  %v4415_v48 = vsel %vm8057_vm13, %v4371_v43, %v7984_v46 }
 0x166   : > { %9721 = vst [vmem:[#allocation10_spill] sm:$0xff] %v8090_v9  ;;  %v8096_v49 = vadd.s32 192, %v7613_v18  ;;  %v4374_v53 = vadd.s32 22, %v8010_v21  ;;  %v4372_v14 = vadd.s32 22, %v8022_v31  ;;  %vm4245_vm2 = vcmp.ne.s32.totalorder %v8064_v35, 0 }
 0x167   : > { %v8111_v59 = vmul.u32.u64.low 3123612579, %v8067_v23  ;;  %v8112_v46 = vmul.u32.u64.high 3123612579, %v8067_v23, %v8111_v59  ;;  %vm4289_vm3 = vcmp.lt.s32.totalorder %v8064_v35, 0  ;;  %v3937_v62 = vmul.u32 22, %v3936_v25 }
 0x168   : > { %v8127_v43 = vadd.s32 216, %v7613_v18  ;;  %vm4243_vm4 = vcmp.ne.s32.totalorder %v8070_v27, 0  ;;  %vm4287_vm5 = vcmp.lt.s32.totalorder %v8070_v27, 0  ;;  %v8134_v4 = vsub.s32 %v7913_v0, %v3959_v39  ;;  %vm8154_vm7 = vmand %vm4289_vm3, %vm4245_vm2 }
 0x169   : > { %v3992_v11 = vmul.u32 22, %v3991_v42  ;;  %v4377_v12 = vadd.s32 22, %v8064_v35  ;;  %v3969_v29 = vshrl.u32 %v8051_v16, 4  ;;  %vm4459_vm6 = vcmp.lt.s32.totalorder %v4415_v48, 16  ;;  %vm8161_vm8 = vmand %vm4287_vm5, %vm4243_vm4 }
 0x16a   : > { %v8141_v25 = vmul.u32.u64.low 3123612579, %v8096_v49  ;;  %v8142_v30 = vmul.u32.u64.high 3123612579, %v8096_v49, %v8141_v25  ;;  %v4418_v56 = vsel %vm8104_vm0, %v4374_v53, %v8010_v21  ;;  %v4416_v0 = vsel %vm8120_vm1, %v4372_v14, %v8022_v31 }
 0x16b   : > { %v4375_v16 = vadd.s32 22, %v8070_v27  ;;  %v8166_v21 = vsub.s32 %v7948_v26, %v3937_v62  ;;  %v4002_v31 = vshrl.u32 %v8075_v37, 4  ;;  %vm4246_vm9 = vcmp.ne.s32.totalorder %v8134_v4, 0 }
 0x16c   : > { %v8170_v48 = vmul.u32.u64.low 3123612579, %v8127_v43  ;;  %v8171_v52 = vmul.u32.u64.high 3123612579, %v8127_v43, %v8170_v48  ;;  %vm4290_vm10 = vcmp.lt.s32.totalorder %v8134_v4, 0  ;;  %v8176_v53 = vsub.s32 %v7960_v34, %v3992_v11 }
 0x16d   : > { %v3980_v14 = vshrl.u32 %v8080_v33, 4  ;;  %v8180_v59 = vsel %vm4459_vm6, 1.0, %v9609_v13  ;;  %vm8182_vm11 = vcmp.lt.s32.totalorder %v4418_v56, 16  ;;  %v4421_v37 = vsel %vm8154_vm7, %v4377_v12, %v8064_v35  ;;  %vm8204_vm13 = vmand %vm4290_vm10, %vm4246_vm9 }
 0x16e   : > { %9730 = vst [vmem:[#allocation11_spill] sm:$0xff] %v8180_v59  ;;  %v3970_v1 = vmul.u32 22, %v3969_v29  ;;  %vm8191_vm12 = vcmp.lt.s32.totalorder %v4416_v0, 16  ;;  %v4419_v34 = vsel %vm8161_vm8, %v4375_v16, %v8070_v27  ;;  %v4378_v33 = vadd.s32 22, %v8134_v4 }
 0x16f   : > { %v4035_v11 = vshrl.u32 %v8112_v46, 4  ;;  %vm4244_vm14 = vcmp.ne.s32.totalorder %v8166_v21, 0  ;;  %vm4288_vm15 = vcmp.lt.s32.totalorder %v8166_v21, 0  ;;  %v4003_v12 = vmul.u32 22, %v4002_v31 }
 0x170   : > { %v8211_v29 = vadd.s32 200, %v7613_v18  ;;  %vm8215_vm0 = vcmp.lt.s32.totalorder %v4421_v37, 16  ;;  %vm4249_vm1 = vcmp.ne.s32.totalorder %v8176_v53, 0  ;;  %vm4293_vm2 = vcmp.lt.s32.totalorder %v8176_v53, 0  ;;  %vm8238_vm4 = vmand %vm4288_vm15, %vm4244_vm14 }
 0x171   : > { %v3981_v0 = vmul.u32 22, %v3980_v14  ;;  %vm4463_vm3 = vcmp.lt.s32.totalorder %v4419_v34, 16  ;;  %v4376_v16 = vadd.s32 22, %v8166_v21  ;;  %v3971_v42 = vsub.s32 %v8013_v32, %v3970_v1  ;;  %vm8243_vm5 = vmand %vm4293_vm2, %vm4249_vm1 }
 0x172   : > { %v4013_v31 = vshrl.u32 %v8142_v30, 4  ;;  %v8229_v48 = vsel %vm8182_vm11, 1.0, %v9609_v13  ;;  %v4422_v37 = vsel %vm8204_vm13, %v4378_v33, %v8134_v4  ;;  %v4381_v32 = vadd.s32 22, %v8176_v53 }
 0x173   : > { %9740 = vst [vmem:[#allocation13_spill] sm:$0xff] %v8229_v48  ;;  %v4036_v30 = vmul.u32 22, %v4035_v11  ;;  %v8248_v26 = vsub.s32 %v8029_v2, %v4003_v12  ;;  %v4046_v4 = vshrl.u32 %v8171_v52, 4  ;;  %v8258_v35 = vsel %vm8191_vm12, 1.0, %v9609_v13 }
 0x174   : > { %v8252_v34 = vmul.u32.u64.low 3123612579, %v8211_v29  ;;  %v8253_v33 = vmul.u32.u64.high 3123612579, %v8211_v29, %v8252_v34  ;;  %9745 = vst [vmem:[#allocation14_spill] sm:$0xff] %v8258_v35  ;;  %v8263_v11 = vsel %vm8215_vm0, 1.0, %v9609_v13  ;;  %v3982_v2 = vsub.s32 %v8043_v5, %v3981_v0 }
 0x175   : > { %9746 = vst [vmem:[#allocation15_spill] sm:$0xff] %v8263_v11  ;;  %v4420_v52 = vsel %vm8238_vm4, %v4376_v16, %v8166_v21  ;;  %vm4247_vm6 = vcmp.ne.s32.totalorder %v3971_v42, 0  ;;  %vm4291_vm7 = vcmp.lt.s32.totalorder %v3971_v42, 0  ;;  %v4014_v12 = vmul.u32 22, %v4013_v31 }
 0x176   : > { %vm8274_vm8 = vcmp.lt.s32.totalorder %v4422_v37, 16  ;;  %v4425_v46 = vsel %vm8243_vm5, %v4381_v32, %v8176_v53  ;;  %v8285_v5 = vadd.s32 240, %v7613_v18  ;;  %v4379_v0 = vadd.s32 22, %v3971_v42  ;;  %vm8299_vm12 = vmand %vm4291_vm7, %vm4247_vm6 }
 0x177   : > { %vm4250_vm9 = vcmp.ne.s32.totalorder %v8248_v26, 0  ;;  %vm4294_vm10 = vcmp.lt.s32.totalorder %v8248_v26, 0  ;;  %v4047_v16 = vmul.u32 22, %v4046_v4  ;;  %vm8293_vm11 = vcmp.lt.s32.totalorder %v4420_v52, 16 }
 0x178   : > { %vm4248_vm13 = vcmp.ne.s32.totalorder %v3982_v2, 0  ;;  %vm4292_vm14 = vcmp.lt.s32.totalorder %v3982_v2, 0  ;;  %v8304_v53 = vadd.s32 224, %v7613_v18  ;;  %vm4469_vm15 = vcmp.lt.s32.totalorder %v4425_v46, 16  ;;  %vm8312_vm0 = vmand %vm4294_vm10, %vm4250_vm9 }
 0x179   : > { %v4382_v32 = vadd.s32 22, %v8248_v26  ;;  %v4015_v1 = vsub.s32 %v8096_v49, %v4014_v12  ;;  %v9760_v46 = vmov 0.0   ;;  %v4423_v49 = vsel %vm8299_vm12, %v4379_v0, %v3971_v42 }
 0x17a   : > { %v8341_v34 = vsel %vm4469_vm15, 1.0, %v9760_v46  ;;  %v8345_v42 = vadd.s32 248, %v7613_v18  ;;  %vm8355_vm7 = vcmp.lt.s32.totalorder %v4423_v49, 16 }
 0x17b   : > { %9765 = vst [vmem:[#allocation23_spill] sm:$0xff] %v8341_v34  ;;  %vm4251_vm5 = vcmp.ne.s32.totalorder %v4015_v1, 0  ;;  %vm4295_vm6 = vcmp.lt.s32.totalorder %v4015_v1, 0  ;;  %v4426_v37 = vsel %vm8312_vm0, %v4382_v32, %v8248_v26  ;;  %v8365_v34 = vadd.s32 232, %v7613_v18 }
 0x17c   : > { %vm8375_vm10 = vmand %vm4295_vm6, %vm4251_vm5 }
 0x1a1   : > { %v7826_v47 = vpop.f32.mrb[0].mxu1 }
 0x1a2   : > { %v7839_v55 = vpop.f32.mrb[1].mxu1 }
 0x1a3   : > { %v7846_v8 = vpop.f32.mrb[2].mxu1 }
 0x1a4   : > { %v7861_v28 = vpop.f32.mrb[3].mxu1 }
 0x1a9   : > { %v7936_v17 = vpop.f32.mrb[4].mxu1 }
 0x1aa   : > { %v7941_v22 = vpop.f32.mrb[5].mxu1 }
 0x1ab   : > { %v7950_v40 = vpop.f32.mrb[6].mxu1 }
 0x1ac   : > { %v7962_v36 = vpop.f32.mrb[7].mxu1 }
 0x1b1   : > { %v8015_v41 = vpop.f32.mrb[8].mxu1 }
 0x1b2   : > { %v8024_v50 = vpop.f32.mrb[9].mxu1 }
 0x1b3   : > { %v8031_v3 = vpop.f32.mrb[10].mxu1 }
 0x1b4   : > { %v8045_v7 = vpop.f32.mrb[11].mxu1 }
 0x1b9   : > { %v8098_v51 = vpop.f32.mrb[12].mxu1 }
 0x1ba   : > { %v8114_v60 = vpop.f32.mrb[13].mxu1 }
 0x1bb   : > { %v8129_v63 = vpop.f32.mrb[14].mxu1 }
 0x1bc   : > { %v8136_v57 = vpop.f32.mrb[15].mxu1 }
 0x1c1   : > { %v8189_v62 = vpop.f32.mrb[16].mxu1 }
 0x1c2   : > { %v8200_v56 = vpop.f32.mrb[17].mxu1 }
 0x1c3   : > { %v8213_v27 = vpop.f32.mrb[18].mxu1 }
 0x1c4   : > { %v8221_v39 = vpop.f32.mrb[19].mxu1 }
 0x1c5   : > { %9739 = vst [vmem:[#allocation12_spill] sm:$0xff] %v8221_v39  ;;  %v8266_v39 = vsel %vm4463_vm3, 1.0, %v9609_v13  ;;  %v8282_v13 = vsub.s32 %v8067_v23, %v4036_v30  ;;  %v4380_v30 = vadd.s32 22, %v3982_v2  ;;  %vm8329_vm3 = vmand %vm4292_vm14, %vm4248_vm13 }
 0x1c6   : > { %9747 = vst [vmem:[#allocation16_spill] sm:$0xff] %v8266_v39 }
 0x1c7   : > { %vm4253_vm1 = vcmp.ne.s32.totalorder %v8282_v13, 0  ;;  %vm4297_vm2 = vcmp.lt.s32.totalorder %v8282_v13, 0  ;;  %v4424_v23 = vsel %vm8329_vm3, %v4380_v30, %v3982_v2 }
 0x1c8   : > { %vm8347_vm4 = vmand %vm4297_vm2, %vm4253_vm1  ;;  %v8380_v2 = vmul.u32.u64.low 3123612579, %v8345_v42  ;;  %v8381_v32 = vmul.u32.u64.high 3123612579, %v8345_v42, %v8380_v2  ;;  %vm4468_vm12 = vcmp.lt.s32.totalorder %v4424_v23, 16 }
 0x1c9   : > { %v8272_v25 = vpop.f32.mrb[20].mxu1  ;;  %v8415_v2 = vsel %vm4468_vm12, 1.0, %v9760_v46 }
 0x1ca   : > { %9748 = vst [vmem:[#allocation17_spill] sm:$0xff] %v8272_v25  ;;  %v8287_v21 = vpop.f32.mrb[21].mxu1  ;;  %v4024_v25 = vshrl.u32 %v8253_v33, 4  ;;  %9778 = vst [vmem:[#allocation28_spill] sm:$0xff] %v8415_v2 }
 0x1cb   : > { %9751 = vst [vmem:[#allocation18_spill] sm:$0xff] %v8287_v21  ;;  %v8291_v31 = vpop.f32.mrb[22].mxu1  ;;  %v4048_v21 = vsub.s32 %v8127_v43, %v4047_v16  ;;  %v8352_v43 = vmul.u32.u64.low 3123612579, %v8304_v53  ;;  %v8353_v33 = vmul.u32.u64.high 3123612579, %v8304_v53, %v8352_v43 }
 0x1cc   : > { %9752 = vst [vmem:[#allocation19_spill] sm:$0xff] %v8291_v31  ;;  %v8306_v14 = vpop.f32.mrb[23].mxu1  ;;  %v8319_v52 = vmul.u32.u64.low 3123612579, %v8285_v5  ;;  %v8320_v31 = vmul.u32.u64.high 3123612579, %v8285_v5, %v8319_v52  ;;  %v4025_v39 = vmul.u32 22, %v4024_v25 }
 0x1cd   : > { %9757 = vst [vmem:[#allocation20_spill] sm:$0xff] %v8306_v14  ;;  %v8325_v14 = vsel %vm8274_vm8, 1.0, %v9760_v46  ;;  %v8338_v52 = vsel %vm8293_vm11, 1.0, %v9760_v46  ;;  %vm4254_vm8 = vcmp.ne.s32.totalorder %v4048_v21, 0  ;;  %vm4298_vm9 = vcmp.lt.s32.totalorder %v4048_v21, 0 }
 0x1ce   : > { %9761 = vst [vmem:[#allocation21_spill] sm:$0xff] %v8325_v14  ;;  %9764 = vst [vmem:[#allocation22_spill] sm:$0xff] %v8338_v52  ;;  %v4385_v14 = vadd.s32 22, %v8282_v13  ;;  %v4383_v52 = vadd.s32 22, %v4015_v1  ;;  %vm4470_vm11 = vcmp.lt.s32.totalorder %v4426_v37, 16  ;;  %v4079_v12 = vshrl.u32 %v8320_v31, 4 }
 0x1cf   : > { %vm8391_vm13 = vmand %vm4298_vm9, %vm4254_vm8  ;;  %v4026_v23 = vsub.s32 %v8211_v29, %v4025_v39  ;;  %v8412_v31 = vsel %vm4470_vm11, 1.0, %v9760_v46 }
 0x1d0   : > { %v4429_v4 = vsel %vm8347_vm4, %v4385_v14, %v8282_v13  ;;  %9777 = vst [vmem:[#allocation27_spill] sm:$0xff] %v8412_v31  ;;  %v4080_v26 = vmul.u32 22, %v4079_v12  ;;  %v4090_v12 = vshrl.u32 %v8381_v32, 4 }
 0x1d1   : > { %v6361_v11 = vpop.f32.mrb[0].mxu0  ;;  %vm4473_vm14 = vcmp.lt.s32.totalorder %v4429_v4, 16  ;;  %vm4252_vm0 = vcmp.ne.s32.totalorder %v4026_v23, 0  ;;  %vm4296_vm1 = vcmp.lt.s32.totalorder %v4026_v23, 0  ;;  %v4384_v14 = vadd.s32 22, %v4026_v23 }
 0x1d2   : > { %v8368_v49 = vadd.f32 %v6361_v11, %v7826_v47  ;;  %v3479_v43 = vpop.f32.mrb[1].mxu0  ;;  %v4386_v11 = vadd.s32 22, %v4048_v21  ;;  %vm8455_vm3 = vmand %vm4296_vm1, %vm4252_vm0 }
 0x1d3   : > { %v8384_v25 = vadd.f32 %v3479_v43, %v7839_v55  ;;  %v6362_v47 = vpop.f32.mrb[2].mxu0  ;;  %v8397_v0 = vmul.u32.u64.low 3123612579, %v8365_v34  ;;  %v8398_v55 = vmul.u32.u64.high 3123612579, %v8365_v34, %v8397_v0  ;;  %v8409_v43 = vsel %vm8355_vm7, 1.0, %v9760_v46 }
 0x1d4   : > { %9770 = vst [vmem:[#allocation24_spill] sm:$0xff] %v8368_v49  ;;  %v8387_v30 = vadd.f32 %v6362_v47, %v7846_v8  ;;  %v3482_v13 = vpop.f32.mrb[3].mxu0  ;;  %v4427_v8 = vsel %vm8375_vm10, %v4383_v52, %v4015_v1  ;;  %9776 = vst [vmem:[#allocation26_spill] sm:$0xff] %v8409_v43  ;;  %v4430_v39 = vsel %vm8391_vm13, %v4386_v11, %v4048_v21  ;;  %v4057_v1 = vshrl.u32 %v8353_v33, 4 }
 0x1d5   : > { %v8401_v37 = vadd.f32 %v3482_v13, %v7861_v28  ;;  %v8418_v28 = vadd.s32 272, %v7613_v18  ;;  %v4579_v4 = vmul.f32 %v8384_v25, %v7758_v15  ;;  %v8428_v52 = vsel %vm4473_vm14, 1.0, %v9760_v46 }
 0x1d6   : > { %9779 = vst [vmem:[#allocation29_spill] sm:$0xff] %v8428_v52  ;;  %vm8430_vm15 = vcmp.lt.s32.totalorder %v4427_v8, 16  ;;  %v8435_v47 = vadd.s32 256, %v7613_v18  ;;  %v4581_v13 = vmul.f32 %v8368_v49, %v7755_v19  ;;  %vm8442_vm2 = vcmp.lt.s32.totalorder %v4430_v39, 16 }
 0x1d7   : > { %9775 = vst [vmem:[#allocation25_spill] sm:$0xff] %v8401_v37  ;;  %v4580_v29 = vmul.f32 %v8401_v37, %v7783_v24  ;;  %v4582_v8 = vmul.f32 %v8387_v30, %v7766_v20  ;;  %v4058_v19 = vmul.u32 22, %v4057_v1  ;;  %v4068_v49 = vshrl.u32 %v8398_v55, 4 }
 0x1d8   : > { %v8461_v32 = vmul.u32.u64.low 3123612579, %v8418_v28  ;;  %v8462_v37 = vmul.u32.u64.high 3123612579, %v8418_v28, %v8461_v32  ;;  %v4091_v55 = vmul.u32 22, %v4090_v12 }
 0x1d9   : > { %v4623_v0 = vadd.f32 %v4580_v29, %v4579_v4  ;;  %v6365_v24 = vpop.f32.mrb[4].mxu0  ;;  %v8493_v16 = vsub.s32 %v8304_v53, %v4058_v19 }
 0x1da   : > { %v8440_v21 = vadd.f32 %v6365_v24, %v7936_v17  ;;  %v3495_v33 = vpop.f32.mrb[5].mxu0  ;;  %v8511_v53 = vsub.s32 %v8345_v42, %v4091_v55 }
 0x1db   : > { %v4624_v15 = vadd.f32 %v4623_v0, %v4581_v13  ;;  %v8450_v4 = vadd.f32 %v3495_v33, %v7941_v22  ;;  %v6366_v29 = vpop.f32.mrb[6].mxu0  ;;  %v8475_v0 = vsel %vm8430_vm15, 1.0, %v9760_v46  ;;  %v8478_v33 = vadd.s32 280, %v7613_v18 }
 0x1dc   : > { %v8453_v24 = vadd.f32 %v6366_v29, %v7950_v40  ;;  %v3498_v17 = vpop.f32.mrb[7].mxu0  ;;  %v8470_v40 = vsub.s32 %v8285_v5, %v4080_v26  ;;  %v8481_v29 = vadd.s32 264, %v7613_v18  ;;  %v4428_v5 = vsel %vm8455_vm3, %v4384_v14, %v4026_v23 }
 0x1dd   : > { %v4583_v22 = vmul.f32 %v8450_v4, %v7906_v10  ;;  %v4625_v13 = vadd.f32 %v4624_v15, %v4582_v8  ;;  %v8467_v1 = vadd.f32 %v3498_v17, %v7962_v36  ;;  %v8488_v36 = vsel %vm8442_vm2, 1.0, %v9760_v46 }
 0x1de   : > { %9786 = vst [vmem:[#allocation30_spill] sm:$0xff] %v8488_v36  ;;  %v4069_v26 = vmul.u32 22, %v4068_v49  ;;  %v8496_v12 = vmul.u32.u64.low 3123612579, %v8435_v47  ;;  %v8497_v8 = vmul.u32.u64.high 3123612579, %v8435_v47, %v8496_v12  ;;  %v4585_v17 = vmul.f32 %v8440_v21, %v7896_v38 }
 0x1df   : > { %v4626_v32 = vadd.f32 %v4625_v13, %v4583_v22  ;;  %v4584_v15 = vmul.f32 %v8467_v1, %v7976_v44  ;;  %vm4257_vm4 = vcmp.ne.s32.totalorder %v8470_v40, 0  ;;  %vm4301_vm5 = vcmp.lt.s32.totalorder %v8470_v40, 0 }
 0x1e0   : > { %vm8506_vm6 = vcmp.lt.s32.totalorder %v4428_v5, 16  ;;  %v8514_v49 = vadd.s32 304, %v7613_v18  ;;  %v4586_v14 = vmul.f32 %v8453_v24, %v7918_v61  ;;  %vm8527_vm7 = vmand %vm4301_vm5, %vm4257_vm4  ;;  %vm4255_vm8 = vcmp.ne.s32.totalorder %v8493_v16, 0 }
 0x1e1   : > { %v4627_v22 = vadd.f32 %v4626_v32, %v4584_v15  ;;  %v6369_v13 = vpop.f32.mrb[8].mxu0  ;;  %v4389_v15 = vadd.s32 22, %v8470_v40  ;;  %vm4299_vm9 = vcmp.lt.s32.totalorder %v8493_v16, 0  ;;  %vm4258_vm10 = vcmp.ne.s32.totalorder %v8511_v53, 0 }
 0x1e2   : > { %v8504_v11 = vadd.f32 %v6369_v13, %v8015_v41  ;;  %v3511_v23 = vpop.f32.mrb[9].mxu0  ;;  %vm4302_vm11 = vcmp.lt.s32.totalorder %v8511_v53, 0  ;;  %vm8554_vm12 = vmand %vm4299_vm9, %vm4255_vm8 }
 0x1e3   : > { %v4628_v39 = vadd.f32 %v4627_v22, %v4585_v17  ;;  %v8519_v32 = vadd.f32 %v3511_v23, %v8024_v50  ;;  %v6370_v41 = vpop.f32.mrb[10].mxu0  ;;  %v4070_v50 = vsub.s32 %v8365_v34, %v4069_v26  ;;  %v4123_v22 = vshrl.u32 %v8462_v37, 4  ;;  %vm8571_vm15 = vmand %vm4302_vm11, %vm4258_vm10 }
 0x1e4   : > { %v8523_v5 = vadd.f32 %v6370_v41, %v8031_v3  ;;  %v3514_v12 = vpop.f32.mrb[11].mxu0  ;;  %v8543_v13 = vmul.u32.u64.low 3123612579, %v8478_v33  ;;  %v8544_v23 = vmul.u32.u64.high 3123612579, %v8478_v33, %v8543_v13  ;;  %v4433_v26 = vsel %vm8527_vm7, %v4389_v15, %v8470_v40 }
 0x1e5   : > { %v4587_v55 = vmul.f32 %v8519_v32, %v7998_v58  ;;  %v4629_v17 = vadd.f32 %v4628_v39, %v4586_v14  ;;  %v8537_v3 = vadd.f32 %v3514_v12, %v8045_v7  ;;  %v4387_v7 = vadd.s32 22, %v8493_v16 }
 0x1e6   : > { %9789 = vst [vmem:[#allocation31_spill] sm:$0xff] %v8523_v5  ;;  %v4390_v14 = vadd.s32 22, %v8511_v53  ;;  %vm4256_vm13 = vcmp.ne.s32.totalorder %v4070_v50, 0  ;;  %vm4300_vm14 = vcmp.lt.s32.totalorder %v4070_v50, 0  ;;  %v4101_v39 = vshrl.u32 %v8497_v8, 4 }
 0x1e7   : > { %v4630_v41 = vadd.f32 %v4629_v17, %v4587_v55  ;;  %v4588_v34 = vmul.f32 %v8537_v3, %v8085_v6  ;;  %v4589_v12 = vmul.f32 %v8504_v11, %v7995_v54  ;;  %v8565_v40 = vsel %vm8506_vm6, 1.0, %v9760_v46  ;;  %vm8589_vm1 = vmand %vm4300_vm14, %vm4256_vm13 }
 0x1e8   : > { %9794 = vst [vmem:[#allocation32_spill] sm:$0xff] %v8565_v40  ;;  %v4124_v17 = vmul.u32 22, %v4123_v22  ;;  %v4590_v19 = vmul.f32 %v8523_v5, %v8018_v45  ;;  %vm4477_vm0 = vcmp.lt.s32.totalorder %v4433_v26, 16 }
 0x1e9   : > { %v4631_v55 = vadd.f32 %v4630_v41, %v4588_v34  ;;  %v6373_v42 = vpop.f32.mrb[12].mxu0  ;;  %v4388_v41 = vadd.s32 22, %v4070_v50  ;;  %v8579_v34 = vmul.u32.u64.low 3123612579, %v8481_v29  ;;  %v8580_v54 = vmul.u32.u64.high 3123612579, %v8481_v29, %v8579_v34 }
 0x1ea   : > { %v8576_v8 = vadd.f32 %v6373_v42, %v8098_v51  ;;  %v3527_v13 = vpop.f32.mrb[13].mxu0  ;;  %v4431_v34 = vsel %vm8554_vm12, %v4387_v7, %v8493_v16  ;;  %v4134_v7 = vshrl.u32 %v8544_v23, 4 }
 0x1eb   : > { %v4632_v6 = vadd.f32 %v4631_v55, %v4589_v12  ;;  %v8585_v58 = vadd.f32 %v3527_v13, %v8114_v60  ;;  %v6374_v61 = vpop.f32.mrb[14].mxu0  ;;  %v4434_v60 = vsel %vm8571_vm15, %v4390_v14, %v8511_v53  ;;  %v4102_v12 = vmul.u32 22, %v4101_v39 }
 0x1ec   : > { %9797 = vst [vmem:[#allocation33_spill] sm:$0xff] %v8576_v8  ;;  %v8594_v22 = vadd.f32 %v6374_v61, %v8129_v63  ;;  %v3530_v42 = vpop.f32.mrb[15].mxu0  ;;  %v8608_v61 = vsub.s32 %v8418_v28, %v4124_v17  ;;  %v8611_v63 = vsel %vm4477_vm0, 1.0, %v9760_v46  ;;  %v4432_v16 = vsel %vm8589_vm1, %v4388_v41, %v4070_v50 }
 0x1ed   : > { %9798 = vst [vmem:[#allocation34_spill] sm:$0xff] %v8585_v58  ;;  %v4591_v26 = vmul.f32 %v8585_v58, %v8180_v59  ;;  %v4633_v55 = vadd.f32 %v4632_v6, %v4590_v19  ;;  %v8605_v13 = vadd.f32 %v3530_v42, %v8136_v57  ;;  %9803 = vst [vmem:[#allocation37_spill] sm:$0xff] %v8611_v63  ;;  %v8617_v53 = vadd.s32 288, %v7613_v18  ;;  %v9824_v59 = vld [vmem:[#allocation17_spill] sm:$0xff] }
 0x1ee   : > { %9801 = vst [vmem:[#allocation35_spill] sm:$0xff] %v8594_v22  ;;  %vm8621_vm2 = vcmp.lt.s32.totalorder %v4431_v34, 16  ;;  %v8626_v28 = vadd.s32 312, %v7613_v18  ;;  %vm8628_vm3 = vcmp.lt.s32.totalorder %v4434_v60, 16  ;;  %v8633_v50 = vsub.s32 %v8435_v47, %v4102_v12 }
 0x1ef   : > { %9802 = vst [vmem:[#allocation36_spill] sm:$0xff] %v8605_v13  ;;  %v4634_v37 = vadd.f32 %v4633_v55, %v4591_v26  ;;  %v4592_v6 = vmul.f32 %v8605_v13, %v8258_v35  ;;  %v8636_v23 = vmul.u32.u64.low 3123612579, %v8514_v49  ;;  %v8637_v39 = vmul.u32.u64.high 3123612579, %v8514_v49, %v8636_v23 }
 0x1f0   : > { %v4593_v15 = vmul.f32 %v8576_v8, %v8090_v9  ;;  %vm8641_vm4 = vcmp.lt.s32.totalorder %v4432_v16, 16  ;;  %vm4261_vm5 = vcmp.ne.s32.totalorder %v8608_v61, 0  ;;  %vm4305_vm6 = vcmp.lt.s32.totalorder %v8608_v61, 0  ;;  %v9826_v8 = vld [vmem:[#allocation21_spill] sm:$0xff] }
 0x1f1   : > { %v4635_v17 = vadd.f32 %v4634_v37, %v4592_v6  ;;  %v6377_v41 = vpop.f32.mrb[16].mxu0  ;;  %v4393_v42 = vadd.s32 22, %v8608_v61  ;;  %v4135_v34 = vmul.u32 22, %v4134_v7  ;;  %v4594_v60 = vmul.f32 %v8594_v22, %v8229_v48  ;;  %v9813_v7 = vld [vmem:[#allocation16_spill] sm:$0xff]  ;;  %vm8674_vm8 = vmand %vm4305_vm6, %vm4261_vm5 }
 0x1f2   : > { %v8647_v51 = vadd.f32 %v6377_v41, %v8189_v62  ;;  %v3543_v47 = vpop.f32.mrb[17].mxu0  ;;  %v4112_v16 = vshrl.u32 %v8580_v54, 4  ;;  %vm4259_vm7 = vcmp.ne.s32.totalorder %v8633_v50, 0  ;;  %vm4303_vm9 = vcmp.lt.s32.totalorder %v8633_v50, 0 }
 0x1f3   : > { %v4636_v12 = vadd.f32 %v4635_v17, %v4593_v15  ;;  %v8654_v26 = vadd.f32 %v3543_v47, %v8200_v56  ;;  %v6378_v55 = vpop.f32.mrb[18].mxu0  ;;  %v8662_v6 = vmul.u32.u64.low 3123612579, %v8617_v53  ;;  %v8663_v23 = vmul.u32.u64.high 3123612579, %v8617_v53, %v8662_v6  ;;  %v9814_v17 = vld [vmem:[#allocation12_spill] sm:$0xff]  ;;  %vm8708_vm10 = vmand %vm4303_vm9, %vm4259_vm7 }
 0x1f4   : > { %9810 = vst [vmem:[#allocation38_spill] sm:$0xff] %v8647_v51  ;;  %v8658_v37 = vadd.f32 %v6378_v55, %v8213_v27  ;;  %v3546_v62 = vpop.f32.mrb[19].mxu0  ;;  %v8682_v27 = vsel %vm8621_vm2, 1.0, %v9760_v46  ;;  %v8687_v47 = vsel %vm8628_vm3, 1.0, %v9760_v46  ;;  %v8700_v57 = vsel %vm8641_vm4, 1.0, %v9760_v46 }
 0x1f5   : > { %9811 = vst [vmem:[#allocation39_spill] sm:$0xff] %v8654_v26  ;;  %v4595_v41 = vmul.f32 %v8654_v26, %v9813_v7  ;;  %v4637_v15 = vadd.f32 %v4636_v12, %v4594_v60  ;;  %v8668_v56 = vadd.f32 %v3546_v62, %v9814_v17  ;;  %9818 = vst [vmem:[#allocation41_spill] sm:$0xff] %v8682_v27  ;;  %v8690_v60 = vadd.s32 296, %v7613_v18  ;;  %v9819_v62 = vld [vmem:[#allocation22_spill] sm:$0xff] }
 0x1f6   : > { %9812 = vst [vmem:[#allocation40_spill] sm:$0xff] %v8658_v37  ;;  %v8693_v12 = vadd.s32 336, %v7613_v18  ;;  %9820 = vst [vmem:[#allocation42_spill] sm:$0xff] %v8700_v57  ;;  %v4391_v17 = vadd.s32 22, %v8633_v50  ;;  %v4437_v7 = vsel %vm8674_vm8, %v4393_v42, %v8608_v61  ;;  %v8716_v19 = vadd.s32 320, %v7613_v18 }
 0x1f7   : > { %9815 = vst [vmem:[#allocation12_spill] sm:$0xff] %v8668_v56  ;;  %v4638_v55 = vadd.f32 %v4637_v15, %v4595_v41  ;;  %v4596_v6 = vmul.f32 %v8668_v56, %v9819_v62  ;;  %v8713_v41 = vsub.s32 %v8478_v33, %v4135_v34  ;;  %v4113_v15 = vmul.u32 22, %v4112_v16  ;;  %v9823_v62 = vld [vmem:[#allocation15_spill] sm:$0xff] }
 0x1f8   : > { %v4597_v9 = vmul.f32 %v8647_v51, %v9823_v62  ;;  %v8721_v61 = vmul.u32.u64.low 3123612579, %v8626_v28  ;;  %v8722_v42 = vmul.u32.u64.high 3123612579, %v8626_v28, %v8721_v61  ;;  %v4167_v34 = vshrl.u32 %v8637_v39, 4  ;;  %v9827_v62 = vld [vmem:[#allocation18_spill] sm:$0xff] }
 0x1f9   : > { %v6229_v14 = vpop.f32.mrb[24].mxu1  ;;  %v4639_v35 = vadd.f32 %v4638_v55, %v4596_v6  ;;  %v6381_v56 = vpop.f32.mrb[20].mxu0  ;;  %v8729_v16 = vmul.u32.u64.low 3123612579, %v8690_v60  ;;  %v8730_v22 = vmul.u32.u64.high 3123612579, %v8690_v60, %v8729_v16  ;;  %v4598_v55 = vmul.f32 %v8658_v37, %v9826_v8 }
 0x1fa   : > { %v1962_v54 = vpop.f32.mrb[25].mxu1  ;;  %v8725_v26 = vadd.f32 %v6381_v56, %v9824_v59  ;;  %v3559_v45 = vpop.f32.mrb[21].mxu0  ;;  %v4435_v59 = vsel %vm8708_vm10, %v4391_v17, %v8633_v50  ;;  %v9829_v56 = vld [vmem:[#allocation19_spill] sm:$0xff]  ;;  %vm8743_vm11 = vcmp.lt.s32.totalorder %v4437_v7, 16  ;;  %v8748_v16 = vsub.s32 %v8481_v29, %v4113_v15 }
 0x1fb   : > { %v6230_v33 = vpop.f32.mrb[26].mxu1  ;;  %v4640_v6 = vadd.f32 %v4639_v35, %v4597_v9  ;;  %v8735_v51 = vadd.f32 %v3559_v45, %v9827_v62  ;;  %v6382_v13 = vpop.f32.mrb[22].mxu0  ;;  %v4145_v45 = vshrl.u32 %v8663_v23, 4  ;;  %v9832_v62 = vld [vmem:[#allocation20_spill] sm:$0xff]  ;;  %vm8759_vm12 = vcmp.lt.s32.totalorder %v4435_v59, 16 }
 0x1fc   : > { %9825 = vst [vmem:[#allocation17_spill] sm:$0xff] %v8725_v26  ;;  %v1965_v61 = vpop.f32.mrb[27].mxu1  ;;  %v8741_v58 = vadd.f32 %v6382_v13, %v9829_v56  ;;  %v3562_v39 = vpop.f32.mrb[23].mxu0  ;;  %v8757_v13 = vadd.s32 344, %v7613_v18  ;;  %vm4262_vm13 = vcmp.ne.s32.totalorder %v8713_v41, 0  ;;  %vm4306_vm14 = vcmp.lt.s32.totalorder %v8713_v41, 0 }
 0x1fd   : > { %9828 = vst [vmem:[#allocation18_spill] sm:$0xff] %v8735_v51  ;;  %v4599_v9 = vmul.f32 %v8735_v51, %v8409_v43  ;;  %v4641_v35 = vadd.f32 %v4640_v6, %v4598_v55  ;;  %v8754_v48 = vadd.f32 %v3562_v39, %v9832_v62  ;;  %v8766_v29 = vadd.s32 22, %v8713_v41  ;;  %v9836_v56 = vld [vmem:[#allocation23_spill] sm:$0xff]  ;;  %vm8797_vm1 = vmand %vm4306_vm14, %vm4262_vm13 }
 0x1fe   : > { %v4168_v17 = vmul.u32 22, %v4167_v34  ;;  %v8771_v15 = vadd.s32 328, %v7613_v18  ;;  %vm4260_vm15 = vcmp.ne.s32.totalorder %v8748_v16, 0  ;;  %vm4304_vm0 = vcmp.lt.s32.totalorder %v8748_v16, 0 }
 0x1ff   : > { %9833 = vst [vmem:[#allocation19_spill] sm:$0xff] %v8754_v48  ;;  %v4642_v23 = vadd.f32 %v4641_v35, %v4599_v9  ;;  %v4600_v7 = vmul.f32 %v8754_v48, %v8415_v2  ;;  %v4392_v6 = vadd.s32 22, %v8748_v16  ;;  %v4146_v59 = vmul.u32 22, %v4145_v45  ;;  %vm8808_vm2 = vmand %vm4304_vm0, %vm4260_vm15 }
 0x200   : > { %v4601_v39 = vmul.f32 %v8725_v26, %v9836_v56  ;;  %v8779_v2 = vmul.u32.u64.low 3123612579, %v8693_v12  ;;  %v8780_v34 = vmul.u32.u64.high 3123612579, %v8693_v12, %v8779_v2  ;;  %v4156_v48 = vshrl.u32 %v8730_v22, 4 }
 0x201   : > { %v6233_v55 = vpop.f32.mrb[28].mxu1  ;;  %v4643_v62 = vadd.f32 %v4642_v23, %v4600_v7  ;;  %v6385_v9 = vpop.f32.mrb[24].mxu0  ;;  %v8786_v51 = vmul.u32.u64.low 3123612579, %v8716_v19  ;;  %v8787_v37 = vmul.u32.u64.high 3123612579, %v8716_v19, %v8786_v51  ;;  %v4602_v45 = vmul.f32 %v8741_v58, %v8412_v31 }
 0x202   : > { %v1978_v35 = vpop.f32.mrb[29].mxu1  ;;  %v8782_v18 = vadd.f32 %v6385_v9, %v6229_v14  ;;  %v3575_v43 = vpop.f32.mrb[25].mxu0  ;;  %v4178_v22 = vshrl.u32 %v8722_v42, 4  ;;  %v8824_v9 = vsub.s32 %v8514_v49, %v4168_v17  ;;  %v8829_v31 = vsel %vm8743_vm11, 1.0, %v9760_v46 }
 0x203   : > { %v6234_v8 = vpop.f32.mrb[30].mxu1  ;;  %v4644_v23 = vadd.f32 %v4643_v62, %v4601_v39  ;;  %v8791_v7 = vadd.f32 %v3575_v43, %v1962_v54  ;;  %v6386_v56 = vpop.f32.mrb[26].mxu0  ;;  %v8813_v54 = vsub.s32 %v8617_v53, %v4146_v59  ;;  %9841 = vst [vmem:[#allocation20_spill] sm:$0xff] %v8829_v31  ;;  %v8834_v53 = vsel %vm8759_vm12, 1.0, %v9760_v46 }
 0x204   : > { %v1981_v26 = vpop.f32.mrb[31].mxu1  ;;  %v8802_v14 = vadd.f32 %v6386_v56, %v6230_v33  ;;  %v3578_v51 = vpop.f32.mrb[27].mxu0  ;;  %v8816_v39 = vmul.u32.u64.low 3123612579, %v8771_v15  ;;  %v8817_v62 = vmul.u32.u64.high 3123612579, %v8771_v15, %v8816_v39  ;;  %9842 = vst [vmem:[#allocation43_spill] sm:$0xff] %v8834_v53  ;;  %v4438_v59 = vsel %vm8797_vm1, %v8766_v29, %v8713_v41 }
 0x205   : > { %v4603_v42 = vmul.f32 %v8791_v7, %v8475_v0  ;;  %v4645_v33 = vadd.f32 %v4644_v23, %v4602_v45  ;;  %v8821_v56 = vadd.f32 %v3578_v51, %v1965_v61  ;;  %v4157_v61 = vmul.u32 22, %v4156_v48 }
 0x206   : > { %v4436_v5 = vsel %vm8808_vm2, %v4392_v6, %v8748_v16  ;;  %v4179_v17 = vmul.u32 22, %v4178_v22  ;;  %vm4263_vm3 = vcmp.ne.s32.totalorder %v8813_v54, 0  ;;  %vm4307_vm4 = vcmp.lt.s32.totalorder %v8813_v54, 0 }
 0x207   : > { %v4646_v45 = vadd.f32 %v4645_v33, %v4603_v42  ;;  %v4604_v49 = vmul.f32 %v8821_v56, %v8565_v40  ;;  %v8848_v50 = vmul.u32.u64.low 3123612579, %v8757_v13  ;;  %v8849_v51 = vmul.u32.u64.high 3123612579, %v8757_v13, %v8848_v50  ;;  %vm8874_vm8 = vmand %vm4307_vm4, %vm4263_vm3 }
 0x208   : > { %v4605_v41 = vmul.f32 %v8782_v18, %v8428_v52  ;;  %vm4265_vm5 = vcmp.ne.s32.totalorder %v8824_v9, 0  ;;  %vm4309_vm6 = vcmp.lt.s32.totalorder %v8824_v9, 0  ;;  %v4395_v43 = vadd.s32 22, %v8813_v54 }
 0x209   : > { %v6237_v23 = vpop.f32.mrb[32].mxu1  ;;  %v4647_v48 = vadd.f32 %v4646_v45, %v4604_v49  ;;  %v6389_v29 = vpop.f32.mrb[28].mxu0  ;;  %v8859_v39 = vsub.s32 %v8690_v60, %v4157_v61  ;;  %v4189_v42 = vshrl.u32 %v8787_v37, 4  ;;  %v4606_v33 = vmul.f32 %v8802_v14, %v8488_v36  ;;  %vm8893_vm9 = vmand %vm4309_vm6, %vm4265_vm5 }
 0x20a   : > { %v1994_v2 = vpop.f32.mrb[33].mxu1  ;;  %v8855_v16 = vadd.f32 %v6389_v29, %v6233_v55  ;;  %v3591_v6 = vpop.f32.mrb[29].mxu0  ;;  %vm8866_vm7 = vcmp.lt.s32.totalorder %v4436_v5, 16  ;;  %v4200_v5 = vshrl.u32 %v8817_v62, 4  ;;  %vm8905_vm12 = vcmp.lt.s32.totalorder %v4438_v59, 16 }
 0x20b   : > { %v6238_v22 = vpop.f32.mrb[34].mxu1  ;;  %v4648_v45 = vadd.f32 %v4647_v48, %v4605_v41  ;;  %v8864_v49 = vadd.f32 %v3591_v6, %v1978_v35  ;;  %v6390_v50 = vpop.f32.mrb[30].mxu0  ;;  %v4397_v35 = vadd.s32 22, %v8824_v9  ;;  %v8882_v41 = vsub.s32 %v8626_v28, %v4179_v17 }
 0x20c   : > { %v1997_v52 = vpop.f32.mrb[35].mxu1  ;;  %v8878_v37 = vadd.f32 %v6390_v50, %v6234_v8  ;;  %v3594_v61 = vpop.f32.mrb[31].mxu0  ;;  %v4211_v50 = vshrl.u32 %v8780_v34, 4  ;;  %v4439_v28 = vsel %vm8874_vm8, %v4395_v43, %v8813_v54  ;;  %vm4264_vm10 = vcmp.ne.s32.totalorder %v8859_v39, 0 }
 0x20d   : > { %v4607_v48 = vmul.f32 %v8864_v49, %v8682_v27  ;;  %v4649_v29 = vadd.f32 %v4648_v45, %v4606_v33  ;;  %v8887_v6 = vadd.f32 %v3594_v61, %v1981_v26  ;;  %vm4308_vm11 = vcmp.lt.s32.totalorder %v8859_v39, 0 }
 0x20e   : > { %v4190_v26 = vmul.u32 22, %v4189_v42  ;;  %v8912_v34 = vsel %vm8866_vm7, 1.0, %v9760_v46  ;;  %v4441_v54 = vsel %vm8893_vm9, %v4397_v35, %v8824_v9  ;;  %v4396_v43 = vadd.s32 22, %v8859_v39  ;;  %vm8929_vm14 = vmand %vm4308_vm11, %vm4264_vm10 }
 0x20f   : > { %v4650_v62 = vadd.f32 %v4649_v29, %v4607_v48  ;;  %v4608_v17 = vmul.f32 %v8887_v6, %v8700_v57  ;;  %9851 = vst [vmem:[#allocation44_spill] sm:$0xff] %v8912_v34  ;;  %v4222_v42 = vshrl.u32 %v8849_v51, 4  ;;  %v4201_v60 = vmul.u32 22, %v4200_v5 }
 0x210   : > { %v4609_v59 = vmul.f32 %v8855_v16, %v8611_v63  ;;  %vm8921_vm13 = vcmp.lt.s32.totalorder %v4439_v28, 16  ;;  %v4212_v51 = vmul.u32 22, %v4211_v50  ;;  %vm4266_vm15 = vcmp.ne.s32.totalorder %v8882_v41, 0 }
 0x211   : > { %v6241_v45 = vpop.f32.mrb[36].mxu1  ;;  %v4651_v61 = vadd.f32 %v4650_v62, %v4608_v17  ;;  %v6393_v48 = vpop.f32.mrb[32].mxu0  ;;  %vm4310_vm0 = vcmp.lt.s32.totalorder %v8882_v41, 0  ;;  %v8938_v28 = vsub.s32 %v8716_v19, %v4190_v26  ;;  %v4610_v62 = vmul.f32 %v8878_v37, %v8687_v47 }
 0x212   : > { %v2010_v29 = vpop.f32.mrb[37].mxu1  ;;  %v8933_v35 = vadd.f32 %v6393_v48, %v6237_v23  ;;  %v3607_v5 = vpop.f32.mrb[33].mxu0  ;;  %v4398_v23 = vadd.s32 22, %v8882_v41  ;;  %v4440_v36 = vsel %vm8929_vm14, %v4396_v43, %v8859_v39  ;;  %v4223_v40 = vmul.u32 22, %v4222_v42  ;;  %vm8971_vm2 = vmand %vm4310_vm0, %vm4266_vm15 }
 0x213   : > { %v6242_v8 = vpop.f32.mrb[38].mxu1  ;;  %v4652_v17 = vadd.f32 %v4651_v61, %v4609_v59  ;;  %v8942_v63 = vadd.f32 %v3607_v5, %v1994_v2  ;;  %v6394_v57 = vpop.f32.mrb[34].mxu0  ;;  %v4202_v19 = vsub.s32 %v8771_v15, %v4201_v60  ;;  %v8956_v61 = vsub.s32 %v8693_v12, %v4212_v51 }
 0x214   : > { %v2013_v27 = vpop.f32.mrb[39].mxu1  ;;  %v8945_v50 = vadd.f32 %v6394_v57, %v6238_v22  ;;  %v3610_v48 = vpop.f32.mrb[35].mxu0  ;;  %v8961_v57 = vsel %vm8905_vm12, 1.0, %v9760_v46  ;;  %vm8963_vm1 = vcmp.lt.s32.totalorder %v4441_v54, 16  ;;  %vm4267_vm3 = vcmp.ne.s32.totalorder %v8938_v28, 0 }
 0x215   : > { %v4611_v26 = vmul.f32 %v8942_v63, %v8834_v53  ;;  %v4653_v59 = vadd.f32 %v4652_v17, %v4610_v62  ;;  %v8953_v2 = vadd.f32 %v3610_v48, %v1997_v52  ;;  %9856 = vst [vmem:[#allocation45_spill] sm:$0xff] %v8961_v57  ;;  %vm4311_vm4 = vcmp.lt.s32.totalorder %v8938_v28, 0 }
 0x216   : > { %v8982_v39 = vsel %vm8921_vm13, 1.0, %v9760_v46  ;;  %vm8984_vm5 = vcmp.lt.s32.totalorder %v4440_v36, 16  ;;  %v4399_v43 = vadd.s32 22, %v8938_v28  ;;  %v4224_v42 = vsub.s32 %v8757_v13, %v4223_v40  ;;  %vm9000_vm9 = vmand %vm4311_vm4, %vm4267_vm3 }
 0x217   : > { %v4654_v52 = vadd.f32 %v4653_v59, %v4611_v26  ;;  %v4612_v12 = vmul.f32 %v8953_v2, %v8912_v34  ;;  %vm4268_vm6 = vcmp.ne.s32.totalorder %v4202_v19, 0  ;;  %vm4312_vm7 = vcmp.lt.s32.totalorder %v4202_v19, 0 }
 0x218   : > { %v4613_v60 = vmul.f32 %v8933_v35, %v8829_v31  ;;  %v4442_v36 = vsel %vm8971_vm2, %v4398_v23, %v8882_v41  ;;  %vm4269_vm8 = vcmp.ne.s32.totalorder %v8956_v61, 0  ;;  %vm4313_vm10 = vcmp.lt.s32.totalorder %v8956_v61, 0  ;;  %vm9019_vm11 = vmand %vm4312_vm7, %vm4268_vm6 }
 0x219   : > { %v6245_v54 = vpop.f32.mrb[40].mxu1  ;;  %v4655_v9 = vadd.f32 %v4654_v52, %v4612_v12  ;;  %v6397_v51 = vpop.f32.mrb[36].mxu0  ;;  %v4401_v17 = vadd.s32 22, %v8956_v61  ;;  %v4400_v48 = vadd.s32 22, %v4202_v19  ;;  %v4614_v41 = vmul.f32 %v8945_v50, %v8961_v57  ;;  %vm9034_vm15 = vmand %vm4313_vm10, %vm4269_vm8 }
 0x21a   : > { %v2026_v5 = vpop.f32.mrb[41].mxu1  ;;  %v9004_v13 = vadd.f32 %v6397_v51, %v6241_v45  ;;  %v3623_v55 = vpop.f32.mrb[37].mxu0  ;;  %v9015_v45 = vsel %vm8984_vm5, 1.0, %v9760_v46  ;;  %vm4270_vm12 = vcmp.ne.s32.totalorder %v4224_v42, 0  ;;  %vm4314_vm13 = vcmp.lt.s32.totalorder %v4224_v42, 0 }
 0x21b   : > { %v6246_v62 = vpop.f32.mrb[42].mxu1  ;;  %v4656_v23 = vadd.f32 %v4655_v9, %v4613_v60  ;;  %v9010_v26 = vadd.f32 %v3623_v55, %v2010_v29  ;;  %v6398_v59 = vpop.f32.mrb[38].mxu0  ;;  %v4443_v29 = vsel %vm9000_vm9, %v4399_v43, %v8938_v28  ;;  %vm4486_vm14 = vcmp.lt.s32.totalorder %v4442_v36, 16  ;;  %vm9046_vm2 = vmand %vm4314_vm13, %vm4270_vm12 }
 0x21c   : > { %v2029_v15 = vpop.f32.mrb[43].mxu1  ;;  %v9023_v12 = vadd.f32 %v6398_v59, %v6242_v8  ;;  %v3626_v51 = vpop.f32.mrb[39].mxu0  ;;  %v9041_v28 = vsel %vm8963_vm1, 1.0, %v9760_v46  ;;  %v4402_v43 = vadd.s32 22, %v4224_v42  ;;  %v4444_v40 = vsel %vm9019_vm11, %v4400_v48, %v4202_v19 }
 0x21d   : > { %v4615_v33 = vmul.f32 %v9010_v26, %v8982_v39  ;;  %v4657_v60 = vadd.f32 %v4656_v23, %v4614_v41  ;;  %v6450_v9 = vadd.f32 %v3626_v51, %v2013_v27  ;;  %vm4487_vm0 = vcmp.lt.s32.totalorder %v4443_v29, 16 }
 0x21e   : > { %v9051_v41 = vsel %vm4486_vm14, 1.0, %v9760_v46  ;;  %v4445_v22 = vsel %vm9034_vm15, %v4401_v17, %v8956_v61  ;;  %v4617_v23 = vmul.f32 %v9004_v13, %v9041_v28  ;;  %vm4488_vm1 = vcmp.lt.s32.totalorder %v4444_v40, 16 }
 0x21f   : > { %v4658_v55 = vadd.f32 %v4657_v60, %v4615_v33  ;;  %v4616_v27 = vmul.f32 %v6450_v9, %v9015_v45  ;;  %v9059_v51 = vsel %vm4487_vm0, 1.0, %v9760_v46  ;;  %v4446_v29 = vsel %vm9046_vm2, %v4402_v43, %v4224_v42 }
 0x220   : > { %v4618_v33 = vmul.f32 %v9023_v12, %v9051_v41  ;;  %vm4489_vm3 = vcmp.lt.s32.totalorder %v4445_v22, 16  ;;  %vm4490_vm4 = vcmp.lt.s32.totalorder %v4446_v29, 16 }
 0x221   : > { %v4659_v59 = vadd.f32 %v4658_v55, %v4616_v27  ;;  %v6401_v19 = vpop.f32.mrb[40].mxu0  ;;  %v9066_v55 = vsel %vm4488_vm1, 1.0, %v9760_v46  ;;  %v5633_v36 = vsel %vm4489_vm3, 1.0, %v9760_v46 }
 0x222   : > { %v6451_v48 = vadd.f32 %v6401_v19, %v6245_v54  ;;  %v3639_v52 = vpop.f32.mrb[41].mxu0 }
 0x223   : > { %v4660_v60 = vadd.f32 %v4659_v59, %v4617_v23  ;;  %v6452_v61 = vadd.f32 %v3639_v52, %v2026_v5  ;;  %v6402_v17 = vpop.f32.mrb[42].mxu0  ;;  %v5634_v23 = vsel %vm4490_vm4, 1.0, %v9760_v46 }
 0x224   : > { %v6453_v8 = vadd.f32 %v6402_v17, %v6246_v62  ;;  %v3642_v57 = vpop.f32.mrb[43].mxu0  ;;  %v4621_v22 = vmul.f32 %v6451_v48, %v5633_v36 }
 0x225   : > { %v4619_v54 = vmul.f32 %v6452_v61, %v9059_v51  ;;  %v4661_v40 = vadd.f32 %v4660_v60, %v4618_v33  ;;  %v6454_v27 = vadd.f32 %v3642_v57, %v2029_v15 }
 0x226   : > { %v4622_v59 = vmul.f32 %v6453_v8, %v5634_v23 }
 0x227   : > { %v4662_v42 = vadd.f32 %v4661_v40, %v4619_v54  ;;  %v4620_v43 = vmul.f32 %v6454_v27, %v9066_v55 }
 0x229   : > { %v4663_v5 = vadd.f32 %v4662_v42, %v4620_v43 }
 0x22b   : > { %v4664_v62 = vadd.f32 %v4663_v5, %v4621_v22 }
 0x22d   : > { %v4665_v19 = vadd.f32 %v4664_v62, %v4622_v59 }
 0x22f   : > { %v4666_v52 = vrot.slane %v4665_v19, 4 }
 0x231   : > { %v4667_v17 = vadd.f32 %v4666_v52, %v4665_v19  ;;  %v9881_v52 = vld [vmem:[#allocation3_spill] sm:$0xff] }
 0x233   : > { %v4668_v31 = vrot.slane %v4667_v17, 2 }
 0x235   : > { %v4669_v34 = vadd.f32 %v4668_v31, %v4667_v17 }
 0x237   : > { %v4670_v53 = vrot.slane %v4669_v34, 1 }
 0x239   : > { %v4671_v33 = vadd.f32 %v4670_v53, %v4669_v34 }
 0x23b   : > { %v9072_v29 = vmul.f32 0.00390625, %v4671_v33  ;;  %v9882_v33 = vld [vmem:[#allocation4_spill] sm:$0xff] }
 0x23d   : > { %v9076_v57 = vsub.f32 %v8791_v7, %v9072_v29  ;;  %v9080_v46 = vsub.f32 %v8821_v56, %v9072_v29  ;;  %v9084_v15 = vsub.f32 %v8782_v18, %v9072_v29  ;;  %v9088_v60 = vsub.f32 %v8802_v14, %v9072_v29 }
 0x23e   : > { %v9092_v31 = vsub.f32 %v8864_v49, %v9072_v29  ;;  %v9096_v7 = vsub.f32 %v8887_v6, %v9072_v29  ;;  %v9100_v56 = vsub.f32 %v8855_v16, %v9072_v29  ;;  %v9104_v18 = vsub.f32 %v8878_v37, %v9072_v29 }
 0x23f   : > { %v9108_v14 = vsub.f32 %v8942_v63, %v9072_v29  ;;  %v9112_v53 = vsub.f32 %v8953_v2, %v9072_v29  ;;  %v9116_v49 = vsub.f32 %v8933_v35, %v9072_v29  ;;  %v9120_v16 = vsub.f32 %v8945_v50, %v9072_v29 }
 0x240   : > { %v9124_v37 = vsub.f32 %v9010_v26, %v9072_v29  ;;  %v9127_v6 = vsub.f32 %v6450_v9, %v9072_v29  ;;  %v9131_v63 = vsub.f32 %v9004_v13, %v9072_v29  ;;  %v9135_v34 = vsub.f32 %v9023_v12, %v9072_v29  ;;  %v9879_v9 = vld [vmem:[#allocation25_spill] sm:$0xff] }
 0x241   : > { %v9138_v35 = vsub.f32 %v6452_v61, %v9072_v29  ;;  %v9141_v50 = vsub.f32 %v6454_v27, %v9072_v29  ;;  %v9144_v2 = vsub.f32 %v6451_v48, %v9072_v29  ;;  %v9147_v26 = vsub.f32 %v6453_v8, %v9072_v29  ;;  %v9880_v61 = vld [vmem:[#allocation24_spill] sm:$0xff] }
 0x242   : > { %9871 = vst [vmem:[#allocation46_spill] sm:$0xff] %v9124_v37  ;;  %9872 = vst [vmem:[#allocation47_spill] sm:$0xff] %v9127_v6  ;;  %v9151_v13 = vsub.f32 %v8384_v25, %v9072_v29  ;;  %v9155_v12 = vsub.f32 %v9879_v9, %v9072_v29  ;;  %v9159_v54 = vsub.f32 %v9880_v61, %v9072_v29 }
 0x243   : > { %9873 = vst [vmem:[#allocation48_spill] sm:$0xff] %v9131_v63  ;;  %9874 = vst [vmem:[#allocation49_spill] sm:$0xff] %v9135_v34  ;;  %v9167_v8 = vsub.f32 %v8387_v30, %v9072_v29  ;;  %v4753_v25 = vmul.f32 %v9124_v37, %v9124_v37  ;;  %v4754_v27 = vmul.f32 %v9127_v6, %v9127_v6  ;;  %v9909_v6 = vld [vmem:[#allocation15_spill] sm:$0xff] }
 0x244   : > { %9875 = vst [vmem:[#allocation50_spill] sm:$0xff] %v9138_v35  ;;  %9876 = vst [vmem:[#allocation51_spill] sm:$0xff] %v9141_v50  ;;  %v4717_v40 = vmul.f32 %v9151_v13, %v9151_v13  ;;  %v4718_v48 = vmul.f32 %v9155_v12, %v9155_v12  ;;  %v4755_v42 = vmul.f32 %v9131_v63, %v9131_v63  ;;  %v9907_v63 = vld [vmem:[#allocation22_spill] sm:$0xff] }
 0x245   : > { %9877 = vst [vmem:[#allocation52_spill] sm:$0xff] %v9144_v2  ;;  %9878 = vst [vmem:[#allocation53_spill] sm:$0xff] %v9147_v26  ;;  %v4756_v43 = vmul.f32 %v9135_v34, %v9135_v34  ;;  %v4757_v22 = vmul.f32 %v9138_v35, %v9138_v35  ;;  %v4758_v5 = vmul.f32 %v9141_v50, %v9141_v50  ;;  %v9901_v35 = vld [vmem:[#allocation13_spill] sm:$0xff]  ;;  %v9904_v34 = vld [vmem:[#allocation16_spill] sm:$0xff] }
 0x246   : > { %v4759_v30 = vmul.f32 %v9144_v2, %v9144_v2  ;;  %v4760_v59 = vmul.f32 %v9147_v26, %v9147_v26  ;;  %v9187_v62 = vsub.f32 %v8450_v4, %v9072_v29  ;;  %v4719_v19 = vmul.f32 %v9159_v54, %v9159_v54 }
 0x247   : > { %v4761_v17 = vmul.f32 %v9881_v52, %v4717_v40  ;;  %v4762_v9 = vmul.f32 %v9882_v33, %v4718_v48  ;;  %v9195_v61 = vsub.f32 %v8467_v1, %v9072_v29  ;;  %v4720_v2 = vmul.f32 %v9167_v8, %v9167_v8 }
 0x248   : > { %v9200_v26 = vmul.f32 %v8982_v39, %v4753_v25  ;;  %v9203_v4 = vmul.f32 %v9015_v45, %v4754_v27  ;;  %v9206_v50 = vmul.f32 %v9041_v28, %v4755_v42  ;;  %v9209_v40 = vmul.f32 %v9051_v41, %v4756_v43  ;;  %v9883_v28 = vld [vmem:[#allocation2_spill] sm:$0xff] }
 0x249   : > { %v9212_v48 = vmul.f32 %v9059_v51, %v4757_v22  ;;  %v9215_v1 = vmul.f32 %v9066_v55, %v4758_v5  ;;  %v9217_v52 = vmul.f32 %v5633_v36, %v4759_v30  ;;  %v9219_v33 = vmul.f32 %v5634_v23, %v4760_v59  ;;  %v9884_v59 = vld [vmem:[#allocation31_spill] sm:$0xff] }
 0x24a   : > { %v9223_v39 = vsub.f32 %v8440_v21, %v9072_v29  ;;  %v4721_v45 = vmul.f32 %v9187_v62, %v9187_v62  ;;  %v4763_v41 = vmul.f32 %v9883_v28, %v4719_v19  ;;  %v4805_v25 = vadd.f32 %v4762_v9, %v4761_v17  ;;  %v9885_v17 = vld [vmem:[#allocation5_spill] sm:$0xff] }
 0x24b   : > { %v9230_v51 = vsub.f32 %v8453_v24, %v9072_v29  ;;  %v4722_v55 = vmul.f32 %v9195_v61, %v9195_v61  ;;  %v4764_v36 = vmul.f32 %v7766_v20, %v4720_v2  ;;  %v9237_v21 = vsub.f32 %v8519_v32, %v9072_v29 }
 0x24c   : > { %v4806_v23 = vadd.f32 %v4805_v25, %v4763_v41  ;;  %v4723_v27 = vmul.f32 %v9223_v39, %v9223_v39  ;;  %v4765_v42 = vmul.f32 %v7906_v10, %v4721_v45  ;;  %v9244_v24 = vsub.f32 %v8537_v3, %v9072_v29  ;;  %v9886_v45 = vld [vmem:[#allocation34_spill] sm:$0xff]  ;;  %v9887_v41 = vld [vmem:[#allocation7_spill] sm:$0xff] }
 0x24d   : > { %v4724_v22 = vmul.f32 %v9230_v51, %v9230_v51  ;;  %v4766_v20 = vmul.f32 %v7976_v44, %v4722_v55  ;;  %v9251_v32 = vsub.f32 %v8504_v11, %v9072_v29  ;;  %v4725_v5 = vmul.f32 %v9237_v21, %v9237_v21  ;;  %v9888_v55 = vld [vmem:[#allocation36_spill] sm:$0xff] }
 0x24e   : > { %v4807_v43 = vadd.f32 %v4806_v23, %v4764_v36  ;;  %v4767_v10 = vmul.f32 %v7896_v38, %v4723_v27  ;;  %v9258_v3 = vsub.f32 %v9884_v59, %v9072_v29  ;;  %v4726_v19 = vmul.f32 %v9244_v24, %v9244_v24  ;;  %v9889_v27 = vld [vmem:[#allocation9_spill] sm:$0xff]  ;;  %v9892_v59 = vld [vmem:[#allocation35_spill] sm:$0xff] }
 0x24f   : > { %v4768_v44 = vmul.f32 %v9885_v17, %v4724_v22  ;;  %v9265_v11 = vsub.f32 %v9886_v45, %v9072_v29  ;;  %v4727_v28 = vmul.f32 %v9251_v32, %v9251_v32  ;;  %v4769_v38 = vmul.f32 %v9887_v41, %v4725_v5  ;;  %v9890_v22 = vld [vmem:[#allocation33_spill] sm:$0xff]  ;;  %v9894_v41 = vld [vmem:[#allocation39_spill] sm:$0xff] }
 0x250   : > { %v4808_v2 = vadd.f32 %v4807_v43, %v4765_v42  ;;  %v9272_v36 = vsub.f32 %v9888_v55, %v9072_v29  ;;  %v4728_v23 = vmul.f32 %v9258_v3, %v9258_v3  ;;  %v4770_v42 = vmul.f32 %v9889_v27, %v4726_v19  ;;  %v9895_v55 = vld [vmem:[#allocation11_spill] sm:$0xff] }
 0x251   : > { %v9286_v17 = vsub.f32 %v9892_v59, %v9072_v29 }
 0x252   : > { %v4809_v30 = vadd.f32 %v4808_v2, %v4766_v20  ;;  %v9279_v20 = vsub.f32 %v9890_v22, %v9072_v29  ;;  %v4729_v2 = vmul.f32 %v9265_v11, %v9265_v11 }
 0x253   : > { %v4732_v22 = vmul.f32 %v9286_v17, %v9286_v17 }
 0x254   : > { %v4810_v9 = vadd.f32 %v4809_v30, %v4767_v10  ;;  %v9891_v10 = vld [vmem:[#allocation6_spill] sm:$0xff] }
 0x255   : > { %v4771_v5 = vmul.f32 %v9891_v10, %v4727_v28  ;;  %v4773_v28 = vmul.f32 %v9895_v55, %v4729_v2  ;;  %v9897_v10 = vld [vmem:[#allocation14_spill] sm:$0xff] }
 0x256   : > { %v4811_v25 = vadd.f32 %v4810_v9, %v4768_v44  ;;  %v4730_v44 = vmul.f32 %v9272_v36, %v9272_v36  ;;  %v9893_v9 = vld [vmem:[#allocation8_spill] sm:$0xff] }
 0x257   : > { %v4772_v19 = vmul.f32 %v9893_v9, %v4728_v23 }
 0x258   : > { %v4812_v43 = vadd.f32 %v4811_v25, %v4769_v38  ;;  %v9293_v38 = vsub.f32 %v9894_v41, %v9072_v29  ;;  %v4731_v25 = vmul.f32 %v9279_v20, %v9279_v20  ;;  %v4774_v23 = vmul.f32 %v9897_v10, %v4730_v44  ;;  %v9899_v41 = vld [vmem:[#allocation10_spill] sm:$0xff] }
 0x259   : > { %v4776_v44 = vmul.f32 %v9901_v35, %v4732_v22 }
 0x25a   : > { %v4813_v30 = vadd.f32 %v4812_v43, %v4770_v42  ;;  %v9896_v42 = vld [vmem:[#allocation12_spill] sm:$0xff]  ;;  %v4733_v9 = vmul.f32 %v9293_v38, %v9293_v38  ;;  %v4775_v2 = vmul.f32 %v9899_v41, %v4731_v25 }
 0x25b   : > { %v9300_v43 = vsub.f32 %v9896_v42, %v9072_v29 }
 0x25c   : > { %v4814_v45 = vadd.f32 %v4813_v30, %v4771_v5  ;;  %v9898_v30 = vld [vmem:[#allocation38_spill] sm:$0xff]  ;;  %v4777_v25 = vmul.f32 %v9904_v34, %v4733_v9 }
 0x25d   : > { %v9307_v59 = vsub.f32 %v9898_v30, %v9072_v29  ;;  %v4734_v42 = vmul.f32 %v9300_v43, %v9300_v43 }
 0x25e   : > { %v4815_v27 = vadd.f32 %v4814_v45, %v4772_v19  ;;  %v9900_v45 = vld [vmem:[#allocation40_spill] sm:$0xff] }
 0x25f   : > { %v9314_v55 = vsub.f32 %v9900_v45, %v9072_v29  ;;  %v4735_v30 = vmul.f32 %v9307_v59, %v9307_v59  ;;  %v4778_v35 = vmul.f32 %v9907_v63, %v4734_v42 }
 0x260   : > { %v4816_v5 = vadd.f32 %v4815_v27, %v4773_v28  ;;  %v9902_v27 = vld [vmem:[#allocation18_spill] sm:$0xff] }
 0x261   : > { %v9321_v10 = vsub.f32 %v9902_v27, %v9072_v29  ;;  %v4736_v45 = vmul.f32 %v9314_v55, %v9314_v55  ;;  %v4779_v34 = vmul.f32 %v9909_v6, %v4735_v30  ;;  %v9912_v30 = vld [vmem:[#allocation28_spill] sm:$0xff] }
 0x262   : > { %v4817_v19 = vadd.f32 %v4816_v5, %v4774_v23  ;;  %v9905_v5 = vld [vmem:[#allocation19_spill] sm:$0xff] }
 0x263   : > { %9903 = vst [vmem:[#allocation25_spill] sm:$0xff] %v9321_v10  ;;  %v9328_v41 = vsub.f32 %v9905_v5, %v9072_v29  ;;  %v4737_v27 = vmul.f32 %v9321_v10, %v9321_v10  ;;  %v9910_v5 = vld [vmem:[#allocation21_spill] sm:$0xff] }
 0x264   : > { %v4818_v28 = vadd.f32 %v4817_v19, %v4775_v2  ;;  %v9908_v2 = vld [vmem:[#allocation17_spill] sm:$0xff]  ;;  %v4780_v63 = vmul.f32 %v9910_v5, %v4736_v45  ;;  %v4742_v45 = vmul.f32 %v9080_v46, %v9080_v46 }
 0x265   : > { %9906 = vst [vmem:[#allocation24_spill] sm:$0xff] %v9328_v41  ;;  %v9335_v19 = vsub.f32 %v9908_v2, %v9072_v29 }
 0x266   : > { %v4819_v23 = vadd.f32 %v4818_v28, %v4776_v44  ;;  %v9342_v44 = vsub.f32 %v8741_v58, %v9072_v29  ;;  %v4738_v28 = vmul.f32 %v9328_v41, %v9328_v41  ;;  %v4741_v58 = vmul.f32 %v9076_v57, %v9076_v57  ;;  %v9913_v29 = vld [vmem:[#allocation23_spill] sm:$0xff] }
 0x268   : > { %v4820_v22 = vadd.f32 %v4819_v23, %v4777_v25  ;;  %v4739_v25 = vmul.f32 %v9335_v19, %v9335_v19  ;;  %v9911_v23 = vld [vmem:[#allocation26_spill] sm:$0xff]  ;;  %v4740_v6 = vmul.f32 %v9342_v44, %v9342_v44 }
 0x269   : > { %v4781_v2 = vmul.f32 %v9911_v23, %v4737_v27  ;;  %v4743_v27 = vmul.f32 %v9084_v15, %v9084_v15 }
 0x26a   : > { %v4821_v9 = vadd.f32 %v4820_v22, %v4778_v35  ;;  %v4782_v35 = vmul.f32 %v9912_v30, %v4738_v28  ;;  %v4783_v41 = vmul.f32 %v9913_v29, %v4739_v25  ;;  %v9915_v28 = vld [vmem:[#allocation32_spill] sm:$0xff]  ;;  %v4745_v25 = vmul.f32 %v9092_v31, %v9092_v31  ;;  %v9916_v30 = vld [vmem:[#allocation29_spill] sm:$0xff] }
 0x26b   : > { %v4786_v23 = vmul.f32 %v9915_v28, %v4742_v45  ;;  %v4748_v45 = vmul.f32 %v9104_v18, %v9104_v18  ;;  %v9920_v28 = vld [vmem:[#allocation37_spill] sm:$0xff] }
 0x26c   : > { %v4822_v42 = vadd.f32 %v4821_v9, %v4779_v34  ;;  %v9914_v34 = vld [vmem:[#allocation27_spill] sm:$0xff] }
 0x26d   : > { %v4784_v9 = vmul.f32 %v9914_v34, %v4740_v6 }
 0x26e   : > { %v4823_v37 = vadd.f32 %v4822_v42, %v4780_v63  ;;  %v4785_v63 = vmul.f32 %v8475_v0, %v4741_v58  ;;  %v4747_v0 = vmul.f32 %v9100_v56, %v9100_v56  ;;  %v9918_v58 = vld [vmem:[#allocation41_spill] sm:$0xff] }
 0x26f   : > { %v4789_v34 = vmul.f32 %v9918_v58, %v4745_v25  ;;  %v4751_v25 = vmul.f32 %v9116_v49, %v9116_v49 }
 0x270   : > { %v4824_v22 = vadd.f32 %v4823_v37, %v4781_v2  ;;  %v4744_v37 = vmul.f32 %v9088_v60, %v9088_v60 }
 0x272   : > { %v4825_v10 = vadd.f32 %v4824_v22, %v4782_v35  ;;  %v4787_v35 = vmul.f32 %v9916_v30, %v4743_v27  ;;  %v4749_v27 = vmul.f32 %v9108_v14, %v9108_v14  ;;  %v4792_v30 = vmul.f32 %v8687_v47, %v4748_v45 }
 0x274   : > { %v4826_v5 = vadd.f32 %v4825_v10, %v4783_v41  ;;  %v4746_v10 = vmul.f32 %v9096_v7, %v9096_v7  ;;  %v9917_v41 = vld [vmem:[#allocation30_spill] sm:$0xff] }
 0x275   : > { %v4788_v6 = vmul.f32 %v9917_v41, %v4744_v37  ;;  %v4750_v37 = vmul.f32 %v9112_v53, %v9112_v53 }
 0x276   : > { %v4827_v42 = vadd.f32 %v4826_v5, %v4784_v9  ;;  %v9919_v5 = vld [vmem:[#allocation42_spill] sm:$0xff] }
 0x278   : > { %v4828_v2 = vadd.f32 %v4827_v42, %v4785_v63  ;;  %v4790_v63 = vmul.f32 %v9919_v5, %v4746_v10  ;;  %v4752_v10 = vmul.f32 %v9120_v16, %v9120_v16 }
 0x27a   : > { %v4829_v22 = vadd.f32 %v4828_v2, %v4786_v23  ;;  %v4791_v23 = vmul.f32 %v9920_v28, %v4747_v0  ;;  %v9923_v0 = vld [vmem:[#allocation20_spill] sm:$0xff] }
 0x27c   : > { %v4830_v29 = vadd.f32 %v4829_v22, %v4787_v35  ;;  %v9921_v22 = vld [vmem:[#allocation43_spill] sm:$0xff] }
 0x27d   : > { %v4793_v41 = vmul.f32 %v9921_v22, %v4749_v27 }
 0x27e   : > { %v4831_v9 = vadd.f32 %v4830_v29, %v4788_v6  ;;  %v9922_v29 = vld [vmem:[#allocation44_spill] sm:$0xff] }
 0x27f   : > { %v4794_v58 = vmul.f32 %v9922_v29, %v4750_v37 }
 0x280   : > { %v4832_v42 = vadd.f32 %v4831_v9, %v4789_v34  ;;  %v4795_v9 = vmul.f32 %v9923_v0, %v4751_v25 }
 0x282   : > { %v4833_v2 = vadd.f32 %v4832_v42, %v4790_v63  ;;  %v9924_v63 = vld [vmem:[#allocation45_spill] sm:$0xff] }
 0x283   : > { %v4796_v42 = vmul.f32 %v9924_v63, %v4752_v10 }
 0x284   : > { %v4834_v35 = vadd.f32 %v4833_v2, %v4791_v23 }
 0x286   : > { %v4835_v6 = vadd.f32 %v4834_v35, %v4792_v30 }
 0x288   : > { %v4836_v34 = vadd.f32 %v4835_v6, %v4793_v41 }
 0x28a   : > { %v4837_v5 = vadd.f32 %v4836_v34, %v4794_v58 }
 0x28c   : > { %v4838_v28 = vadd.f32 %v4837_v5, %v4795_v9 }
 0x28e   : > { %v4839_v47 = vadd.f32 %v4838_v28, %v4796_v42 }
 0x290   : > { %v4840_v45 = vadd.f32 %v4839_v47, %v9200_v26 }
 0x292   : > { %v4841_v23 = vadd.f32 %v4840_v45, %v9203_v4 }
 0x294   : > { %v4842_v27 = vadd.f32 %v4841_v23, %v9206_v50 }
 0x296   : > { %v4843_v2 = vadd.f32 %v4842_v27, %v9209_v40 }
 0x298   : > { %v4844_v30 = vadd.f32 %v4843_v2, %v9212_v48 }
 0x29a   : > { %v4845_v37 = vadd.f32 %v4844_v30, %v9215_v1 }
 0x29c   : > { %v4846_v35 = vadd.f32 %v4845_v37, %v9217_v52  ;;  %v9934_v37 = vld [vmem:[#allocation53_spill] sm:$0xff] }
 0x29e   : > { %v4847_v25 = vadd.f32 %v4846_v35, %v9219_v33 }
 0x2a0   : > { %v4848_v22 = vrot.slane %v4847_v25, 4 }
 0x2a2   : > { %v4849_v41 = vadd.f32 %v4848_v22, %v4847_v25 }
 0x2a4   : > { %v4850_v6 = vrot.slane %v4849_v41, 2 }
 0x2a6   : > { %v4851_v10 = vadd.f32 %v4850_v6, %v4849_v41 }
 0x2a8   : > { %v4852_v29 = vrot.slane %v4851_v10, 1 }
 0x2aa   : > { %v4853_v26 = vadd.f32 %v4852_v29, %v4851_v10 }
 0x2ac   : > { %v4854_v58 = vmul.f32 0.00390625, %v4853_v26 }
 0x2ae   : > { %v4855_v4 = vadd.f32 1e-05, %v4854_v58 }
 0x2b0   : > { %6948 = vrsqrt.f32 %v4855_v4 }
 0x2ba   : > { %v6949_v50 = vpop.eup %6948 }
 0x2bb   : > { %v9400_v40 = vmul.f32 %v6949_v50, %v9151_v13  ;;  %v9403_v48 = vmul.f32 %v6949_v50, %v9155_v12  ;;  %v9406_v1 = vmul.f32 %v6949_v50, %v9159_v54  ;;  %v9409_v52 = vmul.f32 %v6949_v50, %v9167_v8 }
 0x2bc   : > { %v9412_v33 = vmul.f32 %v6949_v50, %v9187_v62  ;;  %v9415_v34 = vmul.f32 %v6949_v50, %v9195_v61  ;;  %v9418_v0 = vmul.f32 %v6949_v50, %v9223_v39  ;;  %v9421_v13 = vmul.f32 %v6949_v50, %v9230_v51 }
 0x2bd   : > { %v9424_v12 = vmul.f32 %v6949_v50, %v9237_v21  ;;  %v9427_v54 = vmul.f32 %v6949_v50, %v9244_v24  ;;  %v9430_v8 = vmul.f32 %v6949_v50, %v9251_v32  ;;  %v9433_v62 = vmul.f32 %v6949_v50, %v9258_v3 }
 0x2be   : > { %v9436_v61 = vmul.f32 %v6949_v50, %v9265_v11  ;;  %v9439_v39 = vmul.f32 %v6949_v50, %v9272_v36  ;;  %v9442_v51 = vmul.f32 %v6949_v50, %v9279_v20  ;;  %v9445_v21 = vmul.f32 %v6949_v50, %v9286_v17  ;;  %v9925_v36 = vld [vmem:[#allocation25_spill] sm:$0xff]  ;;  %v9926_v20 = vld [vmem:[#allocation24_spill] sm:$0xff] }
 0x2bf   : > { %v9448_v24 = vmul.f32 %v6949_v50, %v9293_v38  ;;  %v9451_v32 = vmul.f32 %v6949_v50, %v9300_v43  ;;  %v9454_v3 = vmul.f32 %v6949_v50, %v9307_v59  ;;  %v9457_v11 = vmul.f32 %v6949_v50, %v9314_v55 }
 0x2c0   : > { %v9460_v9 = vmul.f32 %v6949_v50, %v9925_v36  ;;  %v9463_v5 = vmul.f32 %v6949_v50, %v9926_v20  ;;  %v9466_v17 = vmul.f32 %v6949_v50, %v9335_v19  ;;  %v9469_v38 = vmul.f32 %v6949_v50, %v9342_v44 }
 0x2c1   : > { %v9472_v43 = vmul.f32 %v6949_v50, %v9076_v57  ;;  %v9475_v59 = vmul.f32 %v6949_v50, %v9080_v46  ;;  %v9478_v55 = vmul.f32 %v6949_v50, %v9084_v15  ;;  %v9481_v63 = vmul.f32 %v6949_v50, %v9088_v60 }
 0x2c2   : > { %v9484_v42 = vmul.f32 %v6949_v50, %v9092_v31  ;;  %v9487_v19 = vmul.f32 %v6949_v50, %v9096_v7  ;;  %v9490_v44 = vmul.f32 %v6949_v50, %v9100_v56  ;;  %v9493_v57 = vmul.f32 %v6949_v50, %v9104_v18  ;;  %v9927_v7 = vld [vmem:[#allocation46_spill] sm:$0xff]  ;;  %v9928_v56 = vld [vmem:[#allocation47_spill] sm:$0xff]  ;;  %v9929_v18 = vld [vmem:[#allocation48_spill] sm:$0xff] }
 0x2c3   : > { %v9496_v46 = vmul.f32 %v6949_v50, %v9108_v14  ;;  %v9499_v15 = vmul.f32 %v6949_v50, %v9112_v53  ;;  %v9502_v60 = vmul.f32 %v6949_v50, %v9116_v49  ;;  %v9505_v31 = vmul.f32 %v6949_v50, %v9120_v16  ;;  %v9930_v14 = vld [vmem:[#allocation49_spill] sm:$0xff]  ;;  %v9931_v53 = vld [vmem:[#allocation50_spill] sm:$0xff]  ;;  %v9932_v49 = vld [vmem:[#allocation51_spill] sm:$0xff] }
 0x2c4   : > { %v9508_v28 = vmul.f32 %v6949_v50, %v9927_v7  ;;  %v9511_v47 = vmul.f32 %v6949_v50, %v9928_v56  ;;  %v9514_v45 = vmul.f32 %v6949_v50, %v9929_v18  ;;  %v9517_v23 = vmul.f32 %v6949_v50, %v9930_v14  ;;  %v9933_v16 = vld [vmem:[#allocation52_spill] sm:$0xff] }
 0x2c5   : > { %v9520_v27 = vmul.f32 %v6949_v50, %v9931_v53  ;;  %v9523_v2 = vmul.f32 %v6949_v50, %v9932_v49  ;;  %v9526_v30 = vmul.f32 %v6949_v50, %v9933_v16  ;;  %v9529_v35 = vmul.f32 %v6949_v50, %v9934_v37 }
 0x2c6   : > { %v4901_v25 = vmax.f32 %v9400_v40, 0.0  ;;  %v4902_v22 = vmax.f32 %v9403_v48, 0.0  ;;  %v4903_v41 = vmax.f32 %v9406_v1, 0.0  ;;  %v4904_v6 = vmax.f32 %v9409_v52, 0.0 }
 0x2c7   : > { %v4905_v10 = vmax.f32 %v9412_v33, 0.0  ;;  %v4906_v29 = vmax.f32 %v9415_v34, 0.0  ;;  %v4907_v26 = vmax.f32 %v9418_v0, 0.0  ;;  %v4908_v58 = vmax.f32 %v9421_v13, 0.0 }
 0x2c8   : > { %v4909_v4 = vmax.f32 %v9424_v12, 0.0  ;;  %v4910_v50 = vmax.f32 %v9427_v54, 0.0  ;;  %v4911_v40 = vmax.f32 %v9430_v8, 0.0  ;;  %v4912_v48 = vmax.f32 %v9433_v62, 0.0 }
 0x2c9   : > { %v4913_v1 = vmax.f32 %v9436_v61, 0.0  ;;  %v4914_v52 = vmax.f32 %v9439_v39, 0.0  ;;  %v4915_v33 = vmax.f32 %v9442_v51, 0.0  ;;  %v4916_v34 = vmax.f32 %v9445_v21, 0.0 }
 0x2ca   : > { %v4917_v0 = vmax.f32 %v9448_v24, 0.0  ;;  %v4918_v13 = vmax.f32 %v9451_v32, 0.0  ;;  %v4919_v12 = vmax.f32 %v9454_v3, 0.0  ;;  %v4920_v54 = vmax.f32 %v9457_v11, 0.0 }
 0x2cb   : > { %v4921_v8 = vmax.f32 %v9460_v9, 0.0  ;;  %v4922_v62 = vmax.f32 %v9463_v5, 0.0  ;;  %v4923_v61 = vmax.f32 %v9466_v17, 0.0  ;;  %v4924_v39 = vmax.f32 %v9469_v38, 0.0 }
 0x2cc   : > { %v4925_v51 = vmax.f32 %v9472_v43, 0.0  ;;  %v4926_v21 = vmax.f32 %v9475_v59, 0.0  ;;  %v4927_v24 = vmax.f32 %v9478_v55, 0.0  ;;  %v4928_v32 = vmax.f32 %v9481_v63, 0.0 }
 0x2cd   : > { %v4929_v3 = vmax.f32 %v9484_v42, 0.0  ;;  %v4930_v11 = vmax.f32 %v9487_v19, 0.0  ;;  %v4931_v36 = vmax.f32 %v9490_v44, 0.0  ;;  %v4932_v9 = vmax.f32 %v9493_v57, 0.0 }
 0x2ce   : > { %v4933_v20 = vmax.f32 %v9496_v46, 0.0  ;;  %v4934_v5 = vmax.f32 %v9499_v15, 0.0  ;;  %v4935_v17 = vmax.f32 %v9502_v60, 0.0  ;;  %v4936_v38 = vmax.f32 %v9505_v31, 0.0 }
 0x2cf   : > { %v4937_v43 = vmax.f32 %v9508_v28, 0.0  ;;  %v4938_v59 = vmax.f32 %v9511_v47, 0.0  ;;  %v4939_v55 = vmax.f32 %v9514_v45, 0.0  ;;  %v4940_v63 = vmax.f32 %v9517_v23, 0.0 }
 0x2d0   : > { %v4941_v42 = vmax.f32 %v9520_v27, 0.0  ;;  %v4942_v19 = vmax.f32 %v9523_v2, 0.0  ;;  %v4943_v44 = vmax.f32 %v9526_v30, 0.0  ;;  %v4944_v57 = vmax.f32 %v9529_v35, 0.0 }
 0x2d1   : > { %v5729_v46 = vpack.c.bf16 %v4902_v22, %v4901_v25  ;;  %v5734_v15 = vpack.c.bf16 %v4904_v6, %v4903_v41  ;;  %v5739_v60 = vpack.c.bf16 %v4906_v29, %v4905_v10  ;;  %v5744_v31 = vpack.c.bf16 %v4908_v58, %v4907_v26 }
 0x2d2   : > { %v5749_v7 = vpack.c.bf16 %v4910_v50, %v4909_v4  ;;  %v5754_v28 = vpack.c.bf16 %v4912_v48, %v4911_v40  ;;  %v5759_v56 = vpack.c.bf16 %v4914_v52, %v4913_v1  ;;  %v5764_v47 = vpack.c.bf16 %v4916_v34, %v4915_v33 }
 0x2d3   : > { %5730 = vst [vmem:[%s9575_s30] sm:$0xff] %v5729_v46   ;;  %5836 = vst [vmem:[%s9575_s30 + $0x8] sm:$0xff] %v5734_v15   ;;  %v5769_v18 = vpack.c.bf16 %v4918_v13, %v4917_v0  ;;  %v5774_v45 = vpack.c.bf16 %v4920_v54, %v4919_v12  ;;  %v5779_v14 = vpack.c.bf16 %v4922_v62, %v4921_v8 }
 0x2d4   : > { %5837 = vst [vmem:[%s9575_s30 + $0x10] sm:$0xff] %v5739_v60   ;;  %5838 = vst [vmem:[%s9575_s30 + $0x18] sm:$0xff] %v5744_v31   ;;  %v5784_v23 = vpack.c.bf16 %v4924_v39, %v4923_v61  ;;  %v5789_v53 = vpack.c.bf16 %v4926_v21, %v4925_v51  ;;  %v5794_v27 = vpack.c.bf16 %v4928_v32, %v4927_v24 }
 0x2d5   : > { %5839 = vst [vmem:[%s9575_s30 + $0x20] sm:$0xff] %v5749_v7   ;;  %5840 = vst [vmem:[%s9575_s30 + $0x28] sm:$0xff] %v5754_v28   ;;  %v5799_v49 = vpack.c.bf16 %v4930_v11, %v4929_v3  ;;  %v5804_v2 = vpack.c.bf16 %v4932_v9, %v4931_v36  ;;  %v5809_v16 = vpack.c.bf16 %v4934_v5, %v4933_v20 }
 0x2d6   : > { %5841 = vst [vmem:[%s9575_s30 + $0x30] sm:$0xff] %v5759_v56   ;;  %5842 = vst [vmem:[%s9575_s30 + $0x38] sm:$0xff] %v5764_v47   ;;  %v5814_v30 = vpack.c.bf16 %v4936_v38, %v4935_v17  ;;  %v5819_v37 = vpack.c.bf16 %v4938_v59, %v4937_v43  ;;  %v5824_v35 = vpack.c.bf16 %v4940_v63, %v4939_v55 }
 0x2d7   : > { %5843 = vst [vmem:[%s9575_s30 + $0x40] sm:$0xff] %v5769_v18   ;;  %5844 = vst [vmem:[%s9575_s30 + $0x48] sm:$0xff] %v5774_v45   ;;  %v5829_v25 = vpack.c.bf16 %v4942_v19, %v4941_v42  ;;  %v5834_v22 = vpack.c.bf16 %v4944_v57, %v4943_v44 }
 0x2d8   : > { %5845 = vst [vmem:[%s9575_s30 + $0x50] sm:$0xff] %v5779_v14   ;;  %5846 = vst [vmem:[%s9575_s30 + $0x58] sm:$0xff] %v5784_v23  }
 0x2d9   : > { %5847 = vst [vmem:[%s9575_s30 + $0x60] sm:$0xff] %v5789_v53   ;;  %5848 = vst [vmem:[%s9575_s30 + $0x68] sm:$0xff] %v5794_v27  }
 0x2da   : > { %5849 = vst [vmem:[%s9575_s30 + $0x70] sm:$0xff] %v5799_v49   ;;  %5850 = vst [vmem:[%s9575_s30 + $0x78] sm:$0xff] %v5804_v2  }
 0x2db   : > { %5851 = vst [vmem:[%s9575_s30 + $0x80] sm:$0xff] %v5809_v16   ;;  %5852 = vst [vmem:[%s9575_s30 + $0x88] sm:$0xff] %v5814_v30  }
 0x2dc   : > { %5853 = vst [vmem:[%s9575_s30 + $0x90] sm:$0xff] %v5819_v37   ;;  %5854 = vst [vmem:[%s9575_s30 + $0x98] sm:$0xff] %v5824_v35  }
 0x2dd   : > { %5855 = vst [vmem:[%s9575_s30 + $0xa0] sm:$0xff] %v5829_v25   ;;  %5856 = vst [vmem:[%s9575_s30 + $0xa8] sm:$0xff] %v5834_v22  }
 0x2de PF: > { %s12_s9 = sadd.s32 1, %s6960_s9  }
 0x2df   : > { %p9_p4 = scmp.ge.s32.totalorder %s12_s9, 4  }
 0x2e1   :  { %11 = sbr.rel (!%p9_p4) target bundleno = 1 (0x1), region = 64 }

// kernel: generator_forward.10
= control target key start
LH: loop header
LB: loop body
LE: loop exit
PB: predicated region body
PF: predicated region fallthrough
CT: control target
= control target key end

     0   :  { %s1176_s9 = smov 0   ;;  %s1323_s0 = inlined_call_operand.vmem [shape: bf16[2,30,128], index: 0, kind: input, shape index: {}]   ;;  %s1324_s1 = inlined_call_operand.vmem [shape: bf16[4,128,128], index: 1, kind: input, shape index: {}]   ;;  %s1325_s2 = inlined_call_operand.vmem [shape: bf16[2,20,128], index: 2, kind: output, shape index: {}]  }
   0x1 LB: > { %s854_s10 = sadd.s32 4294967295, %s1158_s9   ;;  %p858_p0 = scmp.ge.s32.totalorder %s1158_s9, 1  ;;  %s1158_s9 = sphi %s1176_s9, %s12_s9  }
   0x2   : > { %p112_p1 = scmp.lt.s32.totalorder %s1158_s9, 3 }
   0x4   : > { %p113_p2 = pnand %p858_p0, %p112_p1 }
   0x5   : > { %v1112_v0 = vld [vmem:[%s1324_s1 + $0x40] sm:$0xff] (!%p113_p2)   ;;  %v1114_v2 = vld [vmem:[%s1324_s1 + $0x48] sm:$0xff] (!%p113_p2)   ;;  %p134_p3 = scmp.lt.s32.totalorder (!%p113_p2), %s854_s10, 1  ;;  %v1116_v4 = vld [vmem:[%s1324_s1 + $0x50] sm:$0xff] (!%p113_p2)   ;;  %vm190_vm0 = vsmask.f32 (!%p113_p2), 7424 }
   0x6   : > { %116 = sbr.rel (%p113_p2) target bundleno = 352 (0x160), region = 28  ;;  %v1113_v1 = vld [vmem:[%s1324_s1 + $0x80] sm:$0xff] (!%p113_p2)   ;;  %1005 = vmatprep.subr.bf16.mxu1 (!%p113_p2), %v1112_v0  ;;  %v1115_v3 = vld [vmem:[%s1324_s1 + $0x88] sm:$0xff] (!%p113_p2)   ;;  %v1117_v5 = vld [vmem:[%s1324_s1 + $0x90] sm:$0xff] (!%p113_p2)   ;;  %vm436_vm1 = vsmask.f32 (!%p113_p2), 5376 }
   0x7   : > { %1045 = vmatprep.subr.bf16.mxu0 (!%p113_p2), %v1113_v1  ;;  %1006 = vmatpush3.bf16.msra.mxu1 (!%p113_p2), %v1112_v0  ;;  %v1118_v6 = vld [vmem:[%s1324_s1 + $0x58] sm:$0xff] (!%p113_p2)   ;;  %v1120_v8 = vld [vmem:[%s1324_s1 + $0x60] sm:$0xff] (!%p113_p2)   ;;  %v1122_v10 = vld [vmem:[%s1324_s1 + $0x68] sm:$0xff] (!%p113_p2)   ;;  %vm576_vm2 = vcmask (!%p113_p2), 1044480   ;;  %v681_v0 = vlaneseq (!%p113_p2)  ;;  %vm746_vm15 = vcmask (!%p113_p2), 1043456  }
   0x8   : > { %1046 = vmatpush3.bf16.msra.mxu0 (!%p113_p2), %v1113_v1  ;;  %1007 = vmatprep.subr.bf16.mxu1 (!%p113_p2), %v1114_v2  ;;  %v1119_v7 = vld [vmem:[%s1324_s1 + $0x98] sm:$0xff] (!%p113_p2)   ;;  %v1121_v9 = vld [vmem:[%s1324_s1 + $0xa0] sm:$0xff] (!%p113_p2)   ;;  %v1123_v11 = vld [vmem:[%s1324_s1 + $0xa8] sm:$0xff] (!%p113_p2)  }
   0x9   : > { %1047 = vmatprep.subr.bf16.mxu0 (!%p113_p2), %v1115_v3  ;;  %v1124_v14 = vld [vmem:[%s1324_s1 + $0x70] sm:$0xff] (!%p113_p2)   ;;  %v1126_v29 = vld [vmem:[%s1324_s1 + $0x78] sm:$0xff] (!%p113_p2)   ;;  %v1130_v36 = vld [vmem:[%s1324_s1] sm:$0xff] (!%p113_p2)   ;;  %v682_v1 = vshrl.u32 (!%p113_p2), %v681_v0, 7 }
   0xa   : > { %v1125_v15 = vld [vmem:[%s1324_s1 + $0xb0] sm:$0xff] (!%p113_p2)   ;;  %v1127_v31 = vld [vmem:[%s1324_s1 + $0xb8] sm:$0xff] (!%p113_p2)   ;;  %v1133_v41 = vld [vmem:[%s1324_s1 + $0xc0] sm:$0xff] (!%p113_p2)  }
   0xb   : > { %1008 = vmatpush3.bf16.msra.mxu1 (!%p113_p2), %v1114_v2  ;;  %v1134_v44 = vld [vmem:[%s1324_s1 + $0x8] sm:$0xff] (!%p113_p2)   ;;  %v1136_v46 = vld [vmem:[%s1324_s1 + $0x10] sm:$0xff] (!%p113_p2)   ;;  %v1138_v51 = vld [vmem:[%s1324_s1 + $0x18] sm:$0xff] (!%p113_p2)   ;;  %v684_v2 = vadd.s32 (!%p113_p2), 16, %v682_v1 }
   0xc   : > { %1048 = vmatpush3.bf16.msra.mxu0 (!%p113_p2), %v1115_v3  ;;  %1009 = vmatprep.subr.bf16.mxu1 (!%p113_p2), %v1116_v4  ;;  %v1135_v45 = vld [vmem:[%s1324_s1 + $0xc8] sm:$0xff] (!%p113_p2)   ;;  %v1137_v47 = vld [vmem:[%s1324_s1 + $0xd0] sm:$0xff] (!%p113_p2)   ;;  %v1139_v53 = vld [vmem:[%s1324_s1 + $0xd8] sm:$0xff] (!%p113_p2)   ;;  %v683_v3 = vadd.s32 (!%p113_p2), 8, %v682_v1 }
   0xd   : > { %s1327_s10 = smov (!%p134_p3, %s854_s10), 1  ;;  %1049 = vmatprep.subr.bf16.mxu0 %v1117_v5  ;;  %v1140_v55 = vld [vmem:[%s1324_s1 + $0x20] sm:$0xff]   ;;  %v1142_v57 = vld [vmem:[%s1324_s1 + $0x28] sm:$0xff]   ;;  %v1144_v59 = vld [vmem:[%s1324_s1 + $0x30] sm:$0xff]  }
   0xe   : > { %s956_s27 = sshll.u32 %s1327_s10, 4  ;;  %v1141_v56 = vld [vmem:[%s1324_s1 + $0xe0] sm:$0xff]   ;;  %v1143_v58 = vld [vmem:[%s1324_s1 + $0xe8] sm:$0xff]   ;;  %v1145_v60 = vld [vmem:[%s1324_s1 + $0xf0] sm:$0xff]  }
   0xf   : > { %1010 = vmatpush3.bf16.msra.mxu1 %v1116_v4  ;;  %s1220_s6 = scalar_lea.vmem %s1323_s0, %s956_s27  ;;  %v1146_v61 = vld [vmem:[%s1324_s1 + $0x38] sm:$0xff]  }
  0x10   : > { %1050 = vmatpush3.bf16.msra.mxu0 %v1117_v5  ;;  %1011 = vmatprep.subr.bf16.mxu1 %v1118_v6  ;;  %v1128_v12 = vld [vmem:[%s1220_s6] sm:$0xff]   ;;  %v1129_v13 = vld [vmem:[%s1220_s6 + $0x8] ss:$0 sps:$4 sm:$0x77]   ;;  %v1147_v62 = vld [vmem:[%s1324_s1 + $0xf8] sm:$0xff]  }
  0x11   : > { %1051 = vmatprep.subr.bf16.mxu0 %v1119_v7  ;;  %v192_v16 = vshrl.u32 %v1128_v12, 16  ;;  %v194_v17 = vshll.u32 %v1128_v12, 16  ;;  %v199_v18 = vshll.u32 %v1129_v13, 16  ;;  %v405_v19 = vld [vmem:[%s1220_s6] sm:$0xc]  ;;  %v203_v38 = vshrl.u32 %v1129_v13, 16 }
  0x12   : > { %v406_v20 = vld [vmem:[%s1220_s6 + $0x4] sm:$0xf]  ;;  %v1239_v24 = vld [vmem:[%s1220_s6 + $0x8] sm:$0x1f]   ;;  %v555_v48 = vld [vmem:[%s1220_s6] sm:$0x8] }
  0x13   : > { %1012 = vmatpush3.bf16.msra.mxu1 %v1118_v6  ;;  %v196_v21 = vrot.slane %v194_v17, 1  ;;  %v201_v22 = vrot.slane %v199_v18, 1  ;;  %v913_v23 = vcombine.low %v405_v19, %v406_v20  ;;  %v446_v28 = vshrl.u32 %v1239_v24, 16  ;;  %v1149_v63 = vld [vmem:[%s1220_s6 + $0x8] ss:$0 sps:$4 sm:$0x33]  }
  0x14   : > { %1052 = vmatpush3.bf16.msra.mxu0 %v1119_v7  ;;  %1013 = vmatprep.subr.bf16.mxu1 %v1120_v8  ;;  %v449_v30 = vshll.u32 %v1239_v24, 16  ;;  %v939_v49 = vcombine.low %v555_v48, %v406_v20  ;;  %v578_v50 = vrot.slane %v1239_v24, 3  ;;  %s1096_s6 = smul.u32 12, %s1327_s10 }
  0x15   : > { %1053 = vmatprep.subr.bf16.mxu0 %v1121_v9  ;;  %v197_v25 = vor.u32 %v196_v21, %v192_v16  ;;  %v438_v26 = vshrl.u32 %v913_v23, 16  ;;  %v441_v27 = vshll.u32 %v913_v23, 16  ;;  %v448_v35 = vrot.slane %v446_v28, 2 }
  0x16   : > { %v451_v37 = vrot.slane %v449_v30, 3  ;;  %v205_v43 = vor.u32 %v203_v38, %v201_v22  ;;  %v577_v52 = vrot.slane %v939_v49, 3  ;;  %s143_s30 = scalar_lea.vmem %s1325_s2, %s1096_s6 }
  0x17   : > { %1014 = vmatpush3.bf16.msra.mxu1 %v1120_v8  ;;  %v202_v32 = vsel %vm190_vm0, %v197_v25, %v201_v22  ;;  %v440_v33 = vrot.slane %v438_v26, 2  ;;  %v443_v34 = vrot.slane %v441_v27, 3 }
  0x18   : > { %1054 = vmatpush3.bf16.msra.mxu0 %v1121_v9  ;;  %1015 = vmatprep.subr.bf16.mxu1 %v1122_v10  ;;  %v452_v40 = vor.u32 %v451_v37, %v448_v35  ;;  %v579_v54 = vsel %vm576_vm2, %v577_v52, %v578_v50  ;;  %v1302_v4 = vmul.u32.u64.low 3435973837, %v684_v2  ;;  %v1303_v5 = vmul.u32.u64.high 3435973837, %v684_v2, %v1302_v4 }
  0x19   : > { %1055 = vmatprep.subr.bf16.mxu0 %v1123_v11  ;;  %1021 = vmatprep.mubr.bf16.mxu1 %v202_v32  ;;  %v444_v39 = vor.u32 %v443_v34, %v440_v33  ;;  %v1305_v6 = vmul.u32.u64.low 3435973837, %v682_v1  ;;  %v1306_v7 = vmul.u32.u64.high 3435973837, %v682_v1, %v1305_v6 }
  0x1a   : > { %v1308_v8 = vmul.u32.u64.low 3435973837, %v683_v3  ;;  %v1309_v9 = vmul.u32.u64.high 3435973837, %v683_v3, %v1308_v8 }
  0x1b   : > { %1016 = vmatpush3.bf16.msra.mxu1 %v1122_v10  ;;  %v453_v42 = vsel %vm436_vm1, %v444_v39, %v452_v40  ;;  %v713_v10 = vshrl.u32 %v1303_v5, 2 }
  0x1c   : > { %1056 = vmatpush3.bf16.msra.mxu0 %v1123_v11  ;;  %1017 = vmatprep.subr.bf16.mxu1 %v1124_v14  ;;  %v691_v11 = vshrl.u32 %v1306_v7, 2 }
  0x1d   : > { %1057 = vmatprep.subr.bf16.mxu0 %v1125_v15  ;;  %1061 = vmatprep.mubr.bf16.mxu0 %v453_v42  ;;  %v714_v13 = vmul.u32 5, %v713_v10 }
  0x1f   : > { %1018 = vmatpush3.bf16.msra.mxu1 %v1124_v14  ;;  %v692_v14 = vmul.u32 5, %v691_v11  ;;  %v715_v16 = vsub.s32 %v684_v2, %v714_v13 }
  0x20   : > { %1058 = vmatpush3.bf16.msra.mxu0 %v1125_v15  ;;  %1019 = vmatprep.subr.bf16.mxu1 %v1126_v29 }
  0x21   : > { %1059 = vmatprep.subr.bf16.mxu0 %v1127_v31  ;;  %v693_v17 = vsub.s32 %v682_v1, %v692_v14  ;;  %vm720_vm3 = vcmp.ne.s32.totalorder %v715_v16, 0  ;;  %vm723_vm4 = vcmp.lt.s32.totalorder %v715_v16, 0  ;;  %v729_v19 = vadd.s32 5, %v715_v16 }
  0x22   : > { %vm726_vm9 = vmand %vm723_vm4, %vm720_vm3 }
  0x23   : > { %1020 = vmatpush3.bf16.msra.mxu1 %v1126_v29  ;;  %vm718_vm5 = vcmp.ne.s32.totalorder %v693_v17, 0  ;;  %vm721_vm6 = vcmp.lt.s32.totalorder %v693_v17, 0  ;;  %v727_v20 = vadd.s32 5, %v693_v17  ;;  %v732_v22 = vsel %vm726_vm9, %v729_v19, %v715_v16 }
  0x24   : > { %1060 = vmatpush3.bf16.msra.mxu0 %v1127_v31  ;;  %1025 = vmatprep.subr.bf16.mxu1 %v1130_v36  ;;  %vm724_vm10 = vmand %vm721_vm6, %vm718_vm5  ;;  %vm735_vm12 = vcmp.lt.s32.totalorder %v732_v22, 4  ;;  %v1160_v31 = vmov 0.0  }
  0x25   : > { %1065 = vmatprep.subr.bf16.mxu0 %v1133_v41  ;;  %v730_v23 = vsel %vm724_vm10, %v727_v20, %v693_v17  ;;  %v950_v32 = vsel %vm735_vm12, 1.0, %v1160_v31 }
  0x26   : > { %1022 = vmatmul.mubr.bf16.vlgmr.msra.gmra.mrb[0].mxu1 %v205_v43  ;;  %vm733_vm13 = vcmp.lt.s32.totalorder %v730_v23, 4 }
  0x27   : > { %1026 = vmatpush3.bf16.msra.mxu1 %v1130_v36  ;;  %1062 = vmatmul.mubr.bf16.vlgmr.msra.gmra.mrb[0].mxu0 %v452_v40  ;;  %v948_v36 = vsel %vm733_vm13, 1.0, %v1160_v31 }
  0x28   : > { %1066 = vmatpush3.bf16.msra.mxu0 %v1133_v41  ;;  %1027 = vmatprep.subr.bf16.mxu1 %v1134_v44 }
  0x29   : > { %1067 = vmatprep.subr.bf16.mxu0 %v1135_v45  ;;  %1041 = vmatprep.mubr.bf16.mxu1 %v1128_v12  ;;  %v702_v12 = vshrl.u32 %v1309_v9, 2 }
  0x2a   : > { %1081 = vmatprep.mubr.bf16.mxu0 %v579_v54 }
  0x2b   : > { %1028 = vmatpush3.bf16.msra.mxu1 %v1134_v44  ;;  %v703_v15 = vmul.u32 5, %v702_v12 }
  0x2c   : > { %1068 = vmatpush3.bf16.msra.mxu0 %v1135_v45  ;;  %1029 = vmatprep.subr.bf16.mxu1 %v1136_v46 }
  0x2d   : > { %1069 = vmatprep.subr.bf16.mxu0 %v1137_v47  ;;  %v704_v18 = vsub.s32 %v683_v3, %v703_v15 }
  0x2f   : > { %1030 = vmatpush3.bf16.msra.mxu1 %v1136_v46  ;;  %vm719_vm7 = vcmp.ne.s32.totalorder %v704_v18, 0  ;;  %vm722_vm8 = vcmp.lt.s32.totalorder %v704_v18, 0  ;;  %v728_v21 = vadd.s32 5, %v704_v18 }
  0x30   : > { %1070 = vmatpush3.bf16.msra.mxu0 %v1137_v47  ;;  %1031 = vmatprep.subr.bf16.mxu1 %v1138_v51  ;;  %vm725_vm11 = vmand %vm722_vm8, %vm719_vm7 }
  0x31   : > { %1071 = vmatprep.subr.bf16.mxu0 %v1139_v53  ;;  %v731_v24 = vsel %vm725_vm11, %v728_v21, %v704_v18 }
  0x32   : > { %vm734_vm14 = vcmp.lt.s32.totalorder %v731_v24, 4 }
  0x33   : > { %1032 = vmatpush3.bf16.msra.mxu1 %v1138_v51  ;;  %v949_v38 = vsel %vm734_vm14, 1.0, %v1160_v31 }
  0x34   : > { %1072 = vmatpush3.bf16.msra.mxu0 %v1139_v53  ;;  %1033 = vmatprep.subr.bf16.mxu1 %v1140_v55 }
  0x35   : > { %1073 = vmatprep.subr.bf16.mxu0 %v1141_v56 }
  0x37   : > { %1034 = vmatpush3.bf16.msra.mxu1 %v1140_v55 }
  0x38   : > { %1074 = vmatpush3.bf16.msra.mxu0 %v1141_v56  ;;  %1035 = vmatprep.subr.bf16.mxu1 %v1142_v57 }
  0x39   : > { %1075 = vmatprep.subr.bf16.mxu0 %v1143_v58 }
  0x3b   : > { %1036 = vmatpush3.bf16.msra.mxu1 %v1142_v57 }
  0x3c   : > { %1076 = vmatpush3.bf16.msra.mxu0 %v1143_v58  ;;  %1037 = vmatprep.subr.bf16.mxu1 %v1144_v59 }
  0x3d   : > { %1077 = vmatprep.subr.bf16.mxu0 %v1145_v60 }
  0x3f   : > { %1038 = vmatpush3.bf16.msra.mxu1 %v1144_v59 }
  0x40   : > { %1078 = vmatpush3.bf16.msra.mxu0 %v1145_v60  ;;  %1039 = vmatprep.subr.bf16.mxu1 %v1146_v61 }
  0x41   : > { %1079 = vmatprep.subr.bf16.mxu0 %v1147_v62 }
  0x43   : > { %1040 = vmatpush3.bf16.msra.mxu1 %v1146_v61 }
  0x44   : > { %1080 = vmatpush3.bf16.msra.mxu0 %v1147_v62 }
  0x46   : > { %1042 = vmatmul.mubr.bf16.vlgmr.msra.gmra.mrb[0].mxu1 %v1149_v63 }
  0x47   : > { %1082 = vmatmul.mubr.bf16.vlgmr.msra.gmra.mrb[0].mxu0 %v578_v50 }
 0x119   : > { %v1043_v25 = vpop.f32.mrb[0].mxu1 }
 0x11a   : > { %v1083_v26 = vpop.f32.mrb[0].mxu0  ;;  %v391_v27 = vpop.f32.mrb[1].mxu1 }
 0x11b   : > { %v1085_v28 = vadd.f32 %v1083_v26, %v1043_v25  ;;  %v664_v29 = vpop.f32.mrb[1].mxu0  ;;  %v1044_v30 = vpop.f32.mrb[2].mxu1 }
 0x11c   : > { %v1086_v33 = vadd.f32 %v664_v29, %v391_v27  ;;  %v1084_v34 = vpop.f32.mrb[2].mxu0  ;;  %v394_v35 = vpop.f32.mrb[3].mxu1 }
 0x11d   : > { %v667_v37 = vpop.f32.mrb[3].mxu0  ;;  %v744_v40 = vmul.f32 %v1085_v28, %v950_v32 }
 0x11e   : > { %v1087_v39 = vadd.f32 %v667_v37, %v394_v35  ;;  %v742_v41 = vmul.f32 %v1086_v33, %v948_v36 }
 0x11f   : > { %v747_v44 = vsel %vm746_vm15, %v744_v40, 0.0 }
 0x120   : > { %v743_v42 = vmul.f32 %v1087_v39, %v949_v38 }
 0x122   : > { %v745_v43 = vadd.f32 %v743_v42, %v742_v41 }
 0x124   : > { %v748_v45 = vadd.f32 %v747_v44, %v745_v43 }
 0x126   : > { %v749_v46 = vrot.slane %v748_v45, 4 }
 0x128   : > { %v750_v47 = vadd.f32 %v749_v46, %v748_v45 }
 0x12a   : > { %v751_v48 = vrot.slane %v750_v47, 2 }
 0x12c   : > { %v752_v49 = vadd.f32 %v751_v48, %v750_v47 }
 0x12e   : > { %v753_v50 = vrot.slane %v752_v49, 1 }
 0x130   : > { %v754_v51 = vadd.f32 %v753_v50, %v752_v49 }
 0x132   : > { %v755_v52 = vmul.f32 0.0625, %v754_v51 }
 0x134   : > { %v756_v53 = vsub.f32 %v1086_v33, %v755_v52  ;;  %v757_v54 = vsub.f32 %v1087_v39, %v755_v52  ;;  %v758_v55 = vsub.f32 %v1085_v28, %v755_v52 }
 0x136   : > { %v759_v56 = vmul.f32 %v756_v53, %v756_v53  ;;  %v760_v57 = vmul.f32 %v757_v54, %v757_v54  ;;  %v761_v58 = vmul.f32 %v758_v55, %v758_v55 }
 0x138   : > { %v762_v59 = vmul.f32 %v948_v36, %v759_v56  ;;  %v763_v60 = vmul.f32 %v949_v38, %v760_v57  ;;  %v764_v61 = vmul.f32 %v950_v32, %v761_v58 }
 0x13a   : > { %v765_v62 = vadd.f32 %v763_v60, %v762_v59  ;;  %v766_v63 = vsel %vm746_vm15, %v764_v61, 0.0 }
 0x13c   : > { %v767_v0 = vadd.f32 %v766_v63, %v765_v62 }
 0x13e   : > { %v768_v1 = vrot.slane %v767_v0, 4 }
 0x140   : > { %v769_v2 = vadd.f32 %v768_v1, %v767_v0 }
 0x142   : > { %v770_v3 = vrot.slane %v769_v2, 2 }
 0x144   : > { %v771_v4 = vadd.f32 %v770_v3, %v769_v2 }
 0x146   : > { %v772_v5 = vrot.slane %v771_v4, 1 }
 0x148   : > { %v773_v6 = vadd.f32 %v772_v5, %v771_v4 }
 0x14a   : > { %v774_v7 = vmul.f32 0.0625, %v773_v6 }
 0x14c   : > { %v775_v8 = vadd.f32 1e-05, %v774_v7 }
 0x14e   : > { %1150 = vrsqrt.f32 %v775_v8 }
 0x158   : > { %v1151_v9 = vpop.eup %1150 }
 0x159   : > { %v777_v10 = vmul.f32 %v1151_v9, %v756_v53  ;;  %v778_v11 = vmul.f32 %v1151_v9, %v757_v54  ;;  %v779_v12 = vmul.f32 %v1151_v9, %v758_v55 }
 0x15b   : > { %v780_v13 = vmax.f32 %v777_v10, 0.0  ;;  %v781_v14 = vmax.f32 %v778_v11, 0.0  ;;  %v782_v15 = vmax.f32 %v779_v12, 0.0 }
 0x15d   : > { %v959_v16 = vpack.c.bf16 %v782_v15, %v782_v15  ;;  %v963_v17 = vpack.c.bf16 %v781_v14, %v780_v13 }
 0x15f   : > { %964 = vst [vmem:[%s143_s30] sm:$0xff] %v963_v17   ;;  %798 = vst [vmem:[%s143_s30 + $0x8] sm:$0x3] %v959_v16 }
 0x160 PF: > { %s12_s9 = sadd.s32 1, %s1158_s9  }
 0x161   : > { %p9_p4 = scmp.ge.s32.totalorder %s12_s9, 4  }
 0x163   :  { %11 = sbr.rel (!%p9_p4) target bundleno = 1 (0x1), region = 61 }

// kernel: generator_forward.13
= control target key start
LH: loop header
LB: loop body
LE: loop exit
PB: predicated region body
PF: predicated region fallthrough
CT: control target
= control target key end

     0   :  { %s1158_s9 = smov 0   ;;  %s1418_s0 = inlined_call_operand.vmem [shape: bf16[2,42,192], index: 0, kind: input, shape index: {}]   ;;  %s1419_s1 = inlined_call_operand.vmem [shape: bf16[3,192,128], index: 1, kind: input, shape index: {}]   ;;  %s1420_s2 = inlined_call_operand.vmem [shape: bf16[2,24,128], index: 2, kind: output, shape index: {}]  }
   0x1 LB: > { %s901_s10 = sadd.s32 4294967295, %s1136_s9   ;;  %p905_p0 = scmp.ge.s32.totalorder %s1136_s9, 1  ;;  %s1136_s9 = sphi %s1158_s9, %s12_s9  }
   0x2   : > { %p112_p1 = scmp.lt.s32.totalorder %s1136_s9, 3 }
   0x4   : > { %p113_p2 = pnand %p905_p0, %p112_p1 }
   0x5   : > { %v1079_v0 = vld [vmem:[%s1419_s1 + $0x60] sm:$0xff] (!%p113_p2)   ;;  %v1138_v1 = vmov (!%p113_p2), 0   ;;  %v1081_v3 = vld [vmem:[%s1419_s1 + $0x68] sm:$0xff] (!%p113_p2)   ;;  %v1083_v5 = vld [vmem:[%s1419_s1 + $0x70] sm:$0xff] (!%p113_p2)   ;;  %p134_p3 = scmp.lt.s32.totalorder (!%p113_p2), %s901_s10, 1  ;;  %vm296_vm0 = vcmask (!%p113_p2), 523264  }
   0x6   : > { %116 = sbr.rel (%p113_p2) target bundleno = 870 (0x366), region = 28  ;;  %303 = vmatprep.subr.bf16.mxu1 (!%p113_p2), %v1138_v1  ;;  %438 = vmatprep.subr.bf16.mxu0 (!%p113_p2), %v1138_v1  ;;  %v1080_v2 = vld [vmem:[%s1419_s1] sm:$0xff] (!%p113_p2)   ;;  %v1082_v4 = vld [vmem:[%s1419_s1 + $0x8] sm:$0xff] (!%p113_p2)   ;;  %v1084_v6 = vld [vmem:[%s1419_s1 + $0x10] sm:$0xff] (!%p113_p2)   ;;  %vm215_vm1 = vcmask (!%p113_p2), 1044480   ;;  %vm531_vm2 = vcmask (!%p113_p2), 1045504  }
   0x7   : > { %304 = vmatpush1.bf16.msra.mxu1 (!%p113_p2), %v1079_v0  ;;  %439 = vmatpush1.bf16.msra.mxu0 (!%p113_p2), %v1080_v2  ;;  %v1085_v7 = vld [vmem:[%s1419_s1 + $0x78] sm:$0xff] (!%p113_p2)   ;;  %v1087_v9 = vld [vmem:[%s1419_s1 + $0x80] sm:$0xff] (!%p113_p2)   ;;  %v1089_v11 = vld [vmem:[%s1419_s1 + $0x88] sm:$0xff] (!%p113_p2)   ;;  %s1140_s7 = smov (!%p113_p2), 32   ;;  %s1141_s8 = smov (!%p113_p2), 96   ;;  %vm764_vm15 = vcmask (!%p113_p2), 261120  }
   0x8   : > { %305 = vmatprep.subr.bf16.mxu1 (!%p113_p2), %v1138_v1  ;;  %440 = vmatprep.subr.bf16.mxu0 (!%p113_p2), %v1138_v1  ;;  %v1086_v8 = vld [vmem:[%s1419_s1 + $0x18] sm:$0xff] (!%p113_p2)   ;;  %v1088_v10 = vld [vmem:[%s1419_s1 + $0x20] sm:$0xff] (!%p113_p2)   ;;  %v1090_v12 = vld [vmem:[%s1419_s1 + $0x28] sm:$0xff] (!%p113_p2)   ;;  %s1142_s11 = smov (!%p113_p2), 64  }
   0x9   : > { %v1091_v13 = vld [vmem:[%s1419_s1 + $0x90] sm:$0xff] (!%p113_p2)   ;;  %v1093_v21 = vld [vmem:[%s1419_s1 + $0x98] sm:$0xff] (!%p113_p2)   ;;  %v1095_v27 = vld [vmem:[%s1419_s1 + $0xa0] sm:$0xff] (!%p113_p2)  }
   0xa   : > { %v1092_v14 = vld [vmem:[%s1419_s1 + $0x30] sm:$0xff] (!%p113_p2)   ;;  %v1094_v24 = vld [vmem:[%s1419_s1 + $0x38] sm:$0xff] (!%p113_p2)   ;;  %v1096_v29 = vld [vmem:[%s1419_s1 + $0x40] sm:$0xff] (!%p113_p2)  }
   0xb   : > { %306 = vmatpush1.bf16.msra.mxu1 (!%p113_p2), %v1081_v3  ;;  %441 = vmatpush1.bf16.msra.mxu0 (!%p113_p2), %v1082_v4  ;;  %v1097_v30 = vld [vmem:[%s1419_s1 + $0xa8] sm:$0xff] (!%p113_p2)   ;;  %v1099_v32 = vld [vmem:[%s1419_s1 + $0xb0] sm:$0xff] (!%p113_p2)   ;;  %v1101_v41 = vld [vmem:[%s1419_s1 + $0xb8] sm:$0xff] (!%p113_p2)  }
   0xc   : > { %307 = vmatprep.subr.bf16.mxu1 (!%p113_p2), %v1138_v1  ;;  %442 = vmatprep.subr.bf16.mxu0 (!%p113_p2), %v1138_v1  ;;  %v1098_v31 = vld [vmem:[%s1419_s1 + $0x48] sm:$0xff] (!%p113_p2)   ;;  %v1100_v36 = vld [vmem:[%s1419_s1 + $0x50] sm:$0xff] (!%p113_p2)   ;;  %v1102_v44 = vld [vmem:[%s1419_s1 + $0x58] sm:$0xff] (!%p113_p2)  }
   0xd   : > { %s1422_s10 = smov (!%p134_p3, %s901_s10), 1  ;;  %v1109_v48 = vld [vmem:[%s1419_s1 + $0xc0] sm:$0xff]   ;;  %v1110_v52 = vld [vmem:[%s1419_s1 + $0xc8] sm:$0xff]   ;;  %v1111_v55 = vld [vmem:[%s1419_s1 + $0xd0] sm:$0xff]  }
   0xe   : > { %s1058_s3 = smul.u32 48, %s1422_s10  ;;  %v1112_v58 = vld [vmem:[%s1419_s1 + $0xd8] sm:$0xff]   ;;  %v1113_v59 = vld [vmem:[%s1419_s1 + $0xe0] sm:$0xff]   ;;  %v1114_v60 = vld [vmem:[%s1419_s1 + $0xe8] sm:$0xff]  }
   0xf   : > { %308 = vmatpush1.bf16.msra.mxu1 %v1083_v5  ;;  %443 = vmatpush1.bf16.msra.mxu0 %v1084_v6  ;;  %v1115_v61 = vld [vmem:[%s1419_s1 + $0xf0] sm:$0xff]   ;;  %v1116_v62 = vld [vmem:[%s1419_s1 + $0xf8] sm:$0xff]   ;;  %v1117_v63 = vld [vmem:[%s1419_s1 + $0x100] sm:$0xff]   ;;  %s1059_s13 = smul.u32 12, %s1422_s10 }
  0x10   : > { %309 = vmatprep.subr.bf16.mxu1 %v1138_v1  ;;  %444 = vmatprep.subr.bf16.mxu0 %v1138_v1  ;;  %s1220_s12 = scalar_lea.vmem %s1418_s0, %s1058_s3  ;;  %v1120_v0 = vld [vmem:[%s1419_s1 + $0x108] sm:$0xff]   ;;  %v1121_v2 = vld [vmem:[%s1419_s1 + $0x110] sm:$0xff]   ;;  %v1122_v3 = vld [vmem:[%s1419_s1 + $0x118] sm:$0xff]  }
  0x11   : > { %v1231_v15 = vld [vmem:[%s1220_s12 + $0x8] sm:$0xff]  ;;  %v1234_v16 = vld [vmem:[%s1220_s12 + $0x10] sm:$0xff]  ;;  %v172_v17 = vld [vmem:[%s1220_s12] sm:$0x88]  ;;  %s143_s16 = scalar_lea.vmem %s1420_s2, %s1059_s13 }
  0x12   : > { %v173_v18 = vld [vmem:[%s1220_s12 + $0x18] sm:$0x77]  ;;  %v933_v19 = vcombine.high %v172_v17, %v1231_v15  ;;  %v145_v20 = vld [vmem:[%s1220_s12] sm:$0xff]  ;;  %v932_v33 = vcombine.low %v172_v17, %v1231_v15  ;;  %v486_v35 = vld [vmem:[%s1220_s12 + $0x8] sm:$0xcc]  ;;  %v953_v49 = vcombine.high %v1234_v16, %v1234_v16  ;;  %v952_v56 = vcombine.low %v1234_v16, %v1234_v16 }
  0x13   : > { %310 = vmatpush1.bf16.msra.mxu1 %v1085_v7  ;;  %445 = vmatpush1.bf16.msra.mxu0 %v1086_v8  ;;  %v935_v22 = vcombine.high %v1234_v16, %v173_v18  ;;  %v951_v23 = vcombine.high %v145_v20, %v1231_v15  ;;  %v934_v34 = vcombine.low %v1234_v16, %v173_v18  ;;  %v1281_v38 = vld [vmem:[%s1220_s12 + $0x18] ss:$8 sps:$4 sm:$0x3f]   ;;  %v1127_v51 = vld [vmem:[%s1220_s12 + $0x1c] ss:$8 sps:$4 sm:$0x3f]  }
  0x14   : > { %311 = vmatprep.subr.bf16.mxu1 %v1138_v1  ;;  %446 = vmatprep.subr.bf16.mxu0 %v1138_v1  ;;  %v219_v25 = vrot.slane %v933_v19, 3  ;;  %v992_v37 = vcombine.low %v486_v35, %v1234_v16  ;;  %v533_v40 = vrot.slane %v1281_v38, 2  ;;  %v216_v42 = vrot.slane %v932_v33, 3 }
  0x15   : > { %v220_v26 = vrot.slane %v935_v22, 3  ;;  %966 = vmatprep.mubr.msk.bf16.mxu0 %vm296_vm0, %v951_v23  ;;  %v217_v43 = vrot.slane %v934_v34, 3  ;;  %v950_v46 = vcombine.low %v145_v20, %v1231_v15  ;;  %v993_v50 = vcombine.high %v486_v35, %v1234_v16 }
  0x16   : > { %v532_v39 = vrot.slane %v992_v37, 2  ;;  %v536_v54 = vrot.slane %v1127_v51, 2 }
  0x17   : > { %312 = vmatpush1.bf16.msra.mxu1 %v1087_v9  ;;  %447 = vmatpush1.bf16.msra.mxu0 %v1088_v10  ;;  %v221_v28 = vsel %vm215_vm1, %v219_v25, %v220_v26  ;;  %v218_v47 = vsel %vm215_vm1, %v216_v42, %v217_v43  ;;  %v535_v53 = vrot.slane %v993_v50, 2  ;;  %vm767_vm1 = vcmask 785408  }
  0x18   : > { %313 = vmatprep.subr.bf16.mxu1 %v1138_v1  ;;  %448 = vmatprep.subr.bf16.mxu0 %v1138_v1  ;;  %v1295_v45 = vsel %vm531_vm2, %v532_v39, %v533_v40 }
  0x19   : > { %948 = vmatprep.mubr.msk.bf16.mxu1 %vm296_vm0, %v221_v28  ;;  %v537_v57 = vsel %vm531_vm2, %v535_v53, %v536_v54 }
  0x1b   : > { %314 = vmatpush1.bf16.msra.mxu1 %v1089_v11  ;;  %449 = vmatpush1.bf16.msra.mxu0 %v1090_v12  ;;  %v669_v11 = vlaneseq }
  0x1c   : > { %315 = vmatprep.subr.bf16.mxu1 %v1138_v1  ;;  %450 = vmatprep.subr.bf16.mxu0 %v1138_v1 }
  0x1d   : > { %v1374_v17 = vshrl.u32 %v669_v11, 7 }
  0x1f   : > { %316 = vmatpush1.bf16.msra.mxu1 %v1091_v13  ;;  %451 = vmatpush1.bf16.msra.mxu0 %v1092_v14  ;;  %v671_v18 = vadd.s32 8, %v1374_v17  ;;  %v672_v19 = vadd.s32 16, %v1374_v17 }
  0x20   : > { %317 = vmatprep.subr.bf16.mxu1 %v1138_v1  ;;  %452 = vmatprep.subr.bf16.mxu0 %v1138_v1 }
  0x21   : > { %v1382_v22 = vmul.u32.u64.low 2863311531, %v671_v18  ;;  %v1383_v23 = vmul.u32.u64.high 2863311531, %v671_v18, %v1382_v22 }
  0x23   : > { %318 = vmatpush1.bf16.msra.mxu1 %v1093_v21  ;;  %453 = vmatpush1.bf16.msra.mxu0 %v1094_v24  ;;  %v1379_v20 = vmul.u32.u64.low 2863311531, %v1374_v17  ;;  %v1380_v21 = vmul.u32.u64.high 2863311531, %v1374_v17, %v1379_v20  ;;  %v1385_v24 = vmul.u32.u64.low 2863311531, %v672_v19  ;;  %v1386_v25 = vmul.u32.u64.high 2863311531, %v672_v19, %v1385_v24 }
  0x24   : > { %319 = vmatprep.subr.bf16.mxu1 %v1138_v1  ;;  %454 = vmatprep.subr.bf16.mxu0 %v1138_v1 }
  0x25   : > { %v701_v28 = vshrl.u32 %v1386_v25, 2 }
  0x27   : > { %320 = vmatpush1.bf16.msra.mxu1 %v1095_v27  ;;  %455 = vmatpush1.bf16.msra.mxu0 %v1096_v29  ;;  %v690_v27 = vshrl.u32 %v1383_v23, 2 }
  0x28   : > { %321 = vmatprep.subr.bf16.mxu1 %v1138_v1  ;;  %456 = vmatprep.subr.bf16.mxu0 %v1138_v1 }
  0x2b   : > { %322 = vmatpush1.bf16.msra.mxu1 %v1097_v30  ;;  %457 = vmatpush1.bf16.msra.mxu0 %v1098_v31  ;;  %v691_v30 = vmul.u32 6, %v690_v27  ;;  %v702_v31 = vmul.u32 6, %v701_v28 }
  0x2c   : > { %323 = vmatprep.subr.bf16.mxu1 %v1138_v1  ;;  %458 = vmatprep.subr.bf16.mxu0 %v1138_v1 }
  0x2d   : > { %v692_v33 = vsub.s32 %v671_v18, %v691_v30  ;;  %v703_v34 = vsub.s32 %v672_v19, %v702_v31 }
  0x2f   : > { %324 = vmatpush1.bf16.msra.mxu1 %v1099_v32  ;;  %459 = vmatpush1.bf16.msra.mxu0 %v1100_v36  ;;  %vm707_vm5 = vcmp.ne.s32.totalorder %v692_v33, 0  ;;  %vm710_vm6 = vcmp.lt.s32.totalorder %v692_v33, 0  ;;  %vm708_vm8 = vcmp.ne.s32.totalorder %v703_v34, 0  ;;  %vm711_vm9 = vcmp.lt.s32.totalorder %v703_v34, 0 }
  0x30   : > { %325 = vmatprep.subr.bf16.mxu1 %v1138_v1  ;;  %460 = vmatprep.subr.bf16.mxu0 %v1138_v1  ;;  %v716_v36 = vadd.s32 6, %v692_v33  ;;  %vm713_vm10 = vmand %vm710_vm6, %vm707_vm5  ;;  %v717_v37 = vadd.s32 6, %v703_v34 }
  0x31   : > { %vm714_vm11 = vmand %vm711_vm9, %vm708_vm8 }
  0x32   : > { %v719_v39 = vsel %vm713_vm10, %v716_v36, %v692_v33 }
  0x33   : > { %326 = vmatpush1.bf16.msra.mxu1 %v1101_v41  ;;  %461 = vmatpush1.bf16.msra.mxu0 %v1102_v44  ;;  %vm722_vm13 = vcmp.lt.s32.totalorder %v719_v39, 4 }
  0x34   : > { %1026 = vmatprep.subr.bf16.mxu1 %v1138_v1  ;;  %618 = vmatprep.subr.bf16.mxu0 %v1138_v1 }
  0x36   : > { %336 = vmatmul.mubr.bf16.vlgmr.msra.gmra.mrb[0].mxu1 %v218_v47  ;;  %471 = vmatmul.mubr.bf16.vlgmr.msra.gmra.mrb[0].mxu0 %v950_v46 }
  0x37   : > { %1038 = vmatpush1.bf16.msra.mxu1 %v1109_v48  ;;  %619 = vmatpush1.bf16.msra.mxu0 %v1109_v48  ;;  %v1139_v48 = vmov 0.0  }
  0x38   : > { %1027 = vmatprep.subr.bf16.mxu1 %v1138_v1  ;;  %620 = vmatprep.subr.bf16.mxu0 %v1138_v1  ;;  %v1011_v51 = vsel %vm722_vm13, 1.0, %v1139_v48 }
  0x39   : > { %967 = vmatprep.mubr.msk.bf16.mxu0 %vm296_vm0, %v953_v49  ;;  %949 = vmatprep.mubr.msk.bf16.mxu1 %vm296_vm0, %v220_v26  ;;  %v679_v26 = vshrl.u32 %v1380_v21, 2 }
  0x3b   : > { %1039 = vmatpush1.bf16.msra.mxu1 %v1110_v52  ;;  %621 = vmatpush1.bf16.msra.mxu0 %v1110_v52  ;;  %v680_v29 = vmul.u32 6, %v679_v26 }
  0x3c   : > { %1028 = vmatprep.subr.bf16.mxu1 %v1138_v1  ;;  %622 = vmatprep.subr.bf16.mxu0 %v1138_v1 }
  0x3d   : > { %v681_v32 = vsub.s32 %v1374_v17, %v680_v29 }
  0x3e   : > { %344 = vmatmul.mubr.bf16.gmra.mrb[4].mxu1 %v217_v43  ;;  %479 = vmatmul.mubr.bf16.gmra.mrb[4].mxu0 %v952_v56 }
  0x3f   : > { %1040 = vmatpush1.bf16.msra.mxu1 %v1111_v55  ;;  %623 = vmatpush1.bf16.msra.mxu0 %v1111_v55  ;;  %vm706_vm3 = vcmp.ne.s32.totalorder %v681_v32, 0  ;;  %vm709_vm4 = vcmp.lt.s32.totalorder %v681_v32, 0  ;;  %v715_v35 = vadd.s32 6, %v681_v32 }
  0x40   : > { %1029 = vmatprep.subr.bf16.mxu1 %v1138_v1  ;;  %624 = vmatprep.subr.bf16.mxu0 %v1138_v1  ;;  %vm712_vm7 = vmand %vm709_vm4, %vm706_vm3 }
  0x41   : > { %1008 = vmatprep.mubr.msk.bf16.mxu0 %vm296_vm0, %v537_v57  ;;  %1009 = vmatprep.mubr.msk.bf16.mxu1 %vm296_vm0, %v536_v54  ;;  %v718_v38 = vsel %vm712_vm7, %v715_v35, %v681_v32 }
  0x42   : > { %vm721_vm12 = vcmp.lt.s32.totalorder %v718_v38, 4 }
  0x43   : > { %1041 = vmatpush1.bf16.msra.mxu1 %v1112_v58  ;;  %625 = vmatpush1.bf16.msra.mxu0 %v1112_v58  ;;  %v1010_v49 = vsel %vm721_vm12, 1.0, %v1139_v48 }
  0x44   : > { %1030 = vmatprep.subr.bf16.mxu1 %v1138_v1  ;;  %626 = vmatprep.subr.bf16.mxu0 %v1138_v1 }
  0x47   : > { %1042 = vmatpush1.bf16.msra.mxu1 %v1113_v59  ;;  %627 = vmatpush1.bf16.msra.mxu0 %v1113_v59 }
  0x48   : > { %1031 = vmatprep.subr.bf16.mxu1 %v1138_v1  ;;  %628 = vmatprep.subr.bf16.mxu0 %v1138_v1 }
  0x4b   : > { %1043 = vmatpush1.bf16.msra.mxu1 %v1114_v60  ;;  %629 = vmatpush1.bf16.msra.mxu0 %v1114_v60 }
  0x4c   : > { %1032 = vmatprep.subr.bf16.mxu1 %v1138_v1  ;;  %630 = vmatprep.subr.bf16.mxu0 %v1138_v1 }
  0x4f   : > { %1044 = vmatpush1.bf16.msra.mxu1 %v1115_v61  ;;  %631 = vmatpush1.bf16.msra.mxu0 %v1115_v61 }
  0x50   : > { %1033 = vmatprep.subr.bf16.mxu1 %v1138_v1  ;;  %632 = vmatprep.subr.bf16.mxu0 %v1138_v1 }
  0x53   : > { %1045 = vmatpush1.bf16.msra.mxu1 %v1116_v62  ;;  %633 = vmatpush1.bf16.msra.mxu0 %v1116_v62 }
  0x54   : > { %1034 = vmatprep.subr.bf16.mxu1 %v1138_v1  ;;  %634 = vmatprep.subr.bf16.mxu0 %v1138_v1 }
  0x57   : > { %1046 = vmatpush1.bf16.msra.mxu1 %v1117_v63  ;;  %635 = vmatpush1.bf16.msra.mxu0 %v1117_v63 }
  0x58   : > { %1035 = vmatprep.subr.bf16.mxu1 %v1138_v1  ;;  %636 = vmatprep.subr.bf16.mxu0 %v1138_v1 }
  0x5b   : > { %1047 = vmatpush1.bf16.msra.mxu1 %v1120_v0  ;;  %637 = vmatpush1.bf16.msra.mxu0 %v1120_v0 }
  0x5c   : > { %1036 = vmatprep.subr.bf16.mxu1 %v1138_v1  ;;  %638 = vmatprep.subr.bf16.mxu0 %v1138_v1 }
  0x5f   : > { %1048 = vmatpush1.bf16.msra.mxu1 %v1121_v2  ;;  %639 = vmatpush1.bf16.msra.mxu0 %v1121_v2 }
  0x60   : > { %1037 = vmatprep.subr.bf16.mxu1 %v1138_v1  ;;  %640 = vmatprep.subr.bf16.mxu0 %v1138_v1 }
  0x63   : > { %1049 = vmatpush1.bf16.msra.mxu1 %v1122_v3  ;;  %641 = vmatpush1.bf16.msra.mxu0 %v1122_v3 }
  0x66   : > { %659 = vmatmul.mubr.bf16.vlgmr.msra.gmra.mrb[8].mxu1 %v533_v40  ;;  %651 = vmatmul.mubr.bf16.vlgmr.msra.gmra.mrb[0].mxu0 %v1295_v45  ;;  %v720_v40 = vsel %vm714_vm11, %v717_v37, %v703_v34 }
  0x67   : > { %vm723_vm14 = vcmp.lt.s32.totalorder %v720_v40, 4 }
  0x68   : > { %v1012_v55 = vsel %vm723_vm14, 1.0, %v1139_v48 }
 0x109   : > { %v337_v4 = vpop.f32.mrb[0].mxu1 }
 0x10a   : > { %v339_v5 = vpop.f32.mrb[1].mxu1 }
 0x10b   : > { %v340_v6 = vpop.f32.mrb[2].mxu1 }
 0x10c   : > { %v342_v7 = vpop.f32.mrb[3].mxu1 }
 0x111   : > { %v345_v8 = vpop.f32.mrb[4].mxu1  ;;  %v480_v9 = vpop.f32.mrb[4].mxu0 }
 0x112   : > { %v347_v10 = vpop.f32.mrb[5].mxu1  ;;  %v482_v12 = vpop.f32.mrb[5].mxu0  ;;  %v481_v13 = vadd.f32 %v480_v9, %v345_v8 }
 0x113   : > { %v348_v14 = vpop.f32.mrb[6].mxu1  ;;  %v483_v15 = vpop.f32.mrb[6].mxu0 }
 0x114   : > { %v349_v1 = vpop.f32.mrb[7].mxu1  ;;  %v484_v16 = vpop.f32.mrb[7].mxu0  ;;  %v772_v14 = vsub.s32 0, %v1374_v17 }
 0x139   : > { %v660_v41 = vpop.f32.mrb[8].mxu1  ;;  %v652_v42 = vpop.f32.mrb[0].mxu0 }
 0x13a   : > { %v668_v43 = vadd.f32 %v660_v41, %v481_v13  ;;  %v662_v44 = vpop.f32.mrb[9].mxu1  ;;  %v1050_v45 = vadd.f32 %v652_v42, %v337_v4  ;;  %v654_v46 = vpop.f32.mrb[1].mxu0 }
 0x13b   : > { %v663_v47 = vpop.f32.mrb[10].mxu1  ;;  %v655_v50 = vpop.f32.mrb[2].mxu0 }
 0x13c   : > { %v664_v52 = vpop.f32.mrb[11].mxu1  ;;  %v1051_v53 = vadd.f32 %v655_v50, %v340_v6  ;;  %v657_v54 = vpop.f32.mrb[3].mxu0  ;;  %v730_v56 = vmul.f32 %v1050_v45, %v1010_v49  ;;  %v732_v58 = vmul.f32 %v1012_v55, %v668_v43 }
 0x13e   : > { %v731_v57 = vmul.f32 %v1051_v53, %v1011_v51 }
 0x140   : > { %v733_v59 = vadd.f32 %v731_v57, %v730_v56 }
 0x142   : > { %v734_v60 = vadd.f32 %v733_v59, %v732_v58 }
 0x144   : > { %v735_v61 = vrot.slane %v734_v60, 4 }
 0x146   : > { %v736_v62 = vadd.f32 %v735_v61, %v734_v60 }
 0x148   : > { %v737_v63 = vrot.slane %v736_v62, 2 }
 0x14a   : > { %v738_v0 = vadd.f32 %v737_v63, %v736_v62 }
 0x14c   : > { %v739_v2 = vrot.slane %v738_v0, 1 }
 0x14e   : > { %v740_v3 = vadd.f32 %v739_v2, %v738_v0 }
 0x150   : > { %750 = vrot.lane.b32.xlu1 %v740_v3, %s1140_s7  ;;  %742 = vrot.lane.b32.xlu0 %v740_v3, %s1141_s8 }
 0x154   : > { %746 = vrot.lane.b32.xlu0 %v740_v3, %s1142_s11 }
 0x1c2   : > { %v743_v4 = vpop.permute.xlu0 %742  ;;  %v751_v8 = vpop.permute.xlu1 %750 }
 0x1c3   : > { %v745_v5 = vadd.f32 %v743_v4, %v740_v3 }
 0x1c6   : > { %v747_v6 = vpop.permute.xlu0 %746 }
 0x1c7   : > { %v749_v7 = vadd.f32 %v747_v6, %v745_v5 }
 0x1c9   : > { %v753_v9 = vadd.f32 %v751_v8, %v749_v7 }
 0x1cb   : > { %758 = vrot.lane.b32.xlu0 %v753_v9, %s1142_s11  ;;  %755 = vrot.lane.b32.xlu1 %v753_v9, %s1140_s7 }
 0x1cf   : > { %761 = vrot.lane.b32.xlu1 %v753_v9, %s1141_s8 }
 0x23d   : > { %v756_v10 = vpop.permute.xlu1 %755  ;;  %v759_v11 = vpop.permute.xlu0 %758 }
 0x23e   : > { %v765_v12 = vsel %vm764_vm15, %v753_v9, %v756_v10 }
 0x23f   : > { %v766_v13 = vsel %vm296_vm0, %v765_v12, %v759_v11 }
 0x241   : > { %v762_v15 = vpop.permute.xlu1 %761 }
 0x242   : > { %v768_v1 = vsel %vm767_vm1, %v766_v13, %v762_v15 }
 0x243   : > { %v769_v16 = vmul.f32 0.015625, %v768_v1 }
 0x245   : > { %v773_v18 = vrot.slane %v769_v16, %v772_v14 }
 0x247   : > { %v774_v19 = vsub.f32 %v1050_v45, %v773_v18  ;;  %v775_v20 = vsub.f32 %v1051_v53, %v773_v18  ;;  %v776_v21 = vsub.f32 %v668_v43, %v773_v18 }
 0x249   : > { %v777_v22 = vmul.f32 %v774_v19, %v774_v19  ;;  %v778_v23 = vmul.f32 %v775_v20, %v775_v20  ;;  %v779_v24 = vmul.f32 %v776_v21, %v776_v21 }
 0x24b   : > { %v780_v25 = vmul.f32 %v1010_v49, %v777_v22  ;;  %v781_v26 = vmul.f32 %v1011_v51, %v778_v23  ;;  %v782_v27 = vmul.f32 %v1012_v55, %v779_v24 }
 0x24d   : > { %v783_v28 = vadd.f32 %v781_v26, %v780_v25 }
 0x24f   : > { %v784_v29 = vadd.f32 %v783_v28, %v782_v27 }
 0x251   : > { %v785_v30 = vrot.slane %v784_v29, 4 }
 0x253   : > { %v786_v31 = vadd.f32 %v785_v30, %v784_v29 }
 0x255   : > { %v787_v32 = vrot.slane %v786_v31, 2 }
 0x257   : > { %v788_v17 = vadd.f32 %v787_v32, %v786_v31 }
 0x259   : > { %v789_v33 = vrot.slane %v788_v17, 1 }
 0x25b   : > { %v790_v34 = vadd.f32 %v789_v33, %v788_v17 }
 0x25d   : > { %796 = vrot.lane.b32.xlu1 %v790_v34, %s1142_s11  ;;  %792 = vrot.lane.b32.xlu0 %v790_v34, %s1141_s8 }
 0x261   : > { %800 = vrot.lane.b32.xlu0 %v790_v34, %s1140_s7 }
 0x2cf   : > { %v793_v35 = vpop.permute.xlu0 %792  ;;  %v797_v37 = vpop.permute.xlu1 %796 }
 0x2d0   : > { %v795_v36 = vadd.f32 %v793_v35, %v790_v34 }
 0x2d2   : > { %v799_v38 = vadd.f32 %v797_v37, %v795_v36 }
 0x2d3   : > { %v801_v39 = vpop.permute.xlu0 %800 }
 0x2d4   : > { %v803_v40 = vadd.f32 %v801_v39, %v799_v38 }
 0x2d6   : > { %808 = vrot.lane.b32.xlu0 %v803_v40, %s1142_s11  ;;  %805 = vrot.lane.b32.xlu1 %v803_v40, %s1140_s7 }
 0x2da   : > { %811 = vrot.lane.b32.xlu1 %v803_v40, %s1141_s8 }
 0x348   : > { %v806_v41 = vpop.permute.xlu1 %805  ;;  %v809_v42 = vpop.permute.xlu0 %808 }
 0x349   : > { %v814_v43 = vsel %vm764_vm15, %v803_v40, %v806_v41 }
 0x34a   : > { %v815_v44 = vsel %vm296_vm0, %v814_v43, %v809_v42 }
 0x34c   : > { %v812_v45 = vpop.permute.xlu1 %811 }
 0x34d   : > { %v816_v46 = vsel %vm767_vm1, %v815_v44, %v812_v45 }
 0x34e   : > { %v817_v47 = vmul.f32 0.015625, %v816_v46 }
 0x350   : > { %v818_v48 = vadd.f32 1e-05, %v817_v47 }
 0x352   : > { %1128 = vrsqrt.f32 %v818_v48 }
 0x35c   : > { %v1129_v49 = vpop.eup %1128 }
 0x35d   : > { %v823_v50 = vrot.slane %v1129_v49, %v772_v14 }
 0x35f   : > { %v824_v51 = vmul.f32 %v823_v50, %v774_v19  ;;  %v825_v52 = vmul.f32 %v823_v50, %v775_v20  ;;  %v826_v53 = vmul.f32 %v823_v50, %v776_v21 }
 0x361   : > { %v827_v54 = vmax.f32 %v824_v51, 0.0  ;;  %v828_v55 = vmax.f32 %v825_v52, 0.0  ;;  %v829_v56 = vmax.f32 %v826_v53, 0.0 }
 0x363   : > { %v1020_v57 = vpack.c.bf16 %v829_v56, %v829_v56  ;;  %v1024_v58 = vpack.c.bf16 %v828_v55, %v827_v54 }
 0x365   : > { %1025 = vst [vmem:[%s143_s16] sm:$0xff] %v1024_v58   ;;  %845 = vst [vmem:[%s143_s16 + $0x8] sm:$0xf] %v1020_v57 }
 0x366 PF: > { %s12_s9 = sadd.s32 1, %s1136_s9  }
 0x367   : > { %p9_p4 = scmp.ge.s32.totalorder %s12_s9, 4  }
 0x369   :  { %11 = sbr.rel (!%p9_p4) target bundleno = 1 (0x1), region = 60 }

// kernel: generator_forward.11
= control target key start
LH: loop header
LB: loop body
LE: loop exit
PB: predicated region body
PF: predicated region fallthrough
CT: control target
= control target key end

     0   :  { %s3043_s12 = smov 0   ;;  %s3571_s0 = inlined_call_operand.vmem [shape: bf16[2,42,192], index: 0, kind: input, shape index: {}]   ;;  %s3572_s1 = inlined_call_operand.vmem [shape: bf16[3,192,128], index: 1, kind: input, shape index: {}]   ;;  %s3573_s2 = inlined_call_operand.vmem [shape: bf16[9,128,128], index: 2, kind: input, shape index: {}]   ;;  %s3574_s3 = inlined_call_operand.vmem [shape: bf16[2,24,128], index: 3, kind: output, shape index: {}]  }
   0x1 LB: > { %s2188_s13 = sadd.s32 4294967295, %s3019_s12   ;;  %p2192_p0 = scmp.ge.s32.totalorder %s3019_s12, 1  ;;  %s3019_s12 = sphi %s3043_s12, %s13_s12  }
   0x2   : > { %p137_p1 = scmp.lt.s32.totalorder %s3019_s12, 3 }
   0x4   : > { %p138_p2 = pnand %p2192_p0, %p137_p1 }
   0x5   : > { %v2874_v0 = vld [vmem:[%s3572_s1 + $0x60] sm:$0xff] (!%p138_p2)   ;;  %v3021_v1 = vmov (!%p138_p2), 0   ;;  %p161_p3 = scmp.lt.s32.totalorder (!%p138_p2), %s2188_s13, 1  ;;  %v2875_v2 = vld [vmem:[%s3572_s1 + $0x68] sm:$0xff] (!%p138_p2)   ;;  %v2876_v3 = vld [vmem:[%s3572_s1 + $0x70] sm:$0xff] (!%p138_p2)   ;;  %vm303_vm0 = vcmask (!%p138_p2), 1044480  }
   0x6   : > { %141 = sbr.rel (%p138_p2) target bundleno = 926 (0x39e), region = 32  ;;  %391 = vmatprep.subr.bf16.mxu0 (!%p138_p2), %v3021_v1  ;;  %796 = vst [vmem:[#allocation2 + $0x4] sm:$0xf] (!%p138_p2), %v3021_v1  ;;  %797 = vst [vmem:[#allocation2 + $0x8] sm:$0xf] (!%p138_p2), %v3021_v1  ;;  %v2877_v4 = vld [vmem:[%s3572_s1 + $0x78] sm:$0xff] (!%p138_p2)  }
   0x7   : > { %798 = vst [vmem:[#allocation2 + $0xc] sm:$0xf] (!%p138_p2), %v3021_v1  ;;  %799 = vst [vmem:[#allocation2 + $0x10] sm:$0xf] (!%p138_p2), %v3021_v1  ;;  %392 = vmatpush1.bf16.msra.mxu0 (!%p138_p2), %v2874_v0  ;;  %v2878_v10 = vld [vmem:[%s3572_s1 + $0x80] sm:$0xff] (!%p138_p2)   ;;  %vm384_vm1 = vcmask (!%p138_p2), 523264  }
   0x8   : > { %800 = vst [vmem:[#allocation2 + $0x14] sm:$0xf] (!%p138_p2), %v3021_v1  ;;  %393 = vmatprep.subr.bf16.mxu0 (!%p138_p2), %v3021_v1  ;;  %v2879_v14 = vld [vmem:[%s3572_s1 + $0x88] sm:$0xff] (!%p138_p2)   ;;  %v2880_v16 = vld [vmem:[%s3572_s1 + $0x90] sm:$0xff] (!%p138_p2)   ;;  %v2881_v17 = vld [vmem:[%s3572_s1 + $0x98] sm:$0xff] (!%p138_p2)   ;;  %vm619_vm2 = vcmask (!%p138_p2), 1045504  }
   0x9   : > { %v2882_v18 = vld [vmem:[%s3572_s1 + $0xa0] sm:$0xff] (!%p138_p2)   ;;  %v2883_v19 = vld [vmem:[%s3572_s1 + $0xa8] sm:$0xff] (!%p138_p2)   ;;  %v2884_v22 = vld [vmem:[%s3572_s1 + $0xb0] sm:$0xff] (!%p138_p2)   ;;  %vm801_vm3 = vcmask (!%p138_p2), 1041408   ;;  %vm802_vm4 = vsmask.f32 (!%p138_p2), 1280 }
   0xa   : > { %v2885_v23 = vld [vmem:[%s3572_s1 + $0xb8] sm:$0xff] (!%p138_p2)   ;;  %v2890_v27 = vld [vmem:[%s3572_s1] sm:$0xff] (!%p138_p2)   ;;  %v2891_v28 = vld [vmem:[%s3572_s1 + $0x8] sm:$0xff] (!%p138_p2)  }
   0xb   : > { %394 = vmatpush1.bf16.msra.mxu0 (!%p138_p2), %v2875_v2  ;;  %v2892_v30 = vld [vmem:[%s3572_s1 + $0x10] sm:$0xff] (!%p138_p2)   ;;  %v2893_v32 = vld [vmem:[%s3572_s1 + $0x18] sm:$0xff] (!%p138_p2)   ;;  %v2894_v33 = vld [vmem:[%s3572_s1 + $0x20] sm:$0xff] (!%p138_p2)  }
   0xc   : > { %395 = vmatprep.subr.bf16.mxu0 (!%p138_p2), %v3021_v1  ;;  %v2895_v34 = vld [vmem:[%s3572_s1 + $0x28] sm:$0xff] (!%p138_p2)   ;;  %v2896_v35 = vld [vmem:[%s3572_s1 + $0x30] sm:$0xff] (!%p138_p2)   ;;  %v2897_v36 = vld [vmem:[%s3572_s1 + $0x38] sm:$0xff] (!%p138_p2)  }
   0xd   : > { %s3576_s13 = smov (!%p161_p3, %s2188_s13), 1  ;;  %v2898_v37 = vld [vmem:[%s3572_s1 + $0x40] sm:$0xff]   ;;  %v2899_v38 = vld [vmem:[%s3572_s1 + $0x48] sm:$0xff]   ;;  %v2900_v39 = vld [vmem:[%s3572_s1 + $0x50] sm:$0xff]  }
   0xe   : > { %s2856_s18 = smul.u32 48, %s3576_s13  ;;  %v2901_v40 = vld [vmem:[%s3572_s1 + $0x58] sm:$0xff]   ;;  %v2904_v43 = vld [vmem:[%s3572_s1 + $0xc0] sm:$0xff]   ;;  %v2905_v47 = vld [vmem:[%s3572_s1 + $0xc8] sm:$0xff]  }
   0xf   : > { %396 = vmatpush1.bf16.msra.mxu0 %v2876_v3  ;;  %v2906_v51 = vld [vmem:[%s3572_s1 + $0xd0] sm:$0xff]   ;;  %v2907_v53 = vld [vmem:[%s3572_s1 + $0xd8] sm:$0xff]   ;;  %v2908_v54 = vld [vmem:[%s3572_s1 + $0xe0] sm:$0xff]  }
  0x10   : > { %s3074_s23 = scalar_lea.vmem %s3571_s0, %s2856_s18  ;;  %397 = vmatprep.subr.bf16.mxu0 %v3021_v1  ;;  %v2909_v55 = vld [vmem:[%s3572_s1 + $0xe8] sm:$0xff]   ;;  %v2910_v56 = vld [vmem:[%s3572_s1 + $0xf0] sm:$0xff]   ;;  %v2911_v57 = vld [vmem:[%s3572_s1 + $0xf8] sm:$0xff]  }
  0x11   : > { %v3081_v5 = vld [vmem:[%s3074_s23 + $0x8] sm:$0xff]  ;;  %v3084_v6 = vld [vmem:[%s3074_s23 + $0x10] sm:$0xff]  ;;  %v260_v7 = vld [vmem:[%s3074_s23] sm:$0x88] }
  0x12   : > { %v261_v8 = vld [vmem:[%s3074_s23 + $0x18] sm:$0x77]  ;;  %v2223_v9 = vcombine.high %v260_v7, %v3081_v5  ;;  %v2222_v20 = vcombine.low %v260_v7, %v3081_v5  ;;  %v233_v29 = vld [vmem:[%s3074_s23] sm:$0xff]  ;;  %v574_v41 = vld [vmem:[%s3074_s23 + $0x8] sm:$0xcc]  ;;  %v2243_v44 = vcombine.high %v3084_v6, %v3084_v6  ;;  %v2242_v50 = vcombine.low %v3084_v6, %v3084_v6 }
  0x13   : > { %398 = vmatpush1.bf16.msra.mxu0 %v2877_v4  ;;  %v2225_v11 = vcombine.high %v3084_v6, %v261_v8  ;;  %v2224_v21 = vcombine.low %v3084_v6, %v261_v8  ;;  %v2241_v31 = vcombine.high %v233_v29, %v3081_v5  ;;  %v2240_v42 = vcombine.low %v233_v29, %v3081_v5  ;;  %v2922_v46 = vld [vmem:[%s3074_s23 + $0x1c] ss:$8 sps:$4 sm:$0x3f]   ;;  %v2913_v59 = vld [vmem:[%s3572_s1 + $0x108] sm:$0xff]   ;;  %v2916_v60 = vld [vmem:[%s3572_s1 + $0x110] sm:$0xff]  }
  0x14   : > { %399 = vmatprep.subr.bf16.mxu0 %v3021_v1  ;;  %v307_v12 = vrot.slane %v2223_v9, 3  ;;  %v304_v24 = vrot.slane %v2222_v20, 3  ;;  %v2283_v45 = vcombine.high %v574_v41, %v3084_v6  ;;  %v624_v49 = vrot.slane %v2922_v46, 2  ;;  %v2912_v58 = vld [vmem:[%s3572_s1 + $0x100] sm:$0xff]   ;;  %v2917_v63 = vld [vmem:[%s3572_s1 + $0x118] sm:$0xff]   ;;  %v2924_v5 = vld [vmem:[%s3573_s2 + $0x48] sm:$0xff]  }
  0x15   : > { %v308_v13 = vrot.slane %v2225_v11, 3  ;;  %v305_v25 = vrot.slane %v2224_v21, 3  ;;  %v2282_v61 = vcombine.low %v574_v41, %v3084_v6  ;;  %v2920_v62 = vld [vmem:[%s3074_s23 + $0x18] ss:$8 sps:$4 sm:$0x3f]   ;;  %v2926_v6 = vld [vmem:[%s3573_s2 + $0x50] sm:$0xff]   ;;  %vm803_vm5 = vmand %vm801_vm3, %vm802_vm4 }
  0x16   : > { %v623_v48 = vrot.slane %v2283_v45, 2  ;;  %v621_v2 = vrot.slane %v2920_v62, 2  ;;  %v2923_v4 = vld [vmem:[%s3573_s2 + $0x40] sm:$0xff]   ;;  %v2927_v7 = vld [vmem:[%s3573_s2 + $0x88] sm:$0xff]   ;;  %v2928_v8 = vld [vmem:[%s3573_s2 + $0x58] sm:$0xff]   ;;  %vm874_vm4 = vcmask 1046528  }
  0x17   : > { %400 = vmatpush1.bf16.msra.mxu0 %v2878_v10  ;;  %v309_v15 = vsel %vm303_vm0, %v307_v12, %v308_v13  ;;  %v306_v26 = vsel %vm303_vm0, %v304_v24, %v305_v25  ;;  %v620_v0 = vrot.slane %v2282_v61, 2  ;;  %v2929_v9 = vld [vmem:[%s3573_s2 + $0x90] sm:$0xff]   ;;  %v2930_v10 = vld [vmem:[%s3573_s2 + $0x60] sm:$0xff]   ;;  %v2931_v11 = vld [vmem:[%s3573_s2 + $0x98] sm:$0xff]  }
  0x18   : > { %401 = vmatprep.subr.bf16.mxu0 %v3021_v1  ;;  %2238 = vmatprep.mubr.msk.bf16.mxu0 %vm384_vm1, %v309_v15  ;;  %v625_v52 = vsel %vm619_vm2, %v623_v48, %v624_v49  ;;  %v2932_v12 = vld [vmem:[%s3573_s2 + $0x68] sm:$0xff]   ;;  %v2934_v15 = vld [vmem:[%s3573_s2 + $0x70] sm:$0xff]   ;;  %v3290_v20 = vld [vmem:[%s3573_s2] sm:$0xff]  }
  0x19   : > { %v622_v3 = vsel %vm619_vm2, %v620_v0, %v621_v2  ;;  %v2941_v21 = vld [vmem:[%s3573_s2 + $0xb8] sm:$0xff]   ;;  %v3299_v24 = vld [vmem:[%s3573_s2 + $0xc0] sm:$0xff]  }
  0x1b   : > { %402 = vmatpush1.bf16.msra.mxu0 %v2879_v14  ;;  %v804_v14 = vld [vmem:[#allocation2 + $0x18] sm:$0x3] }
  0x1c   : > { %403 = vmatprep.subr.bf16.mxu0 %v3021_v1 }
  0x1f   : > { %404 = vmatpush1.bf16.msra.mxu0 %v2880_v16  ;;  %v2935_v16 = vld [vmem:[%s3573_s2 + $0xa8] sm:$0xff]  }
  0x20   : > { %405 = vmatprep.subr.bf16.mxu0 %v3021_v1 }
  0x23   : > { %406 = vmatpush1.bf16.msra.mxu0 %v2881_v17  ;;  %v805_v17 = vsel %vm803_vm5, 0, %v804_v14  ;;  %vm979_vm5 = vsmask.f32 7424 }
  0x24   : > { %407 = vmatprep.subr.bf16.mxu0 %v3021_v1  ;;  %806 = vst [vmem:[#allocation2 + $0x18] sm:$0x3] %v805_v17 }
  0x27   : > { %408 = vmatpush1.bf16.msra.mxu0 %v2882_v18  ;;  %v2936_v18 = vld [vmem:[%s3573_s2 + $0x78] sm:$0xff]  }
  0x28   : > { %409 = vmatprep.subr.bf16.mxu0 %v3021_v1 }
  0x2b   : > { %410 = vmatpush1.bf16.msra.mxu0 %v2883_v19  ;;  %v2937_v19 = vld [vmem:[%s3573_s2 + $0xb0] sm:$0xff]  }
  0x2c   : > { %411 = vmatprep.subr.bf16.mxu0 %v3021_v1 }
  0x2f   : > { %412 = vmatpush1.bf16.msra.mxu0 %v2884_v22  ;;  %v172_v22 = vlaneseq }
  0x30   : > { %413 = vmatprep.subr.bf16.mxu0 %v3021_v1 }
  0x33   : > { %414 = vmatpush1.bf16.msra.mxu0 %v2885_v23  ;;  %v173_v23 = vshrl.u32 %v172_v22, 7 }
  0x34   : > { %526 = vmatprep.subr.bf16.mxu0 %v3021_v1 }
  0x36   : > { %424 = vmatmul.mubr.bf16.vlgmr.msra.gmra.mrb[0].mxu0 %v306_v26 }
  0x37   : > { %527 = vmatpush1.bf16.msra.mxu0 %v2890_v27  ;;  %2239 = vmatprep.mubr.msk.bf16.mxu0 %vm384_vm1, %v308_v13  ;;  %v2933_v13 = vld [vmem:[%s3573_s2 + $0xa0] sm:$0xff]   ;;  %v3302_v26 = vmul.u32.u64.low 2863311531, %v173_v23  ;;  %v3303_v27 = vmul.u32.u64.high 2863311531, %v173_v23, %v3302_v26 }
  0x38   : > { %528 = vmatprep.subr.bf16.mxu0 %v3021_v1 }
  0x3b   : > { %529 = vmatpush1.bf16.msra.mxu0 %v2891_v28 }
  0x3c   : > { %530 = vmatprep.subr.bf16.mxu0 %v3021_v1 }
  0x3e   : > { %432 = vmatmul.mubr.bf16.gmra.mrb[4].mxu0 %v305_v25  ;;  %v174_v25 = vadd.s32 8, %v173_v23 }
  0x3f   : > { %531 = vmatpush1.bf16.msra.mxu0 %v2892_v30  ;;  %2256 = vmatprep.mubr.msk.bf16.mxu0 %vm384_vm1, %v2241_v31  ;;  %v175_v30 = vadd.s32 16, %v173_v23 }
  0x40   : > { %532 = vmatprep.subr.bf16.mxu0 %v3021_v1  ;;  %v3305_v28 = vmul.u32.u64.low 2863311531, %v174_v25  ;;  %v3306_v29 = vmul.u32.u64.high 2863311531, %v174_v25, %v3305_v28 }
  0x43   : > { %533 = vmatpush1.bf16.msra.mxu0 %v2893_v32  ;;  %v3308_v31 = vmul.u32.u64.low 2863311531, %v175_v30  ;;  %v3309_v32 = vmul.u32.u64.high 2863311531, %v175_v30, %v3308_v31 }
  0x44   : > { %534 = vmatprep.subr.bf16.mxu0 %v3021_v1 }
  0x47   : > { %535 = vmatpush1.bf16.msra.mxu0 %v2894_v33  ;;  %v182_v33 = vshrl.u32 %v3303_v27, 2 }
  0x48   : > { %536 = vmatprep.subr.bf16.mxu0 %v3021_v1 }
  0x4b   : > { %537 = vmatpush1.bf16.msra.mxu0 %v2895_v34  ;;  %v193_v34 = vshrl.u32 %v3306_v29, 2 }
  0x4c   : > { %538 = vmatprep.subr.bf16.mxu0 %v3021_v1 }
  0x4f   : > { %539 = vmatpush1.bf16.msra.mxu0 %v2896_v35  ;;  %v183_v35 = vmul.u32 6, %v182_v33 }
  0x50   : > { %540 = vmatprep.subr.bf16.mxu0 %v3021_v1 }
  0x53   : > { %541 = vmatpush1.bf16.msra.mxu0 %v2897_v36  ;;  %v194_v36 = vmul.u32 6, %v193_v34 }
  0x54   : > { %542 = vmatprep.subr.bf16.mxu0 %v3021_v1 }
  0x57   : > { %543 = vmatpush1.bf16.msra.mxu0 %v2898_v37  ;;  %v204_v37 = vshrl.u32 %v3309_v32, 2 }
  0x58   : > { %544 = vmatprep.subr.bf16.mxu0 %v3021_v1 }
  0x5b   : > { %545 = vmatpush1.bf16.msra.mxu0 %v2899_v38  ;;  %v184_v38 = vsub.s32 %v173_v23, %v183_v35 }
  0x5c   : > { %546 = vmatprep.subr.bf16.mxu0 %v3021_v1 }
  0x5d   : > { %vm209_vm6 = vcmp.ne.s32.totalorder %v184_v38, 0  ;;  %vm212_vm7 = vcmp.lt.s32.totalorder %v184_v38, 0  ;;  %v218_v41 = vadd.s32 6, %v184_v38 }
  0x5e   : > { %vm215_vm10 = vmand %vm212_vm7, %vm209_vm6  ;;  %vm1114_vm6 = vsmask.f32 6400  ;;  %vm1258_vm7 = vsmask.f32 4352 }
  0x5f   : > { %547 = vmatpush1.bf16.msra.mxu0 %v2900_v39  ;;  %v195_v39 = vsub.s32 %v174_v25, %v194_v36 }
  0x60   : > { %548 = vmatprep.subr.bf16.mxu0 %v3021_v1 }
  0x61   : > { %vm210_vm8 = vcmp.ne.s32.totalorder %v195_v39, 0  ;;  %vm213_vm9 = vcmp.lt.s32.totalorder %v195_v39, 0 }
  0x62   : > { %vm216_vm11 = vmand %vm213_vm9, %vm210_vm8  ;;  %vm1669_vm8 = vsmask.f32 5376 }
  0x63   : > { %549 = vmatpush1.bf16.msra.mxu0 %v2901_v40  ;;  %v205_v40 = vmul.u32 6, %v204_v37 }
  0x64   : > { %706 = vmatprep.subr.bf16.mxu0 %v3021_v1 }
  0x66   : > { %559 = vmatmul.mubr.bf16.vlgmr.msra.gmra.mrb[0].mxu0 %v2240_v42  ;;  %v219_v42 = vadd.s32 6, %v195_v39 }
  0x67   : > { %707 = vmatpush1.bf16.msra.mxu0 %v2904_v43  ;;  %2257 = vmatprep.mubr.msk.bf16.mxu0 %vm384_vm1, %v2243_v44  ;;  %v206_v43 = vsub.s32 %v175_v30, %v205_v40  ;;  %v221_v44 = vsel %vm215_vm10, %v218_v41, %v184_v38  ;;  %v846_v41 = vld [vmem:[#allocation2 + $0x4] sm:$0xe] }
  0x68   : > { %708 = vmatprep.subr.bf16.mxu0 %v3021_v1  ;;  %v222_v45 = vsel %vm216_vm11, %v219_v42, %v195_v39  ;;  %vm224_vm14 = vcmp.lt.s32.totalorder %v221_v44, 4  ;;  %v826_v42 = vld [vmem:[#allocation2 + $0x4] sm:$0xf] }
  0x69   : > { %vm211_vm12 = vcmp.ne.s32.totalorder %v206_v43, 0  ;;  %vm214_vm13 = vcmp.lt.s32.totalorder %v206_v43, 0  ;;  %v220_v46 = vadd.s32 6, %v206_v43  ;;  %vm225_vm15 = vcmp.lt.s32.totalorder %v222_v45, 4 }
  0x6a   : > { %vm217_vm2 = vmand %vm214_vm13, %vm211_vm12 }
  0x6b   : > { %709 = vmatpush1.bf16.msra.mxu0 %v2905_v47  ;;  %v3022_v47 = vmov 0.0  }
  0x6c   : > { %710 = vmatprep.subr.bf16.mxu0 %v3021_v1  ;;  %v3314_v48 = vsel %vm224_vm14, 1.0, %v3022_v47 }
  0x6e   : > { %567 = vmatmul.mubr.bf16.gmra.mrb[4].mxu0 %v2242_v50  ;;  %v3316_v50 = vsel %vm225_vm15, 1.0, %v3022_v47 }
  0x6f   : > { %711 = vmatpush1.bf16.msra.mxu0 %v2906_v51  ;;  %2298 = vmatprep.mubr.msk.bf16.mxu0 %vm384_vm1, %v625_v52  ;;  %v223_v51 = vsel %vm217_vm2, %v220_v46, %v206_v43  ;;  %v1233_v43 = vld [vmem:[#allocation2 + $0x4] sm:$0x8] }
  0x70   : > { %712 = vmatprep.subr.bf16.mxu0 %v3021_v1  ;;  %vm226_vm3 = vcmp.lt.s32.totalorder %v223_v51, 4 }
  0x73   : > { %713 = vmatpush1.bf16.msra.mxu0 %v2907_v53 }
  0x74   : > { %714 = vmatprep.subr.bf16.mxu0 %v3021_v1 }
  0x77   : > { %715 = vmatpush1.bf16.msra.mxu0 %v2908_v54 }
  0x78   : > { %716 = vmatprep.subr.bf16.mxu0 %v3021_v1 }
  0x7b   : > { %717 = vmatpush1.bf16.msra.mxu0 %v2909_v55 }
  0x7c   : > { %718 = vmatprep.subr.bf16.mxu0 %v3021_v1 }
  0x7f   : > { %719 = vmatpush1.bf16.msra.mxu0 %v2910_v56 }
  0x80   : > { %720 = vmatprep.subr.bf16.mxu0 %v3021_v1 }
  0x83   : > { %721 = vmatpush1.bf16.msra.mxu0 %v2911_v57 }
  0x84   : > { %722 = vmatprep.subr.bf16.mxu0 %v3021_v1 }
  0x87   : > { %723 = vmatpush1.bf16.msra.mxu0 %v2912_v58  ;;  %v3320_v58 = vsel %vm226_vm3, 1.0, %v3022_v47 }
  0x88   : > { %724 = vmatprep.subr.bf16.mxu0 %v3021_v1 }
  0x8b   : > { %725 = vmatpush1.bf16.msra.mxu0 %v2913_v59 }
  0x8c   : > { %726 = vmatprep.subr.bf16.mxu0 %v3021_v1 }
  0x8f   : > { %727 = vmatpush1.bf16.msra.mxu0 %v2916_v60 }
  0x90   : > { %728 = vmatprep.subr.bf16.mxu0 %v3021_v1  ;;  %v2925_v1 = vld [vmem:[%s3573_s2 + $0x80] sm:$0xff]  }
  0x91   : > { %2669 = vmatprep.subr.bf16.mxu1 %v2925_v1 }
  0x92   : > { %2670 = vmatpush3.bf16.msra.mxu1 %v2925_v1 }
  0x93   : > { %729 = vmatpush1.bf16.msra.mxu0 %v2917_v63  ;;  %2671 = vmatprep.subr.bf16.mxu1 %v2927_v7 }
  0x94   : > { %2629 = vmatprep.subr.bf16.mxu0 %v2923_v4 }
  0x96   : > { %739 = vmatmul.mubr.bf16.vlgmr.msra.gmra.mrb[0].mxu0 %v622_v3  ;;  %2672 = vmatpush3.bf16.msra.mxu1 %v2927_v7 }
  0x97   : > { %2299 = vmatprep.mubr.msk.bf16.mxu0 %vm384_vm1, %v624_v49  ;;  %2630 = vmatpush3.bf16.msra.mxu0 %v2923_v4 }
  0x98   : > { %2631 = vmatprep.subr.bf16.mxu0 %v2924_v5  ;;  %2673 = vmatprep.subr.bf16.mxu1 %v2929_v9 }
  0x9a   : > { %2674 = vmatpush3.bf16.msra.mxu1 %v2929_v9 }
  0x9b   : > { %2632 = vmatpush3.bf16.msra.mxu0 %v2924_v5  ;;  %2675 = vmatprep.subr.bf16.mxu1 %v2931_v11 }
  0x9c   : > { %2633 = vmatprep.subr.bf16.mxu0 %v2926_v6 }
  0x9e   : > { %747 = vmatmul.mubr.bf16.gmra.mrb[4].mxu0 %v621_v2  ;;  %2676 = vmatpush3.bf16.msra.mxu1 %v2931_v11 }
  0x9f   : > { %2634 = vmatpush3.bf16.msra.mxu0 %v2926_v6  ;;  %2677 = vmatprep.subr.bf16.mxu1 %v2933_v13 }
  0xa0   : > { %2635 = vmatprep.subr.bf16.mxu0 %v2928_v8 }
  0xa2   : > { %2678 = vmatpush3.bf16.msra.mxu1 %v2933_v13 }
  0xa3   : > { %2636 = vmatpush3.bf16.msra.mxu0 %v2928_v8  ;;  %2679 = vmatprep.subr.bf16.mxu1 %v2935_v16 }
  0xa4   : > { %2637 = vmatprep.subr.bf16.mxu0 %v2930_v10 }
  0xa6   : > { %2680 = vmatpush3.bf16.msra.mxu1 %v2935_v16 }
  0xa7   : > { %2638 = vmatpush3.bf16.msra.mxu0 %v2930_v10  ;;  %2681 = vmatprep.subr.bf16.mxu1 %v2937_v19 }
  0xa8   : > { %2639 = vmatprep.subr.bf16.mxu0 %v2932_v12 }
  0xaa   : > { %2682 = vmatpush3.bf16.msra.mxu1 %v2937_v19 }
  0xab   : > { %2640 = vmatpush3.bf16.msra.mxu0 %v2932_v12  ;;  %2683 = vmatprep.subr.bf16.mxu1 %v2941_v21 }
  0xac   : > { %2641 = vmatprep.subr.bf16.mxu0 %v2934_v15 }
  0xae   : > { %2684 = vmatpush3.bf16.msra.mxu1 %v2941_v21 }
  0xaf   : > { %2642 = vmatpush3.bf16.msra.mxu0 %v2934_v15  ;;  %2689 = vmatprep.subr.bf16.mxu1 %v3299_v24 }
  0xb0   : > { %2643 = vmatprep.subr.bf16.mxu0 %v2936_v18 }
  0xb3   : > { %2644 = vmatpush3.bf16.msra.mxu0 %v2936_v18 }
  0xb4   : > { %2649 = vmatprep.subr.bf16.mxu0 %v3290_v20 }
 0x169   : > { %v740_v49 = vpop.f32.mrb[0].mxu0 }
 0x16a   : > { %v742_v52 = vpop.f32.mrb[1].mxu0  ;;  %v757_v54 = vmul.f32 %v3314_v48, %v740_v49 }
 0x16b   : > { %v743_v53 = vpop.f32.mrb[2].mxu0 }
 0x16c   : > { %v758_v55 = vmul.f32 %v3316_v50, %v743_v53  ;;  %v745_v56 = vpop.f32.mrb[3].mxu0 }
 0x16e   : > { %v760_v57 = vadd.f32 %v758_v55, %v757_v54 }
 0x171   : > { %v748_v59 = vpop.f32.mrb[4].mxu0 }
 0x172   : > { %v759_v60 = vmul.f32 %v3320_v58, %v748_v59  ;;  %v750_v61 = vpop.f32.mrb[5].mxu0 }
 0x173   : > { %v751_v62 = vpop.f32.mrb[6].mxu0 }
 0x174   : > { %v761_v63 = vadd.f32 %v760_v57, %v759_v60  ;;  %v752_v0 = vpop.f32.mrb[7].mxu0 }
 0x176   : > { %v762_v2 = vrot.slane %v761_v63, 4 }
 0x178   : > { %v763_v3 = vadd.f32 %v762_v2, %v761_v63 }
 0x17a   : > { %v764_v4 = vrot.slane %v763_v3, 2 }
 0x17c   : > { %v765_v5 = vadd.f32 %v764_v4, %v763_v3  ;;  %v2942_v4 = vld [vmem:[%s3573_s2 + $0x8] sm:$0xff]  }
 0x17e   : > { %v766_v1 = vrot.slane %v765_v5, 1 }
 0x180   : > { %v767_v6 = vadd.f32 %v766_v1, %v765_v5 }
 0x182   : > { %v768_v7 = vmul.f32 0.0625, %v767_v6 }
 0x184   : > { %v769_v8 = vsub.f32 %v740_v49, %v768_v7  ;;  %v770_v9 = vsub.f32 %v743_v53, %v768_v7  ;;  %v771_v10 = vsub.f32 %v748_v59, %v768_v7 }
 0x186   : > { %v772_v11 = vmul.f32 %v769_v8, %v769_v8  ;;  %v773_v12 = vmul.f32 %v770_v9, %v770_v9  ;;  %v774_v13 = vmul.f32 %v771_v10, %v771_v10 }
 0x188   : > { %v775_v14 = vmul.f32 %v3314_v48, %v772_v11  ;;  %v776_v15 = vmul.f32 %v3316_v50, %v773_v12  ;;  %v777_v16 = vmul.f32 %v3320_v58, %v774_v13 }
 0x18a   : > { %v778_v17 = vadd.f32 %v776_v15, %v775_v14 }
 0x18c   : > { %v779_v18 = vadd.f32 %v778_v17, %v777_v16 }
 0x18e   : > { %v780_v19 = vrot.slane %v779_v18, 4 }
 0x190   : > { %v781_v21 = vadd.f32 %v780_v19, %v779_v18 }
 0x192   : > { %v782_v22 = vrot.slane %v781_v21, 2 }
 0x194   : > { %v783_v23 = vadd.f32 %v782_v22, %v781_v21  ;;  %v2948_v22 = vld [vmem:[%s3573_s2 + $0x10] sm:$0xff]  }
 0x196   : > { %v784_v25 = vrot.slane %v783_v23, 1 }
 0x198   : > { %v785_v26 = vadd.f32 %v784_v25, %v783_v23 }
 0x19a   : > { %v786_v27 = vmul.f32 0.0625, %v785_v26 }
 0x19c   : > { %v787_v28 = vadd.f32 1e-05, %v786_v27 }
 0x19e   : > { %3009 = vrsqrt.f32 %v787_v28 }
 0x1a8   : > { %v3010_v29 = vpop.eup %3009 }
 0x1a9   : > { %v789_v30 = vmul.f32 %v3010_v29, %v769_v8  ;;  %v790_v31 = vmul.f32 %v3010_v29, %v770_v9  ;;  %v791_v32 = vmul.f32 %v3010_v29, %v771_v10  ;;  %v2949_v29 = vld [vmem:[%s3573_s2 + $0xc8] sm:$0xff]  }
 0x1ab   : > { %v792_v33 = vmax.f32 %v789_v30, 0.0  ;;  %v793_v34 = vmax.f32 %v790_v31, 0.0  ;;  %v794_v35 = vmax.f32 %v791_v32, 0.0  ;;  %v1913_v31 = vld [vmem:[#allocation2 + $0x14] sm:$0xf] }
 0x1ad   : > { %v807_v36 = vmul.f32 %v3314_v48, %v792_v33  ;;  %v808_v37 = vmul.f32 %v3316_v50, %v793_v34  ;;  %v809_v38 = vmul.f32 %v3320_v58, %v794_v35  ;;  %v2950_v33 = vld [vmem:[%s3573_s2 + $0x18] sm:$0xff]  }
 0x1af   : > { %v2524_v39 = vpack.c.bf16 %v809_v38, %v809_v38  ;;  %v2531_v40 = vpack.c.bf16 %v808_v37, %v807_v36  ;;  %v2951_v37 = vld [vmem:[%s3573_s2 + $0xd0] sm:$0xff]   ;;  %v2952_v38 = vld [vmem:[%s3573_s2 + $0x20] sm:$0xff]  }
 0x1b1   : > { %2538 = vst [vmem:[#allocation2 + $0x8] sm:$0xff] %v2531_v40   ;;  %825 = vst [vmem:[#allocation2 + $0x10] sm:$0xf] %v2524_v39 }
 0x1b8   : > { %v3329_v44 = vld [vmem:[#allocation2 + $0x8] sm:$0xf]  ;;  %v3331_v45 = vld [vmem:[#allocation2 + $0xc] sm:$0xf]  ;;  %v829_v46 = vld [vmem:[#allocation2 + $0x10] sm:$0x1] }
 0x1b9   : > { %v2319_v47 = vcombine.low %v846_v41, %v3329_v44  ;;  %v3335_v49 = vcombine.low %v3331_v45, %v829_v46  ;;  %v2329_v51 = vcombine.low %v826_v42, %v3329_v44  ;;  %v1093_v52 = vld [vmem:[#allocation2 + $0x10] sm:$0x3]  ;;  %v2379_v54 = vcombine.low %v1233_v43, %v3329_v44  ;;  %v3357_v26 = vld [vmem:[#allocation2 + $0xc] sm:$0xf]  ;;  %v2953_v41 = vld [vmem:[%s3573_s2 + $0xd8] sm:$0xff]  }
 0x1ba   : > { %v3338_v53 = vld [vmem:[#allocation2 + $0x10] sm:$0xf]  ;;  %v2354_v55 = vcombine.low %v3331_v45, %v1093_v52 }
 0x1bb   : > { %v2380_v56 = vcombine.low %v3331_v45, %v3338_v53  ;;  %v875_v57 = vrot.slane %v2319_v47, 1  ;;  %v876_v59 = vrot.slane %v3335_v49, 1  ;;  %v981_v60 = vshrl.u32 %v2329_v51, 16  ;;  %v3362_v30 = vld [vmem:[#allocation2 + $0x10] sm:$0xf] }
 0x1bc   : > { %v983_v61 = vshll.u32 %v2329_v51, 16  ;;  %v988_v62 = vshll.u32 %v3335_v49, 16  ;;  %v1116_v63 = vshrl.u32 %v2319_v47, 16  ;;  %v1119_v0 = vshll.u32 %v2319_v47, 16  ;;  %v2954_v51 = vld [vmem:[%s3573_s2 + $0x28] sm:$0xff]  }
 0x1bd   : > { %v1124_v2 = vshrl.u32 %v2354_v55, 16  ;;  %v877_v3 = vsel %vm874_vm4, %v875_v57, %v876_v59  ;;  %v1127_v1 = vshll.u32 %v2354_v55, 16  ;;  %v1260_v6 = vshrl.u32 %v2379_v54, 16  ;;  %v2955_v55 = vld [vmem:[%s3573_s2 + $0xe0] sm:$0xff]   ;;  %v2956_v57 = vld [vmem:[%s3573_s2 + $0x30] sm:$0xff]  }
 0x1be   : > { %v985_v5 = vrot.slane %v983_v61, 1  ;;  %2645 = vmatprep.mubr.bf16.mxu0 %v877_v3  ;;  %v3349_v7 = vrot.slane %v988_v62, 1  ;;  %v1118_v8 = vrot.slane %v1116_v63, 1  ;;  %v1121_v9 = vrot.slane %v1119_v0, 2  ;;  %v2958_v61 = vld [vmem:[%s3573_s2 + $0x38] sm:$0xff]   ;;  %v2959_v62 = vld [vmem:[%s3573_s2 + $0xf0] sm:$0xff]  }
 0x1bf   : > { %v1126_v10 = vrot.slane %v1124_v2, 1  ;;  %2646 = vmatmul.mubr.bf16.vlgmr.msra.gmra.mrb[8].mxu0 %v876_v59  ;;  %v1129_v12 = vrot.slane %v1127_v1, 2  ;;  %v1262_v13 = vrot.slane %v1260_v6, 3  ;;  %v1263_v14 = vshll.u32 %v2379_v54, 16  ;;  %v2960_v0 = vld [vmem:[%s3573_s2 + $0xf8] sm:$0xff]   ;;  %v2961_v3 = vld [vmem:[%s3573_s2 + $0x100] sm:$0xff]  }
 0x1c0   : > { %v986_v11 = vor.u32 %v985_v5, %v981_v60  ;;  %2650 = vmatpush3.bf16.msra.mxu0 %v3290_v20  ;;  %v1122_v15 = vor.u32 %v1121_v9, %v1118_v8  ;;  %v1268_v16 = vshrl.u32 %v2380_v56, 16  ;;  %v1271_v17 = vshll.u32 %v2380_v56, 16  ;;  %v1788_v20 = vld [vmem:[#allocation2 + $0x8] sm:$0x8]  ;;  %v2964_v5 = vld [vmem:[%s3573_s2 + $0x110] sm:$0xff]   ;;  %v2965_v1 = vld [vmem:[%s3573_s2 + $0x118] sm:$0xff]  }
 0x1c1   : > { %2651 = vmatprep.subr.bf16.mxu0 %v2942_v4  ;;  %v1130_v19 = vor.u32 %v1129_v12, %v1126_v10  ;;  %v1265_v21 = vrot.slane %v1263_v14, 4  ;;  %v3368_v34 = vcombine.low %v1788_v20, %v3357_v26  ;;  %v2508_v36 = vcombine.low %v3362_v30, %v1913_v31  ;;  %v2957_v60 = vld [vmem:[%s3573_s2 + $0xe8] sm:$0xff]   ;;  %v2968_v8 = vld [vmem:[%s3573_s2 + $0x130] sm:$0xff]   ;;  %v2971_v14 = vld [vmem:[%s3573_s2 + $0x140] sm:$0xff]  }
 0x1c2   : > { %v991_v18 = vsel %vm979_vm5, %v986_v11, %v3349_v7  ;;  %v1270_v23 = vrot.slane %v1268_v16, 3  ;;  %v1273_v25 = vrot.slane %v1271_v17, 4  ;;  %v992_v63 = vshrl.u32 %v3335_v49, 16  ;;  %v2963_v49 = vld [vmem:[%s3573_s2 + $0x108] sm:$0xff]   ;;  %v1500_v9 = vld [vmem:[#allocation2 + $0x14] sm:$0x1] }
 0x1c3   : > { %2665 = vmatprep.mubr.bf16.mxu0 %v991_v18  ;;  %v1131_v27 = vsel %vm1114_vm6, %v1122_v15, %v1130_v19  ;;  %v1266_v28 = vor.u32 %v1265_v21, %v1262_v13  ;;  %v1935_v39 = vshrl.u32 %v3368_v34, 16  ;;  %v1943_v40 = vshrl.u32 %v2508_v36, 16  ;;  %v2967_v6 = vld [vmem:[%s3573_s2 + $0x128] sm:$0xff]   ;;  %v2969_v11 = vld [vmem:[%s3573_s2 + $0x138] sm:$0xff]  }
 0x1c4   : > { %2685 = vmatprep.mubr.bf16.mxu1 %v1131_v27  ;;  %2652 = vmatpush3.bf16.msra.mxu0 %v2942_v4  ;;  %v1274_v32 = vor.u32 %v1273_v25, %v1270_v23  ;;  %v1946_v43 = vshll.u32 %v2508_v36, 16  ;;  %v994_v2 = vor.u32 %v992_v63, %v3349_v7  ;;  %v2405_v4 = vcombine.low %v3329_v44, %v3331_v45  ;;  %v2966_v44 = vld [vmem:[%s3573_s2 + $0x120] sm:$0xff]   ;;  %v1497_v45 = vld [vmem:[#allocation2 + $0x8] sm:$0xf]  ;;  %v2975_v23 = vld [vmem:[%s3573_s2 + $0x150] sm:$0xff]  }
 0x1c5   : > { %2686 = vmatmul.mubr.bf16.vlgmr.msra.gmra.mrb[0].mxu1 %v1130_v19  ;;  %2653 = vmatprep.subr.bf16.mxu0 %v2948_v22  ;;  %v1937_v42 = vrot.slane %v1935_v39, 3  ;;  %v1945_v47 = vrot.slane %v1943_v40, 3  ;;  %v2431_v7 = vcombine.low %v1497_v45, %v3357_v26  ;;  %v2432_v12 = vcombine.low %v3362_v30, %v1500_v9  ;;  %v2974_v21 = vld [vmem:[%s3573_s2 + $0x148] sm:$0xff]   ;;  %v2977_v25 = vld [vmem:[%s3573_s2 + $0x160] sm:$0xff]   ;;  %v1645_v27 = vld [vmem:[#allocation2 + $0x14] sm:$0x7] }
 0x1c6   : > { %2690 = vmatpush3.bf16.msra.mxu1 %v3299_v24  ;;  %v1275_v35 = vsel %vm1258_vm7, %v1266_v28, %v1274_v32  ;;  %v1938_v24 = vshll.u32 %v3368_v34, 16  ;;  %v1948_v52 = vrot.slane %v1946_v43, 4  ;;  %v2406_v18 = vcombine.low %v3338_v53, %v3338_v53  ;;  %v2976_v53 = vld [vmem:[%s3573_s2 + $0x158] sm:$0xff]   ;;  %v1644_v20 = vld [vmem:[#allocation2 + $0x8] sm:$0xc]  ;;  %v2981_v40 = vld [vmem:[%s3573_s2 + $0x180] sm:$0xff]  }
 0x1c7   : > { %2705 = vmatprep.mubr.bf16.mxu1 %v1275_v35  ;;  %2691 = vmatprep.subr.bf16.mxu1 %v2949_v29  ;;  %v1531_v10 = vshll.u32 %v2431_v7, 16  ;;  %v1529_v15 = vshrl.u32 %v2431_v7, 16  ;;  %v1536_v16 = vshll.u32 %v2432_v12, 16  ;;  %v2978_v28 = vld [vmem:[%s3573_s2 + $0x168] sm:$0xff]   ;;  %v3464_v31 = vcombine.low %v3362_v30, %v1645_v27  ;;  %v3000_v45 = vld [vmem:[%s3573_s2 + $0x200] sm:$0xff]   ;;  %v3003_v7 = vld [vmem:[%s3573_s2 + $0x210] sm:$0xff]  }
 0x1c8   : > { %2654 = vmatpush3.bf16.msra.mxu0 %v2948_v22  ;;  %v1940_v46 = vrot.slane %v1938_v24, 4  ;;  %v3390_v56 = vor.u32 %v1948_v52, %v1945_v47  ;;  %v2984_v47 = vld [vmem:[%s3573_s2 + $0x188] sm:$0xff]   ;;  %v2985_v52 = vld [vmem:[%s3573_s2 + $0x190] sm:$0xff]   ;;  %v1809_v63 = vrot.slane %v3368_v34, 3  ;;  %v2995_v34 = vld [vmem:[%s3573_s2 + $0x1d8] sm:$0xff]  }
 0x1c9   : > { %2655 = vmatprep.subr.bf16.mxu0 %v2950_v33  ;;  %v1533_v13 = vrot.slane %v1531_v10, 1  ;;  %v1538_v19 = vrot.slane %v1536_v16, 1  ;;  %v1679_v36 = vshrl.u32 %v3464_v31, 16  ;;  %v3005_v9 = vld [vmem:[%s3573_s2 + $0x220] sm:$0xff]   ;;  %v3007_v10 = vld [vmem:[%s3573_s2 + $0x230] sm:$0xff]  }
 0x1ca   : > { %2692 = vmatpush3.bf16.msra.mxu1 %v2949_v29  ;;  %v1941_v54 = vor.u32 %v1940_v46, %v1937_v42  ;;  %v2457_v29 = vcombine.low %v1644_v20, %v3357_v26  ;;  %v2980_v26 = vld [vmem:[%s3573_s2 + $0x178] sm:$0xff]  }
 0x1cb   : > { %2693 = vmatprep.subr.bf16.mxu1 %v2951_v37  ;;  %v1534_v17 = vor.u32 %v1533_v13, %v1529_v15  ;;  %v1681_v39 = vrot.slane %v1679_v36, 2 }
 0x1cc   : > { %2656 = vmatpush3.bf16.msra.mxu0 %v2950_v33  ;;  %v3397_v59 = vsel %vm1258_vm7, %v1941_v54, %v3390_v56  ;;  %v1671_v33 = vshrl.u32 %v2457_v29, 16  ;;  %v1674_v35 = vshll.u32 %v2457_v29, 16  ;;  %v2986_v54 = vld [vmem:[%s3573_s2 + $0x198] sm:$0xff]  }
 0x1cd   : > { %2657 = vmatprep.subr.bf16.mxu0 %v2952_v38  ;;  %v1539_v22 = vsel %vm979_vm5, %v1534_v17, %v1538_v19 }
 0x1ce   : > { %2694 = vmatpush3.bf16.msra.mxu1 %v2951_v37  ;;  %v1682_v37 = vshll.u32 %v3464_v31, 16  ;;  %v1673_v30 = vrot.slane %v1671_v33, 2 }
 0x1cf   : > { %2695 = vmatprep.subr.bf16.mxu1 %v2953_v41 }
 0x1d0   : > { %2658 = vmatpush3.bf16.msra.mxu0 %v2952_v38  ;;  %v1676_v38 = vrot.slane %v1674_v35, 3  ;;  %v1684_v24 = vrot.slane %v1682_v37, 3 }
 0x1d1   : > { %2659 = vmatprep.subr.bf16.mxu0 %v2954_v51 }
 0x1d2   : > { %2696 = vmatpush3.bf16.msra.mxu1 %v2953_v41  ;;  %v1540_v41 = vshrl.u32 %v2432_v12, 16  ;;  %v1677_v42 = vor.u32 %v1676_v38, %v1673_v30  ;;  %v1685_v43 = vor.u32 %v1684_v24, %v1681_v39 }
 0x1d3   : > { %2697 = vmatprep.subr.bf16.mxu1 %v2955_v55 }
 0x1d4   : > { %2660 = vmatpush3.bf16.msra.mxu0 %v2954_v51  ;;  %v1542_v46 = vor.u32 %v1540_v41, %v1538_v19  ;;  %v1686_v51 = vsel %vm1669_vm8, %v1677_v42, %v1685_v43 }
 0x1d5   : > { %2661 = vmatprep.subr.bf16.mxu0 %v2956_v57 }
 0x1d6   : > { %2698 = vmatpush3.bf16.msra.mxu1 %v2955_v55  ;;  %v2987_v55 = vld [vmem:[%s3573_s2 + $0x1a0] sm:$0xff]  }
 0x1d7   : > { %2699 = vmatprep.subr.bf16.mxu1 %v2957_v60 }
 0x1d8   : > { %2662 = vmatpush3.bf16.msra.mxu0 %v2956_v57  ;;  %v2988_v57 = vld [vmem:[%s3573_s2 + $0x1a8] sm:$0xff]  }
 0x1d9   : > { %2663 = vmatprep.subr.bf16.mxu0 %v2958_v61 }
 0x1da   : > { %2700 = vmatpush3.bf16.msra.mxu1 %v2957_v60  ;;  %v2989_v60 = vld [vmem:[%s3573_s2 + $0x1b0] sm:$0xff]  }
 0x1db   : > { %2701 = vmatprep.subr.bf16.mxu1 %v2959_v62 }
 0x1dc   : > { %2664 = vmatpush3.bf16.msra.mxu0 %v2958_v61  ;;  %v2990_v61 = vld [vmem:[%s3573_s2 + $0x1b8] sm:$0xff]  }
 0x1de   : > { %2702 = vmatpush3.bf16.msra.mxu1 %v2959_v62  ;;  %v2991_v62 = vld [vmem:[%s3573_s2 + $0x1c0] sm:$0xff]  }
 0x1df   : > { %2666 = vmatmul.mubr.bf16.vlgmr.msra.gmra.mrb[8].mxu0 %v994_v2  ;;  %2703 = vmatprep.subr.bf16.mxu1 %v2960_v0  ;;  %v2993_v2 = vld [vmem:[%s3573_s2 + $0x1c8] sm:$0xff]  }
 0x1e2   : > { %2704 = vmatpush3.bf16.msra.mxu1 %v2960_v0  ;;  %v1810_v0 = vrot.slane %v3464_v31, 3 }
 0x1e3   : > { %2709 = vmatprep.subr.bf16.mxu1 %v2961_v3 }
 0x1e5   : > { %2706 = vmatmul.mubr.bf16.vlgmr.msra.gmra.mrb[0].mxu1 %v1274_v32  ;;  %v2979_v32 = vld [vmem:[%s3573_s2 + $0x170] sm:$0xff]  }
 0x1e6   : > { %2710 = vmatpush3.bf16.msra.mxu1 %v2961_v3  ;;  %2725 = vmatprep.mubr.bf16.mxu1 %v2405_v4  ;;  %v1811_v3 = vsel %vm303_vm0, %v1809_v63, %v1810_v0  ;;  %v2996_v4 = vld [vmem:[%s3573_s2 + $0x1e0] sm:$0xff]   ;;  %v2090_v63 = vld [vmem:[%s3074_s23 + $0x18] sm:$0xf]  ;;  %vm2103_vm0 = vcmask 1040384  }
 0x1e7   : > { %2711 = vmatprep.subr.bf16.mxu1 %v2963_v49 }
 0x1ea   : > { %2712 = vmatpush3.bf16.msra.mxu1 %v2963_v49  ;;  %v2994_v49 = vld [vmem:[%s3573_s2 + $0x1d0] sm:$0xff]  }
 0x1eb   : > { %2713 = vmatprep.subr.bf16.mxu1 %v2964_v5 }
 0x1ee   : > { %2714 = vmatpush3.bf16.msra.mxu1 %v2964_v5  ;;  %v2997_v5 = vld [vmem:[%s3573_s2 + $0x1e8] sm:$0xff]  }
 0x1ef   : > { %2715 = vmatprep.subr.bf16.mxu1 %v2965_v1 }
 0x1f2   : > { %2716 = vmatpush3.bf16.msra.mxu1 %v2965_v1  ;;  %v2998_v1 = vld [vmem:[%s3573_s2 + $0x1f0] sm:$0xff]  }
 0x1f3   : > { %2717 = vmatprep.subr.bf16.mxu1 %v2966_v44 }
 0x1f6   : > { %2718 = vmatpush3.bf16.msra.mxu1 %v2966_v44  ;;  %v2999_v44 = vld [vmem:[%s3573_s2 + $0x1f8] sm:$0xff]  }
 0x1f7   : > { %2719 = vmatprep.subr.bf16.mxu1 %v2967_v6 }
 0x1fa   : > { %2720 = vmatpush3.bf16.msra.mxu1 %v2967_v6  ;;  %v3002_v6 = vld [vmem:[%s3573_s2 + $0x208] sm:$0xff]  }
 0x1fb   : > { %2721 = vmatprep.subr.bf16.mxu1 %v2968_v8 }
 0x1fe   : > { %2722 = vmatpush3.bf16.msra.mxu1 %v2968_v8  ;;  %v3004_v8 = vld [vmem:[%s3573_s2 + $0x218] sm:$0xff]  }
 0x1ff   : > { %2723 = vmatprep.subr.bf16.mxu1 %v2969_v11 }
 0x202   : > { %2724 = vmatpush3.bf16.msra.mxu1 %v2969_v11  ;;  %v3008_v11 = vld [vmem:[%s3573_s2 + $0x238] sm:$0xff]  }
 0x203   : > { %2729 = vmatprep.subr.bf16.mxu1 %v2971_v14 }
 0x205   : > { %2726 = vmatmul.mubr.bf16.vlgmr.msra.gmra.mrb[0].mxu1 %v2406_v18 }
 0x206   : > { %2730 = vmatpush3.bf16.msra.mxu1 %v2971_v14  ;;  %2745 = vmatprep.mubr.bf16.mxu1 %v1539_v22 }
 0x207   : > { %2731 = vmatprep.subr.bf16.mxu1 %v2974_v21 }
 0x20a   : > { %2732 = vmatpush3.bf16.msra.mxu1 %v2974_v21 }
 0x20b   : > { %2733 = vmatprep.subr.bf16.mxu1 %v2975_v23 }
 0x20e   : > { %2734 = vmatpush3.bf16.msra.mxu1 %v2975_v23 }
 0x20f   : > { %2735 = vmatprep.subr.bf16.mxu1 %v2976_v53 }
 0x212   : > { %2736 = vmatpush3.bf16.msra.mxu1 %v2976_v53 }
 0x213   : > { %2737 = vmatprep.subr.bf16.mxu1 %v2977_v25 }
 0x216   : > { %2738 = vmatpush3.bf16.msra.mxu1 %v2977_v25 }
 0x217   : > { %2739 = vmatprep.subr.bf16.mxu1 %v2978_v28 }
 0x21a   : > { %2740 = vmatpush3.bf16.msra.mxu1 %v2978_v28 }
 0x21b   : > { %2741 = vmatprep.subr.bf16.mxu1 %v2979_v32 }
 0x21e   : > { %2742 = vmatpush3.bf16.msra.mxu1 %v2979_v32 }
 0x21f   : > { %2743 = vmatprep.subr.bf16.mxu1 %v2980_v26 }
 0x222   : > { %2744 = vmatpush3.bf16.msra.mxu1 %v2980_v26 }
 0x223   : > { %2749 = vmatprep.subr.bf16.mxu1 %v2981_v40 }
 0x225   : > { %2746 = vmatmul.mubr.bf16.vlgmr.msra.gmra.mrb[0].mxu1 %v1542_v46 }
 0x226   : > { %2750 = vmatpush3.bf16.msra.mxu1 %v2981_v40  ;;  %2765 = vmatprep.mubr.bf16.mxu1 %v1686_v51 }
 0x227   : > { %2751 = vmatprep.subr.bf16.mxu1 %v2984_v47 }
 0x22a   : > { %2752 = vmatpush3.bf16.msra.mxu1 %v2984_v47 }
 0x22b   : > { %2753 = vmatprep.subr.bf16.mxu1 %v2985_v52 }
 0x22e   : > { %2754 = vmatpush3.bf16.msra.mxu1 %v2985_v52 }
 0x22f   : > { %2755 = vmatprep.subr.bf16.mxu1 %v2986_v54 }
 0x232   : > { %2756 = vmatpush3.bf16.msra.mxu1 %v2986_v54 }
 0x233   : > { %2757 = vmatprep.subr.bf16.mxu1 %v2987_v55 }
 0x236   : > { %2758 = vmatpush3.bf16.msra.mxu1 %v2987_v55 }
 0x237   : > { %2759 = vmatprep.subr.bf16.mxu1 %v2988_v57 }
 0x23a   : > { %2760 = vmatpush3.bf16.msra.mxu1 %v2988_v57 }
 0x23b   : > { %2761 = vmatprep.subr.bf16.mxu1 %v2989_v60 }
 0x23e   : > { %2762 = vmatpush3.bf16.msra.mxu1 %v2989_v60  ;;  %v2087_v60 = vld [vmem:[%s3074_s23] sm:$0x8] }
 0x23f   : > { %2763 = vmatprep.subr.bf16.mxu1 %v2990_v61 }
 0x242   : > { %2764 = vmatpush3.bf16.msra.mxu1 %v2990_v61 }
 0x243   : > { %2769 = vmatprep.subr.bf16.mxu1 %v2991_v62 }
 0x245   : > { %2766 = vmatmul.mubr.bf16.vlgmr.msra.gmra.mrb[0].mxu1 %v1685_v43 }
 0x246   : > { %2770 = vmatpush3.bf16.msra.mxu1 %v2991_v62  ;;  %2785 = vmatprep.mubr.bf16.mxu1 %v1811_v3  ;;  %v2088_v62 = vld [vmem:[%s3074_s23 + $0x8] ss:$8 sps:$4 sm:$0xff]   ;;  %s2857_s23 = smul.u32 12, %s3576_s13 }
 0x247   : > { %2771 = vmatprep.subr.bf16.mxu1 %v2993_v2  ;;  %v2093_v3 = vunpack.c.h.bf16 %v2088_v62 }
 0x248   : > { %s170_s19 = scalar_lea.vmem %s3574_s3, %s2857_s23 }
 0x24a   : > { %2772 = vmatpush3.bf16.msra.mxu1 %v2993_v2  ;;  %v2091_v2 = vunpack.c.l.bf16 %v2087_v60 }
 0x24b   : > { %2773 = vmatprep.subr.bf16.mxu1 %v2994_v49 }
 0x24e   : > { %2774 = vmatpush3.bf16.msra.mxu1 %v2994_v49 }
 0x24f   : > { %2775 = vmatprep.subr.bf16.mxu1 %v2995_v34 }
 0x252   : > { %2776 = vmatpush3.bf16.msra.mxu1 %v2995_v34  ;;  %v2097_v34 = vsel %vm384_vm1, %v2093_v3, 0.0 }
 0x253   : > { %2777 = vmatprep.subr.bf16.mxu1 %v2996_v4 }
 0x256   : > { %2778 = vmatpush3.bf16.msra.mxu1 %v2996_v4 }
 0x257   : > { %2779 = vmatprep.subr.bf16.mxu1 %v2997_v5 }
 0x25a   : > { %2780 = vmatpush3.bf16.msra.mxu1 %v2997_v5 }
 0x25b   : > { %2781 = vmatprep.subr.bf16.mxu1 %v2998_v1 }
 0x25e   : > { %2782 = vmatpush3.bf16.msra.mxu1 %v2998_v1 }
 0x25f   : > { %2783 = vmatprep.subr.bf16.mxu1 %v2999_v44 }
 0x262   : > { %2784 = vmatpush3.bf16.msra.mxu1 %v2999_v44  ;;  %v2107_v44 = vrot.slane %v2097_v34, 7 }
 0x263   : > { %2789 = vmatprep.subr.bf16.mxu1 %v3000_v45 }
 0x265   : > { %2786 = vmatmul.mubr.bf16.vlgmr.msra.gmra.mrb[0].mxu1 %v1810_v0 }
 0x266   : > { %2790 = vmatpush3.bf16.msra.mxu1 %v3000_v45  ;;  %2805 = vmatprep.mubr.bf16.mxu1 %v3397_v59  ;;  %v3006_v59 = vld [vmem:[%s3573_s2 + $0x228] sm:$0xff]  }
 0x267   : > { %2791 = vmatprep.subr.bf16.mxu1 %v3002_v6 }
 0x26a   : > { %2792 = vmatpush3.bf16.msra.mxu1 %v3002_v6 }
 0x26b   : > { %2793 = vmatprep.subr.bf16.mxu1 %v3003_v7 }
 0x26e   : > { %2794 = vmatpush3.bf16.msra.mxu1 %v3003_v7 }
 0x26f   : > { %2795 = vmatprep.subr.bf16.mxu1 %v3004_v8 }
 0x272   : > { %2796 = vmatpush3.bf16.msra.mxu1 %v3004_v8 }
 0x273   : > { %2797 = vmatprep.subr.bf16.mxu1 %v3005_v9 }
 0x276   : > { %2798 = vmatpush3.bf16.msra.mxu1 %v3005_v9 }
 0x277   : > { %2799 = vmatprep.subr.bf16.mxu1 %v3006_v59 }
 0x27a   : > { %2800 = vmatpush3.bf16.msra.mxu1 %v3006_v59 }
 0x27b   : > { %2801 = vmatprep.subr.bf16.mxu1 %v3007_v10 }
 0x27e   : > { %2802 = vmatpush3.bf16.msra.mxu1 %v3007_v10 }
 0x27f   : > { %2803 = vmatprep.subr.bf16.mxu1 %v3008_v11 }
 0x282   : > { %2804 = vmatpush3.bf16.msra.mxu1 %v3008_v11 }
 0x285   : > { %2806 = vmatmul.mubr.bf16.vlgmr.msra.gmra.mrb[0].mxu1 %v3390_v56 }
 0x2b2   : > { %v2667_v12 = vpop.f32.mrb[8].mxu0 }
 0x2b3   : > { %v1079_v13 = vpop.f32.mrb[9].mxu0 }
 0x2b4   : > { %v2668_v14 = vpop.f32.mrb[10].mxu0 }
 0x2b5   : > { %v1082_v15 = vpop.f32.mrb[11].mxu0 }
 0x358   : > { %v2807_v16 = vpop.f32.mrb[0].mxu1 }
 0x359   : > { %v2809_v17 = vadd.f32 %v2807_v16, %v2667_v12  ;;  %v2035_v18 = vpop.f32.mrb[1].mxu1 }
 0x35a   : > { %v2810_v19 = vadd.f32 %v2035_v18, %v1079_v13  ;;  %v2808_v21 = vpop.f32.mrb[2].mxu1 }
 0x35b   : > { %v2038_v22 = vpop.f32.mrb[3].mxu1  ;;  %v2054_v20 = vmul.f32 %v2809_v17, %v3320_v58 }
 0x35c   : > { %v2811_v23 = vadd.f32 %v2038_v22, %v1082_v15  ;;  %v2052_v53 = vmul.f32 %v2810_v19, %v3314_v48 }
 0x35e   : > { %v2053_v25 = vmul.f32 %v2811_v23, %v3316_v50 }
 0x360   : > { %v2055_v27 = vadd.f32 %v2053_v25, %v2052_v53 }
 0x362   : > { %v2056_v28 = vadd.f32 %v2055_v27, %v2054_v20 }
 0x364   : > { %v2057_v56 = vrot.slane %v2056_v28, 4 }
 0x366   : > { %v2058_v29 = vadd.f32 %v2057_v56, %v2056_v28 }
 0x368   : > { %v2059_v31 = vrot.slane %v2058_v29, 2 }
 0x36a   : > { %v2060_v32 = vadd.f32 %v2059_v31, %v2058_v29 }
 0x36c   : > { %v2061_v33 = vrot.slane %v2060_v32, 1 }
 0x36e   : > { %v2062_v35 = vadd.f32 %v2061_v33, %v2060_v32 }
 0x370   : > { %v2063_v36 = vmul.f32 0.0625, %v2062_v35 }
 0x372   : > { %v2064_v37 = vsub.f32 %v2810_v19, %v2063_v36  ;;  %v2065_v26 = vsub.f32 %v2811_v23, %v2063_v36  ;;  %v2066_v30 = vsub.f32 %v2809_v17, %v2063_v36 }
 0x374   : > { %v2067_v38 = vmul.f32 %v2064_v37, %v2064_v37  ;;  %v2068_v39 = vmul.f32 %v2065_v26, %v2065_v26  ;;  %v2069_v24 = vmul.f32 %v2066_v30, %v2066_v30 }
 0x376   : > { %v2070_v40 = vmul.f32 %v3314_v48, %v2067_v38  ;;  %v2071_v41 = vmul.f32 %v3316_v50, %v2068_v39  ;;  %v2072_v42 = vmul.f32 %v3320_v58, %v2069_v24  ;;  %v2092_v48 = vunpack.c.l.bf16 %v2088_v62 }
 0x377   : > { %v2094_v50 = vunpack.c.l.bf16 %v2090_v63  ;;  %v2095_v58 = vsel %vm384_vm1, %v2091_v2, 0.0 }
 0x378   : > { %v2073_v43 = vadd.f32 %v2071_v41, %v2070_v40  ;;  %v2096_v49 = vsel %vm384_vm1, %v2092_v48, 0.0  ;;  %v2104_v5 = vrot.slane %v2095_v58, 7 }
 0x379   : > { %v2098_v4 = vsel %vm384_vm1, %v2094_v50, 0.0  ;;  %v2105_v1 = vrot.slane %v2096_v49, 7 }
 0x37a   : > { %v2074_v46 = vadd.f32 %v2073_v43, %v2072_v42  ;;  %v2109_v45 = vrot.slane %v2098_v4, 7 }
 0x37b   : > { %v2106_v7 = vsel %vm2103_vm0, %v2104_v5, %v2105_v1  ;;  %v2108_v8 = vsel %vm2103_vm0, %v2105_v1, %v2107_v44 }
 0x37c   : > { %v2075_v47 = vrot.slane %v2074_v46, 4  ;;  %v2110_v9 = vsel %vm2103_vm0, %v2107_v44, %v2109_v45 }
 0x37e   : > { %v2076_v51 = vadd.f32 %v2075_v47, %v2074_v46 }
 0x380   : > { %v2077_v52 = vrot.slane %v2076_v51, 2 }
 0x382   : > { %v2078_v54 = vadd.f32 %v2077_v52, %v2076_v51 }
 0x384   : > { %v2079_v55 = vrot.slane %v2078_v54, 1 }
 0x386   : > { %v2080_v57 = vadd.f32 %v2079_v55, %v2078_v54 }
 0x388   : > { %v2081_v61 = vmul.f32 0.0625, %v2080_v57 }
 0x38a   : > { %v2082_v0 = vadd.f32 1e-05, %v2081_v61 }
 0x38c   : > { %3011 = vrsqrt.f32 %v2082_v0 }
 0x396   : > { %v3012_v6 = vpop.eup %3011 }
 0x397   : > { %v2084_v59 = vmul.f32 %v3012_v6, %v2064_v37  ;;  %v2085_v10 = vmul.f32 %v3012_v6, %v2065_v26  ;;  %v2086_v11 = vmul.f32 %v3012_v6, %v2066_v30 }
 0x399   : > { %v2114_v12 = vadd.f32 %v2106_v7, %v2084_v59  ;;  %v2115_v13 = vadd.f32 %v2108_v8, %v2085_v10  ;;  %v2116_v14 = vadd.f32 %v2110_v9, %v2086_v11 }
 0x39b   : > { %v2527_v15 = vpack.c.bf16 %v2116_v14, %v2116_v14  ;;  %v2536_v16 = vpack.c.bf16 %v2115_v13, %v2114_v12 }
 0x39d   : > { %2537 = vst [vmem:[%s170_s19] sm:$0xff] %v2536_v16   ;;  %2132 = vst [vmem:[%s170_s19 + $0x8] sm:$0xf] %v2527_v15 }
 0x39e PF: > { %s13_s12 = sadd.s32 1, %s3019_s12  }
 0x39f   : > { %p10_p4 = scmp.ge.s32.totalorder %s13_s12, 4  }
 0x3a1   :  { %12 = sbr.rel (!%p10_p4) target bundleno = 1 (0x1), region = 72 }

// kernel: generator_forward.14
= control target key start
LH: loop header
LB: loop body
LE: loop exit
PB: predicated region body
PF: predicated region fallthrough
CT: control target
= control target key end

     0   :  { %s1554_s9 = smov 0   ;;  %s2066_s0 = inlined_call_operand.vmem [shape: bf16[2,110,96], index: 0, kind: input, shape index: {}]   ;;  %s2067_s1 = inlined_call_operand.vmem [shape: bf16[3,96,128], index: 1, kind: input, shape index: {}]   ;;  %s2068_s2 = inlined_call_operand.vmem [shape: bf16[2,80,128], index: 2, kind: output, shape index: {}]  }
   0x1 LB: > { %s1141_s10 = sadd.s32 4294967295, %s1532_s9   ;;  %p1145_p0 = scmp.ge.s32.totalorder %s1532_s9, 1  ;;  %s1532_s9 = sphi %s1554_s9, %s12_s9  }
   0x2   : > { %p112_p1 = scmp.lt.s32.totalorder %s1532_s9, 3 }
   0x4   : > { %p113_p2 = pnand %p1145_p0, %p112_p1 }
   0x5   : > { %v1489_v0 = vld [vmem:[%s2067_s1 + $0x30] sm:$0xff] (!%p113_p2)   ;;  %v1534_v1 = vmov (!%p113_p2), 0.0   ;;  %v1570_v2 = vld [vmem:[%s2067_s1] sm:$0xff] (!%p113_p2)   ;;  %v1491_v3 = vld [vmem:[%s2067_s1 + $0x38] sm:$0xff] (!%p113_p2)   ;;  %vm1535_vm0 = vmmov (!%p113_p2), 0   ;;  %p134_p3 = scmp.lt.s32.totalorder (!%p113_p2), %s1141_s10, 1 }
   0x6   : > { %116 = sbr.rel (%p113_p2) target bundleno = 870 (0x366), region = 28  ;;  %1316 = vmatprep.subr.bf16.mxu1 (!%p113_p2), %v1534_v1  ;;  %1348 = vmatprep.subr.bf16.mxu0 (!%p113_p2), %v1534_v1  ;;  %v1582_v4 = vld [vmem:[%s2067_s1 + $0x8] sm:$0xff] (!%p113_p2)   ;;  %v1493_v5 = vld [vmem:[%s2067_s1 + $0x40] sm:$0xff] (!%p113_p2)   ;;  %v1598_v6 = vld [vmem:[%s2067_s1 + $0x10] sm:$0xff] (!%p113_p2)   ;;  %vm211_vm1 = vcmask (!%p113_p2), 1046528   ;;  %vm259_vm2 = vcmask (!%p113_p2), 785408  }
   0x7   : > { %1317 = vmatpush3.bf16.msra.mxu1 (!%p113_p2), %v1489_v0  ;;  %1328 = vmatprep.mubr.msk.bf16.mxu1 (!%p113_p2), %vm1535_vm0, %v1534_v1  ;;  %v1495_v7 = vld [vmem:[%s2067_s1 + $0x48] sm:$0xff] (!%p113_p2)   ;;  %v1614_v8 = vld [vmem:[%s2067_s1 + $0x18] sm:$0xff] (!%p113_p2)   ;;  %v1497_v14 = vld [vmem:[%s2067_s1 + $0x50] sm:$0xff] (!%p113_p2)   ;;  %vm533_vm3 = vcmask (!%p113_p2), 1045504   ;;  %s1536_s25 = smov (!%p113_p2), 32   ;;  %s1538_s27 = smov (!%p113_p2), 64  }
   0x8   : > { %1349 = vmatpush3.bf16.msra.mxu0 (!%p113_p2), %v1570_v2  ;;  %1318 = vmatprep.subr.bf16.mxu1 (!%p113_p2), %v1534_v1  ;;  %v1632_v16 = vld [vmem:[%s2067_s1 + $0x20] sm:$0xff] (!%p113_p2)   ;;  %v1499_v17 = vld [vmem:[%s2067_s1 + $0x58] sm:$0xff] (!%p113_p2)   ;;  %v1647_v22 = vld [vmem:[%s2067_s1 + $0x28] sm:$0xff] (!%p113_p2)  }
   0x9   : > { %1350 = vmatprep.subr.bf16.mxu0 (!%p113_p2), %v1534_v1  ;;  %1360 = vmatprep.mubr.msk.bf16.mxu0 (!%p113_p2), %vm1535_vm0, %v1534_v1  ;;  %v1504_v26 = vld [vmem:[%s2067_s1 + $0x60] sm:$0xff] (!%p113_p2)   ;;  %v1505_v27 = vld [vmem:[%s2067_s1 + $0x68] sm:$0xff] (!%p113_p2)   ;;  %v1508_v34 = vld [vmem:[%s2067_s1 + $0x70] sm:$0xff] (!%p113_p2)  }
   0xa   : > { %v1509_v36 = vld [vmem:[%s2067_s1 + $0x78] sm:$0xff] (!%p113_p2)   ;;  %v1513_v42 = vld [vmem:[%s2067_s1 + $0x80] sm:$0xff] (!%p113_p2)   ;;  %v1514_v46 = vld [vmem:[%s2067_s1 + $0x88] sm:$0xff] (!%p113_p2)  }
   0xb   : > { %1319 = vmatpush3.bf16.msra.mxu1 (!%p113_p2), %v1491_v3 }
   0xc   : > { %1351 = vmatpush3.bf16.msra.mxu0 (!%p113_p2), %v1582_v4  ;;  %1320 = vmatprep.subr.bf16.mxu1 (!%p113_p2), %v1534_v1 }
   0xd   : > { %s2090_s10 = smov (!%p134_p3, %s1141_s10), 1  ;;  %1352 = vmatprep.subr.bf16.mxu0 %v1534_v1 }
   0xe   : > { %s1454_s21 = smul.u32 56, %s2090_s10 }
   0xf   : > { %1321 = vmatpush3.bf16.msra.mxu1 %v1493_v5  ;;  %v679_v5 = vlaneseq  ;;  %s1455_s28 = smul.u32 40, %s2090_s10 }
  0x10   : > { %s1604_s26 = scalar_lea.vmem %s2066_s0, %s1454_s21  ;;  %1353 = vmatpush3.bf16.msra.mxu0 %v1598_v6  ;;  %1322 = vmatprep.subr.bf16.mxu1 %v1534_v1 }
  0x11   : > { %1354 = vmatprep.subr.bf16.mxu0 %v1534_v1  ;;  %v147_v9 = vld [vmem:[%s1604_s26 + $0x8] sm:$0xf]  ;;  %v148_v10 = vld [vmem:[%s1604_s26 + $0xc] sm:$0xf]  ;;  %v1620_v11 = vld [vmem:[%s1604_s26 + $0x10] sm:$0xf]  ;;  %s143_s30 = scalar_lea.vmem %s2068_s2, %s1455_s28 }
  0x12   : > { %v167_v12 = vld [vmem:[%s1604_s26 + $0x4] sm:$0xe]  ;;  %v1161_v13 = vcombine.low %v148_v10, %v1620_v11  ;;  %v150_v20 = vld [vmem:[%s1604_s26 + $0x14] sm:$0xf]  ;;  %v1640_v21 = vld [vmem:[%s1604_s26 + $0x18] sm:$0xf]  ;;  %v1178_v32 = vcombine.low %v147_v9, %v148_v10 }
  0x13   : > { %1323 = vmatpush3.bf16.msra.mxu1 %v1495_v7  ;;  %v1160_v15 = vcombine.low %v167_v12, %v147_v9  ;;  %v1162_v23 = vcombine.low %v150_v20, %v1640_v21  ;;  %v1503_v25 = vld [vmem:[%s1604_s26] sm:$0xff]   ;;  %v1667_v29 = vld [vmem:[%s1604_s26 + $0x1c] sm:$0xf]  ;;  %v168_v38 = vld [vmem:[%s1604_s26 + $0x28] sm:$0xf]  ;;  %v1179_v40 = vcombine.low %v1620_v11, %v150_v20 }
  0x14   : > { %1355 = vmatpush3.bf16.msra.mxu0 %v1614_v8  ;;  %1324 = vmatprep.subr.bf16.mxu1 %v1534_v1  ;;  %v213_v19 = vrot.slane %v1161_v13, 1  ;;  %v1672_v30 = vld [vmem:[%s1604_s26 + $0x20] sm:$0xf]  ;;  %v154_v37 = vld [vmem:[%s1604_s26 + $0x24] sm:$0xf]  ;;  %v1517_v44 = vld [vmem:[%s1604_s26 + $0x10] sm:$0xff]   ;;  %v1180_v59 = vcombine.low %v1640_v21, %v1667_v29 }
  0x15   : > { %1356 = vmatprep.subr.bf16.mxu0 %v1534_v1  ;;  %v212_v18 = vrot.slane %v1160_v15, 1  ;;  %v215_v28 = vrot.slane %v1162_v23, 1  ;;  %v1163_v33 = vcombine.low %v1667_v29, %v1672_v30  ;;  %v1164_v41 = vcombine.low %v154_v37, %v168_v38  ;;  %v1516_v43 = vld [vmem:[%s1604_s26 + $0x8] sm:$0xfc]   ;;  %v1519_v52 = vld [vmem:[%s1604_s26 + $0x18] sm:$0xff]   ;;  %v1520_v57 = vld [vmem:[%s1604_s26 + $0x20] sm:$0xff]  }
  0x16   : > { %v534_v47 = vrot.slane %v1516_v43, 2  ;;  %v535_v48 = vrot.slane %v1517_v44, 2  ;;  %v1518_v50 = vld [vmem:[%s1604_s26 + $0x2c] ss:$0 sps:$4 sm:$0x11]   ;;  %v537_v54 = vrot.slane %v1519_v52, 2  ;;  %v1181_v63 = vcombine.low %v1672_v30, %v154_v37 }
  0x17   : > { %1325 = vmatpush3.bf16.msra.mxu1 %v1497_v14  ;;  %v214_v24 = vsel %vm211_vm1, %v212_v18, %v213_v19  ;;  %v216_v31 = vsel %vm211_vm1, %v213_v19, %v215_v28  ;;  %v217_v35 = vrot.slane %v1163_v33, 1  ;;  %v219_v45 = vrot.slane %v1164_v41, 1  ;;  %v1522_v61 = vld [vmem:[%s1604_s26 + $0x28] sm:$0xff]  }
  0x18   : > { %1357 = vmatpush3.bf16.msra.mxu0 %v1632_v16  ;;  %1326 = vmatprep.subr.bf16.mxu1 %v1534_v1  ;;  %v536_v51 = vsel %vm533_vm3, %v534_v47, %v535_v48  ;;  %v221_v53 = vrot.slane %v1518_v50, 1  ;;  %v538_v56 = vsel %vm533_vm3, %v535_v48, %v537_v54  ;;  %v539_v58 = vrot.slane %v1520_v57, 2 }
  0x19   : > { %1358 = vmatprep.subr.bf16.mxu0 %v1534_v1  ;;  %v218_v39 = vsel %vm211_vm1, %v215_v28, %v217_v35  ;;  %v220_v49 = vsel %vm211_vm1, %v217_v35, %v219_v45  ;;  %v541_v62 = vrot.slane %v1522_v61, 2 }
  0x1a   : > { %v222_v55 = vsel %vm211_vm1, %v219_v45, %v221_v53  ;;  %v540_v60 = vsel %vm533_vm3, %v537_v54, %v539_v58 }
  0x1b   : > { %1327 = vmatpush3.bf16.msra.mxu1 %v1499_v17  ;;  %v542_v0 = vsel %vm533_vm3, %v539_v58, %v541_v62 }
  0x1c   : > { %1359 = vmatpush3.bf16.msra.mxu0 %v1647_v22  ;;  %1412 = vmatprep.subr.bf16.mxu1 %v1534_v1 }
  0x1d   : > { %1380 = vmatprep.subr.bf16.mxu0 %v1534_v1 }
  0x1e   : > { %1329 = vmatmul.mubr.msk.bf16.vlgmr.msra.gmra.mrb[0].mxu1 %vm259_vm2, %v214_v24 }
  0x1f   : > { %1361 = vmatmul.mubr.msk.bf16.vlgmr.msra.gmra.mrb[0].mxu0 %vm259_vm2, %v1503_v25  ;;  %1332 = vmatprep.mubr.msk.bf16.mxu1 %vm1535_vm0, %v1534_v1 }
  0x20   : > { %1381 = vmatpush3.bf16.msra.mxu0 %v1504_v26  ;;  %1364 = vmatprep.mubr.msk.bf16.mxu0 %vm1535_vm0, %v1534_v1 }
  0x21   : > { %1382 = vmatprep.subr.bf16.mxu0 %v1534_v1  ;;  %1418 = vmatpush3.bf16.msra.mxu1 %v1570_v2  ;;  %v1523_v2 = vld [vmem:[%s1604_s26 + $0x30] ss:$0 sps:$4 sm:$0x33]   ;;  %s1537_s26 = smov 96  }
  0x22   : > { %1413 = vmatprep.subr.bf16.mxu1 %v1534_v1  ;;  %v543_v3 = vrot.slane %v1523_v2, 2 }
  0x24   : > { %1383 = vmatpush3.bf16.msra.mxu0 %v1505_v27 }
  0x25   : > { %1384 = vmatprep.subr.bf16.mxu0 %v1534_v1  ;;  %1419 = vmatpush3.bf16.msra.mxu1 %v1582_v4  ;;  %v544_v4 = vsel %vm533_vm3, %v541_v62, %v543_v3 }
  0x26   : > { %1333 = vmatmul.mubr.msk.bf16.gmra.mrb[4].mxu1 %vm259_vm2, %v216_v31  ;;  %1414 = vmatprep.subr.bf16.mxu1 %v1534_v1 }
  0x27   : > { %1365 = vmatmul.mubr.msk.bf16.gmra.mrb[4].mxu0 %vm259_vm2, %v1178_v32  ;;  %1336 = vmatprep.mubr.msk.bf16.mxu1 %vm1535_vm0, %v1534_v1 }
  0x28   : > { %1385 = vmatpush3.bf16.msra.mxu0 %v1508_v34  ;;  %1368 = vmatprep.mubr.msk.bf16.mxu0 %vm1535_vm0, %v1534_v1 }
  0x29   : > { %1386 = vmatprep.subr.bf16.mxu0 %v1534_v1  ;;  %1420 = vmatpush3.bf16.msra.mxu1 %v1598_v6  ;;  %v1761_v6 = vshrl.u32 %v679_v5, 7 }
  0x2a   : > { %1415 = vmatprep.subr.bf16.mxu1 %v1534_v1 }
  0x2b   : > { %v681_v7 = vadd.s32 8, %v1761_v6  ;;  %v1767_v9 = vmul.u32.u64.low 3435973837, %v1761_v6  ;;  %v1768_v10 = vmul.u32.u64.high 3435973837, %v1761_v6, %v1767_v9  ;;  %v682_v11 = vadd.s32 16, %v1761_v6 }
  0x2c   : > { %1387 = vmatpush3.bf16.msra.mxu0 %v1509_v36  ;;  %v683_v19 = vadd.s32 24, %v1761_v6  ;;  %v684_v20 = vadd.s32 32, %v1761_v6  ;;  %v1794_v30 = vadd.s32 40, %v1761_v6  ;;  %v1798_v34 = vadd.s32 48, %v1761_v6 }
  0x2d   : > { %1388 = vmatprep.subr.bf16.mxu0 %v1534_v1  ;;  %1421 = vmatpush3.bf16.msra.mxu1 %v1614_v8  ;;  %v1773_v14 = vmul.u32.u64.low 3435973837, %v681_v7  ;;  %v1774_v15 = vmul.u32.u64.high 3435973837, %v681_v7, %v1773_v14  ;;  %v1776_v17 = vmul.u32.u64.low 3435973837, %v682_v11  ;;  %v1777_v18 = vmul.u32.u64.high 3435973837, %v682_v11, %v1776_v17 }
  0x2e   : > { %1337 = vmatmul.mubr.msk.bf16.gmra.mrb[8].mxu1 %vm259_vm2, %v218_v39  ;;  %1416 = vmatprep.subr.bf16.mxu1 %v1534_v1  ;;  %v1784_v24 = vmul.u32.u64.low 3435973837, %v683_v19  ;;  %v1785_v25 = vmul.u32.u64.high 3435973837, %v683_v19, %v1784_v24  ;;  %v1790_v28 = vmul.u32.u64.low 3435973837, %v684_v20  ;;  %v1791_v29 = vmul.u32.u64.high 3435973837, %v684_v20, %v1790_v28 }
  0x2f   : > { %1369 = vmatmul.mubr.msk.bf16.gmra.mrb[8].mxu0 %vm259_vm2, %v1179_v40  ;;  %1340 = vmatprep.mubr.msk.bf16.mxu1 %vm1535_vm0, %v1534_v1  ;;  %v707_v27 = vshrl.u32 %v1774_v15, 3  ;;  %v718_v33 = vshrl.u32 %v1777_v18, 3  ;;  %v1801_v36 = vmul.u32.u64.low 3435973837, %v1794_v30  ;;  %v1802_v37 = vmul.u32.u64.high 3435973837, %v1794_v30, %v1801_v36 }
  0x30   : > { %1389 = vmatpush3.bf16.msra.mxu0 %v1513_v42  ;;  %1392 = vmatprep.mubr.msk.bf16.mxu0 %vm1535_vm0, %v1534_v1  ;;  %v729_v42 = vshrl.u32 %v1785_v25, 3  ;;  %v1809_v43 = vmul.u32.u64.low 3435973837, %v1798_v34  ;;  %v1810_v44 = vmul.u32.u64.high 3435973837, %v1798_v34, %v1809_v43  ;;  %v1813_v45 = vadd.s32 56, %v1761_v6 }
  0x31   : > { %1390 = vmatprep.subr.bf16.mxu0 %v1534_v1  ;;  %1422 = vmatpush3.bf16.msra.mxu1 %v1632_v16  ;;  %v708_v35 = vmul.u32 10, %v707_v27  ;;  %v719_v40 = vmul.u32 10, %v718_v33  ;;  %v740_v48 = vshrl.u32 %v1791_v29, 3  ;;  %v1823_v54 = vadd.s32 64, %v1761_v6 }
  0x32   : > { %1417 = vmatprep.subr.bf16.mxu1 %v1534_v1  ;;  %v1819_v52 = vmul.u32.u64.low 3435973837, %v1813_v45  ;;  %v1820_v53 = vmul.u32.u64.high 3435973837, %v1813_v45, %v1819_v52  ;;  %v1827_v57 = vadd.s32 72, %v1761_v6 }
  0x33   : > { %v709_v47 = vsub.s32 %v681_v7, %v708_v35  ;;  %v720_v50 = vsub.s32 %v682_v11, %v719_v40  ;;  %v1839_v2 = vmul.u32.u64.low 3435973837, %v1823_v54  ;;  %v1840_v3 = vmul.u32.u64.high 3435973837, %v1823_v54, %v1839_v2 }
  0x34   : > { %1391 = vmatpush3.bf16.msra.mxu0 %v1514_v46  ;;  %v1850_v14 = vmul.u32.u64.low 3435973837, %v1827_v57  ;;  %v1851_v15 = vmul.u32.u64.high 3435973837, %v1827_v57, %v1850_v14 }
  0x35   : > { %1423 = vmatpush3.bf16.msra.mxu1 %v1647_v22  ;;  %v696_v22 = vshrl.u32 %v1768_v10, 3  ;;  %vm801_vm6 = vcmp.ne.s32.totalorder %v709_v47, 0  ;;  %vm811_vm7 = vcmp.lt.s32.totalorder %v709_v47, 0  ;;  %vm802_vm9 = vcmp.ne.s32.totalorder %v720_v50, 0 }
  0x36   : > { %1341 = vmatmul.mubr.msk.bf16.gmra.mrb[12].mxu1 %vm259_vm2, %v220_v49  ;;  %vm812_vm10 = vcmp.lt.s32.totalorder %v720_v50, 0  ;;  %vm1833_vm11 = vmand %vm811_vm7, %vm801_vm6  ;;  %v832_v7 = vadd.s32 10, %v720_v50 }
  0x37   : > { %1393 = vmatmul.mubr.msk.bf16.vlgmr.msra.gmra.mrb[0].mxu0 %vm259_vm2, %v536_v51  ;;  %1344 = vmatprep.mubr.msk.bf16.mxu1 %vm1535_vm0, %v1534_v1  ;;  %v697_v32 = vmul.u32 10, %v696_v22  ;;  %v730_v51 = vmul.u32 10, %v729_v42  ;;  %vm1845_vm12 = vmand %vm812_vm10, %vm802_vm9 }
  0x38   : > { %1396 = vmatprep.mubr.msk.bf16.mxu0 %vm1535_vm0, %v1534_v1  ;;  %v842_v22 = vsel %vm1845_vm12, %v832_v7, %v720_v50 }
  0x39   : > { %v698_v39 = vsub.s32 %v1761_v6, %v697_v32  ;;  %v784_v32 = vshrl.u32 %v1840_v3, 3 }
  0x3b   : > { %vm800_vm4 = vcmp.ne.s32.totalorder %v698_v39, 0  ;;  %vm810_vm5 = vcmp.lt.s32.totalorder %v698_v39, 0 }
  0x3c   : > { %vm1829_vm8 = vmand %vm810_vm5, %vm800_vm4  ;;  %vm852_vm5 = vcmp.lt.s32.totalorder %v842_v22, 8 }
  0x3d   : > { %v1887_v40 = vsel %vm852_vm5, 1.0, %v1534_v1 }
  0x3e   : > { %1345 = vmatmul.mubr.msk.bf16.gmra.mrb[16].mxu1 %vm259_vm2, %v222_v55  ;;  %v741_v55 = vmul.u32 10, %v740_v48  ;;  %v785_v48 = vmul.u32 10, %v784_v32 }
  0x3f   : > { %1397 = vmatmul.mubr.msk.bf16.gmra.mrb[4].mxu0 %vm259_vm2, %v538_v56  ;;  %1372 = vmatprep.mubr.msk.bf16.mxu1 %vm1535_vm0, %v1534_v1  ;;  %v751_v56 = vshrl.u32 %v1802_v37, 3 }
  0x40   : > { %1400 = vmatprep.mubr.msk.bf16.mxu0 %vm1535_vm0, %v1534_v1  ;;  %v742_v9 = vsub.s32 %v684_v20, %v741_v55  ;;  %v773_v20 = vshrl.u32 %v1820_v53, 3 }
  0x41   : > { %v752_v10 = vmul.u32 10, %v751_v56 }
  0x42   : > { %vm804_vm15 = vcmp.ne.s32.totalorder %v742_v9, 0  ;;  %v834_v25 = vadd.s32 10, %v742_v9 }
  0x46   : > { %1373 = vmatmul.mubr.msk.bf16.vlgmr.msra.gmra.mrb[12].mxu1 %vm259_vm2, %v1180_v59  ;;  %v830_v59 = vadd.s32 10, %v698_v39 }
  0x47   : > { %1401 = vmatmul.mubr.msk.bf16.gmra.mrb[8].mxu0 %vm259_vm2, %v540_v60  ;;  %1376 = vmatprep.mubr.msk.bf16.mxu1 %vm1535_vm0, %v1534_v1  ;;  %v831_v60 = vadd.s32 10, %v709_v47 }
  0x48   : > { %1404 = vmatprep.mubr.msk.bf16.mxu0 %vm1535_vm0, %v1534_v1 }
  0x4e   : > { %1377 = vmatmul.mubr.msk.bf16.gmra.mrb[16].mxu1 %vm259_vm2, %v1181_v63  ;;  %v731_v63 = vsub.s32 %v683_v19, %v730_v51 }
  0x4f   : > { %1405 = vmatmul.mubr.msk.bf16.gmra.mrb[12].mxu0 %vm259_vm2, %v542_v0  ;;  %v762_v0 = vshrl.u32 %v1810_v44, 3 }
  0x50   : > { %1408 = vmatprep.mubr.msk.bf16.mxu0 %vm1535_vm0, %v1534_v1  ;;  %vm803_vm13 = vcmp.ne.s32.totalorder %v731_v63, 0  ;;  %vm813_vm14 = vcmp.lt.s32.totalorder %v731_v63, 0  ;;  %vm814_vm0 = vcmp.lt.s32.totalorder %v742_v9, 0  ;;  %v833_v24 = vadd.s32 10, %v731_v63 }
  0x51   : > { %v763_v19 = vmul.u32 10, %v762_v0  ;;  %vm1864_vm4 = vmand %vm813_vm14, %vm803_vm13 }
  0x52   : > { %vm1868_vm6 = vmand %vm814_vm0, %vm804_vm15 }
  0x53   : > { %v764_v29 = vsub.s32 %v1798_v34, %v763_v19  ;;  %v795_v34 = vshrl.u32 %v1851_v15, 3  ;;  %v844_v42 = vsel %vm1868_vm6, %v834_v25, %v742_v9 }
  0x54   : > { %vm1901_vm13 = vcmp.lt.s32.totalorder %v844_v42, 8 }
  0x55   : > { %vm806_vm10 = vcmp.ne.s32.totalorder %v764_v29, 0  ;;  %v836_v50 = vadd.s32 10, %v764_v29  ;;  %v796_v51 = vmul.u32 10, %v795_v34  ;;  %v1925_v0 = vsel %vm1901_vm13, 1.0, %v1534_v1 }
  0x57   : > { %1409 = vmatmul.mubr.msk.bf16.gmra.mrb[16].mxu0 %vm259_vm2, %v544_v4 }
  0xf1   : > { %v1764_v8 = vpop.f32.mrb[0].mxu1 }
  0xf2   : > { %v1330_v12 = vpop.f32.mrb[1].mxu1 }
  0xf3   : > { %v1771_v13 = vpop.f32.mrb[2].mxu1 }
  0xf4   : > { %v1331_v16 = vpop.f32.mrb[3].mxu1 }
  0xf5   : > { %v840_v16 = vsel %vm1829_vm8, %v830_v59, %v698_v39  ;;  %v843_v39 = vsel %vm1864_vm4, %v833_v24, %v731_v63 }
  0xf6   : > { %vm850_vm1 = vcmp.lt.s32.totalorder %v840_v16, 8  ;;  %vm853_vm12 = vcmp.lt.s32.totalorder %v843_v39, 8 }
  0xf7   : > { %v1878_v35 = vsel %vm850_vm1, 1.0, %v1534_v1  ;;  %v1916_v58 = vsel %vm853_vm12, 1.0, %v1534_v1 }
  0xf9   : > { %v1781_v21 = vpop.f32.mrb[4].mxu1 }
  0xfa   : > { %v1334_v23 = vpop.f32.mrb[5].mxu1 }
  0xfb   : > { %v1787_v26 = vpop.f32.mrb[6].mxu1  ;;  %v753_v23 = vsub.s32 %v1794_v30, %v752_v10 }
  0xfc   : > { %v1335_v31 = vpop.f32.mrb[7].mxu1 }
  0xfd   : > { %v774_v31 = vmul.u32 10, %v773_v20  ;;  %vm805_vm7 = vcmp.ne.s32.totalorder %v753_v23, 0  ;;  %vm815_vm8 = vcmp.lt.s32.totalorder %v753_v23, 0  ;;  %v835_v43 = vadd.s32 10, %v753_v23 }
  0xfe   : > { %vm1894_vm9 = vmand %vm815_vm8, %vm805_vm7 }
 0x101   : > { %v1804_v38 = vpop.f32.mrb[8].mxu1 }
 0x102   : > { %v1338_v41 = vpop.f32.mrb[9].mxu1 }
 0x103   : > { %v1815_v46 = vpop.f32.mrb[10].mxu1 }
 0x104   : > { %v1339_v49 = vpop.f32.mrb[11].mxu1 }
 0x10a   : > { %v630_v61 = vpop.f32.mrb[0].mxu0 }
 0x10b   : > { %v1843_v4 = vadd.f32 %v630_v61, %v1764_v8  ;;  %v1394_v5 = vpop.f32.mrb[1].mxu0  ;;  %v841_v8 = vsel %vm1833_vm11, %v831_v60, %v709_v47  ;;  %vm816_vm11 = vcmp.lt.s32.totalorder %v764_v29, 0  ;;  %v775_v47 = vsub.s32 %v1813_v45, %v774_v31 }
 0x10c   : > { %v633_v11 = vpop.f32.mrb[2].mxu0  ;;  %vm851_vm3 = vcmp.lt.s32.totalorder %v841_v8, 8  ;;  %v845_v45 = vsel %vm1894_vm9, %v835_v43, %v753_v23  ;;  %vm1911_vm14 = vmand %vm816_vm11, %vm806_vm10  ;;  %v786_v61 = vsub.s32 %v1823_v54, %v785_v48  ;;  %v797_v54 = vsub.s32 %v1827_v57, %v796_v51 }
 0x10d   : > { %v1856_v17 = vadd.f32 %v633_v11, %v1771_v13  ;;  %v1395_v18 = vpop.f32.mrb[3].mxu0  ;;  %v1881_v36 = vsel %vm851_vm3, 1.0, %v1534_v1  ;;  %v880_v52 = vmul.f32 %v1843_v4, %v1878_v35  ;;  %vm807_vm15 = vcmp.ne.s32.totalorder %v775_v47, 0 }
 0x10e   : > { %vm817_vm0 = vcmp.lt.s32.totalorder %v775_v47, 0  ;;  %vm855_vm1 = vcmp.lt.s32.totalorder %v845_v45, 8  ;;  %v846_v9 = vsel %vm1911_vm14, %v836_v50, %v764_v29  ;;  %v837_v10 = vadd.s32 10, %v775_v47 }
 0x10f   : > { %v881_v49 = vmul.f32 %v1856_v17, %v1881_v36  ;;  %vm1937_vm3 = vmand %vm817_vm0, %vm807_vm15  ;;  %vm808_vm4 = vcmp.ne.s32.totalorder %v786_v61, 0  ;;  %vm818_vm5 = vcmp.lt.s32.totalorder %v786_v61, 0  ;;  %v1944_v57 = vsel %vm855_vm1, 1.0, %v1534_v1 }
 0x110   : > { %vm856_vm6 = vcmp.lt.s32.totalorder %v846_v9, 8  ;;  %v838_v8 = vadd.s32 10, %v786_v61  ;;  %vm809_vm7 = vcmp.ne.s32.totalorder %v797_v54, 0  ;;  %vm819_vm8 = vcmp.lt.s32.totalorder %v797_v54, 0  ;;  %vm1948_vm9 = vmand %vm818_vm5, %vm808_vm4 }
 0x111   : > { %v890_v62 = vadd.f32 %v881_v49, %v880_v52  ;;  %v1953_v23 = vsel %vm856_vm6, 1.0, %v1534_v1  ;;  %v839_v13 = vadd.s32 10, %v797_v54  ;;  %vm829_vm11 = vmand %vm819_vm8, %vm809_vm7  ;;  %vm928_vm14 = vcmask 261120  }
 0x112   : > { %v638_v27 = vpop.f32.mrb[4].mxu0  ;;  %vm930_vm15 = vcmask 523264  }
 0x113   : > { %v1875_v30 = vadd.f32 %v638_v27, %v1781_v21  ;;  %v1398_v33 = vpop.f32.mrb[5].mxu0  ;;  %v849_v43 = vsel %vm829_vm11, %v839_v13, %v797_v54 }
 0x114   : > { %v641_v37 = vpop.f32.mrb[6].mxu0  ;;  %vm859_vm13 = vcmp.lt.s32.totalorder %v849_v43, 8 }
 0x115   : > { %v1890_v21 = vadd.f32 %v641_v37, %v1787_v26  ;;  %v1399_v41 = vpop.f32.mrb[7].mxu0  ;;  %v882_v53 = vmul.f32 %v1875_v30, %v1887_v40  ;;  %v848_v37 = vsel %vm1948_vm9, %v838_v8, %v786_v61 }
 0x116   : > { %vm858_vm12 = vcmp.lt.s32.totalorder %v848_v37, 8 }
 0x117   : > { %v891_v11 = vadd.f32 %v890_v62, %v882_v53  ;;  %v1972_v26 = vsel %vm858_vm12, 1.0, %v1534_v1  ;;  %v1977_v53 = vsel %vm859_vm13, 1.0, %v1534_v1 }
 0x119   : > { %v466_v55 = vpop.f32.mrb[12].mxu1 }
 0x11a   : > { %v646_v59 = vpop.f32.mrb[8].mxu0  ;;  %v1374_v60 = vpop.f32.mrb[13].mxu1 }
 0x11b   : > { %v1920_v63 = vadd.f32 %v646_v59, %v1804_v38  ;;  %v1402_v2 = vpop.f32.mrb[9].mxu0  ;;  %v469_v3 = vpop.f32.mrb[14].mxu1  ;;  %v883_v38 = vmul.f32 %v1890_v21, %v1916_v58 }
 0x11c   : > { %v649_v5 = vpop.f32.mrb[10].mxu0  ;;  %v1375_v7 = vpop.f32.mrb[15].mxu1 }
 0x11d   : > { %v1933_v12 = vadd.f32 %v649_v5, %v1815_v46  ;;  %v1403_v14 = vpop.f32.mrb[11].mxu0  ;;  %v884_v16 = vmul.f32 %v1920_v63, %v1925_v0  ;;  %v847_v46 = vsel %vm1937_vm3, %v837_v10, %v775_v47  ;;  %v892_v18 = vadd.f32 %v891_v11, %v883_v38 }
 0x11e   : > { %vm857_vm10 = vcmp.lt.s32.totalorder %v847_v46, 8 }
 0x11f   : > { %v893_v25 = vadd.f32 %v892_v18, %v884_v16  ;;  %v885_v27 = vmul.f32 %v1933_v12, %v1944_v57  ;;  %v1967_v42 = vsel %vm857_vm10, 1.0, %v1534_v1 }
 0x121   : > { %v474_v19 = vpop.f32.mrb[16].mxu1  ;;  %v894_v44 = vadd.f32 %v893_v25, %v885_v27 }
 0x122   : > { %v654_v22 = vpop.f32.mrb[12].mxu0  ;;  %v1378_v24 = vpop.f32.mrb[17].mxu1 }
 0x123   : > { %v1957_v28 = vadd.f32 %v654_v22, %v466_v55  ;;  %v1406_v29 = vpop.f32.mrb[13].mxu0  ;;  %v477_v31 = vpop.f32.mrb[18].mxu1 }
 0x124   : > { %v657_v32 = vpop.f32.mrb[14].mxu0  ;;  %v1379_v33 = vpop.f32.mrb[19].mxu1 }
 0x125   : > { %v886_v39 = vmul.f32 %v1957_v28, %v1953_v23  ;;  %v1964_v34 = vadd.f32 %v657_v32, %v469_v3  ;;  %v1407_v41 = vpop.f32.mrb[15].mxu0 }
 0x127   : > { %v895_v47 = vadd.f32 %v894_v44, %v886_v39  ;;  %v887_v48 = vmul.f32 %v1964_v34, %v1967_v42 }
 0x129   : > { %v896_v55 = vadd.f32 %v895_v47, %v887_v48 }
 0x12a   : > { %v662_v49 = vpop.f32.mrb[16].mxu0 }
 0x12b   : > { %v1974_v50 = vadd.f32 %v662_v49, %v474_v19  ;;  %v1410_v51 = vpop.f32.mrb[17].mxu0  ;;  %v936_v19 = vsub.s32 0, %v1761_v6 }
 0x12c   : > { %v665_v52 = vpop.f32.mrb[18].mxu0 }
 0x12d   : > { %v888_v45 = vmul.f32 %v1974_v50, %v1972_v26  ;;  %v1433_v56 = vadd.f32 %v665_v52, %v477_v31  ;;  %v1411_v59 = vpop.f32.mrb[19].mxu0 }
 0x12f   : > { %v897_v60 = vadd.f32 %v896_v55, %v888_v45  ;;  %v889_v61 = vmul.f32 %v1433_v56, %v1977_v53 }
 0x131   : > { %v898_v62 = vadd.f32 %v897_v60, %v889_v61 }
 0x133   : > { %v899_v2 = vrot.slane %v898_v62, 4 }
 0x135   : > { %v900_v3 = vadd.f32 %v899_v2, %v898_v62 }
 0x137   : > { %v901_v5 = vrot.slane %v900_v3, 2 }
 0x139   : > { %v902_v7 = vadd.f32 %v901_v5, %v900_v3 }
 0x13b   : > { %v903_v9 = vrot.slane %v902_v7, 1 }
 0x13d   : > { %v904_v10 = vadd.f32 %v903_v9, %v902_v7 }
 0x13f   : > { %914 = vrot.lane.b32.xlu1 %v904_v10, %s1536_s25  ;;  %906 = vrot.lane.b32.xlu0 %v904_v10, %s1537_s26 }
 0x143   : > { %910 = vrot.lane.b32.xlu0 %v904_v10, %s1538_s27 }
 0x1b1   : > { %v907_v1 = vpop.permute.xlu0 %906  ;;  %v915_v14 = vpop.permute.xlu1 %914 }
 0x1b2   : > { %v909_v54 = vadd.f32 %v907_v1, %v904_v10 }
 0x1b5   : > { %v911_v11 = vpop.permute.xlu0 %910 }
 0x1b6   : > { %v913_v38 = vadd.f32 %v911_v11, %v909_v54 }
 0x1b8   : > { %v917_v15 = vadd.f32 %v915_v14, %v913_v38 }
 0x1ba   : > { %922 = vrot.lane.b32.xlu0 %v917_v15, %s1538_s27  ;;  %919 = vrot.lane.b32.xlu1 %v917_v15, %s1536_s25 }
 0x1be   : > { %925 = vrot.lane.b32.xlu1 %v917_v15, %s1537_s26 }
 0x22c   : > { %v920_v16 = vpop.permute.xlu1 %919  ;;  %v923_v46 = vpop.permute.xlu0 %922 }
 0x22d   : > { %v929_v8 = vsel %vm928_vm14, %v917_v15, %v920_v16 }
 0x22e   : > { %v931_v18 = vsel %vm930_vm15, %v929_v8, %v923_v46 }
 0x230   : > { %v926_v20 = vpop.permute.xlu1 %925 }
 0x231   : > { %v932_v22 = vsel %vm259_vm2, %v931_v18, %v926_v20 }
 0x232   : > { %v933_v24 = vmul.f32 0.00390625, %v932_v22 }
 0x234   : > { %v937_v13 = vrot.slane %v933_v24, %v936_v19 }
 0x236   : > { %v1995_v25 = vsub.f32 %v1843_v4, %v937_v13  ;;  %v1998_v27 = vsub.f32 %v1856_v17, %v937_v13  ;;  %v2001_v29 = vsub.f32 %v1875_v30, %v937_v13  ;;  %v2004_v31 = vsub.f32 %v1890_v21, %v937_v13 }
 0x237   : > { %v2011_v37 = vsub.f32 %v1920_v63, %v937_v13  ;;  %v2016_v17 = vsub.f32 %v1933_v12, %v937_v13  ;;  %v2023_v41 = vsub.f32 %v1957_v28, %v937_v13  ;;  %v945_v47 = vsub.f32 %v1964_v34, %v937_v13 }
 0x238   : > { %v948_v32 = vmul.f32 %v1995_v25, %v1995_v25  ;;  %v949_v33 = vmul.f32 %v1998_v27, %v1998_v27  ;;  %v950_v4 = vmul.f32 %v2001_v29, %v2001_v29  ;;  %v951_v30 = vmul.f32 %v2004_v31, %v2004_v31 }
 0x239   : > { %v952_v63 = vmul.f32 %v2011_v37, %v2011_v37  ;;  %v953_v12 = vmul.f32 %v2016_v17, %v2016_v17  ;;  %v947_v52 = vsub.f32 %v1433_v56, %v937_v13  ;;  %v955_v55 = vmul.f32 %v945_v47, %v945_v47 }
 0x23a   : > { %v958_v21 = vmul.f32 %v1878_v35, %v948_v32  ;;  %v959_v39 = vmul.f32 %v1881_v36, %v949_v33  ;;  %v960_v43 = vmul.f32 %v1887_v40, %v950_v4  ;;  %v961_v48 = vmul.f32 %v1916_v58, %v951_v30 }
 0x23b   : > { %v946_v35 = vsub.f32 %v1974_v50, %v937_v13  ;;  %v954_v36 = vmul.f32 %v2023_v41, %v2023_v41  ;;  %v962_v28 = vmul.f32 %v1925_v0, %v952_v63  ;;  %v963_v40 = vmul.f32 %v1944_v57, %v953_v12 }
 0x23c   : > { %v968_v44 = vadd.f32 %v959_v39, %v958_v21  ;;  %v957_v61 = vmul.f32 %v947_v52, %v947_v52  ;;  %v965_v58 = vmul.f32 %v1967_v42, %v955_v55 }
 0x23d   : > { %v956_v34 = vmul.f32 %v946_v35, %v946_v35  ;;  %v964_v59 = vmul.f32 %v1953_v23, %v954_v36 }
 0x23e   : > { %v969_v49 = vadd.f32 %v968_v44, %v960_v43  ;;  %v967_v3 = vmul.f32 %v1977_v53, %v957_v61 }
 0x23f   : > { %v966_v50 = vmul.f32 %v1972_v26, %v956_v34 }
 0x240   : > { %v970_v51 = vadd.f32 %v969_v49, %v961_v48 }
 0x242   : > { %v971_v45 = vadd.f32 %v970_v51, %v962_v28 }
 0x244   : > { %v972_v60 = vadd.f32 %v971_v45, %v963_v40 }
 0x246   : > { %v973_v62 = vadd.f32 %v972_v60, %v964_v59 }
 0x248   : > { %v974_v2 = vadd.f32 %v973_v62, %v965_v58 }
 0x24a   : > { %v975_v0 = vadd.f32 %v974_v2, %v966_v50 }
 0x24c   : > { %v976_v5 = vadd.f32 %v975_v0, %v967_v3 }
 0x24e   : > { %v977_v56 = vrot.slane %v976_v5, 4 }
 0x250   : > { %v978_v7 = vadd.f32 %v977_v56, %v976_v5 }
 0x252   : > { %v979_v9 = vrot.slane %v978_v7, 2 }
 0x254   : > { %v980_v57 = vadd.f32 %v979_v9, %v978_v7 }
 0x256   : > { %v981_v10 = vrot.slane %v980_v57, 1 }
 0x258   : > { %v982_v1 = vadd.f32 %v981_v10, %v980_v57 }
 0x25a   : > { %988 = vrot.lane.b32.xlu1 %v982_v1, %s1538_s27  ;;  %984 = vrot.lane.b32.xlu0 %v982_v1, %s1537_s26 }
 0x25e   : > { %992 = vrot.lane.b32.xlu0 %v982_v1, %s1536_s25 }
 0x2cc   : > { %v985_v23 = vpop.permute.xlu0 %984  ;;  %v989_v26 = vpop.permute.xlu1 %988 }
 0x2cd   : > { %v987_v42 = vadd.f32 %v985_v23, %v982_v1 }
 0x2cf   : > { %v991_v54 = vadd.f32 %v989_v26, %v987_v42 }
 0x2d0   : > { %v993_v11 = vpop.permute.xlu0 %992 }
 0x2d1   : > { %v995_v53 = vadd.f32 %v993_v11, %v991_v54 }
 0x2d3   : > { %1000 = vrot.lane.b32.xlu0 %v995_v53, %s1538_s27  ;;  %997 = vrot.lane.b32.xlu1 %v995_v53, %s1536_s25 }
 0x2d7   : > { %1003 = vrot.lane.b32.xlu1 %v995_v53, %s1537_s26 }
 0x345   : > { %v998_v38 = vpop.permute.xlu1 %997  ;;  %v1001_v14 = vpop.permute.xlu0 %1000 }
 0x346   : > { %v1006_v15 = vsel %vm928_vm14, %v995_v53, %v998_v38 }
 0x347   : > { %v1007_v16 = vsel %vm930_vm15, %v1006_v15, %v1001_v14 }
 0x349   : > { %v1004_v46 = vpop.permute.xlu1 %1003 }
 0x34a   : > { %v1008_v8 = vsel %vm259_vm2, %v1007_v16, %v1004_v46 }
 0x34b   : > { %v1009_v18 = vmul.f32 0.00390625, %v1008_v8 }
 0x34d   : > { %v1010_v20 = vadd.f32 1e-05, %v1009_v18 }
 0x34f   : > { %1524 = vrsqrt.f32 %v1010_v20 }
 0x359   : > { %v1525_v22 = vpop.eup %1524 }
 0x35a   : > { %v1015_v24 = vrot.slane %v1525_v22, %v936_v19 }
 0x35c   : > { %v1016_v13 = vmul.f32 %v1015_v24, %v1995_v25  ;;  %v1017_v32 = vmul.f32 %v1015_v24, %v1998_v27  ;;  %v1018_v33 = vmul.f32 %v1015_v24, %v2001_v29  ;;  %v1019_v4 = vmul.f32 %v1015_v24, %v2004_v31 }
 0x35d   : > { %v1020_v30 = vmul.f32 %v1015_v24, %v2011_v37  ;;  %v1021_v21 = vmul.f32 %v1015_v24, %v2016_v17  ;;  %v1022_v39 = vmul.f32 %v1015_v24, %v2023_v41  ;;  %v1023_v63 = vmul.f32 %v1015_v24, %v945_v47 }
 0x35e   : > { %v1024_v43 = vmul.f32 %v1015_v24, %v946_v35  ;;  %v1025_v44 = vmul.f32 %v1015_v24, %v947_v52  ;;  %v1026_v6 = vmax.f32 %v1016_v13, 0.0  ;;  %v1027_v19 = vmax.f32 %v1017_v32, 0.0 }
 0x35f   : > { %v1028_v12 = vmax.f32 %v1018_v33, 0.0  ;;  %v1029_v48 = vmax.f32 %v1019_v4, 0.0  ;;  %v1030_v25 = vmax.f32 %v1020_v30, 0.0  ;;  %v1031_v49 = vmax.f32 %v1021_v21, 0.0 }
 0x360   : > { %v1032_v27 = vmax.f32 %v1022_v39, 0.0  ;;  %v1033_v29 = vmax.f32 %v1023_v63, 0.0  ;;  %v1034_v31 = vmax.f32 %v1024_v43, 0.0  ;;  %v1035_v37 = vmax.f32 %v1025_v44, 0.0 }
 0x361   : > { %v1257_v17 = vpack.c.bf16 %v1027_v19, %v1026_v6  ;;  %v1262_v36 = vpack.c.bf16 %v1029_v48, %v1028_v12  ;;  %v1267_v41 = vpack.c.bf16 %v1031_v49, %v1030_v25 }
 0x362   : > { %v1272_v47 = vpack.c.bf16 %v1033_v29, %v1032_v27  ;;  %v1277_v35 = vpack.c.bf16 %v1035_v37, %v1034_v31 }
 0x363   : > { %1258 = vst [vmem:[%s143_s30] sm:$0xff] %v1257_v17   ;;  %1279 = vst [vmem:[%s143_s30 + $0x8] sm:$0xff] %v1262_v36  }
 0x364   : > { %1280 = vst [vmem:[%s143_s30 + $0x10] sm:$0xff] %v1267_v41   ;;  %1281 = vst [vmem:[%s143_s30 + $0x18] sm:$0xff] %v1272_v47  }
 0x365   : > { %1282 = vst [vmem:[%s143_s30 + $0x20] sm:$0xff] %v1277_v35  }
 0x366 PF: > { %s12_s9 = sadd.s32 1, %s1532_s9  }
 0x367   : > { %p9_p4 = scmp.ge.s32.totalorder %s12_s9, 4  }
 0x369   :  { %11 = sbr.rel (!%p9_p4) target bundleno = 1 (0x1), region = 60 }

// kernel: generator_forward.15
= control target key start
LH: loop header
LB: loop body
LE: loop exit
PB: predicated region body
PF: predicated region fallthrough
CT: control target
= control target key end

     0   :  { %s6185_s9 = smov 0   ;;  %s7213_s0 = inlined_call_operand.vmem [shape: bf16[2,506,112], index: 0, kind: input, shape index: {}]   ;;  %s7214_s1 = inlined_call_operand.vmem [shape: bf16[7,112,128], index: 1, kind: input, shape index: {}]   ;;  %s7215_s2 = inlined_call_operand.vmem [shape: f32[2,352,128], index: 2, kind: output, shape index: {}]  }
   0x1 LB: > { %s4326_s10 = sadd.s32 4294967295, %s6168_s9   ;;  %p4330_p0 = scmp.ge.s32.totalorder %s6168_s9, 1  ;;  %s6168_s9 = sphi %s6185_s9, %s12_s9  }
   0x2   : > { %p112_p1 = scmp.lt.s32.totalorder %s6168_s9, 3 }
   0x4   : > { %p113_p2 = pnand %p4330_p0, %p112_p1 }
   0x5   : > { %v5703_v0 = vld [vmem:[%s7214_s1 + $0x38] sm:$0xff] (!%p113_p2)   ;;  %p134_p3 = scmp.lt.s32.totalorder (!%p113_p2), %s4326_s10, 1  ;;  %v5704_v1 = vld [vmem:[%s7214_s1 + $0xa8] sm:$0xff] (!%p113_p2)   ;;  %v5705_v2 = vld [vmem:[%s7214_s1 + $0x40] sm:$0xff] (!%p113_p2)   ;;  %vm335_vm0 = vcmask (!%p113_p2), 1044480   ;;  %vm423_vm1 = vcmask (!%p113_p2), 916480  }
   0x6   : > { %116 = sbr.rel (%p113_p2) target bundleno = 626 (0x272), region = 28  ;;  %5010 = vmatprep.subr.bf16.mxu1 (!%p113_p2), %v5703_v0  ;;  %5184 = vmatprep.subr.bf16.mxu0 (!%p113_p2), %v5704_v1  ;;  %v5706_v3 = vld [vmem:[%s7214_s1 + $0xb0] sm:$0xff] (!%p113_p2)   ;;  %v5707_v4 = vld [vmem:[%s7214_s1 + $0x48] sm:$0xff] (!%p113_p2)   ;;  %v5708_v5 = vld [vmem:[%s7214_s1 + $0xb8] sm:$0xff] (!%p113_p2)   ;;  %vm1777_vm2 = vcmask (!%p113_p2), 1046528   ;;  %vm1197_vm3 = vcmask (!%p113_p2), 1045504  }
   0x7   : > { %5011 = vmatpush3.bf16.msra.mxu1 (!%p113_p2), %v5703_v0  ;;  %5185 = vmatpush3.bf16.msra.mxu0 (!%p113_p2), %v5704_v1  ;;  %v5709_v6 = vld [vmem:[%s7214_s1 + $0x50] sm:$0xff] (!%p113_p2)   ;;  %v5710_v7 = vld [vmem:[%s7214_s1 + $0xc0] sm:$0xff] (!%p113_p2)   ;;  %v5711_v8 = vld [vmem:[%s7214_s1 + $0x58] sm:$0xff] (!%p113_p2)  }
   0x8   : > { %5012 = vmatprep.subr.bf16.mxu1 (!%p113_p2), %v5705_v2  ;;  %5186 = vmatprep.subr.bf16.mxu0 (!%p113_p2), %v5706_v3  ;;  %v5712_v9 = vld [vmem:[%s7214_s1 + $0xc8] sm:$0xff] (!%p113_p2)   ;;  %v5713_v10 = vld [vmem:[%s7214_s1 + $0x60] sm:$0xff] (!%p113_p2)   ;;  %v5714_v12 = vld [vmem:[%s7214_s1 + $0xd0] sm:$0xff] (!%p113_p2)  }
   0x9   : > { %v5715_v19 = vld [vmem:[%s7214_s1 + $0x68] sm:$0xff] (!%p113_p2)   ;;  %v5716_v26 = vld [vmem:[%s7214_s1 + $0xd8] sm:$0xff] (!%p113_p2)   ;;  %v5724_v33 = vld [vmem:[%s7214_s1 + $0xe0] sm:$0xff] (!%p113_p2)  }
   0xa   : > { %v5729_v35 = vld [vmem:[%s7214_s1] sm:$0xff] (!%p113_p2)   ;;  %v5727_v37 = vld [vmem:[%s7214_s1 + $0xe8] sm:$0xff] (!%p113_p2)   ;;  %v5731_v46 = vld [vmem:[%s7214_s1 + $0xf0] sm:$0xff] (!%p113_p2)  }
   0xb   : > { %5013 = vmatpush3.bf16.msra.mxu1 (!%p113_p2), %v5705_v2  ;;  %5187 = vmatpush3.bf16.msra.mxu0 (!%p113_p2), %v5706_v3  ;;  %v5736_v51 = vld [vmem:[%s7214_s1 + $0x8] sm:$0xff] (!%p113_p2)   ;;  %v5737_v54 = vld [vmem:[%s7214_s1 + $0xf8] sm:$0xff] (!%p113_p2)   ;;  %v5742_v1 = vld [vmem:[%s7214_s1 + $0x100] sm:$0xff] (!%p113_p2)  }
   0xc   : > { %5014 = vmatprep.subr.bf16.mxu1 (!%p113_p2), %v5707_v4  ;;  %5188 = vmatprep.subr.bf16.mxu0 (!%p113_p2), %v5708_v5 }
   0xd   : > { %s7217_s10 = smov (!%p134_p3, %s4326_s10), 1 }
   0xe   : > { %s4806_s25 = sshll.u32 %s7217_s10, 8 }
   0xf   : > { %5015 = vmatpush3.bf16.msra.mxu1 %v5707_v4  ;;  %s6223_s30 = scalar_lea.vmem %s7213_s0, %s4806_s25  ;;  %5189 = vmatpush3.bf16.msra.mxu0 %v5708_v5 }
  0x10   : > { %5016 = vmatprep.subr.bf16.mxu1 %v5709_v6  ;;  %5190 = vmatprep.subr.bf16.mxu0 %v5710_v7  ;;  %v6235_v11 = vld [vmem:[%s6223_s30 + $0xc] sm:$0xf]  ;;  %v203_v13 = vld [vmem:[%s6223_s30 + $0x8] sm:$0x8]  ;;  %v6242_v14 = vld [vmem:[%s6223_s30 + $0x10] sm:$0xff]  }
  0x11   : > { %v4348_v15 = vcombine.low %v203_v13, %v6235_v11  ;;  %v337_v16 = vrot.slane %v6242_v14, 3  ;;  %v5720_v17 = vld [vmem:[%s6223_s30 + $0x20] sm:$0xfe]   ;;  %v5721_v18 = vld [vmem:[%s6223_s30 + $0x28] sm:$0xff]   ;;  %v6252_v21 = vld [vmem:[%s6223_s30 + $0x18] sm:$0xff]  }
  0x12   : > { %v1778_v22 = vrot.slane %v5720_v17, 1  ;;  %v1779_v23 = vrot.slane %v5721_v18, 1  ;;  %v5723_v25 = vld [vmem:[%s6223_s30 + $0x30] sm:$0xff]   ;;  %v6263_v28 = vld [vmem:[%s6223_s30 + $0x20] sm:$0xff]   ;;  %v339_v29 = vrot.slane %v6252_v21, 3  ;;  %v5726_v30 = vld [vmem:[%s6223_s30 + $0x38] sm:$0xff]  }
  0x13   : > { %5017 = vmatpush3.bf16.msra.mxu1 %v5709_v6  ;;  %5191 = vmatpush3.bf16.msra.mxu0 %v5710_v7  ;;  %v336_v20 = vrot.slane %v4348_v15, 3  ;;  %v1781_v31 = vrot.slane %v5723_v25, 1  ;;  %v341_v32 = vrot.slane %v6263_v28, 3  ;;  %v1783_v34 = vrot.slane %v5726_v30, 1  ;;  %v6279_v38 = vld [vmem:[%s6223_s30 + $0x28] sm:$0xff]   ;;  %v5730_v41 = vld [vmem:[%s6223_s30 + $0x40] sm:$0xff]  }
  0x14   : > { %5018 = vmatprep.subr.bf16.mxu1 %v5711_v8  ;;  %5192 = vmatprep.subr.bf16.mxu0 %v5712_v9  ;;  %v1780_v27 = vsel %vm1777_vm2, %v1778_v22, %v1779_v23  ;;  %v340_v36 = vsel %vm335_vm0, %v337_v16, %v339_v29  ;;  %v6286_v43 = vld [vmem:[%s6223_s30 + $0x30] sm:$0xff]   ;;  %v5733_v44 = vld [vmem:[%s6223_s30 + $0x48] sm:$0xff]   ;;  %v343_v45 = vrot.slane %v6279_v38, 3  ;;  %v1785_v47 = vrot.slane %v5730_v41, 1  ;;  %v6299_v50 = vld [vmem:[%s6223_s30 + $0x38] sm:$0xff]  }
  0x15   : > { %v338_v24 = vsel %vm335_vm0, %v336_v20, %v337_v16  ;;  %5198 = vmatprep.mubr.msk.bf16.mxu0 %vm423_vm1, %v1780_v27  ;;  %v1782_v39 = vsel %vm1777_vm2, %v1779_v23, %v1781_v31  ;;  %v342_v40 = vsel %vm335_vm0, %v339_v29, %v341_v32  ;;  %v1784_v42 = vsel %vm1777_vm2, %v1781_v31, %v1783_v34  ;;  %v5735_v52 = vld [vmem:[%s6223_s30 + $0x50] sm:$0xff]   ;;  %v6312_v57 = vld [vmem:[%s6223_s30 + $0x40] sm:$0xff]   ;;  %v5739_v59 = vld [vmem:[%s6223_s30 + $0x58] sm:$0xff]  }
  0x16   : > { %5024 = vmatprep.mubr.msk.bf16.mxu1 %vm423_vm1, %v338_v24  ;;  %v345_v48 = vrot.slane %v6286_v43, 3  ;;  %v1787_v49 = vrot.slane %v5733_v44, 1  ;;  %v344_v53 = vsel %vm335_vm0, %v341_v32, %v343_v45  ;;  %v1786_v55 = vsel %vm1777_vm2, %v1783_v34, %v1785_v47  ;;  %v6323_v0 = vld [vmem:[%s6223_s30 + $0x48] sm:$0xff]   ;;  %v5741_v2 = vld [vmem:[%s6223_s30 + $0x60] sm:$0xff]   ;;  %v6330_v3 = vld [vmem:[%s6223_s30 + $0x50] sm:$0xff]  }
  0x17   : > { %5019 = vmatpush3.bf16.msra.mxu1 %v5711_v8  ;;  %5193 = vmatpush3.bf16.msra.mxu0 %v5712_v9  ;;  %v347_v60 = vrot.slane %v6299_v50, 3  ;;  %v1789_v61 = vrot.slane %v5735_v52, 1  ;;  %v349_v62 = vrot.slane %v6312_v57, 3  ;;  %v1791_v63 = vrot.slane %v5739_v59, 1  ;;  %v5744_v5 = vld [vmem:[%s6223_s30 + $0x68] sm:$0xff]   ;;  %v5747_v8 = vld [vmem:[%s7214_s1 + $0x10] sm:$0xff]  }
  0x18   : > { %5020 = vmatprep.subr.bf16.mxu1 %v5713_v10  ;;  %5194 = vmatprep.subr.bf16.mxu0 %v5714_v12  ;;  %v346_v56 = vsel %vm335_vm0, %v343_v45, %v345_v48  ;;  %v1788_v58 = vsel %vm1777_vm2, %v1785_v47, %v1787_v49  ;;  %v1793_v13 = vrot.slane %v5741_v2, 1  ;;  %v353_v15 = vrot.slane %v6330_v3, 3  ;;  %v6350_v17 = vld [vmem:[%s6223_s30 + $0x58] sm:$0xff]   ;;  %v5746_v18 = vld [vmem:[%s6223_s30 + $0x70] sm:$0xff]   ;;  %v6363_v25 = vld [vmem:[%s6223_s30 + $0x60] sm:$0xff]  }
  0x19   : > { %v348_v4 = vsel %vm335_vm0, %v345_v48, %v347_v60  ;;  %v1790_v6 = vsel %vm1777_vm2, %v1787_v49, %v1789_v61  ;;  %v350_v7 = vsel %vm335_vm0, %v347_v60, %v349_v62  ;;  %v1792_v9 = vsel %vm1777_vm2, %v1789_v61, %v1791_v63  ;;  %v5754_v22 = vld [vmem:[%s7214_s1 + $0x18] sm:$0xff]   ;;  %v6377_v34 = vld [vmem:[%s6223_s30 + $0x68] sm:$0xff]   ;;  %v5765_v2 = vld [vmem:[%s7214_s1 + $0x120] sm:$0xff]  }
  0x1a   : > { %v1795_v16 = vrot.slane %v5744_v5, 1  ;;  %v1794_v23 = vsel %vm1777_vm2, %v1791_v63, %v1793_v13  ;;  %v5750_v27 = vld [vmem:[%s6223_s30 + $0x78] sm:$0xff]   ;;  %v355_v29 = vrot.slane %v6350_v17, 3  ;;  %v1797_v30 = vrot.slane %v5746_v18, 1  ;;  %v5756_v47 = vld [vmem:[%s6223_s30 + $0x2c] sm:$0xff]  }
  0x1b   : > { %5021 = vmatpush3.bf16.msra.mxu1 %v5713_v10  ;;  %5195 = vmatpush3.bf16.msra.mxu0 %v5714_v12  ;;  %v5748_v10 = vld [vmem:[%s7214_s1 + $0x108] sm:$0xff]   ;;  %v351_v12 = vrot.slane %v6323_v0, 3  ;;  %v357_v31 = vrot.slane %v6363_v25, 3  ;;  %v5759_v32 = vld [vmem:[%s7214_s1 + $0x118] sm:$0xff]   ;;  %v359_v44 = vrot.slane %v6377_v34, 3 }
  0x1c   : > { %5022 = vmatprep.subr.bf16.mxu1 %v5715_v19  ;;  %5196 = vmatprep.subr.bf16.mxu0 %v5716_v26  ;;  %v6401_v48 = vld [vmem:[%s6223_s30 + $0x78] sm:$0xff]   ;;  %v6423_v60 = vld [vmem:[%s6223_s30 + $0x88] sm:$0xff]  }
  0x1d   : > { %v352_v20 = vsel %vm335_vm0, %v349_v62, %v351_v12  ;;  %v354_v24 = vsel %vm335_vm0, %v351_v12, %v353_v15  ;;  %v360_v49 = vsel %vm335_vm0, %v357_v31, %v359_v44  ;;  %v5761_v59 = vld [vmem:[%s6223_s30 + $0x3c] sm:$0xff]   ;;  %v6427_v62 = vld [vmem:[%s6223_s30 + $0x90] sm:$0xff]  }
  0x1e   : > { %v369_v5 = vrot.slane %v6427_v62, 3  ;;  %v6454_v12 = vld [vmem:[%s6223_s30 + $0x98] sm:$0xff]  }
  0x1f   : > { %5023 = vmatpush3.bf16.msra.mxu1 %v5715_v19  ;;  %5197 = vmatpush3.bf16.msra.mxu0 %v5716_v26  ;;  %v5753_v19 = vld [vmem:[%s7214_s1 + $0x110] sm:$0xff]   ;;  %v1796_v26 = vsel %vm1777_vm2, %v1793_v13, %v1795_v16  ;;  %v371_v18 = vrot.slane %v6454_v12, 3 }
  0x20   : > { %5068 = vmatprep.subr.bf16.mxu1 %v5729_v35  ;;  %5242 = vmatprep.subr.bf16.mxu0 %v5724_v33 }
  0x22   : > { %5025 = vmatmul.mubr.msk.bf16.vlgmr.msra.gmra.mrb[0].mxu1 %vm423_vm1, %v340_v36  ;;  %5199 = vmatmul.mubr.msk.bf16.vlgmr.msra.gmra.mrb[0].mxu0 %vm423_vm1, %v1782_v39  ;;  %v6381_v36 = vld [vmem:[%s6223_s30 + $0x80] sm:$0xff]   ;;  %v358_v39 = vsel %vm335_vm0, %v355_v29, %v357_v31 }
  0x23   : > { %5028 = vmatprep.mubr.msk.bf16.mxu1 %vm423_vm1, %v342_v40  ;;  %5243 = vmatpush3.bf16.msra.mxu0 %v5724_v33  ;;  %v1799_v33 = vrot.slane %v5750_v27, 1  ;;  %v6386_v40 = vld [vmem:[%s6223_s30 + $0x70] sm:$0xff]   ;;  %v1801_v45 = vrot.slane %v6381_v36, 1 }
  0x24   : > { %5202 = vmatprep.mubr.msk.bf16.mxu0 %vm423_vm1, %v1784_v42  ;;  %5244 = vmatprep.subr.bf16.mxu0 %v5727_v37  ;;  %v5764_v42 = vld [vmem:[%s7214_s1 + $0x20] sm:$0xff]  }
  0x25   : > { %5069 = vmatpush3.bf16.msra.mxu1 %v5729_v35  ;;  %v356_v35 = vsel %vm335_vm0, %v353_v15, %v355_v29  ;;  %v1800_v41 = vsel %vm1777_vm2, %v1797_v30, %v1799_v33  ;;  %v1802_v52 = vsel %vm1777_vm2, %v1799_v33, %v1801_v45  ;;  %v6458_v15 = vld [vmem:[%s6223_s30 + $0xa0] sm:$0xff]   ;;  %v5776_v29 = vld [vmem:[%s6223_s30 + $0xb0] sm:$0xff]   ;;  %v5798_v33 = vld [vmem:[%s7214_s1 + $0x148] sm:$0xff]  }
  0x26   : > { %5070 = vmatprep.subr.bf16.mxu1 %v5736_v51 }
  0x27   : > { %5245 = vmatpush3.bf16.msra.mxu0 %v5727_v37  ;;  %v1798_v37 = vsel %vm1777_vm2, %v1795_v16, %v1797_v30  ;;  %v5781_v16 = vld [vmem:[%s7214_s1 + $0x130] sm:$0xff]   ;;  %v5793_v30 = vld [vmem:[%s7214_s1 + $0x140] sm:$0xff]  }
  0x28   : > { %5246 = vmatprep.subr.bf16.mxu0 %v5731_v46 }
  0x29   : > { %5071 = vmatpush3.bf16.msra.mxu1 %v5736_v51  ;;  %v6405_v51 = vld [vmem:[%s6223_s30 + $0x80] sm:$0xff]  }
  0x2a   : > { %5029 = vmatmul.mubr.msk.bf16.gmra.mrb[4].mxu1 %vm423_vm1, %v344_v53  ;;  %5203 = vmatmul.mubr.msk.bf16.gmra.mrb[4].mxu0 %vm423_vm1, %v1786_v55  ;;  %v363_v55 = vrot.slane %v6401_v48, 3 }
  0x2b   : > { %5032 = vmatprep.mubr.msk.bf16.mxu1 %vm423_vm1, %v346_v56  ;;  %5206 = vmatprep.mubr.msk.bf16.mxu0 %vm423_vm1, %v1788_v58  ;;  %v365_v56 = vrot.slane %v6405_v51, 3  ;;  %v5758_v58 = vld [vmem:[%s6223_s30 + $0x34] sm:$0xff]  }
  0x2c   : > { %5247 = vmatpush3.bf16.msra.mxu0 %v5731_v46  ;;  %5072 = vmatprep.subr.bf16.mxu1 %v5747_v8  ;;  %v361_v46 = vrot.slane %v6386_v40, 3 }
  0x2d   : > { %5248 = vmatprep.subr.bf16.mxu0 %v5737_v54  ;;  %5073 = vmatpush3.bf16.msra.mxu1 %v5747_v8  ;;  %v366_v63 = vsel %vm335_vm0, %v363_v55, %v365_v56  ;;  %v5767_v8 = vld [vmem:[%s6223_s30 + $0x4c] sm:$0xff]  }
  0x2e   : > { %5074 = vmatprep.subr.bf16.mxu1 %v5754_v22  ;;  %v362_v53 = vsel %vm335_vm0, %v359_v44, %v361_v46  ;;  %v364_v61 = vsel %vm335_vm0, %v361_v46, %v363_v55  ;;  %v6501_v44 = vld [vmem:[%s7214_s1 + $0x150] sm:$0xff]  }
  0x30   : > { %5249 = vmatpush3.bf16.msra.mxu0 %v5737_v54  ;;  %v5771_v54 = vld [vmem:[%s7214_s1 + $0x28] sm:$0xff]  }
  0x31   : > { %5250 = vmatprep.subr.bf16.mxu0 %v5742_v1  ;;  %5075 = vmatpush3.bf16.msra.mxu1 %v5754_v22  ;;  %v5788_v22 = vld [vmem:[%s7214_s1 + $0x138] sm:$0xff]  }
  0x32   : > { %5033 = vmatmul.mubr.msk.bf16.gmra.mrb[8].mxu1 %vm423_vm1, %v348_v4  ;;  %5207 = vmatmul.mubr.msk.bf16.gmra.mrb[8].mxu0 %vm423_vm1, %v1790_v6  ;;  %v367_v4 = vrot.slane %v6423_v60, 3  ;;  %v5763_v6 = vld [vmem:[%s6223_s30 + $0x44] sm:$0xff]  }
  0x33   : > { %5036 = vmatprep.mubr.msk.bf16.mxu1 %vm423_vm1, %v350_v7  ;;  %5210 = vmatprep.mubr.msk.bf16.mxu0 %vm423_vm1, %v1792_v9  ;;  %v5775_v7 = vld [vmem:[%s7214_s1 + $0x128] sm:$0xff]   ;;  %v6450_v9 = vld [vmem:[%s7214_s1 + $0x70] sm:$0xff]  }
  0x34   : > { %5251 = vmatpush3.bf16.msra.mxu0 %v5742_v1  ;;  %5076 = vmatprep.subr.bf16.mxu1 %v5764_v42  ;;  %v5780_v1 = vld [vmem:[%s7214_s1 + $0x30] sm:$0xff]   ;;  %v370_v13 = vsel %vm335_vm0, %v367_v4, %v369_v5 }
  0x35   : > { %5252 = vmatprep.subr.bf16.mxu0 %v5748_v10  ;;  %5077 = vmatpush3.bf16.msra.mxu1 %v5764_v42  ;;  %v5777_v42 = vld [vmem:[%s6223_s30 + $0x6c] sm:$0xff]  }
  0x36   : > { %5078 = vmatprep.subr.bf16.mxu1 %v5771_v54 }
  0x38   : > { %5253 = vmatpush3.bf16.msra.mxu0 %v5748_v10  ;;  %v368_v10 = vsel %vm335_vm0, %v365_v56, %v367_v4  ;;  %v5784_v56 = vld [vmem:[%s6223_s30 + $0x84] sm:$0xff]   ;;  %v5792_v4 = vld [vmem:[%s6223_s30 + $0xac] sm:$0xff]  }
  0x39   : > { %5254 = vmatprep.subr.bf16.mxu0 %v5753_v19  ;;  %5079 = vmatpush3.bf16.msra.mxu1 %v5771_v54  ;;  %v147_v54 = vld [vmem:[%s6223_s30 + $0x8] sm:$0xf] }
  0x3a   : > { %5037 = vmatmul.mubr.msk.bf16.gmra.mrb[12].mxu1 %vm423_vm1, %v352_v20  ;;  %5211 = vmatmul.mubr.msk.bf16.gmra.mrb[12].mxu0 %vm423_vm1, %v1794_v23  ;;  %v5769_v20 = vld [vmem:[%s6223_s30 + $0x54] sm:$0xff]   ;;  %v5772_v23 = vld [vmem:[%s6223_s30 + $0x5c] sm:$0xff]   ;;  %v4401_v55 = vcombine.low %v147_v54, %v6235_v11 }
  0x3b   : > { %5040 = vmatprep.mubr.msk.bf16.mxu1 %vm423_vm1, %v354_v24  ;;  %5214 = vmatprep.mubr.msk.bf16.mxu0 %vm423_vm1, %v1796_v26  ;;  %v372_v24 = vsel %vm335_vm0, %v369_v5, %v371_v18  ;;  %v6477_v26 = vld [vmem:[%s6223_s30 + $0xa8] sm:$0xff]   ;;  %v5797_v11 = vld [vmem:[%s7214_s1 + $0x80] sm:$0xff]   ;;  %v5794_v5 = vld [vmem:[%s6223_s30 + $0xb4] sm:$0xff]  }
  0x3c   : > { %5255 = vmatpush3.bf16.msra.mxu0 %v5753_v19  ;;  %5080 = vmatprep.subr.bf16.mxu1 %v5780_v1  ;;  %v373_v19 = vrot.slane %v6458_v15, 3  ;;  %v375_v31 = vrot.slane %v6477_v26, 3 }
  0x3d   : > { %5300 = vmatprep.subr.bf16.mxu0 %v5759_v32  ;;  %5081 = vmatpush3.bf16.msra.mxu1 %v5780_v1  ;;  %v5801_v1 = vld [vmem:[%s7214_s1 + $0x88] sm:$0xff]  }
  0x3e   : > { %5126 = vmatprep.subr.bf16.mxu1 %v6450_v9  ;;  %v374_v27 = vsel %vm335_vm0, %v371_v18, %v373_v19  ;;  %v5806_v18 = vld [vmem:[%s6223_s30 + $0x4c] sm:$0xff]  }
  0x42   : > { %5041 = vmatmul.mubr.msk.bf16.gmra.mrb[16].mxu1 %vm423_vm1, %v356_v35  ;;  %5215 = vmatmul.mubr.msk.bf16.gmra.mrb[16].mxu0 %vm423_vm1, %v1798_v37  ;;  %v376_v35 = vsel %vm335_vm0, %v373_v19, %v375_v31  ;;  %v5774_v37 = vld [vmem:[%s6223_s30 + $0x64] sm:$0xff]  }
  0x43   : > { %5044 = vmatprep.mubr.msk.bf16.mxu1 %vm423_vm1, %v358_v39  ;;  %5218 = vmatprep.mubr.msk.bf16.mxu0 %vm423_vm1, %v1800_v41  ;;  %v5778_v39 = vld [vmem:[%s6223_s30 + $0xb8] ss:$0 sps:$4 sm:$0x77]  }
  0x44   : > { %v379_v46 = vrot.slane %v5778_v39, 3  ;;  %v5816_v39 = vld [vmem:[%s6223_s30 + $0x7c] sm:$0xff]  }
  0x4a   : > { %5045 = vmatmul.mubr.msk.bf16.gmra.mrb[20].mxu1 %vm423_vm1, %v360_v49  ;;  %5219 = vmatmul.mubr.msk.bf16.gmra.mrb[20].mxu0 %vm423_vm1, %v1802_v52  ;;  %v5782_v52 = vld [vmem:[%s6223_s30] sm:$0xff]  }
  0x4b   : > { %5048 = vmatprep.mubr.msk.bf16.mxu1 %vm423_vm1, %v362_v53  ;;  %5256 = vmatprep.mubr.msk.bf16.mxu0 %vm423_vm1, %v5756_v47  ;;  %v5779_v47 = vld [vmem:[%s6223_s30 + $0x74] sm:$0xff]   ;;  %v5783_v53 = vld [vmem:[%s6223_s30 + $0x7c] sm:$0xff]  }
  0x52   : > { %5049 = vmatmul.mubr.msk.bf16.gmra.mrb[24].mxu1 %vm423_vm1, %v364_v61  ;;  %5257 = vmatmul.mubr.msk.bf16.vlgmr.msra.gmra.mrb[0].mxu0 %vm423_vm1, %v5758_v58  ;;  %v5785_v58 = vld [vmem:[%s6223_s30 + $0x8c] sm:$0xff]   ;;  %v5787_v61 = vld [vmem:[%s6223_s30 + $0x94] sm:$0xff]  }
  0x53   : > { %5052 = vmatprep.mubr.msk.bf16.mxu1 %vm423_vm1, %v366_v63  ;;  %5301 = vmatpush3.bf16.msra.mxu0 %v5759_v32  ;;  %v377_v32 = vrot.slane %v5776_v29, 3  ;;  %v5789_v63 = vld [vmem:[%s6223_s30 + $0x9c] sm:$0xff]   ;;  %v5811_v29 = vld [vmem:[%s6223_s30 + $0x64] sm:$0xff]  }
  0x54   : > { %5260 = vmatprep.mubr.msk.bf16.mxu0 %vm423_vm1, %v5761_v59  ;;  %5302 = vmatprep.subr.bf16.mxu0 %v5765_v2  ;;  %v5791_v59 = vld [vmem:[%s7214_s1 + $0x78] sm:$0xff]  }
  0x55   : > { %v378_v41 = vsel %vm335_vm0, %v375_v31, %v377_v32  ;;  %v380_v49 = vsel %vm335_vm0, %v377_v32, %v379_v46  ;;  %v5819_v31 = vld [vmem:[%s7214_s1 + $0x168] sm:$0xff]   ;;  %v2898_v32 = vrot.slane %v5811_v29, 3  ;;  %v5843_v46 = vld [vmem:[%s7214_s1 + $0x180] sm:$0xff]  }
  0x57   : > { %5303 = vmatpush3.bf16.msra.mxu0 %v5765_v2  ;;  %v5790_v2 = vld [vmem:[%s6223_s30 + $0xa4] sm:$0xff]  }
  0x58   : > { %5304 = vmatprep.subr.bf16.mxu0 %v5775_v7 }
  0x5a   : > { %5053 = vmatmul.mubr.msk.bf16.gmra.mrb[28].mxu1 %vm423_vm1, %v368_v10  ;;  %5261 = vmatmul.mubr.msk.bf16.gmra.mrb[4].mxu0 %vm423_vm1, %v5763_v6  ;;  %v5795_v6 = vld [vmem:[%s6223_s30 + $0xbc] sm:$0xff]   ;;  %v5800_v10 = vld [vmem:[%s6223_s30 + $0xd4] sm:$0xff]  }
  0x5b   : > { %5056 = vmatprep.mubr.msk.bf16.mxu1 %vm423_vm1, %v370_v13  ;;  %5264 = vmatprep.mubr.msk.bf16.mxu0 %vm423_vm1, %v5767_v8  ;;  %v5803_v8 = vld [vmem:[%s6223_s30 + $0x3c] sm:$0xff]   ;;  %v5804_v13 = vld [vmem:[%s6223_s30 + $0x44] sm:$0xff]  }
  0x5c   : > { %5305 = vmatpush3.bf16.msra.mxu0 %v5775_v7  ;;  %v5802_v7 = vld [vmem:[%s6223_s30 + $0x34] sm:$0xf8]  }
  0x5d   : > { %5306 = vmatprep.subr.bf16.mxu0 %v5781_v16 }
  0x60   : > { %5307 = vmatpush3.bf16.msra.mxu0 %v5781_v16 }
  0x61   : > { %5308 = vmatprep.subr.bf16.mxu0 %v5788_v22 }
  0x62   : > { %5057 = vmatmul.mubr.msk.bf16.gmra.mrb[32].mxu1 %vm423_vm1, %v372_v24  ;;  %5265 = vmatmul.mubr.msk.bf16.gmra.mrb[8].mxu0 %vm423_vm1, %v5769_v20  ;;  %v5807_v20 = vld [vmem:[%s6223_s30 + $0x54] sm:$0xff]  }
  0x63   : > { %5060 = vmatprep.mubr.msk.bf16.mxu1 %vm423_vm1, %v374_v27  ;;  %5268 = vmatprep.mubr.msk.bf16.mxu0 %vm423_vm1, %v5772_v23  ;;  %v5810_v23 = vld [vmem:[%s6223_s30 + $0x5c] sm:$0xff]  }
  0x64   : > { %5309 = vmatpush3.bf16.msra.mxu0 %v5788_v22  ;;  %v5809_v22 = vld [vmem:[%s7214_s1 + $0x158] sm:$0xff]   ;;  %v2896_v24 = vrot.slane %v5810_v23, 3  ;;  %v5815_v27 = vld [vmem:[%s7214_s1 + $0x160] sm:$0xff]  }
  0x65   : > { %5310 = vmatprep.subr.bf16.mxu0 %v5793_v30  ;;  %v6157_v23 = vld [vmem:[%s7214_s1 + $0xb8] sm:$0xff]  }
  0x68   : > { %5311 = vmatpush3.bf16.msra.mxu0 %v5793_v30  ;;  %v5813_v30 = vld [vmem:[%s6223_s30 + $0x6c] sm:$0xff]  }
  0x69   : > { %5312 = vmatprep.subr.bf16.mxu0 %v5798_v33 }
  0x6a   : > { %5061 = vmatmul.mubr.msk.bf16.gmra.mrb[36].mxu1 %vm423_vm1, %v376_v35  ;;  %5269 = vmatmul.mubr.msk.bf16.gmra.mrb[12].mxu0 %vm423_vm1, %v5774_v37  ;;  %v5829_v35 = vld [vmem:[%s7214_s1 + $0x170] sm:$0xff]  }
  0x6b   : > { %5064 = vmatprep.mubr.msk.bf16.mxu1 %vm423_vm1, %v378_v41  ;;  %5272 = vmatprep.mubr.msk.bf16.mxu0 %vm423_vm1, %v5777_v42  ;;  %v5814_v37 = vld [vmem:[%s6223_s30 + $0x74] sm:$0xff]  }
  0x6c   : > { %5313 = vmatpush3.bf16.msra.mxu0 %v5798_v33  ;;  %v2900_v33 = vrot.slane %v5813_v30, 3  ;;  %v2902_v42 = vrot.slane %v5814_v37, 3 }
  0x6d   : > { %5358 = vmatprep.subr.bf16.mxu0 %v6501_v44 }
  0x6e   : > { %v2901_v41 = vsel %vm335_vm0, %v2898_v32, %v2900_v33 }
  0x72   : > { %5065 = vmatmul.mubr.msk.bf16.gmra.mrb[40].mxu1 %vm423_vm1, %v380_v49  ;;  %5273 = vmatmul.mubr.msk.bf16.gmra.mrb[16].mxu0 %vm423_vm1, %v5779_v47  ;;  %v2903_v47 = vsel %vm335_vm0, %v2900_v33, %v2902_v42  ;;  %v5817_v49 = vld [vmem:[%s6223_s30 + $0x84] sm:$0xff]  }
  0x73   : > { %5082 = vmatprep.mubr.msk.bf16.mxu1 %vm423_vm1, %v5782_v52  ;;  %5276 = vmatprep.mubr.msk.bf16.mxu0 %vm423_vm1, %v5783_v53  ;;  %v5820_v52 = vld [vmem:[%s6223_s30 + $0x14] sm:$0xfc]   ;;  %v2906_v54 = vrot.slane %v5817_v49, 3  ;;  %v5838_v33 = vld [vmem:[%s6223_s30 + $0xc4] sm:$0xff]  }
  0x74   : > { %v5841_v49 = vld [vmem:[%s6223_s30 + $0x64] sm:$0xff]  }
  0x7a   : > { %5083 = vmatmul.mubr.msk.bf16.vlgmr.msra.gmra.mrb[0].mxu1 %vm423_vm1, %v4401_v55  ;;  %5277 = vmatmul.mubr.msk.bf16.gmra.mrb[20].mxu0 %vm423_vm1, %v5784_v56  ;;  %v1198_v55 = vrot.slane %v5820_v52, 2 }
  0x7b   : > { %5086 = vmatprep.mubr.msk.bf16.mxu1 %vm423_vm1, %v6242_v14  ;;  %5280 = vmatprep.mubr.msk.bf16.mxu0 %vm423_vm1, %v5785_v58  ;;  %v5808_v14 = vld [vmem:[%s7214_s1 + $0x90] sm:$0xff]  }
  0x7c   : > { %5127 = vmatpush3.bf16.msra.mxu1 %v6450_v9  ;;  %v2888_v9 = vrot.slane %v5803_v8, 3  ;;  %v5831_v8 = vld [vmem:[%s6223_s30 + $0xac] sm:$0xff]  }
  0x7d   : > { %5128 = vmatprep.subr.bf16.mxu1 %v5791_v59 }
  0x80   : > { %5129 = vmatpush3.bf16.msra.mxu1 %v5791_v59  ;;  %v5823_v59 = vld [vmem:[%s6223_s30 + $0x24] sm:$0xff]  }
  0x81   : > { %5130 = vmatprep.subr.bf16.mxu1 %v5797_v11 }
  0x82   : > { %5087 = vmatmul.mubr.msk.bf16.gmra.mrb[4].mxu1 %vm423_vm1, %v6252_v21  ;;  %5281 = vmatmul.mubr.msk.bf16.gmra.mrb[24].mxu0 %vm423_vm1, %v5787_v61  ;;  %v5812_v21 = vld [vmem:[%s7214_s1 + $0x98] sm:$0xff]  }
  0x83   : > { %5090 = vmatprep.mubr.msk.bf16.mxu1 %vm423_vm1, %v6263_v28  ;;  %5284 = vmatprep.mubr.msk.bf16.mxu0 %vm423_vm1, %v5789_v63  ;;  %v5818_v28 = vld [vmem:[%s7214_s1 + $0xa0] sm:$0xff]   ;;  %v5824_v61 = vld [vmem:[%s6223_s30 + $0x94] sm:$0xff]   ;;  %v5825_v63 = vld [vmem:[%s6223_s30 + $0x2c] sm:$0xff]  }
  0x84   : > { %5131 = vmatpush3.bf16.msra.mxu1 %v5797_v11 }
  0x85   : > { %5132 = vmatprep.subr.bf16.mxu1 %v5801_v1 }
  0x88   : > { %5133 = vmatpush3.bf16.msra.mxu1 %v5801_v1  ;;  %v5826_v1 = vld [vmem:[%s6223_s30 + $0x9c] sm:$0xff]  }
  0x89   : > { %5134 = vmatprep.subr.bf16.mxu1 %v5808_v14 }
  0x8a   : > { %5091 = vmatmul.mubr.msk.bf16.gmra.mrb[8].mxu1 %vm423_vm1, %v6279_v38  ;;  %5285 = vmatmul.mubr.msk.bf16.gmra.mrb[28].mxu0 %vm423_vm1, %v5790_v2  ;;  %v6570_v38 = vld [vmem:[%s7214_s1 + $0xa8] sm:$0xff]   ;;  %v2910_v2 = vrot.slane %v5824_v61, 3 }
  0x8b   : > { %5094 = vmatprep.mubr.msk.bf16.mxu1 %vm423_vm1, %v6286_v43  ;;  %5288 = vmatprep.mubr.msk.bf16.mxu0 %vm423_vm1, %v5792_v4  ;;  %v5796_v43 = vld [vmem:[%s6223_s30 + $0xc4] sm:$0xff]   ;;  %v1203_v4 = vrot.slane %v5825_v63, 2  ;;  %v5846_v63 = vld [vmem:[%s6223_s30 + $0x74] sm:$0xff]  }
  0x8c   : > { %5135 = vmatpush3.bf16.msra.mxu1 %v5808_v14  ;;  %v1201_v14 = vrot.slane %v5823_v59, 2 }
  0x8d   : > { %5136 = vmatprep.subr.bf16.mxu1 %v5812_v21 }
  0x90   : > { %5137 = vmatpush3.bf16.msra.mxu1 %v5812_v21  ;;  %v2912_v21 = vrot.slane %v5826_v1, 3 }
  0x91   : > { %5138 = vmatprep.subr.bf16.mxu1 %v5818_v28 }
  0x92   : > { %5095 = vmatmul.mubr.msk.bf16.gmra.mrb[12].mxu1 %vm423_vm1, %v6299_v50  ;;  %5289 = vmatmul.mubr.msk.bf16.gmra.mrb[32].mxu0 %vm423_vm1, %v5794_v5  ;;  %v5799_v50 = vld [vmem:[%s6223_s30 + $0xcc] sm:$0xff]   ;;  %v5827_v5 = vld [vmem:[%s6223_s30 + $0x34] sm:$0xff]  }
  0x93   : > { %5098 = vmatprep.mubr.msk.bf16.mxu1 %vm423_vm1, %v6312_v57  ;;  %5292 = vmatprep.mubr.msk.bf16.mxu0 %vm423_vm1, %v5795_v6  ;;  %v2887_v57 = vrot.slane %v5802_v7, 3  ;;  %v2913_v7 = vsel %vm335_vm0, %v2910_v2, %v2912_v21 }
  0x94   : > { %5139 = vmatpush3.bf16.msra.mxu1 %v5818_v28 }
  0x95   : > { %5416 = vmatprep.subr.bf16.mxu1 %v6570_v38  ;;  %v2889_v16 = vsel %vm335_vm0, %v2887_v57, %v2888_v9  ;;  %v1205_v57 = vrot.slane %v5827_v5, 2  ;;  %v1221_v5 = vrot.slane %v5846_v63, 2  ;;  %v5867_v63 = vld [vmem:[%s6223_s30 + $0xc4] ss:$0 sps:$4 sm:$0x33]  }
  0x9a   : > { %5099 = vmatmul.mubr.msk.bf16.gmra.mrb[16].mxu1 %vm423_vm1, %v6323_v0  ;;  %5293 = vmatmul.mubr.msk.bf16.gmra.mrb[36].mxu0 %vm423_vm1, %v5796_v43  ;;  %v2890_v0 = vrot.slane %v5804_v13, 3  ;;  %v1204_v43 = vsel %vm1197_vm3, %v1201_v14, %v1203_v4  ;;  %v2916_v13 = vrot.slane %v5831_v8, 3  ;;  %v5851_v8 = vld [vmem:[%s6223_s30 + $0x84] sm:$0xff]  }
  0x9b   : > { %5102 = vmatprep.mubr.msk.bf16.mxu1 %vm423_vm1, %v6330_v3  ;;  %5296 = vmatprep.mubr.msk.bf16.mxu0 %vm423_vm1, %v5799_v50  ;;  %v2892_v3 = vrot.slane %v5806_v18, 3  ;;  %v5828_v50 = vld [vmem:[%s6223_s30 + $0xa4] sm:$0xff]   ;;  %v1206_v18 = vsel %vm1197_vm3, %v1203_v4, %v1205_v57 }
  0x9c   : > { %v2891_v19 = vsel %vm335_vm0, %v2888_v9, %v2890_v0  ;;  %v2914_v9 = vrot.slane %v5828_v50, 3 }
  0xa2   : > { %5103 = vmatmul.mubr.msk.bf16.gmra.mrb[20].mxu1 %vm423_vm1, %v6350_v17  ;;  %5297 = vmatmul.mubr.msk.bf16.gmra.mrb[40].mxu0 %vm423_vm1, %v5800_v10  ;;  %v2893_v17 = vsel %vm335_vm0, %v2890_v0, %v2892_v3  ;;  %v5832_v0 = vld [vmem:[%s6223_s30 + $0x44] sm:$0xff]  }
  0xa3   : > { %5106 = vmatprep.mubr.msk.bf16.mxu1 %vm423_vm1, %v6363_v25  ;;  %5314 = vmatprep.mubr.msk.bf16.mxu0 %vm423_vm1, %v2889_v16  ;;  %v2894_v25 = vrot.slane %v5807_v20, 3  ;;  %v6156_v16 = vld [vmem:[%s7214_s1 + $0xb0] sm:$0xff]  }
  0xa4   : > { %v5833_v20 = vld [vmem:[%s6223_s30 + $0xb4] sm:$0xff]  }
  0xaa   : > { %5107 = vmatmul.mubr.msk.bf16.gmra.mrb[24].mxu1 %vm423_vm1, %v6377_v34  ;;  %5315 = vmatmul.mubr.msk.bf16.vlgmr.msra.gmra.mrb[0].mxu0 %vm423_vm1, %v2891_v19  ;;  %v2895_v34 = vsel %vm335_vm0, %v2892_v3, %v2894_v25  ;;  %v2915_v3 = vsel %vm335_vm0, %v2912_v21, %v2914_v9  ;;  %v5849_v21 = vld [vmem:[%s6223_s30 + $0x40] sm:$0xfc]  }
  0xab   : > { %5110 = vmatprep.mubr.msk.bf16.mxu1 %vm423_vm1, %v6386_v40  ;;  %5359 = vmatpush3.bf16.msra.mxu0 %v6501_v44  ;;  %v2897_v40 = vsel %vm335_vm0, %v2894_v25, %v2896_v24  ;;  %v2904_v44 = vrot.slane %v5816_v39, 3  ;;  %v1209_v25 = vrot.slane %v5832_v0, 2  ;;  %v5840_v39 = vld [vmem:[%s6223_s30 + $0xcc] sm:$0xff]   ;;  %v3466_v50 = vrot.slane %v5849_v21, 2  ;;  %v5870_v21 = vld [vmem:[%s6223_s30 + $0x98] sm:$0xff]  }
  0xac   : > { %5318 = vmatprep.mubr.msk.bf16.mxu0 %vm423_vm1, %v2893_v17  ;;  %5360 = vmatprep.subr.bf16.mxu0 %v5809_v22  ;;  %v2917_v17 = vsel %vm335_vm0, %v2914_v9, %v2916_v13  ;;  %v1225_v0 = vrot.slane %v5851_v8, 2 }
  0xad   : > { %v2905_v53 = vsel %vm335_vm0, %v2902_v42, %v2904_v44  ;;  %v2907_v11 = vsel %vm335_vm0, %v2904_v44, %v2906_v54  ;;  %v2924_v44 = vrot.slane %v5840_v39, 3  ;;  %v5860_v39 = vld [vmem:[%s6223_s30 + $0x70] sm:$0xff]  }
  0xaf   : > { %5361 = vmatpush3.bf16.msra.mxu0 %v5809_v22  ;;  %v5834_v22 = vld [vmem:[%s6223_s30 + $0x4c] sm:$0xff]  }
  0xb0   : > { %5362 = vmatprep.subr.bf16.mxu0 %v5815_v27 }
  0xb2   : > { %5111 = vmatmul.mubr.msk.bf16.gmra.mrb[28].mxu1 %vm423_vm1, %v6401_v48  ;;  %5319 = vmatmul.mubr.msk.bf16.gmra.mrb[4].mxu0 %vm423_vm1, %v2895_v34  ;;  %v2899_v48 = vsel %vm335_vm0, %v2896_v24, %v2898_v32  ;;  %v2918_v24 = vrot.slane %v5833_v20, 3  ;;  %v6158_v34 = vld [vmem:[%s7214_s1 + $0xc0] sm:$0xff]  }
  0xb3   : > { %5114 = vmatprep.mubr.msk.bf16.mxu1 %vm423_vm1, %v6405_v51  ;;  %5322 = vmatprep.mubr.msk.bf16.mxu0 %vm423_vm1, %v2897_v40  ;;  %v5836_v51 = vld [vmem:[%s7214_s1 + $0x178] sm:$0xff]  }
  0xb4   : > { %5363 = vmatpush3.bf16.msra.mxu0 %v5815_v27  ;;  %v1211_v27 = vrot.slane %v5834_v22, 2  ;;  %v5837_v40 = vld [vmem:[%s6223_s30 + $0x54] sm:$0xff]  }
  0xb5   : > { %5364 = vmatprep.subr.bf16.mxu0 %v5819_v31 }
  0xb6   : > { %v1212_v32 = vsel %vm1197_vm3, %v1209_v25, %v1211_v27 }
  0xb8   : > { %5365 = vmatpush3.bf16.msra.mxu0 %v5819_v31  ;;  %v2919_v31 = vsel %vm335_vm0, %v2916_v13, %v2918_v24  ;;  %v5853_v13 = vld [vmem:[%s6223_s30 + $0x8c] sm:$0xff]  }
  0xb9   : > { %5366 = vmatprep.subr.bf16.mxu0 %v5829_v35 }
  0xba   : > { %5115 = vmatmul.mubr.msk.bf16.gmra.mrb[32].mxu1 %vm423_vm1, %v6423_v60  ;;  %5323 = vmatmul.mubr.msk.bf16.gmra.mrb[8].mxu0 %vm423_vm1, %v2899_v48  ;;  %v5821_v60 = vld [vmem:[%s6223_s30 + $0x1c] sm:$0xff]   ;;  %v6159_v48 = vld [vmem:[%s7214_s1 + $0xc8] sm:$0xff]  }
  0xbb   : > { %5118 = vmatprep.mubr.msk.bf16.mxu1 %vm423_vm1, %v6427_v62  ;;  %5326 = vmatprep.mubr.msk.bf16.mxu0 %vm423_vm1, %v2901_v41  ;;  %v5822_v62 = vld [vmem:[%s6223_s30 + $0x8c] sm:$0xff]   ;;  %v1199_v56 = vrot.slane %v5821_v60, 2  ;;  %v2922_v41 = vrot.slane %v5838_v33, 3  ;;  %v5859_v33 = vld [vmem:[%s6223_s30 + $0xa4] sm:$0xff]  }
  0xbc   : > { %5367 = vmatpush3.bf16.msra.mxu0 %v5829_v35  ;;  %v2908_v58 = vrot.slane %v5822_v62, 3  ;;  %v5839_v35 = vld [vmem:[%s6223_s30 + $0x5c] sm:$0xff]   ;;  %v5844_v62 = vld [vmem:[%s6223_s30 + $0x6c] sm:$0xff]  }
  0xbd   : > { %5368 = vmatprep.subr.bf16.mxu0 %v5836_v51  ;;  %v1202_v28 = vsel %vm1197_vm3, %v1199_v56, %v1201_v14  ;;  %v1215_v42 = vrot.slane %v5839_v35, 2  ;;  %v5847_v14 = vld [vmem:[%s6223_s30 + $0xe4] ss:$0 sps:$4 sm:$0x77]  }
  0xbe   : > { %v2911_v6 = vsel %vm335_vm0, %v2908_v58, %v2910_v2  ;;  %v5848_v2 = vld [vmem:[%s6223_s30 + $0x7c] sm:$0xff]  }
  0xc0   : > { %5369 = vmatpush3.bf16.msra.mxu0 %v5836_v51  ;;  %v1213_v51 = vrot.slane %v5837_v40, 2 }
  0xc1   : > { %5370 = vmatprep.subr.bf16.mxu0 %v5843_v46 }
  0xc2   : > { %5119 = vmatmul.mubr.msk.bf16.gmra.mrb[36].mxu1 %vm423_vm1, %v6454_v12  ;;  %5327 = vmatmul.mubr.msk.bf16.gmra.mrb[12].mxu0 %vm423_vm1, %v2903_v47  ;;  %v1200_v12 = vsel %vm1197_vm3, %v1198_v55, %v1199_v56  ;;  %v1214_v47 = vsel %vm1197_vm3, %v1211_v27, %v1213_v51  ;;  %v1216_v60 = vsel %vm1197_vm3, %v1213_v51, %v1215_v42  ;;  %v5845_v55 = vld [vmem:[%s6223_s30 + $0xdc] sm:$0xff]  }
  0xc3   : > { %5122 = vmatprep.mubr.msk.bf16.mxu1 %vm423_vm1, %v6458_v15  ;;  %5330 = vmatprep.mubr.msk.bf16.mxu0 %vm423_vm1, %v2905_v53  ;;  %v2909_v15 = vsel %vm335_vm0, %v2906_v54, %v2908_v58  ;;  %v5842_v53 = vld [vmem:[%s6223_s30 + $0xd4] sm:$0xff]   ;;  %v2925_v54 = vsel %vm335_vm0, %v2922_v41, %v2924_v44  ;;  %v1217_v58 = vrot.slane %v5841_v49, 2 }
  0xc4   : > { %5371 = vmatpush3.bf16.msra.mxu0 %v5843_v46  ;;  %v6160_v46 = vld [vmem:[%s7214_s1 + $0xd0] sm:$0xff]   ;;  %v6161_v56 = vld [vmem:[%s7214_s1 + $0xd8] sm:$0xff]   ;;  %v2926_v59 = vrot.slane %v5842_v53, 3 }
  0xc5   : > { %v1218_v61 = vsel %vm1197_vm3, %v1215_v42, %v1217_v58  ;;  %v1233_v42 = vrot.slane %v5859_v33, 2  ;;  %v5881_v33 = vld [vmem:[%s6223_s30 + $0xb8] sm:$0xff]  }
  0xca   : > { %5123 = vmatmul.mubr.msk.bf16.gmra.mrb[40].mxu1 %vm423_vm1, %v6477_v26  ;;  %5331 = vmatmul.mubr.msk.bf16.gmra.mrb[16].mxu0 %vm423_vm1, %v2907_v11  ;;  %v5830_v26 = vld [vmem:[%s6223_s30 + $0x3c] sm:$0xff]   ;;  %v1219_v11 = vrot.slane %v5844_v62, 2 }
  0xcb   : > { %5140 = vmatprep.mubr.msk.bf16.mxu1 %vm423_vm1, %v1200_v12  ;;  %5334 = vmatprep.mubr.msk.bf16.mxu0 %vm423_vm1, %v2909_v15  ;;  %v1207_v10 = vrot.slane %v5830_v26, 2  ;;  %v2928_v12 = vrot.slane %v5845_v55, 3  ;;  %v2927_v15 = vsel %vm335_vm0, %v2924_v44, %v2926_v59  ;;  %v3477_v44 = vrot.slane %v5860_v39, 2  ;;  %v5864_v62 = vld [vmem:[%s6223_s30 + $0x80] sm:$0xff]  }
  0xcc   : > { %v1220_v1 = vsel %vm1197_vm3, %v1217_v58, %v1219_v11 }
  0xcd   : > { %v1208_v19 = vsel %vm1197_vm3, %v1205_v57, %v1207_v10  ;;  %v1210_v30 = vsel %vm1197_vm3, %v1207_v10, %v1209_v25  ;;  %v2929_v4 = vsel %vm335_vm0, %v2926_v59, %v2928_v12  ;;  %v5852_v10 = vld [vmem:[%s6223_s30 + $0x50] sm:$0xff]   ;;  %v5856_v25 = vld [vmem:[%s6223_s30 + $0x60] sm:$0xff]   ;;  %v3481_v59 = vrot.slane %v5864_v62, 2 }
  0xd2   : > { %5141 = vmatmul.mubr.msk.bf16.vlgmr.msra.gmra.mrb[0].mxu1 %vm423_vm1, %v1202_v28  ;;  %5335 = vmatmul.mubr.msk.bf16.gmra.mrb[20].mxu0 %vm423_vm1, %v2911_v6  ;;  %v5850_v28 = vld [vmem:[%s6223_s30 + $0x48] sm:$0xff]   ;;  %v2930_v6 = vrot.slane %v5847_v14, 3  ;;  %v5868_v14 = vld [vmem:[%s6223_s30 + $0x90] sm:$0xff]  }
  0xd3   : > { %5144 = vmatprep.mubr.msk.bf16.mxu1 %vm423_vm1, %v1204_v43  ;;  %5338 = vmatprep.mubr.msk.bf16.mxu0 %vm423_vm1, %v2913_v7  ;;  %v1223_v43 = vrot.slane %v5848_v2, 2  ;;  %v3467_v26 = vrot.slane %v5850_v28, 2  ;;  %v1222_v7 = vsel %vm1197_vm3, %v1219_v11, %v1221_v5  ;;  %v5869_v2 = vld [vmem:[%s6223_s30 + $0x88] sm:$0xff]   ;;  %v1241_v28 = vrot.slane %v5867_v63, 2 }
  0xd4   : > { %5423 = vmatpush3.bf16.msra.mxu1 %v6570_v38  ;;  %v5835_v38 = vld [vmem:[%s6223_s30 + $0xbc] sm:$0xff]   ;;  %v2931_v57 = vsel %vm335_vm0, %v2928_v12, %v2930_v6  ;;  %v1803_v6 = vrot.slane %v5869_v2, 1 }
  0xd5   : > { %5417 = vmatprep.subr.bf16.mxu1 %v6156_v16  ;;  %v2920_v29 = vrot.slane %v5835_v38, 3  ;;  %v1224_v9 = vsel %vm1197_vm3, %v1221_v5, %v1223_v43  ;;  %v1226_v22 = vsel %vm1197_vm3, %v1223_v43, %v1225_v0  ;;  %v3485_v5 = vrot.slane %v5868_v14, 2 }
  0xd6   : > { %v3487_v43 = vrot.slane %v5870_v21, 2  ;;  %v1804_v8 = vsel %vm1777_vm2, %v1801_v45, %v1803_v6 }
  0xd7   : > { %v2921_v37 = vsel %vm335_vm0, %v2918_v24, %v2920_v29  ;;  %v2923_v52 = vsel %vm335_vm0, %v2920_v29, %v2922_v41  ;;  %v5857_v24 = vld [vmem:[%s6223_s30 + $0x9c] sm:$0xff]   ;;  %v5858_v29 = vld [vmem:[%s6223_s30 + $0x68] sm:$0xff]  }
  0xd8   : > { %5424 = vmatpush3.bf16.msra.mxu1 %v6156_v16  ;;  %v3468_v16 = vsel %vm1197_vm3, %v3466_v50, %v3467_v26  ;;  %v1231_v40 = vrot.slane %v5857_v24, 2  ;;  %v5862_v41 = vld [vmem:[%s6223_s30 + $0x78] sm:$0xff]  }
  0xd9   : > { %5418 = vmatprep.subr.bf16.mxu1 %v6157_v23 }
  0xda   : > { %5145 = vmatmul.mubr.msk.bf16.gmra.mrb[4].mxu1 %vm423_vm1, %v1206_v18  ;;  %5339 = vmatmul.mubr.msk.bf16.gmra.mrb[24].mxu0 %vm423_vm1, %v2915_v3  ;;  %v5854_v18 = vld [vmem:[%s6223_s30 + $0x58] sm:$0xff]   ;;  %v3469_v3 = vrot.slane %v5852_v10, 2  ;;  %v1234_v49 = vsel %vm1197_vm3, %v1231_v40, %v1233_v42  ;;  %v3488_v10 = vsel %vm1197_vm3, %v3485_v5, %v3487_v43 }
  0xdb   : > { %5148 = vmatprep.mubr.msk.bf16.mxu1 %vm423_vm1, %v1208_v19  ;;  %5342 = vmatprep.mubr.msk.bf16.mxu0 %vm423_vm1, %v2917_v17  ;;  %v1227_v19 = vrot.slane %v5853_v13, 2  ;;  %v3471_v20 = vrot.slane %v5854_v18, 2  ;;  %v5855_v17 = vld [vmem:[%s6223_s30 + $0x94] sm:$0xff]   ;;  %v5874_v13 = vld [vmem:[%s6223_s30 + $0xa8] sm:$0xff]  }
  0xdc   : > { %5425 = vmatpush3.bf16.msra.mxu1 %v6157_v23  ;;  %v3470_v38 = vsel %vm1197_vm3, %v3467_v26, %v3469_v3  ;;  %v5871_v26 = vld [vmem:[%s6223_s30 + $0x90] sm:$0xff]   ;;  %v3491_v45 = vrot.slane %v5874_v13, 2 }
  0xdd   : > { %5419 = vmatprep.subr.bf16.mxu1 %v6158_v34  ;;  %v1228_v23 = vsel %vm1197_vm3, %v1225_v0, %v1227_v19  ;;  %v3472_v27 = vsel %vm1197_vm3, %v3469_v3, %v3471_v20  ;;  %v5875_v3 = vld [vmem:[%s6223_s30 + $0xa0] sm:$0xff]  }
  0xe0   : > { %5426 = vmatpush3.bf16.msra.mxu1 %v6158_v34  ;;  %v1229_v34 = vrot.slane %v5855_v17, 2  ;;  %v5877_v17 = vld [vmem:[%s6223_s30 + $0xa8] sm:$0xff]  }
  0xe1   : > { %5420 = vmatprep.subr.bf16.mxu1 %v6159_v48 }
  0xe2   : > { %5149 = vmatmul.mubr.msk.bf16.gmra.mrb[8].mxu1 %vm423_vm1, %v1210_v30  ;;  %5343 = vmatmul.mubr.msk.bf16.gmra.mrb[28].mxu0 %vm423_vm1, %v2919_v31  ;;  %v3473_v30 = vrot.slane %v5856_v25, 2  ;;  %v3475_v31 = vrot.slane %v5858_v29, 2  ;;  %v1809_v25 = vrot.slane %v5875_v3, 1 }
  0xe3   : > { %5152 = vmatprep.mubr.msk.bf16.mxu1 %vm423_vm1, %v1212_v32  ;;  %5346 = vmatprep.mubr.msk.bf16.mxu0 %vm423_vm1, %v2921_v37  ;;  %v1230_v32 = vsel %vm1197_vm3, %v1227_v19, %v1229_v34  ;;  %v1232_v37 = vsel %vm1197_vm3, %v1229_v34, %v1231_v40 }
  0xe4   : > { %5427 = vmatpush3.bf16.msra.mxu1 %v6159_v48  ;;  %v3474_v35 = vsel %vm1197_vm3, %v3471_v20, %v3473_v30  ;;  %v5861_v48 = vld [vmem:[%s6223_s30 + $0xac] sm:$0xff]   ;;  %v3476_v51 = vsel %vm1197_vm3, %v3473_v30, %v3475_v31 }
  0xe5   : > { %5421 = vmatprep.subr.bf16.mxu1 %v6160_v46  ;;  %v5879_v30 = vld [vmem:[%s6223_s30 + $0xb0] sm:$0xff]  }
  0xe6   : > { %v1813_v39 = vrot.slane %v5879_v30, 1 }
  0xe8   : > { %5428 = vmatpush3.bf16.msra.mxu1 %v6160_v46  ;;  %v1235_v46 = vrot.slane %v5861_v48, 2 }
  0xe9   : > { %5422 = vmatprep.subr.bf16.mxu1 %v6161_v56 }
  0xea   : > { %5153 = vmatmul.mubr.msk.bf16.gmra.mrb[12].mxu1 %vm423_vm1, %v1214_v47  ;;  %5347 = vmatmul.mubr.msk.bf16.gmra.mrb[32].mxu0 %vm423_vm1, %v2923_v52  ;;  %v3479_v47 = vrot.slane %v5862_v41, 2  ;;  %v5863_v52 = vld [vmem:[%s6223_s30 + $0xb4] sm:$0xff]   ;;  %v1236_v53 = vsel %vm1197_vm3, %v1233_v42, %v1235_v46 }
  0xeb   : > { %5156 = vmatprep.mubr.msk.bf16.mxu1 %vm423_vm1, %v1216_v60  ;;  %5350 = vmatprep.mubr.msk.bf16.mxu0 %vm423_vm1, %v2925_v54  ;;  %v3478_v60 = vsel %vm1197_vm3, %v3475_v31, %v3477_v44  ;;  %v5865_v54 = vld [vmem:[%s6223_s30 + $0xbc] sm:$0xff]   ;;  %v1237_v58 = vrot.slane %v5863_v52, 2  ;;  %v5885_v52 = vld [vmem:[%s6223_s30 + $0xc8] sm:$0xff]  }
  0xec   : > { %5429 = vmatpush3.bf16.msra.mxu1 %v6161_v56  ;;  %v3480_v55 = vsel %vm1197_vm3, %v3477_v44, %v3479_v47  ;;  %v5866_v56 = vld [vmem:[%s6223_s30 + $0x88] sm:$0xff]   ;;  %v1239_v11 = vrot.slane %v5865_v54, 2  ;;  %v5883_v44 = vld [vmem:[%s6223_s30 + $0xc0] sm:$0xff]  }
  0xed   : > { %v3483_v12 = vrot.slane %v5866_v56, 2  ;;  %v1817_v62 = vrot.slane %v5883_v44, 1 }
  0xee   : > { %v1242_v50 = vsel %vm1197_vm3, %v1239_v11, %v1241_v28  ;;  %v5890_v28 = vld [vmem:[%s6223_s30 + $0xf0] ss:$0 sps:$4 sm:$0x33]  }
  0xf2   : > { %5157 = vmatmul.mubr.msk.bf16.gmra.mrb[16].mxu1 %vm423_vm1, %v1218_v61  ;;  %5351 = vmatmul.mubr.msk.bf16.gmra.mrb[36].mxu0 %vm423_vm1, %v2927_v15  ;;  %v1238_v61 = vsel %vm1197_vm3, %v1235_v46, %v1237_v58  ;;  %v3482_v15 = vsel %vm1197_vm3, %v3479_v47, %v3481_v59 }
  0xf3   : > { %5160 = vmatprep.mubr.msk.bf16.mxu1 %vm423_vm1, %v1220_v1  ;;  %5354 = vmatprep.mubr.msk.bf16.mxu0 %vm423_vm1, %v2929_v4  ;;  %v1240_v1 = vsel %vm1197_vm3, %v1237_v58, %v1239_v11  ;;  %v3484_v4 = vsel %vm1197_vm3, %v3481_v59, %v3483_v12  ;;  %v5887_v59 = vld [vmem:[%s6223_s30 + $0xd0] ss:$0 sps:$4 sm:$0x11]  }
  0xfa   : > { %5161 = vmatmul.mubr.msk.bf16.gmra.mrb[20].mxu1 %vm423_vm1, %v1222_v7  ;;  %5355 = vmatmul.mubr.msk.bf16.gmra.mrb[40].mxu0 %vm423_vm1, %v2931_v57  ;;  %v3486_v7 = vsel %vm1197_vm3, %v3483_v12, %v3485_v5  ;;  %v5872_v57 = vld [vmem:[%s6223_s30 + $0xa0] sm:$0xff]  }
  0xfb   : > { %5164 = vmatprep.mubr.msk.bf16.mxu1 %vm423_vm1, %v1224_v9  ;;  %5372 = vmatprep.mubr.msk.bf16.mxu0 %vm423_vm1, %v3468_v16  ;;  %v5873_v9 = vld [vmem:[%s6223_s30 + $0x98] sm:$0xff]   ;;  %v1805_v16 = vrot.slane %v5871_v26, 1  ;;  %v3489_v36 = vrot.slane %v5872_v57, 2 }
  0xfc   : > { %v1807_v18 = vrot.slane %v5873_v9, 1 }
  0xfd   : > { %v1806_v0 = vsel %vm1777_vm2, %v1803_v6, %v1805_v16  ;;  %v3490_v19 = vsel %vm1197_vm3, %v3487_v43, %v3489_v36  ;;  %v3509_v6 = vrot.slane %v5890_v28, 2 }
  0xfe   : > { %v1808_v20 = vsel %vm1777_vm2, %v1805_v16, %v1807_v18  ;;  %v1810_v34 = vsel %vm1777_vm2, %v1807_v18, %v1809_v25 }
 0x102   : > { %5165 = vmatmul.mubr.msk.bf16.gmra.mrb[24].mxu1 %vm423_vm1, %v1226_v22  ;;  %5373 = vmatmul.mubr.msk.bf16.vlgmr.msra.gmra.mrb[0].mxu0 %vm423_vm1, %v3470_v38  ;;  %v5876_v22 = vld [vmem:[%s6223_s30 + $0xb0] sm:$0xff]   ;;  %v3492_v38 = vsel %vm1197_vm3, %v3489_v36, %v3491_v45 }
 0x103   : > { %5168 = vmatprep.mubr.msk.bf16.mxu1 %vm423_vm1, %v1228_v23  ;;  %5376 = vmatprep.mubr.msk.bf16.mxu0 %vm423_vm1, %v3472_v27  ;;  %v5878_v23 = vld [vmem:[%s6223_s30 + $0xb8] sm:$0xff]   ;;  %v3493_v24 = vrot.slane %v5876_v22, 2  ;;  %v1811_v27 = vrot.slane %v5877_v17, 1 }
 0x104   : > { %v3495_v29 = vrot.slane %v5878_v23, 2 }
 0x105   : > { %v3494_v40 = vsel %vm1197_vm3, %v3491_v45, %v3493_v24  ;;  %v1812_v31 = vsel %vm1777_vm2, %v1809_v25, %v1811_v27  ;;  %v1814_v42 = vsel %vm1777_vm2, %v1811_v27, %v1813_v39 }
 0x10a   : > { %5169 = vmatmul.mubr.msk.bf16.gmra.mrb[28].mxu1 %vm423_vm1, %v1230_v32  ;;  %5377 = vmatmul.mubr.msk.bf16.gmra.mrb[4].mxu0 %vm423_vm1, %v3474_v35  ;;  %v5880_v32 = vld [vmem:[%s6223_s30 + $0xc0] sm:$0xff]   ;;  %v3496_v35 = vsel %vm1197_vm3, %v3493_v24, %v3495_v29 }
 0x10b   : > { %5172 = vmatprep.mubr.msk.bf16.mxu1 %vm423_vm1, %v1232_v37  ;;  %5380 = vmatprep.mubr.msk.bf16.mxu0 %vm423_vm1, %v3476_v51  ;;  %v5882_v37 = vld [vmem:[%s6223_s30 + $0xc8] sm:$0xff]   ;;  %v3497_v48 = vrot.slane %v5880_v32, 2  ;;  %v1815_v51 = vrot.slane %v5881_v33, 1 }
 0x10c   : > { %v3499_v41 = vrot.slane %v5882_v37, 2 }
 0x10d   : > { %v3498_v46 = vsel %vm1197_vm3, %v3495_v29, %v3497_v48  ;;  %v1816_v47 = vsel %vm1777_vm2, %v1813_v39, %v1815_v51  ;;  %v1818_v58 = vsel %vm1777_vm2, %v1815_v51, %v1817_v62 }
 0x112   : > { %5173 = vmatmul.mubr.msk.bf16.gmra.mrb[32].mxu1 %vm423_vm1, %v1234_v49  ;;  %5381 = vmatmul.mubr.msk.bf16.gmra.mrb[8].mxu0 %vm423_vm1, %v3478_v60  ;;  %v5884_v49 = vld [vmem:[%s6223_s30 + $0xd0] sm:$0xff]   ;;  %v3500_v60 = vsel %vm1197_vm3, %v3497_v48, %v3499_v41 }
 0x113   : > { %5176 = vmatprep.mubr.msk.bf16.mxu1 %vm423_vm1, %v1236_v53  ;;  %5384 = vmatprep.mubr.msk.bf16.mxu0 %vm423_vm1, %v3480_v55  ;;  %v5886_v53 = vld [vmem:[%s6223_s30 + $0xd8] sm:$0xff]   ;;  %v3501_v54 = vrot.slane %v5884_v49, 2  ;;  %v1819_v55 = vrot.slane %v5885_v52, 1 }
 0x114   : > { %v3503_v56 = vrot.slane %v5886_v53, 2 }
 0x115   : > { %v3502_v11 = vsel %vm1197_vm3, %v3499_v41, %v3501_v54  ;;  %v1820_v12 = vsel %vm1777_vm2, %v1817_v62, %v1819_v55 }
 0x116   : > { %v3504_v63 = vsel %vm1197_vm3, %v3501_v54, %v3503_v56 }
 0x11a   : > { %5177 = vmatmul.mubr.msk.bf16.gmra.mrb[36].mxu1 %vm423_vm1, %v1238_v61  ;;  %5385 = vmatmul.mubr.msk.bf16.gmra.mrb[12].mxu0 %vm423_vm1, %v3482_v15  ;;  %v5888_v61 = vld [vmem:[%s6223_s30 + $0xe0] sm:$0xff]   ;;  %v5889_v15 = vld [vmem:[%s6223_s30 + $0xe8] sm:$0xff]   ;;  %s5694_s30 = smul.u32 352, %s7217_s10 }
 0x11b   : > { %5180 = vmatprep.mubr.msk.bf16.mxu1 %vm423_vm1, %v1240_v1  ;;  %5388 = vmatprep.mubr.msk.bf16.mxu0 %vm423_vm1, %v3484_v4  ;;  %v1821_v1 = vrot.slane %v5887_v59, 1  ;;  %v3505_v14 = vrot.slane %v5888_v61, 2  ;;  %v3507_v2 = vrot.slane %v5889_v15, 2 }
 0x11c   : > { %s6935_s27 = scalar_lea.vmem %s7215_s2, %s5694_s30 }
 0x11d   : > { %v1822_v4 = vsel %vm1777_vm2, %v1819_v55, %v1821_v1  ;;  %v3506_v21 = vsel %vm1197_vm3, %v3503_v56, %v3505_v14  ;;  %v3508_v5 = vsel %vm1197_vm3, %v3505_v14, %v3507_v2  ;;  %v3510_v43 = vsel %vm1197_vm3, %v3507_v2, %v3509_v6 }
 0x11e   : > { %v3872_v2 = vlaneseq }
 0x122   : > { %5181 = vmatmul.mubr.msk.bf16.gmra.mrb[40].mxu1 %vm423_vm1, %v1242_v50  ;;  %5389 = vmatmul.mubr.msk.bf16.gmra.mrb[16].mxu0 %vm423_vm1, %v3486_v7 }
 0x123   : > { %5222 = vmatprep.mubr.msk.bf16.mxu1 %vm423_vm1, %v1804_v8  ;;  %5392 = vmatprep.mubr.msk.bf16.mxu0 %vm423_vm1, %v3488_v10 }
 0x12a   : > { %5223 = vmatmul.mubr.msk.bf16.vlgmr.msra.gmra.mrb[24].mxu1 %vm423_vm1, %v1806_v0  ;;  %5393 = vmatmul.mubr.msk.bf16.gmra.mrb[20].mxu0 %vm423_vm1, %v3490_v19 }
 0x12b   : > { %5226 = vmatprep.mubr.msk.bf16.mxu1 %vm423_vm1, %v1808_v20  ;;  %5396 = vmatprep.mubr.msk.bf16.mxu0 %vm423_vm1, %v3492_v38 }
 0x132   : > { %5227 = vmatmul.mubr.msk.bf16.gmra.mrb[28].mxu1 %vm423_vm1, %v1810_v34  ;;  %5397 = vmatmul.mubr.msk.bf16.gmra.mrb[24].mxu0 %vm423_vm1, %v3494_v40 }
 0x133   : > { %5230 = vmatprep.mubr.msk.bf16.mxu1 %vm423_vm1, %v1812_v31  ;;  %5400 = vmatprep.mubr.msk.bf16.mxu0 %vm423_vm1, %v3496_v35 }
 0x13a   : > { %5231 = vmatmul.mubr.msk.bf16.gmra.mrb[32].mxu1 %vm423_vm1, %v1814_v42  ;;  %5401 = vmatmul.mubr.msk.bf16.gmra.mrb[28].mxu0 %vm423_vm1, %v3498_v46 }
 0x13b   : > { %5234 = vmatprep.mubr.msk.bf16.mxu1 %vm423_vm1, %v1816_v47  ;;  %5404 = vmatprep.mubr.msk.bf16.mxu0 %vm423_vm1, %v3500_v60 }
 0x142   : > { %5235 = vmatmul.mubr.msk.bf16.gmra.mrb[36].mxu1 %vm423_vm1, %v1818_v58  ;;  %5405 = vmatmul.mubr.msk.bf16.gmra.mrb[32].mxu0 %vm423_vm1, %v3502_v11 }
 0x143   : > { %5238 = vmatprep.mubr.msk.bf16.mxu1 %vm423_vm1, %v1820_v12  ;;  %5408 = vmatprep.mubr.msk.bf16.mxu0 %vm423_vm1, %v3504_v63 }
 0x14a   : > { %5239 = vmatmul.mubr.msk.bf16.gmra.mrb[40].mxu1 %vm423_vm1, %v1822_v4  ;;  %5409 = vmatmul.mubr.msk.bf16.gmra.mrb[36].mxu0 %vm423_vm1, %v3506_v21 }
 0x14b   : > { %5412 = vmatprep.mubr.msk.bf16.mxu0 %vm423_vm1, %v3508_v5 }
 0x152   : > { %5413 = vmatmul.mubr.msk.bf16.gmra.mrb[40].mxu0 %vm423_vm1, %v3510_v43 }
 0x1a5   : > { %v5142_v50 = vpop.f32.mrb[0].mxu1 }
 0x1a6   : > { %v1385_v26 = vpop.f32.mrb[1].mxu1 }
 0x1a7   : > { %v5143_v7 = vpop.f32.mrb[2].mxu1 }
 0x1a8   : > { %v1388_v8 = vpop.f32.mrb[3].mxu1 }
 0x1ad   : > { %v5146_v57 = vpop.f32.mrb[4].mxu1 }
 0x1ae   : > { %v1401_v9 = vpop.f32.mrb[5].mxu1 }
 0x1af   : > { %v5147_v10 = vpop.f32.mrb[6].mxu1 }
 0x1b0   : > { %v1404_v13 = vpop.f32.mrb[7].mxu1 }
 0x1b5   : > { %v5150_v16 = vpop.f32.mrb[8].mxu1 }
 0x1b6   : > { %v6876_v36 = vpop.f32.mrb[9].mxu1 }
 0x1b7   : > { %v6878_v18 = vpop.f32.mrb[10].mxu1 }
 0x1b8   : > { %v6880_v45 = vpop.f32.mrb[11].mxu1 }
 0x1bd   : > { %v6882_v0 = vpop.f32.mrb[12].mxu1 }
 0x1be   : > { %v6884_v3 = vpop.f32.mrb[13].mxu1 }
 0x1bf   : > { %v6886_v19 = vpop.f32.mrb[14].mxu1 }
 0x1c0   : > { %v6888_v20 = vpop.f32.mrb[15].mxu1 }
 0x1c5   : > { %v6890_v22 = vpop.f32.mrb[16].mxu1 }
 0x1c6   : > { %v6892_v17 = vpop.f32.mrb[17].mxu1 }
 0x1c7   : > { %v6894_v38 = vpop.f32.mrb[18].mxu1 }
 0x1c8   : > { %v6896_v23 = vpop.f32.mrb[19].mxu1 }
 0x1cd   : > { %v6898_v25 = vpop.f32.mrb[20].mxu1 }
 0x1ce   : > { %v6900_v24 = vpop.f32.mrb[21].mxu1 }
 0x1cf   : > { %v6902_v27 = vpop.f32.mrb[22].mxu1 }
 0x1d0   : > { %v6904_v29 = vpop.f32.mrb[23].mxu1 }
 0x1d5   : > { %v5374_v34 = vpop.f32.mrb[0].mxu0 }
 0x1d6   : > { %v5430_v30 = vadd.f32 %v5374_v34, %v5142_v50  ;;  %v3653_v40 = vpop.f32.mrb[1].mxu0 }
 0x1d7   : > { %v5431_v31 = vadd.f32 %v3653_v40, %v1385_v26  ;;  %v5375_v32 = vpop.f32.mrb[2].mxu0 }
 0x1d8   : > { %v4762_v33 = vmul.f32 -1.442695, %v5430_v30  ;;  %v5432_v35 = vadd.f32 %v5375_v32, %v5143_v7  ;;  %v3656_v37 = vpop.f32.mrb[3].mxu0 }
 0x1d9   : > { %v4760_v39 = vmul.f32 -1.442695, %v5431_v31  ;;  %v5433_v48 = vadd.f32 %v3656_v37, %v1388_v8 }
 0x1da   : > { %5891 = vpow2.f32 %v4762_v33  ;;  %v4763_v51 = vmul.f32 -1.442695, %v5432_v35 }
 0x1db   : > { %5893 = vpow2.f32 %v4760_v39  ;;  %v4761_v41 = vmul.f32 -1.442695, %v5433_v48 }
 0x1dc   : > { %5895 = vpow2.f32 %v4763_v51 }
 0x1dd   : > { %5897 = vtanh.f32 %v5430_v30  ;;  %v5378_v42 = vpop.f32.mrb[4].mxu0 }
 0x1de   : > { %5899 = vpow2.f32 %v4761_v41  ;;  %v5434_v44 = vadd.f32 %v5378_v42, %v5146_v57  ;;  %v3669_v46 = vpop.f32.mrb[5].mxu0 }
 0x1df   : > { %5901 = vtanh.f32 %v5431_v31  ;;  %v5435_v47 = vadd.f32 %v3669_v46, %v1401_v9  ;;  %v5379_v49 = vpop.f32.mrb[6].mxu0 }
 0x1e0   : > { %5903 = vtanh.f32 %v5432_v35  ;;  %v4766_v52 = vmul.f32 -1.442695, %v5434_v44  ;;  %v5436_v60 = vadd.f32 %v5379_v49, %v5147_v10  ;;  %v3672_v53 = vpop.f32.mrb[7].mxu0 }
 0x1e1   : > { %5905 = vtanh.f32 %v5433_v48  ;;  %v4764_v62 = vmul.f32 -1.442695, %v5435_v47  ;;  %v6906_v54 = vadd.f32 %v3672_v53, %v1404_v13  ;;  %v6922_v13 = vand.u32 127, %v3872_v2 }
 0x1e2   : > { %5907 = vpow2.f32 %v4766_v52  ;;  %v4767_v55 = vmul.f32 -1.442695, %v5436_v60 }
 0x1e3   : > { %5909 = vpow2.f32 %v4764_v62  ;;  %v4765_v56 = vmul.f32 -1.442695, %v6906_v54  ;;  %vm3874_vm4 = vcmp.lt.s32.totalorder %v6922_v13, 1 }
 0x1e4   : > { %v5892_v58 = vpop.eup %5891  ;;  %5911 = vpow2.f32 %v4767_v55 }
 0x1e5   : > { %v5894_v59 = vpop.eup %5893  ;;  %v4009_v11 = vadd.f32 1.0, %v5892_v58  ;;  %5913 = vtanh.f32 %v5434_v44  ;;  %v5382_v12 = vpop.f32.mrb[8].mxu0 }
 0x1e6   : > { %v5896_v61 = vpop.eup %5895  ;;  %v4007_v63 = vadd.f32 1.0, %v5894_v59  ;;  %5915 = vpow2.f32 %v4765_v56  ;;  %v6909_v15 = vadd.f32 %v5382_v12, %v5150_v16  ;;  %v3685_v1 = vpop.f32.mrb[9].mxu0 }
 0x1e7   : > { %v5898_v14 = vpop.eup %5897  ;;  %5917 = vrcp.f32 %v4009_v11  ;;  %v4010_v4 = vadd.f32 1.0, %v5896_v61  ;;  %v6912_v21 = vadd.f32 %v3685_v1, %v6876_v36  ;;  %v5383_v28 = vpop.f32.mrb[10].mxu0 }
 0x1e8   : > { %v5900_v5 = vpop.eup %5899  ;;  %5919 = vrcp.f32 %v4007_v63  ;;  %v4770_v6 = vmul.f32 -1.442695, %v6909_v15  ;;  %v6916_v43 = vadd.f32 %v5383_v28, %v6878_v18  ;;  %v3688_v50 = vpop.f32.mrb[11].mxu0 }
 0x1e9   : > { %v5902_v26 = vpop.eup %5901  ;;  %5921 = vrcp.f32 %v4010_v4  ;;  %v4008_v7 = vadd.f32 1.0, %v5900_v5  ;;  %v6919_v8 = vadd.f32 %v3688_v50, %v6880_v45  ;;  %v4768_v9 = vmul.f32 -1.442695, %v6912_v21 }
 0x1ea   : > { %v5904_v57 = vpop.eup %5903  ;;  %5923 = vtanh.f32 %v5435_v47 }
 0x1eb   : > { %v5906_v10 = vpop.eup %5905  ;;  %5925 = vrcp.f32 %v4008_v7  ;;  %v4769_v47 = vmul.f32 -1.442695, %v6919_v8 }
 0x1ec   : > { %v5908_v16 = vpop.eup %5907  ;;  %5927 = vpow2.f32 %v4770_v6 }
 0x1ed   : > { %v5910_v36 = vpop.eup %5909  ;;  %v4013_v18 = vadd.f32 1.0, %v5908_v16  ;;  %5929 = vtanh.f32 %v5436_v60  ;;  %v5386_v34 = vpop.f32.mrb[12].mxu0 }
 0x1ee   : > { %v5912_v30 = vpop.eup %5911  ;;  %v4011_v40 = vadd.f32 1.0, %v5910_v36  ;;  %5931 = vpow2.f32 %v4768_v9  ;;  %v6926_v45 = vadd.f32 %v5386_v34, %v6882_v0  ;;  %v3701_v31 = vpop.f32.mrb[13].mxu0  ;;  %v4771_v0 = vmul.f32 -1.442695, %v6916_v43 }
 0x1ef   : > { %v5914_v32 = vpop.eup %5913  ;;  %5933 = vrcp.f32 %v4013_v18  ;;  %v4014_v33 = vadd.f32 1.0, %v5912_v30  ;;  %v6930_v35 = vadd.f32 %v3701_v31, %v6884_v3  ;;  %v5387_v37 = vpop.f32.mrb[14].mxu0 }
 0x1f0   : > { %v5916_v39 = vpop.eup %5915  ;;  %5935 = vrcp.f32 %v4011_v40  ;;  %v6939_v48 = vadd.f32 %v5387_v37, %v6886_v19  ;;  %v3704_v51 = vpop.f32.mrb[15].mxu0  ;;  %v4774_v60 = vmul.f32 -1.442695, %v6926_v45 }
 0x1f1   : > { %v5918_v41 = vpop.eup %5917  ;;  %5937 = vrcp.f32 %v4014_v33  ;;  %v4012_v3 = vadd.f32 1.0, %v5916_v39  ;;  %v6942_v42 = vadd.f32 %v3704_v51, %v6888_v20  ;;  %v4772_v1 = vmul.f32 -1.442695, %v6930_v35 }
 0x1f2   : > { %v5920_v44 = vpop.eup %5919  ;;  %v4185_v46 = vsel %vm3874_vm4, %v5918_v41, %v5898_v14  ;;  %5939 = vtanh.f32 %v6906_v54  ;;  %v4775_v5 = vmul.f32 -1.442695, %v6939_v48 }
 0x1f3   : > { %v5922_v49 = vpop.eup %5921  ;;  %4229 = vst [vmem:[%s6935_s27 + $0x10] sm:$0xff] %v4185_v46  ;;  %v4183_v19 = vsel %vm3874_vm4, %v5920_v44, %v5902_v26  ;;  %5941 = vrcp.f32 %v4012_v3  ;;  %v4773_v26 = vmul.f32 -1.442695, %v6942_v42 }
 0x1f4   : > { %v5924_v52 = vpop.eup %5923  ;;  %4227 = vst [vmem:[%s6935_s27] sm:$0xff] %v4183_v19  ;;  %v4186_v20 = vsel %vm3874_vm4, %v5922_v49, %v5904_v57  ;;  %5943 = vpow2.f32 %v4771_v0 }
 0x1f5   : > { %v5926_v53 = vpop.eup %5925  ;;  %4230 = vst [vmem:[%s6935_s27 + $0x18] sm:$0xff] %v4186_v20  ;;  %v5390_v62 = vpop.f32.mrb[16].mxu0  ;;  %5945 = vpow2.f32 %v4769_v47 }
 0x1f6   : > { %v5928_v54 = vpop.eup %5927  ;;  %v4184_v55 = vsel %vm3874_vm4, %v5926_v53, %v5906_v10  ;;  %v6959_v56 = vadd.f32 %v5390_v62, %v6890_v22  ;;  %v3717_v58 = vpop.f32.mrb[17].mxu0  ;;  %5947 = vtanh.f32 %v6909_v15 }
 0x1f7   : > { %v5930_v59 = vpop.eup %5929  ;;  %4228 = vst [vmem:[%s6935_s27 + $0x8] sm:$0xff] %v4184_v55  ;;  %v4017_v11 = vadd.f32 1.0, %v5928_v54  ;;  %v6964_v12 = vadd.f32 %v3717_v58, %v6892_v17  ;;  %v5391_v61 = vpop.f32.mrb[18].mxu0  ;;  %5949 = vpow2.f32 %v4774_v60 }
 0x1f8   : > { %v5932_v63 = vpop.eup %5931  ;;  %v6968_v14 = vadd.f32 %v5391_v61, %v6894_v38  ;;  %v3720_v22 = vpop.f32.mrb[19].mxu0  ;;  %v4778_v33 = vmul.f32 -1.442695, %v6959_v56 }
 0x1f9   : > { %v5934_v2 = vpop.eup %5933  ;;  %5951 = vrcp.f32 %v4017_v11  ;;  %v4015_v4 = vadd.f32 1.0, %v5932_v63  ;;  %v6971_v28 = vadd.f32 %v3720_v22, %v6896_v23  ;;  %v4776_v3 = vmul.f32 -1.442695, %v6964_v12 }
 0x1fa   : > { %v5936_v17 = vpop.eup %5935  ;;  %v4189_v15 = vsel %vm3874_vm4, %v5934_v2, %v5914_v32  ;;  %5953 = vtanh.f32 %v6912_v21 }
 0x1fb   : > { %v5938_v6 = vpop.eup %5937  ;;  %4233 = vst [vmem:[%s6935_s27 + $0x30] sm:$0xff] %v4189_v15  ;;  %v4187_v38 = vsel %vm3874_vm4, %v5936_v17, %v5924_v52  ;;  %5955 = vrcp.f32 %v4015_v4  ;;  %v4779_v52 = vmul.f32 -1.442695, %v6968_v14  ;;  %v4777_v4 = vmul.f32 -1.442695, %v6971_v28 }
 0x1fc   : > { %v5940_v50 = vpop.eup %5939  ;;  %4231 = vst [vmem:[%s6935_s27 + $0x20] sm:$0xff] %v4187_v38  ;;  %v4190_v23 = vsel %vm3874_vm4, %v5938_v6, %v5930_v59  ;;  %5957 = vpow2.f32 %v4772_v1 }
 0x1fd   : > { %v5224_v7 = vpop.f32.mrb[24].mxu1  ;;  %v5942_v57 = vpop.eup %5941  ;;  %4234 = vst [vmem:[%s6935_s27 + $0x38] sm:$0xff] %v4190_v23  ;;  %5959 = vtanh.f32 %v6916_v43 }
 0x1fe   : > { %v5394_v21 = vpop.f32.mrb[20].mxu0  ;;  %v2061_v9 = vpop.f32.mrb[25].mxu1  ;;  %v4188_v16 = vsel %vm3874_vm4, %v5942_v57, %v5940_v50  ;;  %5961 = vpow2.f32 %v4775_v5 }
 0x1ff   : > { %v5944_v10 = vpop.eup %5943  ;;  %v6989_v36 = vadd.f32 %v5394_v21, %v6898_v25  ;;  %v3733_v18 = vpop.f32.mrb[21].mxu0  ;;  %4232 = vst [vmem:[%s6935_s27 + $0x28] sm:$0xff] %v4188_v16  ;;  %5963 = vtanh.f32 %v6919_v8 }
 0x200   : > { %v5225_v34 = vpop.f32.mrb[26].mxu1  ;;  %v4018_v30 = vadd.f32 1.0, %v5944_v10  ;;  %v6994_v40 = vadd.f32 %v3733_v18, %v6900_v24  ;;  %v5395_v43 = vpop.f32.mrb[22].mxu0  ;;  %5965 = vpow2.f32 %v4773_v26 }
 0x201   : > { %v2064_v31 = vpop.f32.mrb[27].mxu1  ;;  %v5946_v32 = vpop.eup %5945  ;;  %v6998_v37 = vadd.f32 %v5395_v43, %v6902_v27  ;;  %v4782_v6 = vmul.f32 -1.442695, %v6989_v36 }
 0x202   : > { %v3736_v25 = vpop.f32.mrb[23].mxu0  ;;  %v5948_v39 = vpop.eup %5947  ;;  %5967 = vrcp.f32 %v4018_v30  ;;  %v4016_v0 = vadd.f32 1.0, %v5946_v32  ;;  %v4780_v18 = vmul.f32 -1.442695, %v6994_v40 }
 0x203   : > { %v7001_v51 = vadd.f32 %v3736_v25, %v6904_v29  ;;  %v5950_v8 = vpop.eup %5949  ;;  %5969 = vtanh.f32 %v6926_v45 }
 0x204   : > { %v5952_v24 = vpop.eup %5951  ;;  %5971 = vrcp.f32 %v4016_v0  ;;  %v4021_v41 = vadd.f32 1.0, %v5950_v8 }
 0x205   : > { %v5954_v44 = vpop.eup %5953  ;;  %v4193_v27 = vsel %vm3874_vm4, %v5952_v24, %v5948_v39  ;;  %5973 = vpow2.f32 %v4778_v33  ;;  %v5228_v46 = vpop.f32.mrb[28].mxu1  ;;  %v4783_v24 = vmul.f32 -1.442695, %v6998_v37 }
 0x206   : > { %v5956_v47 = vpop.eup %5955  ;;  %4237 = vst [vmem:[%s6935_s27 + $0x50] sm:$0xff] %v4193_v27  ;;  %5975 = vrcp.f32 %v4021_v41  ;;  %v5398_v29 = vpop.f32.mrb[24].mxu0 }
 0x207   : > { %v2077_v49 = vpop.f32.mrb[29].mxu1  ;;  %v5958_v19 = vpop.eup %5957  ;;  %v4191_v45 = vsel %vm3874_vm4, %v5956_v47, %v5954_v44  ;;  %5977 = vtanh.f32 %v6930_v35  ;;  %v7012_v20 = vadd.f32 %v5398_v29, %v5224_v7  ;;  %v4781_v29 = vmul.f32 -1.442695, %v7001_v51 }
 0x208   : > { %v3749_v60 = vpop.f32.mrb[25].mxu0  ;;  %v5229_v53 = vpop.f32.mrb[30].mxu1  ;;  %4235 = vst [vmem:[%s6935_s27 + $0x40] sm:$0xff] %v4191_v45  ;;  %v4019_v54 = vadd.f32 1.0, %v5958_v19  ;;  %5979 = vpow2.f32 %v4776_v3 }
 0x209   : > { %v5960_v62 = vpop.eup %5959  ;;  %v7015_v55 = vadd.f32 %v3749_v60, %v2061_v9  ;;  %v5399_v58 = vpop.f32.mrb[26].mxu0  ;;  %5981 = vtanh.f32 %v6939_v48 }
 0x20a   : > { %v2080_v59 = vpop.f32.mrb[31].mxu1  ;;  %v5962_v11 = vpop.eup %5961  ;;  %v7018_v61 = vadd.f32 %v5399_v58, %v5225_v34  ;;  %5983 = vrcp.f32 %v4019_v54 }
 0x20b   : > { %v3752_v35 = vpop.f32.mrb[27].mxu0  ;;  %v5964_v63 = vpop.eup %5963  ;;  %v4022_v1 = vadd.f32 1.0, %v5962_v11  ;;  %5985 = vpow2.f32 %v4779_v52 }
 0x20c   : > { %v7020_v22 = vadd.f32 %v3752_v35, %v2064_v31  ;;  %v5966_v2 = vpop.eup %5965  ;;  %v4786_v35 = vmul.f32 -1.442695, %v7012_v20 }
 0x20d   : > { %v5968_v17 = vpop.eup %5967  ;;  %5987 = vrcp.f32 %v4022_v1  ;;  %v4020_v15 = vadd.f32 1.0, %v5966_v2  ;;  %v5232_v38 = vpop.f32.mrb[32].mxu1 }
 0x20e   : > { %v5970_v5 = vpop.eup %5969  ;;  %v4194_v48 = vsel %vm3874_vm4, %v5968_v17, %v5960_v62  ;;  %5989 = vtanh.f32 %v6942_v42  ;;  %v5402_v23 = vpop.f32.mrb[28].mxu0 }
 0x20f   : > { %v5972_v50 = vpop.eup %5971  ;;  %4238 = vst [vmem:[%s6935_s27 + $0x58] sm:$0xff] %v4194_v48  ;;  %5991 = vrcp.f32 %v4020_v15  ;;  %v2093_v26 = vpop.f32.mrb[33].mxu1  ;;  %v7030_v21 = vadd.f32 %v5402_v23, %v5228_v46 }
 0x210   : > { %v5974_v7 = vpop.eup %5973  ;;  %v4192_v57 = vsel %vm3874_vm4, %v5972_v50, %v5964_v63  ;;  %5993 = vpow2.f32 %v4777_v4  ;;  %v3765_v9 = vpop.f32.mrb[29].mxu0 }
 0x211   : > { %v5233_v10 = vpop.f32.mrb[34].mxu1  ;;  %v5976_v16 = vpop.eup %5975  ;;  %4236 = vst [vmem:[%s6935_s27 + $0x48] sm:$0xff] %v4192_v57  ;;  %v4025_v42 = vadd.f32 1.0, %v5974_v7  ;;  %5995 = vtanh.f32 %v6959_v56  ;;  %v7035_v34 = vadd.f32 %v3765_v9, %v2077_v49 }
 0x212   : > { %v5403_v30 = vpop.f32.mrb[30].mxu0  ;;  %v2096_v43 = vpop.f32.mrb[35].mxu1  ;;  %v4197_v32 = vsel %vm3874_vm4, %v5976_v16, %v5970_v5  ;;  %5997 = vpow2.f32 %v4782_v6 }
 0x213   : > { %v5978_v31 = vpop.eup %5977  ;;  %v7039_v33 = vadd.f32 %v5403_v30, %v5229_v53  ;;  %v3768_v25 = vpop.f32.mrb[31].mxu0  ;;  %4241 = vst [vmem:[%s6935_s27 + $0x70] sm:$0xff] %v4197_v32  ;;  %5999 = vrcp.f32 %v4025_v42 }
 0x214   : > { %v5980_v39 = vpop.eup %5979  ;;  %v7042_v0 = vadd.f32 %v3768_v25, %v2080_v59  ;;  %6001 = vtanh.f32 %v6964_v12 }
 0x215   : > { %v5982_v56 = vpop.eup %5981  ;;  %v4023_v8 = vadd.f32 1.0, %v5980_v39  ;;  %6003 = vpow2.f32 %v4780_v18  ;;  %v5236_v27 = vpop.f32.mrb[36].mxu1 }
 0x216   : > { %v5984_v41 = vpop.eup %5983  ;;  %v5406_v49 = vpop.f32.mrb[32].mxu0 }
 0x217   : > { %v5986_v3 = vpop.eup %5985  ;;  %v4195_v44 = vsel %vm3874_vm4, %v5984_v41, %v5978_v31  ;;  %6005 = vrcp.f32 %v4023_v8  ;;  %v2109_v12 = vpop.f32.mrb[37].mxu1  ;;  %v7053_v52 = vadd.f32 %v5406_v49, %v5232_v38 }
 0x218   : > { %v5988_v46 = vpop.eup %5987  ;;  %4239 = vst [vmem:[%s6935_s27 + $0x60] sm:$0xff] %v4195_v44  ;;  %v4026_v47 = vadd.f32 1.0, %v5986_v3  ;;  %6007 = vtanh.f32 %v6968_v14  ;;  %v3781_v60 = vpop.f32.mrb[33].mxu0 }
 0x219   : > { %v5990_v19 = vpop.eup %5989  ;;  %v4198_v45 = vsel %vm3874_vm4, %v5988_v46, %v5982_v56  ;;  %6009 = vpow2.f32 %v4783_v24  ;;  %v5237_v53 = vpop.f32.mrb[38].mxu1  ;;  %v7056_v54 = vadd.f32 %v3781_v60, %v2093_v26  ;;  %v4785_v24 = vmul.f32 -1.442695, %v7020_v22 }
 0x21a   : > { %v5992_v62 = vpop.eup %5991  ;;  %4242 = vst [vmem:[%s6935_s27 + $0x78] sm:$0xff] %v4198_v45  ;;  %6011 = vrcp.f32 %v4026_v47  ;;  %v5407_v14 = vpop.f32.mrb[34].mxu0 }
 0x21b   : > { %v2112_v58 = vpop.f32.mrb[39].mxu1  ;;  %v5994_v59 = vpop.eup %5993  ;;  %v4196_v11 = vsel %vm3874_vm4, %v5992_v62, %v5990_v19  ;;  %6013 = vtanh.f32 %v6971_v28  ;;  %v7062_v63 = vadd.f32 %v5407_v14, %v5233_v10  ;;  %v4784_v28 = vmul.f32 -1.442695, %v7015_v55 }
 0x21c   : > { %v3784_v1 = vpop.f32.mrb[35].mxu0  ;;  %v5996_v2 = vpop.eup %5995  ;;  %4240 = vst [vmem:[%s6935_s27 + $0x68] sm:$0xff] %v4196_v11  ;;  %v4024_v4 = vadd.f32 1.0, %v5994_v59  ;;  %6015 = vpow2.f32 %v4781_v29  ;;  %v4790_v29 = vmul.f32 -1.442695, %v7030_v21 }
 0x21d   : > { %v7065_v17 = vadd.f32 %v3784_v1, %v2096_v43  ;;  %v5998_v15 = vpop.eup %5997  ;;  %6017 = vtanh.f32 %v6989_v36  ;;  %v5240_v50 = vpop.f32.mrb[40].mxu1  ;;  %v4787_v36 = vmul.f32 -1.442695, %v7018_v61 }
 0x21e   : > { %v6000_v5 = vpop.eup %5999  ;;  %6019 = vrcp.f32 %v4024_v4  ;;  %v4029_v48 = vadd.f32 1.0, %v5998_v15  ;;  %v5410_v26 = vpop.f32.mrb[36].mxu0 }
 0x21f   : > { %v6002_v6 = vpop.eup %6001  ;;  %v4201_v38 = vsel %vm3874_vm4, %v6000_v5, %v5996_v2  ;;  %6021 = vpow2.f32 %v4786_v35  ;;  %v2125_v7 = vpop.f32.mrb[41].mxu1  ;;  %v7074_v10 = vadd.f32 %v5410_v26, %v5236_v27  ;;  %v4791_v5 = vmul.f32 -1.442695, %v7039_v33 }
 0x220   : > { %v6004_v23 = vpop.eup %6003  ;;  %4245 = vst [vmem:[%s6935_s27 + $0x90] sm:$0xff] %v4201_v38  ;;  %6023 = vrcp.f32 %v4029_v48  ;;  %v3797_v16 = vpop.f32.mrb[37].mxu0 }
 0x221   : > { %v6006_v57 = vpop.eup %6005  ;;  %v4027_v9 = vadd.f32 1.0, %v6004_v23  ;;  %6025 = vtanh.f32 %v6994_v40  ;;  %v5241_v42 = vpop.f32.mrb[42].mxu1  ;;  %v7078_v43 = vadd.f32 %v3797_v16, %v2109_v12  ;;  %v4789_v23 = vmul.f32 -1.442695, %v7042_v0 }
 0x222   : > { %v6008_v18 = vpop.eup %6007  ;;  %v4199_v30 = vsel %vm3874_vm4, %v6006_v57, %v6002_v6  ;;  %6027 = vpow2.f32 %v4784_v28  ;;  %v5411_v31 = vpop.f32.mrb[38].mxu0 }
 0x223   : > { %v2128_v32 = vpop.f32.mrb[43].mxu1  ;;  %v6010_v25 = vpop.eup %6009  ;;  %4243 = vst [vmem:[%s6935_s27 + $0x80] sm:$0xff] %v4199_v30  ;;  %6029 = vrcp.f32 %v4027_v9  ;;  %v7081_v40 = vadd.f32 %v5411_v31, %v5237_v53  ;;  %v4792_v31 = vmul.f32 -1.442695, %v7056_v54 }
 0x224   : > { %v3800_v39 = vpop.f32.mrb[39].mxu0  ;;  %v6012_v56 = vpop.eup %6011  ;;  %v4030_v8 = vadd.f32 1.0, %v6010_v25  ;;  %6031 = vtanh.f32 %v6998_v37 }
 0x225   : > { %v7085_v41 = vadd.f32 %v3800_v39, %v2112_v58  ;;  %v6014_v3 = vpop.eup %6013  ;;  %v4202_v44 = vsel %vm3874_vm4, %v6012_v56, %v6008_v18  ;;  %6033 = vpow2.f32 %v4787_v36  ;;  %v5414_v49 = vpop.f32.mrb[40].mxu0  ;;  %v4794_v36 = vmul.f32 -1.442695, %v7053_v52 }
 0x226   : > { %v6016_v27 = vpop.eup %6015  ;;  %4246 = vst [vmem:[%s6935_s27 + $0x98] sm:$0xff] %v4202_v44  ;;  %6035 = vrcp.f32 %v4030_v8  ;;  %v7094_v45 = vadd.f32 %v5414_v49, %v5240_v50  ;;  %v3813_v60 = vpop.f32.mrb[41].mxu0  ;;  %v4795_v8 = vmul.f32 -1.442695, %v7062_v63 }
 0x227   : > { %v6018_v46 = vpop.eup %6017  ;;  %v4028_v47 = vadd.f32 1.0, %v6016_v27  ;;  %6037 = vtanh.f32 %v7001_v51  ;;  %v4788_v51 = vmul.f32 -1.442695, %v7035_v34  ;;  %v7099_v14 = vadd.f32 %v3813_v60, %v2125_v7  ;;  %v5415_v58 = vpop.f32.mrb[42].mxu0 }
 0x228   : > { %v6020_v37 = vpop.eup %6019  ;;  %6039 = vpow2.f32 %v4785_v24  ;;  %v7103_v35 = vadd.f32 %v5415_v58, %v5241_v42  ;;  %v3816_v1 = vpop.f32.mrb[43].mxu0 }
 0x229   : > { %v6022_v12 = vpop.eup %6021  ;;  %v4200_v19 = vsel %vm3874_vm4, %v6020_v37, %v6014_v3  ;;  %6041 = vrcp.f32 %v4028_v47  ;;  %v7106_v4 = vadd.f32 %v3816_v1, %v2128_v32 }
 0x22a   : > { %v6024_v53 = vpop.eup %6023  ;;  %4244 = vst [vmem:[%s6935_s27 + $0x88] sm:$0xff] %v4200_v19  ;;  %v4033_v62 = vadd.f32 1.0, %v6022_v12  ;;  %6043 = vtanh.f32 %v7012_v20  ;;  %v4798_v12 = vmul.f32 -1.442695, %v7074_v10 }
 0x22b   : > { %v6026_v59 = vpop.eup %6025  ;;  %v4205_v11 = vsel %vm3874_vm4, %v6024_v53, %v6018_v46  ;;  %6045 = vpow2.f32 %v4790_v29  ;;  %v4793_v46 = vmul.f32 -1.442695, %v7065_v17 }
 0x22c   : > { %v6028_v2 = vpop.eup %6027  ;;  %4249 = vst [vmem:[%s6935_s27 + $0xb0] sm:$0xff] %v4205_v11  ;;  %6047 = vrcp.f32 %v4033_v62 }
 0x22d   : > { %v6030_v20 = vpop.eup %6029  ;;  %v4031_v15 = vadd.f32 1.0, %v6028_v2  ;;  %6049 = vtanh.f32 %v7015_v55  ;;  %v4799_v2 = vmul.f32 -1.442695, %v7081_v40 }
 0x22e   : > { %v6032_v48 = vpop.eup %6031  ;;  %v4203_v28 = vsel %vm3874_vm4, %v6030_v20, %v6026_v59  ;;  %6051 = vpow2.f32 %v4788_v51  ;;  %v4796_v51 = vmul.f32 -1.442695, %v7078_v43 }
 0x22f   : > { %v6034_v6 = vpop.eup %6033  ;;  %4247 = vst [vmem:[%s6935_s27 + $0xa0] sm:$0xff] %v4203_v28  ;;  %6053 = vrcp.f32 %v4031_v15  ;;  %v4797_v28 = vmul.f32 -1.442695, %v7085_v41 }
 0x230   : > { %v6036_v38 = vpop.eup %6035  ;;  %v4034_v50 = vadd.f32 1.0, %v6034_v6  ;;  %6055 = vtanh.f32 %v7018_v61 }
 0x231   : > { %v6038_v26 = vpop.eup %6037  ;;  %v4206_v55 = vsel %vm3874_vm4, %v6036_v38, %v6032_v48  ;;  %6057 = vpow2.f32 %v4791_v5 }
 0x232   : > { %v6040_v7 = vpop.eup %6039  ;;  %4250 = vst [vmem:[%s6935_s27 + $0xb8] sm:$0xff] %v4206_v55  ;;  %6059 = vrcp.f32 %v4034_v50 }
 0x233   : > { %v6042_v57 = vpop.eup %6041  ;;  %v4032_v9 = vadd.f32 1.0, %v6040_v7  ;;  %6061 = vtanh.f32 %v7020_v22 }
 0x234   : > { %v6044_v16 = vpop.eup %6043  ;;  %v4204_v61 = vsel %vm3874_vm4, %v6042_v57, %v6038_v26  ;;  %6063 = vpow2.f32 %v4789_v23  ;;  %v4802_v26 = vmul.f32 -1.442695, %v7094_v45 }
 0x235   : > { %v6046_v42 = vpop.eup %6045  ;;  %4248 = vst [vmem:[%s6935_s27 + $0xa8] sm:$0xff] %v4204_v61  ;;  %6065 = vrcp.f32 %v4032_v9 }
 0x236   : > { %v6048_v18 = vpop.eup %6047  ;;  %v4037_v30 = vadd.f32 1.0, %v6046_v42  ;;  %6067 = vtanh.f32 %v7030_v21 }
 0x237   : > { %v6050_v32 = vpop.eup %6049  ;;  %v4209_v22 = vsel %vm3874_vm4, %v6048_v18, %v6044_v16  ;;  %6069 = vpow2.f32 %v4794_v36  ;;  %v4800_v36 = vmul.f32 -1.442695, %v7099_v14 }
 0x238   : > { %v6052_v25 = vpop.eup %6051  ;;  %4253 = vst [vmem:[%s6935_s27 + $0xd0] sm:$0xff] %v4209_v22  ;;  %6071 = vrcp.f32 %v4037_v30  ;;  %v4803_v30 = vmul.f32 -1.442695, %v7103_v35 }
 0x239   : > { %v6054_v39 = vpop.eup %6053  ;;  %v4035_v56 = vadd.f32 1.0, %v6052_v25  ;;  %6073 = vtanh.f32 %v7035_v34 }
 0x23a   : > { %v6056_v24 = vpop.eup %6055  ;;  %v4207_v21 = vsel %vm3874_vm4, %v6054_v39, %v6050_v32  ;;  %6075 = vpow2.f32 %v4792_v31  ;;  %v4801_v39 = vmul.f32 -1.442695, %v7106_v4 }
 0x23b   : > { %v6058_v3 = vpop.eup %6057  ;;  %4251 = vst [vmem:[%s6935_s27 + $0xc0] sm:$0xff] %v4207_v21  ;;  %6077 = vrcp.f32 %v4035_v56 }
 0x23c   : > { %v6060_v44 = vpop.eup %6059  ;;  %v4038_v27 = vadd.f32 1.0, %v6058_v3  ;;  %6079 = vtanh.f32 %v7039_v33 }
 0x23d   : > { %v6062_v47 = vpop.eup %6061  ;;  %v4210_v34 = vsel %vm3874_vm4, %v6060_v44, %v6056_v24  ;;  %6081 = vpow2.f32 %v4795_v8 }
 0x23e   : > { %v6064_v29 = vpop.eup %6063  ;;  %4254 = vst [vmem:[%s6935_s27 + $0xd8] sm:$0xff] %v4210_v34  ;;  %6083 = vrcp.f32 %v4038_v27 }
 0x23f   : > { %v6066_v37 = vpop.eup %6065  ;;  %v4036_v49 = vadd.f32 1.0, %v6064_v29  ;;  %6085 = vtanh.f32 %v7042_v0 }
 0x240   : > { %v6068_v19 = vpop.eup %6067  ;;  %v4208_v33 = vsel %vm3874_vm4, %v6066_v37, %v6062_v47  ;;  %6087 = vpow2.f32 %v4793_v46 }
 0x241   : > { %v6070_v60 = vpop.eup %6069  ;;  %4252 = vst [vmem:[%s6935_s27 + $0xc8] sm:$0xff] %v4208_v33  ;;  %6089 = vrcp.f32 %v4036_v49 }
 0x242   : > { %v6072_v53 = vpop.eup %6071  ;;  %v4041_v62 = vadd.f32 1.0, %v6070_v60  ;;  %6091 = vtanh.f32 %v7053_v52 }
 0x243   : > { %v6074_v58 = vpop.eup %6073  ;;  %v4213_v0 = vsel %vm3874_vm4, %v6072_v53, %v6068_v19  ;;  %6093 = vpow2.f32 %v4798_v12 }
 0x244   : > { %v6076_v59 = vpop.eup %6075  ;;  %4257 = vst [vmem:[%s6935_s27 + $0xf0] sm:$0xff] %v4213_v0  ;;  %6095 = vrcp.f32 %v4041_v62 }
 0x245   : > { %v6078_v11 = vpop.eup %6077  ;;  %v4039_v1 = vadd.f32 1.0, %v6076_v59  ;;  %6097 = vtanh.f32 %v7056_v54 }
 0x246   : > { %v6080_v20 = vpop.eup %6079  ;;  %v4211_v52 = vsel %vm3874_vm4, %v6078_v11, %v6074_v58  ;;  %6099 = vpow2.f32 %v4796_v51 }
 0x247   : > { %v6082_v15 = vpop.eup %6081  ;;  %4255 = vst [vmem:[%s6935_s27 + $0xe0] sm:$0xff] %v4211_v52  ;;  %6101 = vrcp.f32 %v4039_v1 }
 0x248   : > { %v6084_v5 = vpop.eup %6083  ;;  %v4042_v48 = vadd.f32 1.0, %v6082_v15  ;;  %6103 = vtanh.f32 %v7062_v63 }
 0x249   : > { %v6086_v6 = vpop.eup %6085  ;;  %v4214_v54 = vsel %vm3874_vm4, %v6084_v5, %v6080_v20  ;;  %6105 = vpow2.f32 %v4799_v2 }
 0x24a   : > { %v6088_v38 = vpop.eup %6087  ;;  %4258 = vst [vmem:[%s6935_s27 + $0xf8] sm:$0xff] %v4214_v54  ;;  %6107 = vrcp.f32 %v4042_v48 }
 0x24b   : > { %v6090_v50 = vpop.eup %6089  ;;  %v4040_v23 = vadd.f32 1.0, %v6088_v38  ;;  %6109 = vtanh.f32 %v7065_v17 }
 0x24c   : > { %v6092_v55 = vpop.eup %6091  ;;  %v4212_v63 = vsel %vm3874_vm4, %v6090_v50, %v6086_v6  ;;  %6111 = vpow2.f32 %v4797_v28 }
 0x24d   : > { %v6094_v7 = vpop.eup %6093  ;;  %4256 = vst [vmem:[%s6935_s27 + $0xe8] sm:$0xff] %v4212_v63  ;;  %6113 = vrcp.f32 %v4040_v23 }
 0x24e   : > { %v6096_v57 = vpop.eup %6095  ;;  %v4045_v9 = vadd.f32 1.0, %v6094_v7  ;;  %6115 = vtanh.f32 %v7074_v10 }
 0x24f   : > { %v6098_v16 = vpop.eup %6097  ;;  %v4217_v17 = vsel %vm3874_vm4, %v6096_v57, %v6092_v55  ;;  %6117 = vpow2.f32 %v4802_v26 }
 0x250   : > { %v6100_v61 = vpop.eup %6099  ;;  %4261 = vst [vmem:[%s6935_s27 + $0x110] sm:$0xff] %v4217_v17  ;;  %6119 = vrcp.f32 %v4045_v9 }
 0x251   : > { %v6102_v42 = vpop.eup %6101  ;;  %v4043_v18 = vadd.f32 1.0, %v6100_v61  ;;  %6121 = vtanh.f32 %v7078_v43 }
 0x252   : > { %v6104_v31 = vpop.eup %6103  ;;  %v4215_v10 = vsel %vm3874_vm4, %v6102_v42, %v6098_v16  ;;  %6123 = vpow2.f32 %v4800_v36 }
 0x253   : > { %v6106_v32 = vpop.eup %6105  ;;  %4259 = vst [vmem:[%s6935_s27 + $0x100] sm:$0xff] %v4215_v10  ;;  %6125 = vrcp.f32 %v4043_v18 }
 0x254   : > { %v6108_v22 = vpop.eup %6107  ;;  %v4046_v25 = vadd.f32 1.0, %v6106_v32  ;;  %6127 = vtanh.f32 %v7081_v40 }
 0x255   : > { %v6110_v56 = vpop.eup %6109  ;;  %v4218_v43 = vsel %vm3874_vm4, %v6108_v22, %v6104_v31  ;;  %6129 = vpow2.f32 %v4803_v30 }
 0x256   : > { %v6112_v8 = vpop.eup %6111  ;;  %4262 = vst [vmem:[%s6935_s27 + $0x118] sm:$0xff] %v4218_v43  ;;  %6131 = vrcp.f32 %v4046_v25 }
 0x257   : > { %v6114_v24 = vpop.eup %6113  ;;  %v4044_v21 = vadd.f32 1.0, %v6112_v8  ;;  %6133 = vtanh.f32 %v7085_v41 }
 0x258   : > { %v6116_v3 = vpop.eup %6115  ;;  %v4216_v44 = vsel %vm3874_vm4, %v6114_v24, %v6110_v56  ;;  %6135 = vpow2.f32 %v4801_v39 }
 0x259   : > { %v6118_v40 = vpop.eup %6117  ;;  %4260 = vst [vmem:[%s6935_s27 + $0x108] sm:$0xff] %v4216_v44  ;;  %6137 = vrcp.f32 %v4044_v21 }
 0x25a   : > { %v6120_v27 = vpop.eup %6119  ;;  %v4049_v46 = vadd.f32 1.0, %v6118_v40  ;;  %6139 = vtanh.f32 %v7094_v45 }
 0x25b   : > { %v6122_v47 = vpop.eup %6121  ;;  %v4221_v34 = vsel %vm3874_vm4, %v6120_v27, %v6116_v3 }
 0x25c   : > { %v6124_v29 = vpop.eup %6123  ;;  %4265 = vst [vmem:[%s6935_s27 + $0x130] sm:$0xff] %v4221_v34  ;;  %6141 = vrcp.f32 %v4049_v46 }
 0x25d   : > { %v6126_v41 = vpop.eup %6125  ;;  %v4047_v37 = vadd.f32 1.0, %v6124_v29  ;;  %6143 = vtanh.f32 %v7099_v14 }
 0x25e   : > { %v6128_v49 = vpop.eup %6127  ;;  %v4219_v12 = vsel %vm3874_vm4, %v6126_v41, %v6122_v47 }
 0x25f   : > { %v6130_v19 = vpop.eup %6129  ;;  %4263 = vst [vmem:[%s6935_s27 + $0x120] sm:$0xff] %v4219_v12  ;;  %6145 = vrcp.f32 %v4047_v37 }
 0x260   : > { %v6132_v33 = vpop.eup %6131  ;;  %v4050_v60 = vadd.f32 1.0, %v6130_v19  ;;  %6147 = vtanh.f32 %v7103_v35 }
 0x261   : > { %v6134_v53 = vpop.eup %6133  ;;  %v4222_v45 = vsel %vm3874_vm4, %v6132_v33, %v6128_v49 }
 0x262   : > { %v6136_v62 = vpop.eup %6135  ;;  %4266 = vst [vmem:[%s6935_s27 + $0x138] sm:$0xff] %v4222_v45  ;;  %6149 = vrcp.f32 %v4050_v60 }
 0x263   : > { %v6138_v51 = vpop.eup %6137  ;;  %v4048_v58 = vadd.f32 1.0, %v6136_v62  ;;  %6151 = vtanh.f32 %v7106_v4 }
 0x264   : > { %v4220_v14 = vsel %vm3874_vm4, %v6138_v51, %v6134_v53  ;;  %v6140_v0 = vpop.eup %6139 }
 0x265   : > { %4264 = vst [vmem:[%s6935_s27 + $0x128] sm:$0xff] %v4220_v14  ;;  %6153 = vrcp.f32 %v4048_v58 }
 0x266   : > { %v6142_v59 = vpop.eup %6141 }
 0x267   : > { %v4225_v35 = vsel %vm3874_vm4, %v6142_v59, %v6140_v0  ;;  %v6144_v11 = vpop.eup %6143 }
 0x268   : > { %4269 = vst [vmem:[%s6935_s27 + $0x150] sm:$0xff] %v4225_v35 }
 0x269   : > { %v6146_v1 = vpop.eup %6145 }
 0x26a   : > { %v4223_v2 = vsel %vm3874_vm4, %v6146_v1, %v6144_v11  ;;  %v6148_v20 = vpop.eup %6147 }
 0x26b   : > { %4267 = vst [vmem:[%s6935_s27 + $0x140] sm:$0xff] %v4223_v2 }
 0x26c   : > { %v6150_v52 = vpop.eup %6149 }
 0x26d   : > { %v4226_v4 = vsel %vm3874_vm4, %v6150_v52, %v6148_v20  ;;  %v6152_v15 = vpop.eup %6151 }
 0x26e   : > { %4270 = vst [vmem:[%s6935_s27 + $0x158] sm:$0xff] %v4226_v4 }
 0x26f   : > { %v6154_v5 = vpop.eup %6153 }
 0x270   : > { %v4224_v48 = vsel %vm3874_vm4, %v6154_v5, %v6152_v15 }
 0x271   : > { %4268 = vst [vmem:[%s6935_s27 + $0x148] sm:$0xff] %v4224_v48 }
 0x272 PF: > { %s12_s9 = sadd.s32 1, %s6168_s9  }
 0x273   : > { %p9_p4 = scmp.ge.s32.totalorder %s12_s9, 4  }
 0x275   :  { %11 = sbr.rel (!%p9_p4) target bundleno = 1 (0x1), region = 64 }

</bundles_post_ra>
